<compile_context>
chip_gen: v7x
topology: tpu7x:2x2x1
jax: 0.10.0
libtpu: 0.0.40
codegen_flags: <defaults>
</compile_context>

<pallas_src>
import functools

import jax
import jax.numpy as jnp
from jax.experimental import pallas as pl
from jax.experimental.pallas import tpu as pltpu

_LANE = 128                    # channel padding granularity (vreg lane width)
_SUBLANE = 8                   # sublane granularity
_ROW_TILE = 1024               # row tile for the 1x1 GEMMs
_ROW_TARGET_3X3 = 1024         # target width-padded rows per 3x3 grid step
_VMEM_LIMIT = 32 * 1024 * 1024  # above v5e's 16 MiB default, below v7x's 64 MiB


def _rup(a, b):
    return (a + b - 1) // b * b


# ----------------------------- Pallas kernels ------------------------------

def _silu_f32(y):
    # sigmoid = 1/(1+exp(-y)); exp on the EUP, divide replaced by the approx
    # EUP reciprocal -> keeps the compute-bound 3x3 epilogue off the VALU.
    return y * pl.reciprocal(1.0 + jnp.exp(-y), approx=True)


def _dual_mm_bias_silu_kernel(x_ref, w_ref, b_ref, o1_ref, o2_ref, *, n_half):
    """Fused conv1+conv2: one dot over [w1 || w2], two lane-aligned outputs."""
    y = jnp.dot(x_ref[...], w_ref[...],
                preferred_element_type=jnp.float32) + b_ref[...]
    y = y * jax.nn.sigmoid(y)            # HBM-bound kernel: epilogue is hidden
    o1_ref[...] = y[:, :n_half].astype(o1_ref.dtype)
    o2_ref[...] = y[:, n_half:].astype(o2_ref.dtype)


def _mm_bias_silu_kernel(x_ref, w_ref, b_ref, o_ref):
    """o = silu(x @ w + b); BN scale pre-folded into w, f32 accumulation."""
    y = jnp.dot(x_ref[...], w_ref[...],
                preferred_element_type=jnp.float32) + b_ref[...]
    o_ref[...] = (y * jax.nn.sigmoid(y)).astype(o_ref.dtype)


def _mm2_bias_silu_kernel(x1_ref, x2_ref, w1_ref, w2_ref, b_ref, o_ref):
    """Fused concat + 1x1 conv: o = silu(x1 @ w1 + x2 @ w2 + b)."""
    y = jnp.dot(x1_ref[...], w1_ref[...], preferred_element_type=jnp.float32)
    y = y + jnp.dot(x2_ref[...], w2_ref[...],
                    preferred_element_type=jnp.float32)
    y = y + b_ref[...]
    o_ref[...] = (y * jax.nn.sigmoid(y)).astype(o_ref.dtype)


def _conv3x3_res_kernel(x0_ref, x1_ref, w_ref, b_ref, res_ref, o_ref, *,
                        wp_r, tr, th, w_img):
    """One row tile of: res + silu(conv3x3(x) + b), compact NHWC stores.

    x0_ref : (1, tr, Cp)          flattened width-padded rows of this tile
    x1_ref : (1, hr, Cp)          halo rows starting at the next tile boundary
    w_ref  : (3, 3*Cp, Coutp)     per-dy weights, dx folded into K (BN folded)
    b_ref  : (1, Coutp)           BN bias (f32)
    res_ref: (1, th, w, Coutp)    residual input (compact NHWC rows, bf16)
    o_ref  : (1, th, w, Coutp)    output (compact NHWC rows, bf16)
    """
    xcat = jnp.concatenate([x0_ref[0], x1_ref[0]], axis=0)   # (tr + hr, Cp)
    acc = None
    for dy in range(3):
        base = dy * wp_r                                     # sublane-aligned
        lhs = jnp.concatenate(
            [xcat[base + 0:base + 0 + tr],
             xcat[base + 1:base + 1 + tr],
             xcat[base + 2:base + 2 + tr]], axis=1)          # (tr, 3*Cp)
        part = jnp.dot(lhs, w_ref[dy], preferred_element_type=jnp.float32)
        acc = part if acc is None else acc + part
    y = _silu_f32(acc + b_ref[...])                          # (tr, Coutp)
    # Drop the garbage width-pad columns and fuse the residual add.
    y = y.reshape(th, wp_r, y.shape[-1])[:, :w_img, :]       # (th, w, Coutp)
    o_ref[0] = (y + res_ref[0].astype(jnp.float32)).astype(o_ref.dtype)


# --------------------------- conv-block wrappers ----------------------------

def conv1x1_dual_bn_silu(x_nhwc, w_cat, b_cat, n_half, row_tile=_ROW_TILE):
    """Fused conv1+conv2: x read once, [w1||w2] dot, two (N,H,W,n_half) outs."""
    n, h, w, cp = x_nhwc.shape
    n2 = w_cat.shape[-1]
    m = n * h * w
    tm = m if m <= row_tile else row_tile
    x2 = x_nhwc.reshape(m, cp)
    kernel = functools.partial(_dual_mm_bias_silu_kernel, n_half=n_half)
    o1, o2 = pl.pallas_call(
        kernel,
        out_shape=(jax.ShapeDtypeStruct((m, n_half), jnp.bfloat16),
                   jax.ShapeDtypeStruct((m, n_half), jnp.bfloat16)),
        grid_spec=pltpu.PrefetchScalarGridSpec(
            num_scalar_prefetch=0,
            grid=(pl.cdiv(m, tm),),
            in_specs=[pl.BlockSpec((tm, cp), lambda i: (i, 0)),
                      pl.BlockSpec((cp, n2), lambda i: (0, 0)),
                      pl.BlockSpec((1, n2), lambda i: (0, 0))],
            out_specs=(pl.BlockSpec((tm, n_half), lambda i: (i, 0)),
                       pl.BlockSpec((tm, n_half), lambda i: (i, 0))),
        ),
        compiler_params=pltpu.CompilerParams(
            dimension_semantics=("parallel",),
            vmem_limit_bytes=_VMEM_LIMIT),
    )(x2, w_cat, b_cat)
    return o1.reshape(n, h, w, n_half), o2.reshape(n, h, w, n_half)


def conv1x1_bn_silu(x_nhwc, w, bias2, row_tile=_ROW_TILE):
    """1x1 conv + folded BN + SiLU. x: (N,H,W,Cp) bf16, w: (Cp,Coutp) bf16."""
    n, h, ww, cp = x_nhwc.shape
    coutp = w.shape[-1]
    m = n * h * ww
    tm = m if m <= row_tile else row_tile
    x2 = x_nhwc.reshape(m, cp)
    out = pl.pallas_call(
        _mm_bias_silu_kernel,
        out_shape=jax.ShapeDtypeStruct((m, coutp), jnp.bfloat16),
        grid_spec=pltpu.PrefetchScalarGridSpec(
            num_scalar_prefetch=0,
            grid=(pl.cdiv(m, tm),),
            in_specs=[pl.BlockSpec((tm, cp), lambda i: (i, 0)),
                      pl.BlockSpec((cp, coutp), lambda i: (0, 0)),
                      pl.BlockSpec((1, coutp), lambda i: (0, 0))],
            out_specs=pl.BlockSpec((tm, coutp), lambda i: (i, 0)),
        ),
        compiler_params=pltpu.CompilerParams(
            dimension_semantics=("parallel",),
            vmem_limit_bytes=_VMEM_LIMIT),
    )(x2, w, bias2)
    return out.reshape(n, h, ww, coutp)


def concat_conv1x1_bn_silu(x1_nhwc, x2_nhwc, w1, w2, bias2,
                           row_tile=_ROW_TILE):
    """Fused channel-concat + 1x1 conv + folded BN + SiLU."""
    n, h, ww, cp1 = x1_nhwc.shape
    cp2 = x2_nhwc.shape[-1]
    coutp = w1.shape[-1]
    m = n * h * ww
    tm = m if m <= row_tile else row_tile
    a1 = x1_nhwc.reshape(m, cp1)
    a2 = x2_nhwc.reshape(m, cp2)
    out = pl.pallas_call(
        _mm2_bias_silu_kernel,
        out_shape=jax.ShapeDtypeStruct((m, coutp), jnp.bfloat16),
        grid_spec=pltpu.PrefetchScalarGridSpec(
            num_scalar_prefetch=0,
            grid=(pl.cdiv(m, tm),),
            in_specs=[pl.BlockSpec((tm, cp1), lambda i: (i, 0)),
                      pl.BlockSpec((tm, cp2), lambda i: (i, 0)),
                      pl.BlockSpec((cp1, coutp), lambda i: (0, 0)),
                      pl.BlockSpec((cp2, coutp), lambda i: (0, 0)),
                      pl.BlockSpec((1, coutp), lambda i: (0, 0))],
            out_specs=pl.BlockSpec((tm, coutp), lambda i: (i, 0)),
        ),
        compiler_params=pltpu.CompilerParams(
            dimension_semantics=("parallel",),
            vmem_limit_bytes=_VMEM_LIMIT),
    )(a1, a2, w1, w2, bias2)
    return out.reshape(n, h, ww, coutp)


def _pick_tile_h(h, wp_r, target_rows=_ROW_TARGET_3X3):
    """Largest proper divisor of h (>= 3 rows) whose tile fits target_rows."""
    for th in range(h - 1, 2, -1):
        if h % th == 0 and th * wp_r <= target_rows:
            return th
    return h


def _smallest_halo_factor(th):
    """Smallest divisor of th that is >= 3 (halo block of hb*wp_r rows)."""
    for hb in range(3, th + 1):
        if th % hb == 0:
            return hb
    return th


def conv3x3_residual_bn_silu(x_nhwc, res_nhwc, w3, bias2):
    """res + silu(bn(conv3x3(x))), pad=1 stride=1, row-tiled with a halo.

    The zero-padded image is flattened to rows of stride wp_r = rup(W+2, 8);
    tap (dy, dx) of the conv is the row window starting at dy*wp_r + dx, so
    each grid step accumulates 3 shifted-window dots (dx folded into K).  The
    halo rows of a tile are fetched as a second, smaller Blocked window of the
    same flattened array starting exactly at the next tile boundary.  The
    epilogue drops the garbage width-pad columns, adds the residual, and
    stores compact NHWC rows directly.
    """
    n, h, w, cp = x_nhwc.shape
    coutp = w3.shape[-1]
    assert res_nhwc.shape == (n, h, w, coutp)
    assert h >= 3, "row-tiled 3x3 kernel assumes at least 3 image rows"

    wp_r = _rup(w + 2, _SUBLANE)     # sublane-aligned width-padded row stride
    th = _pick_tile_h(h, wp_r)       # image rows per grid step
    t_tiles = h // th
    tr = th * wp_r                   # width-padded output rows per grid step
    hb = _smallest_halo_factor(th)   # halo window = hb image-row strides
    hr = hb * wp_r                   # halo rows (>= 2*wp_r + 2)
    halo_stride = th // hb

    # Spatial zero pad (1 top/bottom, 1 left, wp_r - w - 1 right), flatten
    # rows, then pad with zero slack rows so halo block indices stay in range.
    lpad = (t_tiles + 1) * tr
    xp = jnp.pad(x_nhwc, ((0, 0), (1, 1), (1, wp_r - w - 1), (0, 0)))
    xp = xp.reshape(n, (h + 2) * wp_r, cp)
    xp = jnp.pad(xp, ((0, 0), (0, lpad - (h + 2) * wp_r), (0, 0)))

    kernel = functools.partial(_conv3x3_res_kernel,
                               wp_r=wp_r, tr=tr, th=th, w_img=w)
    out = pl.pallas_call(
        kernel,
        out_shape=jax.ShapeDtypeStruct((n, h, w, coutp), jnp.bfloat16),
        grid_spec=pltpu.PrefetchScalarGridSpec(
            num_scalar_prefetch=0,
            grid=(n, t_tiles),
            in_specs=[
                pl.BlockSpec((1, tr, cp), lambda b, t: (b, t, 0)),
                pl.BlockSpec((1, hr, cp),
                             lambda b, t: (b, (t + 1) * halo_stride, 0)),
                pl.BlockSpec((3, 3 * cp, coutp), lambda b, t: (0, 0, 0)),
                pl.BlockSpec((1, coutp), lambda b, t: (0, 0)),
                pl.BlockSpec((1, th, w, coutp), lambda b, t: (b, t, 0, 0)),
            ],
            out_specs=pl.BlockSpec((1, th, w, coutp),
                                   lambda b, t: (b, t, 0, 0)),
        ),
        compiler_params=pltpu.CompilerParams(
            dimension_semantics=("parallel", "parallel"),
            vmem_limit_bytes=_VMEM_LIMIT),
    )(xp, xp, w3, bias2, res_nhwc)
    return out


# ------------------------------- parameters ---------------------------------

def _fold_bn(gamma, beta, mean, var, eps=1e-5):
    scale = gamma / jnp.sqrt(var + eps)
    bias = beta - mean * scale
    return scale, bias


def _make_convblock_params(key, cin, cout, ksize):
    k_w, k_g, k_b, k_m, k_v = jax.random.split(key, 5)
    fan_in = cin * ksize * ksize
    w = jax.random.normal(k_w, (ksize, ksize, cin, cout), jnp.float32)
    w = w * (1.0 / jnp.sqrt(fan_in))
    gamma = 0.5 + jax.random.uniform(k_g, (cout,), jnp.float32)
    beta = 0.1 * jax.random.normal(k_b, (cout,), jnp.float32)
    mean = 0.1 * jax.random.normal(k_m, (cout,), jnp.float32)
    var = 0.5 + jax.random.uniform(k_v, (cout,), jnp.float32)
    scale, bias = _fold_bn(gamma, beta, mean, var)
    return {"w": w, "scale": scale, "bias": bias}


def make_csp_params(key, in_channels, out_channels, num_blocks):
    mid = out_channels // 2
    keys = jax.random.split(key, 3 + 2 * num_blocks)
    params = {
        "conv1": _make_convblock_params(keys[0], in_channels, mid, 1),
        "conv2": _make_convblock_params(keys[1], in_channels, mid, 1),
        "conv3": _make_convblock_params(keys[2], 2 * mid, out_channels, 1),
        "blocks": [],
    }
    for b in range(num_blocks):
        params["blocks"].append({
            "c1": _make_convblock_params(keys[3 + 2 * b], mid, mid, 1),
            "c2": _make_convblock_params(keys[4 + 2 * b], mid, mid, 3),
        })
    return params


# --------------------- param folding / channel padding ----------------------

def _prep_1x1(p, cin_p, cout_p):
    w = p["w"][0, 0] * p["scale"][None, :]          # (cin, cout), BN folded
    cin, cout = w.shape
    w = jnp.pad(w, ((0, cin_p - cin), (0, cout_p - cout)))
    b = jnp.pad(p["bias"], (0, cout_p - cout)).reshape(1, cout_p)
    return w.astype(jnp.bfloat16), b.astype(jnp.float32)


def _prep_dual_1x1(p1, p2, cin_p, cout_p):
    """conv1 and conv2 weights concatenated along N: (cin_p, 2*cout_p)."""
    w1 = p1["w"][0, 0] * p1["scale"][None, :]
    w2 = p2["w"][0, 0] * p2["scale"][None, :]
    cin, cout = w1.shape
    w1 = jnp.pad(w1, ((0, cin_p - cin), (0, cout_p - cout)))
    w2 = jnp.pad(w2, ((0, cin_p - cin), (0, cout_p - cout)))
    wcat = jnp.concatenate([w1, w2], axis=1).astype(jnp.bfloat16)
    b1 = jnp.pad(p1["bias"], (0, cout_p - cout))
    b2 = jnp.pad(p2["bias"], (0, cout_p - cout))
    bcat = jnp.concatenate([b1, b2]).reshape(1, 2 * cout_p).astype(jnp.float32)
    return wcat, bcat


def _prep_3x3(p, cin_p, cout_p):
    """Per-dy weights with dx folded into K: (3, 3*cin_p, cout_p), BN folded."""
    w = p["w"] * p["scale"][None, None, None, :]    # (3,3,cin,cout)
    cin, cout = w.shape[2], w.shape[3]
    w = jnp.pad(w, ((0, 0), (0, 0), (0, cin_p - cin), (0, cout_p - cout)))
    w3 = w.reshape(3, 3 * cin_p, cout_p).astype(jnp.bfloat16)
    b = jnp.pad(p["bias"], (0, cout_p - cout)).reshape(1, cout_p)
    return w3, b.astype(jnp.float32)


def _prep_conv3_split(p, mid, mid_p, cout_p):
    w = p["w"][0, 0] * p["scale"][None, :]          # (2*mid, cout), BN folded
    cout = w.shape[1]
    wa = jnp.pad(w[:mid], ((0, mid_p - mid), (0, cout_p - cout)))
    wb = jnp.pad(w[mid:], ((0, mid_p - mid), (0, cout_p - cout)))
    b = jnp.pad(p["bias"], (0, cout_p - cout)).reshape(1, cout_p)
    return (wa.astype(jnp.bfloat16), wb.astype(jnp.bfloat16),
            b.astype(jnp.float32))


# ------------------------------- CSP forward --------------------------------

def csp_block_forward(x_nchw, params):
    """CSPBlock forward. Input/output in NCHW (matching PyTorch)."""
    n, cin, h, w = x_nchw.shape
    mid = int(params["conv1"]["w"].shape[-1])
    cout = int(params["conv3"]["w"].shape[-1])
    cin_p = _rup(cin, _LANE)
    mid_p = _rup(mid, _LANE)
    cout_p = _rup(cout, _LANE)

    # NCHW -> NHWC, bf16, channels zero-padded to a lane multiple.
    x = jnp.transpose(x_nchw, (0, 2, 3, 1)).astype(jnp.bfloat16)
    x = jnp.pad(x, ((0, 0), (0, 0), (0, 0), (0, cin_p - cin)))

    # conv1 + conv2 fused: one HBM read of x, one dot over [w1 || w2].
    w12, b12 = _prep_dual_1x1(params["conv1"], params["conv2"], cin_p, mid_p)
    y1, y2 = conv1x1_dual_bn_silu(x, w12, b12, mid_p)   # (N,H,W,mid_p) bf16 x2

    for blk in params["blocks"]:
        wc1, bc1 = _prep_1x1(blk["c1"], mid_p, mid_p)
        wc3, bc2 = _prep_3x3(blk["c2"], mid_p, mid_p)
        hmid = conv1x1_bn_silu(y2, wc1, bc1)
        # 3x3 conv + BN + SiLU + residual add fused; compact NHWC output.
        y2 = conv3x3_residual_bn_silu(hmid, y2, wc3, bc2)

    # concat([y1, y2]) + conv3 fused: y1 @ W3_top + y2 @ W3_bottom.
    w3a, w3b, b3 = _prep_conv3_split(params["conv3"], mid, mid_p, cout_p)
    out = concat_conv1x1_bn_silu(y1, y2, w3a, w3b, b3)   # (N,H,W,cout_p)

    out = out[..., :cout].astype(jnp.float32)
    return jnp.transpose(out, (0, 3, 1, 2))  # -> NCHW


# ------------------------------ pure-JAX ref ---------------------------------

def _ref_conv_bn_silu(x_nhwc, w_kkio, scale, bias, pad):
    y = jax.lax.conv_general_dilated(
        x_nhwc, w_kkio, window_strides=(1, 1),
        padding=[(pad, pad), (pad, pad)],
        dimension_numbers=("NHWC", "HWIO", "NHWC"))
    y = y * scale + bias
    return y * jax.nn.sigmoid(y)


def csp_block_reference(x_nchw, params):
    x = jnp.transpose(x_nchw, (0, 2, 3, 1)).astype(jnp.float32)
    p1, p2, p3 = params["conv1"], params["conv2"], params["conv3"]
    y1 = _ref_conv_bn_silu(x, p1["w"], p1["scale"], p1["bias"], 0)
    y2 = _ref_conv_bn_silu(x, p2["w"], p2["scale"], p2["bias"], 0)
    for blk in params["blocks"]:
        h = _ref_conv_bn_silu(y2, blk["c1"]["w"], blk["c1"]["scale"],
                              blk["c1"]["bias"], 0)
        y2 = y2 + _ref_conv_bn_silu(h, blk["c2"]["w"], blk["c2"]["scale"],
                                    blk["c2"]["bias"], 1)
    y = jnp.concatenate([y1, y2], axis=-1)
    out = _ref_conv_bn_silu(y, p3["w"], p3["scale"], p3["bias"], 0)
    return jnp.transpose(out, (0, 3, 1, 2))


# ---------------------------------- main -------------------------------------

if __name__ == "__main__":
    key = jax.random.PRNGKey(0)
    k_x, k_p = jax.random.split(key)

    batch, in_channels, out_channels, num_blocks = 2, 4, 8, 2
    H = W = 16
    x = jax.random.normal(k_x, (batch, in_channels, H, W), jnp.float32)

    params = make_csp_params(k_p, in_channels, out_channels, num_blocks)

    fwd = jax.jit(functools.partial(csp_block_forward, params=params))
    out = jax.block_until_ready(fwd(x))

    ref = jax.block_until_ready(csp_block_reference(x, params))
    assert out.shape == (batch, out_channels, H, W), out.shape
    # bf16 matmul operands / bf16 activations vs. the f32 reference.
    assert jnp.allclose(out, ref, atol=5e-2, rtol=1e-1), (
        float(jnp.max(jnp.abs(out - ref))))

    print("KERNEL_OK")
</pallas_src>

<mosaic_0001>
module attributes {stable_mosaic.version = 11 : i64} {
  func.func @_dual_mm_bias_silu_kernel(%arg0: i32, %arg1: memref<512x128xbf16, #tpu.memory_space<vmem>>, %arg2: memref<128x256xbf16, #tpu.memory_space<vmem>>, %arg3: memref<1x256xf32, #tpu.memory_space<vmem>>, %arg4: memref<512x128xbf16, #tpu.memory_space<vmem>>, %arg5: memref<512x128xbf16, #tpu.memory_space<vmem>>) attributes {dimension_semantics = [#tpu.dimension_semantics<parallel>], iteration_bounds = array<i64: 1>, scalar_prefetch = 0 : i64, scratch_operands = 0 : i64, tpu.core_type = #tpu.core_type<tc>, window_params = [{transform_indices = @transform_0, window_bounds = array<i64: 512, 128>}, {pipeline_mode = #tpu.pipeline_mode<synchronous>, transform_indices = @transform_1, window_bounds = array<i64: 128, 256>}, {pipeline_mode = #tpu.pipeline_mode<synchronous>, transform_indices = @transform_2, window_bounds = array<i64: 1, 256>}, {transform_indices = @transform_3, window_bounds = array<i64: 512, 128>}, {transform_indices = @transform_4, window_bounds = array<i64: 512, 128>}]} {
    %c0 = arith.constant 0 : index
    %c0_0 = arith.constant 0 : index
    %0 = vector.load %arg1[%c0, %c0_0] : memref<512x128xbf16, #tpu.memory_space<vmem>>, vector<512x128xbf16>
    %c0_1 = arith.constant 0 : index
    %c0_2 = arith.constant 0 : index
    %1 = vector.load %arg2[%c0_1, %c0_2] : memref<128x256xbf16, #tpu.memory_space<vmem>>, vector<128x256xbf16>
    %cst = arith.constant dense<0.000000e+00> : vector<512x256xf32>
    %2 = tpu.matmul %0, %1, %cst {dimension_numbers = #tpu.dot_dimension_numbers<[1], [0], [0], [1], [0, 0, 1, 1], [], []>} : vector<512x128xbf16>, vector<128x256xbf16>, vector<512x256xf32> -> vector<512x256xf32>
    %c0_3 = arith.constant 0 : index
    %c0_4 = arith.constant 0 : index
    %3 = vector.load %arg3[%c0_3, %c0_4] : memref<1x256xf32, #tpu.memory_space<vmem>>, vector<1x256xf32>
    %4 = vector.broadcast %3 : vector<1x256xf32> to vector<512x256xf32>
    %5 = arith.addf %2, %4 : vector<512x256xf32>
    %6 = arith.negf %5 : vector<512x256xf32>
    %7 = math.exp %6 : vector<512x256xf32>
    %cst_5 = arith.constant 1.000000e+00 : f32
    %8 = vector.broadcast %cst_5 : f32 to vector<512x256xf32>
    %9 = arith.addf %8, %7 : vector<512x256xf32>
    %10 = arith.divf %8, %9 : vector<512x256xf32>
    %11 = arith.mulf %5, %10 : vector<512x256xf32>
    %12 = vector.extract_strided_slice %11 {offsets = [0, 0], sizes = [512, 128], strides = [1, 1]} : vector<512x256xf32> to vector<512x128xf32>
    %13 = arith.truncf %12 : vector<512x128xf32> to vector<512x128xbf16>
    %c0_6 = arith.constant 0 : index
    %c0_7 = arith.constant 0 : index
    %14 = vector.load %arg4[%c0_6, %c0_7] : memref<512x128xbf16, #tpu.memory_space<vmem>>, vector<512x128xbf16>
    tpu.vector_store %arg4[%c0_6, %c0_7], %13 {strides = array<i32>} : memref<512x128xbf16, #tpu.memory_space<vmem>>, vector<512x128xbf16>,
    %15 = vector.extract_strided_slice %11 {offsets = [0, 128], sizes = [512, 128], strides = [1, 1]} : vector<512x256xf32> to vector<512x128xf32>
    %16 = arith.truncf %15 : vector<512x128xf32> to vector<512x128xbf16>
    %c0_8 = arith.constant 0 : index
    %c0_9 = arith.constant 0 : index
    %17 = vector.load %arg5[%c0_8, %c0_9] : memref<512x128xbf16, #tpu.memory_space<vmem>>, vector<512x128xbf16>
    tpu.vector_store %arg5[%c0_8, %c0_9], %16 {strides = array<i32>} : memref<512x128xbf16, #tpu.memory_space<vmem>>, vector<512x128xbf16>,
    return
  }
  func.func @transform_0(%arg0: i32) -> (i32, i32) {
    %c0_i32 = arith.constant 0 : i32
    %c0_i32_0 = arith.constant 0 : i32
    return %arg0, %c0_i32 : i32, i32
  }
  func.func @transform_1(%arg0: i32) -> (i32, i32) {
    %c0_i32 = arith.constant 0 : i32
    %c0_i32_0 = arith.constant 0 : i32
    %c0_i32_1 = arith.constant 0 : i32
    return %c0_i32, %c0_i32_0 : i32, i32
  }
  func.func @transform_2(%arg0: i32) -> (i32, i32) {
    %c0_i32 = arith.constant 0 : i32
    %c0_i32_0 = arith.constant 0 : i32
    %c0_i32_1 = arith.constant 0 : i32
    return %c0_i32, %c0_i32_0 : i32, i32
  }
  func.func @transform_3(%arg0: i32) -> (i32, i32) {
    %c0_i32 = arith.constant 0 : i32
    %c0_i32_0 = arith.constant 0 : i32
    return %arg0, %c0_i32 : i32, i32
  }
  func.func @transform_4(%arg0: i32) -> (i32, i32) {
    %c0_i32 = arith.constant 0 : i32
    %c0_i32_0 = arith.constant 0 : i32
    return %arg0, %c0_i32 : i32, i32
  }
}

module attributes {stable_mosaic.version = 11 : i64} {
  func.func @_mm_bias_silu_kernel(%arg0: i32, %arg1: memref<512x128xbf16, #tpu.memory_space<vmem>>, %arg2: memref<128x128xbf16, #tpu.memory_space<vmem>>, %arg3: memref<1x128xf32, #tpu.memory_space<vmem>>, %arg4: memref<512x128xbf16, #tpu.memory_space<vmem>>) attributes {dimension_semantics = [#tpu.dimension_semantics<parallel>], iteration_bounds = array<i64: 1>, scalar_prefetch = 0 : i64, scratch_operands = 0 : i64, tpu.core_type = #tpu.core_type<tc>, window_params = [{transform_indices = @transform_0, window_bounds = array<i64: 512, 128>}, {pipeline_mode = #tpu.pipeline_mode<synchronous>, transform_indices = @transform_1, window_bounds = array<i64: 128, 128>}, {pipeline_mode = #tpu.pipeline_mode<synchronous>, transform_indices = @transform_2, window_bounds = array<i64: 1, 128>}, {transform_indices = @transform_3, window_bounds = array<i64: 512, 128>}]} {
    %c0 = arith.constant 0 : index
    %c0_0 = arith.constant 0 : index
    %0 = vector.load %arg1[%c0, %c0_0] : memref<512x128xbf16, #tpu.memory_space<vmem>>, vector<512x128xbf16>
    %c0_1 = arith.constant 0 : index
    %c0_2 = arith.constant 0 : index
    %1 = vector.load %arg2[%c0_1, %c0_2] : memref<128x128xbf16, #tpu.memory_space<vmem>>, vector<128x128xbf16>
    %cst = arith.constant dense<0.000000e+00> : vector<512x128xf32>
    %2 = tpu.matmul %0, %1, %cst {dimension_numbers = #tpu.dot_dimension_numbers<[1], [0], [0], [1], [0, 0, 1, 1], [], []>} : vector<512x128xbf16>, vector<128x128xbf16>, vector<512x128xf32> -> vector<512x128xf32>
    %c0_3 = arith.constant 0 : index
    %c0_4 = arith.constant 0 : index
    %3 = vector.load %arg3[%c0_3, %c0_4] : memref<1x128xf32, #tpu.memory_space<vmem>>, vector<1x128xf32>
    %4 = vector.broadcast %3 : vector<1x128xf32> to vector<512x128xf32>
    %5 = arith.addf %2, %4 : vector<512x128xf32>
    %6 = arith.negf %5 : vector<512x128xf32>
    %7 = math.exp %6 : vector<512x128xf32>
    %cst_5 = arith.constant 1.000000e+00 : f32
    %8 = vector.broadcast %cst_5 : f32 to vector<512x128xf32>
    %9 = arith.addf %8, %7 : vector<512x128xf32>
    %10 = arith.divf %8, %9 : vector<512x128xf32>
    %11 = arith.mulf %5, %10 : vector<512x128xf32>
    %12 = arith.truncf %11 : vector<512x128xf32> to vector<512x128xbf16>
    %c0_6 = arith.constant 0 : index
    %c0_7 = arith.constant 0 : index
    %13 = vector.load %arg4[%c0_6, %c0_7] : memref<512x128xbf16, #tpu.memory_space<vmem>>, vector<512x128xbf16>
    tpu.vector_store %arg4[%c0_6, %c0_7], %12 {strides = array<i32>} : memref<512x128xbf16, #tpu.memory_space<vmem>>, vector<512x128xbf16>,
    return
  }
  func.func @transform_0(%arg0: i32) -> (i32, i32) {
    %c0_i32 = arith.constant 0 : i32
    %c0_i32_0 = arith.constant 0 : i32
    return %arg0, %c0_i32 : i32, i32
  }
  func.func @transform_1(%arg0: i32) -> (i32, i32) {
    %c0_i32 = arith.constant 0 : i32
    %c0_i32_0 = arith.constant 0 : i32
    %c0_i32_1 = arith.constant 0 : i32
    return %c0_i32, %c0_i32_0 : i32, i32
  }
  func.func @transform_2(%arg0: i32) -> (i32, i32) {
    %c0_i32 = arith.constant 0 : i32
    %c0_i32_0 = arith.constant 0 : i32
    %c0_i32_1 = arith.constant 0 : i32
    return %c0_i32, %c0_i32_0 : i32, i32
  }
  func.func @transform_3(%arg0: i32) -> (i32, i32) {
    %c0_i32 = arith.constant 0 : i32
    %c0_i32_0 = arith.constant 0 : i32
    return %arg0, %c0_i32 : i32, i32
  }
}

module attributes {stable_mosaic.version = 11 : i64} {
  func.func @_conv3x3_res_kernel(%arg0: i32, %arg1: i32, %arg2: memref<1x192x128xbf16, #tpu.memory_space<vmem>>, %arg3: memref<1x96x128xbf16, #tpu.memory_space<vmem>>, %arg4: memref<3x384x128xbf16, #tpu.memory_space<vmem>>, %arg5: memref<1x128xf32, #tpu.memory_space<vmem>>, %arg6: memref<1x8x16x128xbf16, #tpu.memory_space<vmem>>, %arg7: memref<1x8x16x128xbf16, #tpu.memory_space<vmem>>) attributes {dimension_semantics = [#tpu.dimension_semantics<parallel>, #tpu.dimension_semantics<parallel>], iteration_bounds = array<i64: 2, 2>, scalar_prefetch = 0 : i64, scratch_operands = 0 : i64, tpu.core_type = #tpu.core_type<tc>, window_params = [{transform_indices = @transform_0, window_bounds = array<i64: 1, 192, 128>}, {transform_indices = @transform_1, window_bounds = array<i64: 1, 96, 128>}, {pipeline_mode = #tpu.pipeline_mode<synchronous>, transform_indices = @transform_2, window_bounds = array<i64: 3, 384, 128>}, {pipeline_mode = #tpu.pipeline_mode<synchronous>, transform_indices = @transform_3, window_bounds = array<i64: 1, 128>}, {transform_indices = @transform_4, window_bounds = array<i64: 1, 8, 16, 128>}, {transform_indices = @transform_5, window_bounds = array<i64: 1, 8, 16, 128>}]} {
    %c0 = arith.constant 0 : index
    %c0_0 = arith.constant 0 : index
    %c0_1 = arith.constant 0 : index
    %0 = vector.load %arg2[%c0, %c0_0, %c0_1] : memref<1x192x128xbf16, #tpu.memory_space<vmem>>, vector<1x192x128xbf16>
    %1 = vector.shape_cast %0 : vector<1x192x128xbf16> to vector<192x128xbf16>
    %c0_2 = arith.constant 0 : index
    %c0_3 = arith.constant 0 : index
    %c0_4 = arith.constant 0 : index
    %2 = vector.load %arg3[%c0_2, %c0_3, %c0_4] : memref<1x96x128xbf16, #tpu.memory_space<vmem>>, vector<1x96x128xbf16>
    %3 = vector.shape_cast %2 : vector<1x96x128xbf16> to vector<96x128xbf16>
    %4 = tpu.concatenate %1, %3 in 0 : vector<192x128xbf16>, vector<96x128xbf16> -> vector<288x128xbf16>
    %5 = vector.extract_strided_slice %4 {offsets = [0, 0], sizes = [192, 128], strides = [1, 1]} : vector<288x128xbf16> to vector<192x128xbf16>
    %6 = vector.extract_strided_slice %4 {offsets = [1, 0], sizes = [192, 128], strides = [1, 1]} : vector<288x128xbf16> to vector<192x128xbf16>
    %7 = vector.extract_strided_slice %4 {offsets = [2, 0], sizes = [192, 128], strides = [1, 1]} : vector<288x128xbf16> to vector<192x128xbf16>
    %8 = tpu.concatenate %5, %6, %7 in 1 : vector<192x128xbf16>, vector<192x128xbf16>, vector<192x128xbf16> -> vector<192x384xbf16>
    %c0_5 = arith.constant 0 : index
    %c0_6 = arith.constant 0 : index
    %c0_7 = arith.constant 0 : index
    %9 = vector.load %arg4[%c0_5, %c0_6, %c0_7] : memref<3x384x128xbf16, #tpu.memory_space<vmem>>, vector<1x384x128xbf16>
    %10 = vector.shape_cast %9 : vector<1x384x128xbf16> to vector<384x128xbf16>
    %cst = arith.constant dense<0.000000e+00> : vector<192x128xf32>
    %11 = tpu.matmul %8, %10, %cst {dimension_numbers = #tpu.dot_dimension_numbers<[1], [0], [0], [1], [0, 0, 1, 1], [], []>} : vector<192x384xbf16>, vector<384x128xbf16>, vector<192x128xf32> -> vector<192x128xf32>
    %12 = vector.extract_strided_slice %4 {offsets = [24, 0], sizes = [192, 128], strides = [1, 1]} : vector<288x128xbf16> to vector<192x128xbf16>
    %13 = vector.extract_strided_slice %4 {offsets = [25, 0], sizes = [192, 128], strides = [1, 1]} : vector<288x128xbf16> to vector<192x128xbf16>
    %14 = vector.extract_strided_slice %4 {offsets = [26, 0], sizes = [192, 128], strides = [1, 1]} : vector<288x128xbf16> to vector<192x128xbf16>
    %15 = tpu.concatenate %12, %13, %14 in 1 : vector<192x128xbf16>, vector<192x128xbf16>, vector<192x128xbf16> -> vector<192x384xbf16>
    %c1 = arith.constant 1 : index
    %c0_8 = arith.constant 0 : index
    %c0_9 = arith.constant 0 : index
    %16 = vector.load %arg4[%c1, %c0_8, %c0_9] : memref<3x384x128xbf16, #tpu.memory_space<vmem>>, vector<1x384x128xbf16>
    %17 = vector.shape_cast %16 : vector<1x384x128xbf16> to vector<384x128xbf16>
    %cst_10 = arith.constant dense<0.000000e+00> : vector<192x128xf32>
    %18 = tpu.matmul %15, %17, %cst_10 {dimension_numbers = #tpu.dot_dimension_numbers<[1], [0], [0], [1], [0, 0, 1, 1], [], []>} : vector<192x384xbf16>, vector<384x128xbf16>, vector<192x128xf32> -> vector<192x128xf32>
    %19 = arith.addf %11, %18 : vector<192x128xf32>
    %20 = vector.extract_strided_slice %4 {offsets = [48, 0], sizes = [192, 128], strides = [1, 1]} : vector<288x128xbf16> to vector<192x128xbf16>
    %21 = vector.extract_strided_slice %4 {offsets = [49, 0], sizes = [192, 128], strides = [1, 1]} : vector<288x128xbf16> to vector<192x128xbf16>
    %22 = vector.extract_strided_slice %4 {offsets = [50, 0], sizes = [192, 128], strides = [1, 1]} : vector<288x128xbf16> to vector<192x128xbf16>
    %23 = tpu.concatenate %20, %21, %22 in 1 : vector<192x128xbf16>, vector<192x128xbf16>, vector<192x128xbf16> -> vector<192x384xbf16>
    %c2 = arith.constant 2 : index
    %c0_11 = arith.constant 0 : index
    %c0_12 = arith.constant 0 : index
    %24 = vector.load %arg4[%c2, %c0_11, %c0_12] : memref<3x384x128xbf16, #tpu.memory_space<vmem>>, vector<1x384x128xbf16>
    %25 = vector.shape_cast %24 : vector<1x384x128xbf16> to vector<384x128xbf16>
    %cst_13 = arith.constant dense<0.000000e+00> : vector<192x128xf32>
    %26 = tpu.matmul %23, %25, %cst_13 {dimension_numbers = #tpu.dot_dimension_numbers<[1], [0], [0], [1], [0, 0, 1, 1], [], []>} : vector<192x384xbf16>, vector<384x128xbf16>, vector<192x128xf32> -> vector<192x128xf32>
    %27 = arith.addf %19, %26 : vector<192x128xf32>
    %c0_14 = arith.constant 0 : index
    %c0_15 = arith.constant 0 : index
    %28 = vector.load %arg5[%c0_14, %c0_15] : memref<1x128xf32, #tpu.memory_space<vmem>>, vector<1x128xf32>
    %29 = vector.broadcast %28 : vector<1x128xf32> to vector<192x128xf32>
    %30 = arith.addf %27, %29 : vector<192x128xf32>
    %cst_16 = arith.constant 0.000000e+00 : f32
    %31 = vector.broadcast %cst_16 : f32 to vector<192x128xf32>
    %32 = arith.subf %31, %30 : vector<192x128xf32>
    %33 = math.exp %32 : vector<192x128xf32>
    %cst_17 = arith.constant 1.000000e+00 : f32
    %34 = vector.broadcast %cst_17 : f32 to vector<192x128xf32>
    %35 = arith.addf %34, %33 : vector<192x128xf32>
    %36 = tpu.reciprocal %35 {approx = true} : vector<192x128xf32> -> vector<192x128xf32>
    %37 = arith.mulf %30, %36 : vector<192x128xf32>
    %38 = vector.shape_cast %37 : vector<192x128xf32> to vector<8x24x128xf32>
    %39 = vector.extract_strided_slice %38 {offsets = [0, 0, 0], sizes = [8, 16, 128], strides = [1, 1, 1]} : vector<8x24x128xf32> to vector<8x16x128xf32>
    %c0_18 = arith.constant 0 : index
    %c0_19 = arith.constant 0 : index
    %c0_20 = arith.constant 0 : index
    %c0_21 = arith.constant 0 : index
    %40 = vector.load %arg6[%c0_18, %c0_19, %c0_20, %c0_21] : memref<1x8x16x128xbf16, #tpu.memory_space<vmem>>, vector<1x8x16x128xbf16>
    %41 = vector.shape_cast %40 : vector<1x8x16x128xbf16> to vector<8x16x128xbf16>
    %42 = arith.extf %41 : vector<8x16x128xbf16> to vector<8x16x128xf32>
    %43 = arith.addf %39, %42 : vector<8x16x128xf32>
    %44 = arith.truncf %43 : vector<8x16x128xf32> to vector<8x16x128xbf16>
    %c0_22 = arith.constant 0 : index
    %c0_23 = arith.constant 0 : index
    %c0_24 = arith.constant 0 : index
    %c0_25 = arith.constant 0 : index
    %45 = vector.load %arg7[%c0_22, %c0_23, %c0_24, %c0_25] : memref<1x8x16x128xbf16, #tpu.memory_space<vmem>>, vector<1x8x16x128xbf16>
    %46 = vector.shape_cast %45 : vector<1x8x16x128xbf16> to vector<8x16x128xbf16>
    %47 = vector.shape_cast %44 : vector<8x16x128xbf16> to vector<1x8x16x128xbf16>
    tpu.vector_store %arg7[%c0_22, %c0_23, %c0_24, %c0_25], %47 {strides = array<i32>} : memref<1x8x16x128xbf16, #tpu.memory_space<vmem>>, vector<1x8x16x128xbf16>,
    return
  }
  func.func @transform_0(%arg0: i32, %arg1: i32) -> (i32, i32, i32) {
    %c0_i32 = arith.constant 0 : i32
    %c0_i32_0 = arith.constant 0 : i32
    return %arg0, %arg1, %c0_i32 : i32, i32, i32
  }
  func.func @transform_1(%arg0: i32, %arg1: i32) -> (i32, i32, i32) {
    %c1_i32 = arith.constant 1 : i32
    %0 = arith.addi %arg1, %c1_i32 : i32
    %c2_i32 = arith.constant 2 : i32
    %1 = arith.muli %0, %c2_i32 : i32
    %c0_i32 = arith.constant 0 : i32
    %c0_i32_0 = arith.constant 0 : i32
    return %arg0, %1, %c0_i32 : i32, i32, i32
  }
  func.func @transform_2(%arg0: i32, %arg1: i32) -> (i32, i32, i32) {
    %c0_i32 = arith.constant 0 : i32
    %c0_i32_0 = arith.constant 0 : i32
    %c0_i32_1 = arith.constant 0 : i32
    %c0_i32_2 = arith.constant 0 : i32
    return %c0_i32, %c0_i32_0, %c0_i32_1 : i32, i32, i32
  }
  func.func @transform_3(%arg0: i32, %arg1: i32) -> (i32, i32) {
    %c0_i32 = arith.constant 0 : i32
    %c0_i32_0 = arith.constant 0 : i32
    %c0_i32_1 = arith.constant 0 : i32
    return %c0_i32, %c0_i32_0 : i32, i32
  }
  func.func @transform_4(%arg0: i32, %arg1: i32) -> (i32, i32, i32, i32) {
    %c0_i32 = arith.constant 0 : i32
    %c0_i32_0 = arith.constant 0 : i32
    %c0_i32_1 = arith.constant 0 : i32
    return %arg0, %arg1, %c0_i32, %c0_i32_0 : i32, i32, i32, i32
  }
  func.func @transform_5(%arg0: i32, %arg1: i32) -> (i32, i32, i32, i32) {
    %c0_i32 = arith.constant 0 : i32
    %c0_i32_0 = arith.constant 0 : i32
    %c0_i32_1 = arith.constant 0 : i32
    return %arg0, %arg1, %c0_i32, %c0_i32_0 : i32, i32, i32, i32
  }
}

module attributes {stable_mosaic.version = 11 : i64} {
  func.func @_mm2_bias_silu_kernel(%arg0: i32, %arg1: memref<512x128xbf16, #tpu.memory_space<vmem>>, %arg2: memref<512x128xbf16, #tpu.memory_space<vmem>>, %arg3: memref<128x128xbf16, #tpu.memory_space<vmem>>, %arg4: memref<128x128xbf16, #tpu.memory_space<vmem>>, %arg5: memref<1x128xf32, #tpu.memory_space<vmem>>, %arg6: memref<512x128xbf16, #tpu.memory_space<vmem>>) attributes {dimension_semantics = [#tpu.dimension_semantics<parallel>], iteration_bounds = array<i64: 1>, scalar_prefetch = 0 : i64, scratch_operands = 0 : i64, tpu.core_type = #tpu.core_type<tc>, window_params = [{transform_indices = @transform_0, window_bounds = array<i64: 512, 128>}, {transform_indices = @transform_1, window_bounds = array<i64: 512, 128>}, {pipeline_mode = #tpu.pipeline_mode<synchronous>, transform_indices = @transform_2, window_bounds = array<i64: 128, 128>}, {pipeline_mode = #tpu.pipeline_mode<synchronous>, transform_indices = @transform_3, window_bounds = array<i64: 128, 128>}, {pipeline_mode = #tpu.pipeline_mode<synchronous>, transform_indices = @transform_4, window_bounds = array<i64: 1, 128>}, {transform_indices = @transform_5, window_bounds = array<i64: 512, 128>}]} {
    %c0 = arith.constant 0 : index
    %c0_0 = arith.constant 0 : index
    %0 = vector.load %arg1[%c0, %c0_0] : memref<512x128xbf16, #tpu.memory_space<vmem>>, vector<512x128xbf16>
    %c0_1 = arith.constant 0 : index
    %c0_2 = arith.constant 0 : index
    %1 = vector.load %arg3[%c0_1, %c0_2] : memref<128x128xbf16, #tpu.memory_space<vmem>>, vector<128x128xbf16>
    %cst = arith.constant dense<0.000000e+00> : vector<512x128xf32>
    %2 = tpu.matmul %0, %1, %cst {dimension_numbers = #tpu.dot_dimension_numbers<[1], [0], [0], [1], [0, 0, 1, 1], [], []>} : vector<512x128xbf16>, vector<128x128xbf16>, vector<512x128xf32> -> vector<512x128xf32>
    %c0_3 = arith.constant 0 : index
    %c0_4 = arith.constant 0 : index
    %3 = vector.load %arg2[%c0_3, %c0_4] : memref<512x128xbf16, #tpu.memory_space<vmem>>, vector<512x128xbf16>
    %c0_5 = arith.constant 0 : index
    %c0_6 = arith.constant 0 : index
    %4 = vector.load %arg4[%c0_5, %c0_6] : memref<128x128xbf16, #tpu.memory_space<vmem>>, vector<128x128xbf16>
    %cst_7 = arith.constant dense<0.000000e+00> : vector<512x128xf32>
    %5 = tpu.matmul %3, %4, %cst_7 {dimension_numbers = #tpu.dot_dimension_numbers<[1], [0], [0], [1], [0, 0, 1, 1], [], []>} : vector<512x128xbf16>, vector<128x128xbf16>, vector<512x128xf32> -> vector<512x128xf32>
    %6 = arith.addf %2, %5 : vector<512x128xf32>
    %c0_8 = arith.constant 0 : index
    %c0_9 = arith.constant 0 : index
    %7 = vector.load %arg5[%c0_8, %c0_9] : memref<1x128xf32, #tpu.memory_space<vmem>>, vector<1x128xf32>
    %8 = vector.broadcast %7 : vector<1x128xf32> to vector<512x128xf32>
    %9 = arith.addf %6, %8 : vector<512x128xf32>
    %10 = arith.negf %9 : vector<512x128xf32>
    %11 = math.exp %10 : vector<512x128xf32>
    %cst_10 = arith.constant 1.000000e+00 : f32
    %12 = vector.broadcast %cst_10 : f32 to vector<512x128xf32>
    %13 = arith.addf %12, %11 : vector<512x128xf32>
    %14 = arith.divf %12, %13 : vector<512x128xf32>
    %15 = arith.mulf %9, %14 : vector<512x128xf32>
    %16 = arith.truncf %15 : vector<512x128xf32> to vector<512x128xbf16>
    %c0_11 = arith.constant 0 : index
    %c0_12 = arith.constant 0 : index
    %17 = vector.load %arg6[%c0_11, %c0_12] : memref<512x128xbf16, #tpu.memory_space<vmem>>, vector<512x128xbf16>
    tpu.vector_store %arg6[%c0_11, %c0_12], %16 {strides = array<i32>} : memref<512x128xbf16, #tpu.memory_space<vmem>>, vector<512x128xbf16>,
    return
  }
  func.func @transform_0(%arg0: i32) -> (i32, i32) {
    %c0_i32 = arith.constant 0 : i32
    %c0_i32_0 = arith.constant 0 : i32
    return %arg0, %c0_i32 : i32, i32
  }
  func.func @transform_1(%arg0: i32) -> (i32, i32) {
    %c0_i32 = arith.constant 0 : i32
    %c0_i32_0 = arith.constant 0 : i32
    return %arg0, %c0_i32 : i32, i32
  }
  func.func @transform_2(%arg0: i32) -> (i32, i32) {
    %c0_i32 = arith.constant 0 : i32
    %c0_i32_0 = arith.constant 0 : i32
    %c0_i32_1 = arith.constant 0 : i32
    return %c0_i32, %c0_i32_0 : i32, i32
  }
  func.func @transform_3(%arg0: i32) -> (i32, i32) {
    %c0_i32 = arith.constant 0 : i32
    %c0_i32_0 = arith.constant 0 : i32
    %c0_i32_1 = arith.constant 0 : i32
    return %c0_i32, %c0_i32_0 : i32, i32
  }
  func.func @transform_4(%arg0: i32) -> (i32, i32) {
    %c0_i32 = arith.constant 0 : i32
    %c0_i32_0 = arith.constant 0 : i32
    %c0_i32_1 = arith.constant 0 : i32
    return %c0_i32, %c0_i32_0 : i32, i32
  }
  func.func @transform_5(%arg0: i32) -> (i32, i32) {
    %c0_i32 = arith.constant 0 : i32
    %c0_i32_0 = arith.constant 0 : i32
    return %arg0, %c0_i32 : i32, i32
  }
}

</mosaic_0001>

<bundles_post_ra>
// kernel: csp_block_forward.7
= control target key start
LH: loop header
LB: loop body
LE: loop exit
PB: predicated region body
PF: predicated region fallthrough
CT: control target
= control target key end

     0   :  { %s2954_s1 = inlined_call_operand.vmem [shape: bf16[128,128], index: 1, kind: input, shape index: {}]   ;;  %s2955_s0 = inlined_call_operand.vmem [shape: bf16[512,128], index: 0, kind: input, shape index: {}]   ;;  %s2956_s2 = inlined_call_operand.vmem [shape: f32[1,128], index: 2, kind: input, shape index: {}]   ;;  %s2957_s3 = inlined_call_operand.vmem [shape: bf16[512,128], index: 3, kind: output, shape index: {}]  }
   0x1   :  { %v1963_v0 = vld [vmem:[%s2954_s1] sm:$0xff]   ;;  %v1964_v1 = vld [vmem:[%s2954_s1 + $0x8] sm:$0xff]   ;;  %v1965_v2 = vld [vmem:[%s2954_s1 + $0x10] sm:$0xff]  }
   0x2   :  { %1867 = vmatprep.subr.bf16.mxu0 %v1963_v0  ;;  %1947 = vmatprep.subr.bf16.mxu1 %v1963_v0  ;;  %v1966_v3 = vld [vmem:[%s2954_s1 + $0x18] sm:$0xff]   ;;  %v1971_v4 = vld [vmem:[%s2955_s0] sm:$0xff]   ;;  %v1968_v7 = vld [vmem:[%s2954_s1 + $0x28] sm:$0xff]  }
   0x3   :  { %1868 = vmatpush3.bf16.msra.mxu0 %v1963_v0  ;;  %1955 = vmatpush3.bf16.msra.mxu1 %v1963_v0  ;;  %v1972_v5 = vld [vmem:[%s2955_s0 + $0x80] sm:$0xff]   ;;  %v1969_v8 = vld [vmem:[%s2954_s1 + $0x30] sm:$0xff]   ;;  %v1970_v9 = vld [vmem:[%s2954_s1 + $0x38] sm:$0xff]  }
   0x4   :  { %1869 = vmatprep.subr.bf16.mxu0 %v1964_v1  ;;  %1948 = vmatprep.subr.bf16.mxu1 %v1964_v1  ;;  %v1967_v6 = vld [vmem:[%s2954_s1 + $0x20] sm:$0xff]   ;;  %v1973_v10 = vld [vmem:[%s2955_s0 + $0x8] sm:$0xff]   ;;  %v1975_v12 = vld [vmem:[%s2955_s0 + $0x10] sm:$0xff]  }
   0x5   :  { %1883 = vmatprep.mubr.bf16.mxu0 %v1971_v4  ;;  %1915 = vmatprep.mubr.bf16.mxu1 %v1972_v5  ;;  %v1974_v11 = vld [vmem:[%s2955_s0 + $0x88] sm:$0xff]   ;;  %v1976_v13 = vld [vmem:[%s2955_s0 + $0x90] sm:$0xff]   ;;  %v1977_v14 = vld [vmem:[%s2955_s0 + $0x18] sm:$0xff]  }
   0x6   :  { %v1978_v15 = vld [vmem:[%s2955_s0 + $0x98] sm:$0xff]   ;;  %v1979_v16 = vld [vmem:[%s2955_s0 + $0x20] sm:$0xff]   ;;  %v1981_v18 = vld [vmem:[%s2955_s0 + $0x28] sm:$0xff]  }
   0x7   :  { %1870 = vmatpush3.bf16.msra.mxu0 %v1964_v1  ;;  %1956 = vmatpush3.bf16.msra.mxu1 %v1964_v1  ;;  %v1980_v17 = vld [vmem:[%s2955_s0 + $0xa0] sm:$0xff]   ;;  %v1982_v19 = vld [vmem:[%s2955_s0 + $0xa8] sm:$0xff]   ;;  %v1983_v20 = vld [vmem:[%s2955_s0 + $0x30] sm:$0xff]  }
   0x8   :  { %1871 = vmatprep.subr.bf16.mxu0 %v1965_v2  ;;  %1949 = vmatprep.subr.bf16.mxu1 %v1965_v2  ;;  %v1984_v21 = vld [vmem:[%s2955_s0 + $0xb0] sm:$0xff]   ;;  %v1985_v22 = vld [vmem:[%s2955_s0 + $0x38] sm:$0xff]   ;;  %v1987_v24 = vld [vmem:[%s2955_s0 + $0x40] sm:$0xff]  }
   0x9   :  { %v1986_v23 = vld [vmem:[%s2955_s0 + $0xb8] sm:$0xff]   ;;  %v1988_v25 = vld [vmem:[%s2955_s0 + $0xc0] sm:$0xff]   ;;  %v1989_v26 = vld [vmem:[%s2955_s0 + $0x48] sm:$0xff]  }
   0xa   :  { %v1990_v27 = vld [vmem:[%s2955_s0 + $0xc8] sm:$0xff]   ;;  %v1991_v28 = vld [vmem:[%s2955_s0 + $0x50] sm:$0xff]   ;;  %v1993_v30 = vld [vmem:[%s2955_s0 + $0x58] sm:$0xff]  }
   0xb   :  { %1872 = vmatpush3.bf16.msra.mxu0 %v1965_v2  ;;  %1957 = vmatpush3.bf16.msra.mxu1 %v1965_v2  ;;  %v1992_v29 = vld [vmem:[%s2955_s0 + $0xd0] sm:$0xff]   ;;  %v1994_v31 = vld [vmem:[%s2955_s0 + $0xd8] sm:$0xff]   ;;  %v1995_v32 = vld [vmem:[%s2955_s0 + $0x60] sm:$0xff]  }
   0xc   :  { %1873 = vmatprep.subr.bf16.mxu0 %v1966_v3  ;;  %1950 = vmatprep.subr.bf16.mxu1 %v1966_v3  ;;  %v1996_v33 = vld [vmem:[%s2955_s0 + $0xe0] sm:$0xff]   ;;  %v1997_v34 = vld [vmem:[%s2955_s0 + $0x68] sm:$0xff]   ;;  %v1999_v36 = vld [vmem:[%s2955_s0 + $0x70] sm:$0xff]  }
   0xd   :  { %v1998_v35 = vld [vmem:[%s2955_s0 + $0xe8] sm:$0xff]   ;;  %v2000_v37 = vld [vmem:[%s2955_s0 + $0xf0] sm:$0xff]   ;;  %v2001_v38 = vld [vmem:[%s2955_s0 + $0x78] sm:$0xff]  }
   0xe   :  { %v2002_v39 = vld [vmem:[%s2955_s0 + $0xf8] sm:$0xff]   ;;  %v2403_v40 = vld [vmem:[%s2956_s2] ss:$0 sm:$0xff] }
   0xf   :  { %1874 = vmatpush3.bf16.msra.mxu0 %v1966_v3  ;;  %1958 = vmatpush3.bf16.msra.mxu1 %v1966_v3 }
  0x10   :  { %1875 = vmatprep.subr.bf16.mxu0 %v1967_v6  ;;  %1951 = vmatprep.subr.bf16.mxu1 %v1967_v6 }
  0x13   :  { %1876 = vmatpush3.bf16.msra.mxu0 %v1967_v6  ;;  %1959 = vmatpush3.bf16.msra.mxu1 %v1967_v6 }
  0x14   :  { %1877 = vmatprep.subr.bf16.mxu0 %v1968_v7  ;;  %1952 = vmatprep.subr.bf16.mxu1 %v1968_v7 }
  0x17   :  { %1878 = vmatpush3.bf16.msra.mxu0 %v1968_v7  ;;  %1960 = vmatpush3.bf16.msra.mxu1 %v1968_v7 }
  0x18   :  { %1879 = vmatprep.subr.bf16.mxu0 %v1969_v8  ;;  %1953 = vmatprep.subr.bf16.mxu1 %v1969_v8 }
  0x1b   :  { %1880 = vmatpush3.bf16.msra.mxu0 %v1969_v8  ;;  %1961 = vmatpush3.bf16.msra.mxu1 %v1969_v8 }
  0x1c   :  { %1881 = vmatprep.subr.bf16.mxu0 %v1970_v9  ;;  %1954 = vmatprep.subr.bf16.mxu1 %v1970_v9 }
  0x1f   :  { %1882 = vmatpush3.bf16.msra.mxu0 %v1970_v9  ;;  %1962 = vmatpush3.bf16.msra.mxu1 %v1970_v9 }
  0x22   :  { %1884 = vmatmul.mubr.bf16.vlgmr.msra.gmra.mrb[0].mxu0 %v1973_v10  ;;  %1916 = vmatmul.mubr.bf16.vlgmr.msra.gmra.mrb[0].mxu1 %v1974_v11 }
  0x23   :  { %1887 = vmatprep.mubr.bf16.mxu0 %v1975_v12  ;;  %1919 = vmatprep.mubr.bf16.mxu1 %v1976_v13 }
  0x2a   :  { %1888 = vmatmul.mubr.bf16.gmra.mrb[4].mxu0 %v1977_v14  ;;  %1920 = vmatmul.mubr.bf16.gmra.mrb[4].mxu1 %v1978_v15 }
  0x2b   :  { %1891 = vmatprep.mubr.bf16.mxu0 %v1979_v16  ;;  %1923 = vmatprep.mubr.bf16.mxu1 %v1980_v17 }
  0x32   :  { %1892 = vmatmul.mubr.bf16.gmra.mrb[8].mxu0 %v1981_v18  ;;  %1924 = vmatmul.mubr.bf16.gmra.mrb[8].mxu1 %v1982_v19 }
  0x33   :  { %1895 = vmatprep.mubr.bf16.mxu0 %v1983_v20  ;;  %1927 = vmatprep.mubr.bf16.mxu1 %v1984_v21 }
  0x3a   :  { %1896 = vmatmul.mubr.bf16.gmra.mrb[12].mxu0 %v1985_v22  ;;  %1928 = vmatmul.mubr.bf16.gmra.mrb[12].mxu1 %v1986_v23 }
  0x3b   :  { %1899 = vmatprep.mubr.bf16.mxu0 %v1987_v24  ;;  %1931 = vmatprep.mubr.bf16.mxu1 %v1988_v25 }
  0x42   :  { %1900 = vmatmul.mubr.bf16.gmra.mrb[16].mxu0 %v1989_v26  ;;  %1932 = vmatmul.mubr.bf16.gmra.mrb[16].mxu1 %v1990_v27 }
  0x43   :  { %1903 = vmatprep.mubr.bf16.mxu0 %v1991_v28  ;;  %1935 = vmatprep.mubr.bf16.mxu1 %v1992_v29 }
  0x4a   :  { %1904 = vmatmul.mubr.bf16.gmra.mrb[20].mxu0 %v1993_v30  ;;  %1936 = vmatmul.mubr.bf16.gmra.mrb[20].mxu1 %v1994_v31 }
  0x4b   :  { %1907 = vmatprep.mubr.bf16.mxu0 %v1995_v32  ;;  %1939 = vmatprep.mubr.bf16.mxu1 %v1996_v33 }
  0x52   :  { %1908 = vmatmul.mubr.bf16.gmra.mrb[24].mxu0 %v1997_v34  ;;  %1940 = vmatmul.mubr.bf16.gmra.mrb[24].mxu1 %v1998_v35 }
  0x53   :  { %1911 = vmatprep.mubr.bf16.mxu0 %v1999_v36  ;;  %1943 = vmatprep.mubr.bf16.mxu1 %v2000_v37 }
  0x5a   :  { %1912 = vmatmul.mubr.bf16.gmra.mrb[28].mxu0 %v2001_v38  ;;  %1944 = vmatmul.mubr.bf16.gmra.mrb[28].mxu1 %v2002_v39 }
  0xf5   :  { %v1885_v41 = vpop.f32.mrb[0].mxu0  ;;  %v1917_v42 = vpop.f32.mrb[0].mxu1 }
  0xf6   :  { %v2406_v43 = vadd.f32 %v1885_v41, %v2403_v40  ;;  %v2409_v44 = vadd.f32 %v1917_v42, %v2403_v40  ;;  %v376_v45 = vpop.f32.mrb[1].mxu0  ;;  %v504_v46 = vpop.f32.mrb[1].mxu1 }
  0xf7   :  { %v2412_v47 = vadd.f32 %v2403_v40, %v376_v45  ;;  %v2415_v48 = vadd.f32 %v2403_v40, %v504_v46  ;;  %v1886_v49 = vpop.f32.mrb[2].mxu0  ;;  %v1918_v50 = vpop.f32.mrb[2].mxu1 }
  0xf8   :  { %v1446_v51 = vmul.f32 -1.442695, %v2406_v43  ;;  %v1478_v52 = vmul.f32 -1.442695, %v2409_v44  ;;  %v2420_v53 = vadd.f32 %v1886_v49, %v2403_v40  ;;  %v2423_v54 = vadd.f32 %v1918_v50, %v2403_v40  ;;  %v379_v55 = vpop.f32.mrb[3].mxu0  ;;  %v507_v56 = vpop.f32.mrb[3].mxu1 }
  0xf9   :  { %v1444_v57 = vmul.f32 -1.442695, %v2412_v47  ;;  %v1476_v58 = vmul.f32 -1.442695, %v2415_v48  ;;  %v2428_v59 = vadd.f32 %v2403_v40, %v379_v55  ;;  %v2431_v60 = vadd.f32 %v2403_v40, %v507_v56 }
  0xfa   :  { %2003 = vpow2.f32 %v1446_v51  ;;  %v1447_v61 = vmul.f32 -1.442695, %v2420_v53  ;;  %v1479_v62 = vmul.f32 -1.442695, %v2423_v54 }
  0xfb   :  { %2005 = vpow2.f32 %v1478_v52  ;;  %v1445_v63 = vmul.f32 -1.442695, %v2428_v59  ;;  %v1477_v0 = vmul.f32 -1.442695, %v2431_v60 }
  0xfc   :  { %2007 = vpow2.f32 %v1444_v57 }
  0xfd   :  { %2009 = vpow2.f32 %v1476_v58  ;;  %v1889_v1 = vpop.f32.mrb[4].mxu0  ;;  %v1921_v2 = vpop.f32.mrb[4].mxu1 }
  0xfe   :  { %2011 = vpow2.f32 %v1447_v61  ;;  %v2438_v3 = vadd.f32 %v1889_v1, %v2403_v40  ;;  %v2441_v4 = vadd.f32 %v1921_v2, %v2403_v40  ;;  %v392_v5 = vpop.f32.mrb[5].mxu0  ;;  %v520_v6 = vpop.f32.mrb[5].mxu1 }
  0xff   :  { %2013 = vpow2.f32 %v1479_v62  ;;  %v2444_v7 = vadd.f32 %v2403_v40, %v392_v5  ;;  %v2447_v8 = vadd.f32 %v2403_v40, %v520_v6  ;;  %v1890_v9 = vpop.f32.mrb[6].mxu0  ;;  %v1922_v10 = vpop.f32.mrb[6].mxu1 }
 0x100   :  { %2015 = vpow2.f32 %v1445_v63  ;;  %v1450_v11 = vmul.f32 -1.442695, %v2438_v3  ;;  %v1482_v12 = vmul.f32 -1.442695, %v2441_v4  ;;  %v2452_v13 = vadd.f32 %v1890_v9, %v2403_v40  ;;  %v395_v14 = vpop.f32.mrb[7].mxu0  ;;  %v523_v15 = vpop.f32.mrb[7].mxu1 }
 0x101   :  { %2017 = vpow2.f32 %v1477_v0  ;;  %v1448_v16 = vmul.f32 -1.442695, %v2444_v7  ;;  %v1480_v17 = vmul.f32 -1.442695, %v2447_v8  ;;  %v2458_v37 = vadd.f32 %v1922_v10, %v2403_v40 }
 0x102   :  { %2019 = vpow2.f32 %v1450_v11  ;;  %v1451_v18 = vmul.f32 -1.442695, %v2452_v13  ;;  %v2461_v42 = vadd.f32 %v2403_v40, %v395_v14  ;;  %v2465_v56 = vadd.f32 %v2403_v40, %v523_v15 }
 0x103   :  { %2021 = vpow2.f32 %v1482_v12  ;;  %v1483_v55 = vmul.f32 -1.442695, %v2458_v37 }
 0x104   :  { %v2004_v19 = vpop.eup %2003  ;;  %2023 = vpow2.f32 %v1448_v16  ;;  %v1449_v62 = vmul.f32 -1.442695, %v2461_v42 }
 0x105   :  { %v2006_v20 = vpop.eup %2005  ;;  %v825_v21 = vadd.f32 1.0, %v2004_v19  ;;  %2025 = vpow2.f32 %v1480_v17  ;;  %v1893_v22 = vpop.f32.mrb[8].mxu0 }
 0x106   :  { %v1925_v23 = vpop.f32.mrb[8].mxu1  ;;  %v2008_v24 = vpop.eup %2007  ;;  %v857_v25 = vadd.f32 1.0, %v2006_v20  ;;  %2027 = vpow2.f32 %v1451_v18  ;;  %v2469_v63 = vadd.f32 %v1893_v22, %v2403_v40 }
 0x107   :  { %v408_v26 = vpop.f32.mrb[9].mxu0  ;;  %v536_v27 = vpop.f32.mrb[9].mxu1  ;;  %2029 = vrcp.f32 %v825_v21  ;;  %v823_v29 = vadd.f32 1.0, %v2008_v24  ;;  %v2474_v6 = vadd.f32 %v1925_v23, %v2403_v40 }
 0x108   :  { %v2010_v28 = vpop.eup %2009  ;;  %v1894_v30 = vpop.f32.mrb[10].mxu0  ;;  %2031 = vrcp.f32 %v857_v25  ;;  %v2477_v9 = vadd.f32 %v2403_v40, %v408_v26  ;;  %v2484_v15 = vadd.f32 %v2403_v40, %v536_v27  ;;  %v1481_v25 = vmul.f32 -1.442695, %v2465_v56 }
 0x109   :  { %v1926_v31 = vpop.f32.mrb[10].mxu1  ;;  %v2012_v32 = vpop.eup %2011  ;;  %v855_v33 = vadd.f32 1.0, %v2010_v28  ;;  %2033 = vrcp.f32 %v823_v29  ;;  %v2487_v16 = vadd.f32 %v1894_v30, %v2403_v40  ;;  %v1454_v27 = vmul.f32 -1.442695, %v2469_v63 }
 0x10a   :  { %v411_v34 = vpop.f32.mrb[11].mxu0  ;;  %v2014_v35 = vpop.eup %2013  ;;  %v826_v36 = vadd.f32 1.0, %v2012_v32  ;;  %v2494_v21 = vadd.f32 %v1926_v31, %v2403_v40  ;;  %v1486_v28 = vmul.f32 -1.442695, %v2474_v6  ;;  %v1452_v30 = vmul.f32 -1.442695, %v2477_v9 }
 0x10b   :  { %v539_v38 = vpop.f32.mrb[11].mxu1  ;;  %v2016_v39 = vpop.eup %2015  ;;  %2035 = vrcp.f32 %v855_v33  ;;  %v858_v41 = vadd.f32 1.0, %v2014_v35  ;;  %v2497_v22 = vadd.f32 %v2403_v40, %v411_v34  ;;  %v1484_v31 = vmul.f32 -1.442695, %v2484_v15 }
 0x10c   :  { %v2018_v45 = vpop.eup %2017  ;;  %2037 = vrcp.f32 %v826_v36  ;;  %v824_v46 = vadd.f32 1.0, %v2016_v39  ;;  %v1455_v32 = vmul.f32 -1.442695, %v2487_v16  ;;  %v1487_v34 = vmul.f32 -1.442695, %v2494_v21 }
 0x10d   :  { %v2020_v49 = vpop.eup %2019  ;;  %2039 = vrcp.f32 %v858_v41  ;;  %v856_v50 = vadd.f32 1.0, %v2018_v45  ;;  %v1897_v57 = vpop.f32.mrb[12].mxu0  ;;  %v1453_v35 = vmul.f32 -1.442695, %v2497_v22  ;;  %v2510_v36 = vadd.f32 %v2403_v40, %v539_v38 }
 0x10e   :  { %v2022_v51 = vpop.eup %2021  ;;  %2041 = vrcp.f32 %v824_v46  ;;  %v829_v52 = vadd.f32 1.0, %v2020_v49  ;;  %v1929_v0 = vpop.f32.mrb[12].mxu1 }
 0x10f   :  { %v2024_v58 = vpop.eup %2023  ;;  %2043 = vrcp.f32 %v856_v50  ;;  %v861_v61 = vadd.f32 1.0, %v2022_v51  ;;  %v2471_v1 = vpop.f32.mrb[13].mxu0  ;;  %v2519_v50 = vadd.f32 %v1897_v57, %v2403_v40 }
 0x110   :  { %v2026_v2 = vpop.eup %2025  ;;  %2045 = vrcp.f32 %v829_v52  ;;  %v827_v5 = vadd.f32 1.0, %v2024_v58  ;;  %v2479_v10 = vpop.f32.mrb[13].mxu1 }
 0x111   :  { %v2481_v11 = vpop.f32.mrb[14].mxu0  ;;  %v2028_v12 = vpop.eup %2027  ;;  %2047 = vrcp.f32 %v861_v61  ;;  %v859_v14 = vadd.f32 1.0, %v2026_v2  ;;  %v2528_v61 = vadd.f32 %v1929_v0, %v2403_v40 }
 0x112   :  { %v2489_v17 = vpop.f32.mrb[14].mxu1  ;;  %v2491_v18 = vpop.f32.mrb[15].mxu0  ;;  %2049 = vrcp.f32 %v827_v5  ;;  %v830_v20 = vadd.f32 1.0, %v2028_v12 }
 0x113   :  { %v2030_v19 = vpop.eup %2029  ;;  %v2499_v23 = vpop.f32.mrb[15].mxu1  ;;  %2051 = vrcp.f32 %v859_v14 }
 0x114   :  { %v2032_v24 = vpop.eup %2031  ;;  %2053 = vrcp.f32 %v830_v20  ;;  %v1017_v46 = vmul.f32 %v2030_v19, %v2406_v43 }
 0x115   :  { %v2034_v26 = vpop.eup %2033  ;;  %2055 = vpow2.f32 %v1483_v55  ;;  %v2512_v39 = vpop.f32.mrb[16].mxu0  ;;  %v1049_v38 = vmul.f32 %v2032_v24, %v2409_v44 }
 0x116   :  { %v2036_v29 = vpop.eup %2035  ;;  %2057 = vpow2.f32 %v1449_v62  ;;  %v2514_v41 = vpop.f32.mrb[16].mxu1  ;;  %v1015_v57 = vmul.f32 %v2034_v26, %v2412_v47  ;;  %v1490_v26 = vmul.f32 -1.442695, %v2528_v61 }
 0x117   :  { %v2038_v33 = vpop.eup %2037  ;;  %2059 = vpow2.f32 %v1481_v25  ;;  %v2521_v51 = vpop.f32.mrb[17].mxu0  ;;  %v1047_v14 = vmul.f32 %v2036_v29, %v2415_v48 }
 0x118   :  { %v2040_v45 = vpop.eup %2039  ;;  %v1018_v49 = vmul.f32 %v2038_v33, %v2420_v53  ;;  %v2523_v52 = vpop.f32.mrb[17].mxu1  ;;  %2061 = vpow2.f32 %v1454_v27 }
 0x119   :  { %v2042_v55 = vpop.eup %2041  ;;  %v1050_v58 = vmul.f32 %v2040_v45, %v2423_v54  ;;  %v2530_v43 = vpop.f32.mrb[18].mxu0  ;;  %2063 = vpow2.f32 %v1486_v28 }
 0x11a   :  { %v2532_v53 = vpop.f32.mrb[18].mxu1  ;;  %v2044_v62 = vpop.eup %2043  ;;  %v1644_v2 = vpack.c.bf16 %v1018_v49, %v1017_v46  ;;  %v1016_v5 = vmul.f32 %v2042_v55, %v2428_v59  ;;  %2065 = vpow2.f32 %v1452_v30  ;;  %v1485_v59 = vmul.f32 -1.442695, %v2510_v36 }
 0x11b   :  { %v2536_v12 = vpop.f32.mrb[19].mxu0  ;;  %v2538_v44 = vpop.f32.mrb[19].mxu1  ;;  %v1724_v0 = vpack.c.bf16 %v1050_v58, %v1049_v38  ;;  %v1048_v19 = vmul.f32 %v2044_v62, %v2431_v60  ;;  %2067 = vpow2.f32 %v1484_v31  ;;  %v1458_v60 = vmul.f32 -1.442695, %v2519_v50 }
 0x11c   :  { %v2046_v54 = vpop.eup %2045  ;;  %1796 = vst [vmem:[%s2957_s3 + $0x8] sm:$0xff] %v1644_v2   ;;  %v1639_v47 = vpack.c.bf16 %v1016_v5, %v1015_v57  ;;  %2069 = vpow2.f32 %v1455_v32 }
 0x11d   :  { %v2542_v20 = vpop.eup %2047  ;;  %1812 = vst [vmem:[%s2957_s3 + $0x88] sm:$0xff] %v1724_v0   ;;  %v1719_v48 = vpack.c.bf16 %v1048_v19, %v1047_v14  ;;  %2071 = vpow2.f32 %v1487_v34  ;;  %v2563_v28 = vpop.f32.mrb[20].mxu0  ;;  %v1021_v31 = vmul.f32 %v2046_v54, %v2438_v3  ;;  %v2586_v54 = vadd.f32 %v2403_v40, %v2471_v1 }
 0x11e   :  { %v2548_v24 = vpop.eup %2049  ;;  %1640 = vst [vmem:[%s2957_s3] sm:$0xff] %v1639_v47   ;;  %2073 = vpow2.f32 %v1453_v35  ;;  %v2565_v29 = vpop.f32.mrb[20].mxu1  ;;  %v2590_v19 = vadd.f32 %v2403_v40, %v2479_v10  ;;  %v2598_v1 = vadd.f32 %v2489_v17, %v2403_v40 }
 0x11f   :  { %v2554_v25 = vpop.eup %2051  ;;  %1811 = vst [vmem:[%s2957_s3 + $0x80] sm:$0xff] %v1719_v48   ;;  %2075 = vpow2.f32 %v1485_v59  ;;  %v2569_v33 = vpop.f32.mrb[21].mxu0  ;;  %v2594_v48 = vadd.f32 %v2481_v11, %v2403_v40  ;;  %v2607_v11 = vadd.f32 %v2403_v40, %v2491_v18 }
 0x120   :  { %v2054_v27 = vpop.eup %2053  ;;  %v2571_v34 = vpop.f32.mrb[21].mxu1  ;;  %2077 = vpow2.f32 %v1458_v60 }
 0x121   :  { %v2056_v30 = vpop.eup %2055  ;;  %v1022_v32 = vmul.f32 %v2054_v27, %v2452_v13  ;;  %v2573_v49 = vpop.f32.mrb[22].mxu0  ;;  %2079 = vpow2.f32 %v1490_v26 }
 0x122   :  { %v2058_v45 = vpop.eup %2057  ;;  %v862_v46 = vadd.f32 1.0, %v2056_v30  ;;  %v2575_v35 = vpop.f32.mrb[22].mxu1 }
 0x123   :  { %v2060_v55 = vpop.eup %2059  ;;  %v1654_v38 = vpack.c.bf16 %v1022_v32, %v1021_v31  ;;  %v828_v58 = vadd.f32 1.0, %v2058_v45  ;;  %v2577_v62 = vpop.f32.mrb[23].mxu0  ;;  %v1456_v32 = vmul.f32 -1.442695, %v2586_v54 }
 0x124   :  { %v2579_v3 = vpop.f32.mrb[23].mxu1  ;;  %v2062_v13 = vpop.eup %2061  ;;  %2081 = vrcp.f32 %v862_v46  ;;  %v860_v57 = vadd.f32 1.0, %v2060_v55 }
 0x125   :  { %v2064_v2 = vpop.eup %2063  ;;  %1798 = vst [vmem:[%s2957_s3 + $0x18] sm:$0xff] %v1654_v38   ;;  %2083 = vrcp.f32 %v828_v58  ;;  %v833_v5 = vadd.f32 1.0, %v2062_v13  ;;  %v2600_v27 = vpop.f32.mrb[24].mxu0  ;;  %v1488_v38 = vmul.f32 -1.442695, %v2590_v19 }
 0x126   :  { %v2066_v14 = vpop.eup %2065  ;;  %2085 = vrcp.f32 %v860_v57  ;;  %v865_v0 = vadd.f32 1.0, %v2064_v2  ;;  %v2602_v30 = vpop.f32.mrb[24].mxu1 }
 0x127   :  { %v2068_v47 = vpop.eup %2067  ;;  %2087 = vrcp.f32 %v833_v5  ;;  %v831_v59 = vadd.f32 1.0, %v2066_v14  ;;  %v2609_v45 = vpop.f32.mrb[25].mxu0  ;;  %v1459_v5 = vmul.f32 -1.442695, %v2594_v48 }
 0x128   :  { %v2070_v60 = vpop.eup %2069  ;;  %2089 = vrcp.f32 %v865_v0  ;;  %v863_v26 = vadd.f32 1.0, %v2068_v47  ;;  %v2611_v46 = vpop.f32.mrb[25].mxu1 }
 0x129   :  { %v2072_v10 = vpop.eup %2071  ;;  %2091 = vrcp.f32 %v831_v59  ;;  %v834_v31 = vadd.f32 1.0, %v2070_v60  ;;  %v2614_v58 = vpop.f32.mrb[26].mxu0  ;;  %v1491_v59 = vmul.f32 -1.442695, %v2598_v1  ;;  %v2626_v60 = vadd.f32 %v2403_v40, %v2499_v23 }
 0x12a   :  { %v2074_v55 = vpop.eup %2073  ;;  %2093 = vrcp.f32 %v863_v26  ;;  %v866_v17 = vadd.f32 1.0, %v2072_v10  ;;  %v2616_v13 = vpop.f32.mrb[26].mxu1  ;;  %v2639_v23 = vadd.f32 %v2403_v40, %v2521_v51  ;;  %v2653_v51 = vadd.f32 %v2530_v43, %v2403_v40 }
 0x12b   :  { %2959 = vst [vmem:[#allocation2_spill] sm:$0xff] %v2616_v13  ;;  %v2076_v57 = vpop.eup %2075  ;;  %2095 = vrcp.f32 %v834_v31  ;;  %v832_v2 = vadd.f32 1.0, %v2074_v55  ;;  %v2619_v18 = vpop.f32.mrb[27].mxu0  ;;  %v1457_v31 = vmul.f32 -1.442695, %v2607_v11  ;;  %v2631_v55 = vadd.f32 %v2512_v39, %v2403_v40 }
 0x12c   :  { %2960 = vst [vmem:[#allocation3_spill] sm:$0xff] %v2619_v18  ;;  %v2621_v14 = vpop.f32.mrb[27].mxu1  ;;  %v2078_v0 = vpop.eup %2077  ;;  %2097 = vrcp.f32 %v866_v17  ;;  %v864_v47 = vadd.f32 1.0, %v2076_v57  ;;  %v2635_v17 = vadd.f32 %v2514_v41, %v2403_v40  ;;  %v2646_v39 = vadd.f32 %v2403_v40, %v2523_v52 }
 0x12d   :  { %2961 = vst [vmem:[#allocation4_spill] sm:$0xff] %v2621_v14  ;;  %v2080_v26 = vpop.eup %2079  ;;  %2099 = vrcp.f32 %v832_v2  ;;  %v837_v10 = vadd.f32 1.0, %v2078_v0  ;;  %v1053_v2 = vmul.f32 %v2542_v20, %v2441_v4  ;;  %v1019_v41 = vmul.f32 %v2548_v24, %v2444_v7  ;;  %v2655_v13 = vpop.f32.mrb[28].mxu0 }
 0x12e   :  { %v2082_v18 = vpop.eup %2081  ;;  %2101 = vrcp.f32 %v864_v47  ;;  %v869_v14 = vadd.f32 1.0, %v2080_v26  ;;  %2962 = vst [vmem:[#allocation5_spill] sm:$0xff] %v2646_v39  ;;  %v2657_v4 = vpop.f32.mrb[28].mxu1  ;;  %v1051_v52 = vmul.f32 %v2554_v25, %v2447_v8  ;;  %v1489_v43 = vmul.f32 -1.442695, %v2626_v60 }
 0x12f   :  { %v2084_v57 = vpop.eup %2083  ;;  %v1054_v0 = vmul.f32 %v2082_v18, %v2458_v37  ;;  %2103 = vrcp.f32 %v837_v10  ;;  %v2662_v7 = vpop.f32.mrb[29].mxu0  ;;  %v2669_v10 = vadd.f32 %v2532_v53, %v2403_v40 }
 0x130   :  { %v2086_v47 = vpop.eup %2085  ;;  %v1020_v26 = vmul.f32 %v2084_v57, %v2461_v42  ;;  %2105 = vrcp.f32 %v869_v14  ;;  %v2664_v42 = vpop.f32.mrb[29].mxu1 }
 0x131   :  { %v2088_v37 = vpop.eup %2087  ;;  %v1734_v20 = vpack.c.bf16 %v1054_v0, %v1053_v2  ;;  %v1052_v18 = vmul.f32 %v2086_v47, %v2465_v56  ;;  %2107 = vpow2.f32 %v1456_v32  ;;  %v2671_v57 = vpop.f32.mrb[30].mxu0  ;;  %v1462_v32 = vmul.f32 -1.442695, %v2631_v55 }
 0x132   :  { %v2090_v24 = vpop.eup %2089  ;;  %v1649_v14 = vpack.c.bf16 %v1020_v26, %v1019_v41  ;;  %2109 = vpow2.f32 %v1488_v38  ;;  %2963 = vst [vmem:[#allocation6_spill] sm:$0xff] %v2671_v57  ;;  %v2673_v8 = vpop.f32.mrb[30].mxu1  ;;  %v2681_v38 = vadd.f32 %v2403_v40, %v2536_v12  ;;  %v1494_v47 = vmul.f32 -1.442695, %v2635_v17 }
 0x133   :  { %2964 = vst [vmem:[#allocation7_spill] sm:$0xff] %v2673_v8  ;;  %v2092_v25 = vpop.eup %2091  ;;  %1814 = vst [vmem:[%s2957_s3 + $0x98] sm:$0xff] %v1734_v20   ;;  %v1729_v56 = vpack.c.bf16 %v1052_v18, %v1051_v52  ;;  %2111 = vpow2.f32 %v1459_v5  ;;  %v2683_v2 = vpop.f32.mrb[31].mxu0  ;;  %v1460_v12 = vmul.f32 -1.442695, %v2639_v23  ;;  %v1025_v20 = vmul.f32 %v2088_v37, %v2469_v63 }
 0x134   :  { %2965 = vst [vmem:[#allocation8_spill] sm:$0xff] %v2683_v2  ;;  %v2685_v53 = vpop.f32.mrb[31].mxu1  ;;  %v2094_v0 = vpop.eup %2093  ;;  %1797 = vst [vmem:[%s2957_s3 + $0x10] sm:$0xff] %v1649_v14   ;;  %2113 = vpow2.f32 %v1491_v59  ;;  %v1492_v5 = vmul.f32 -1.442695, %v2646_v39  ;;  %v1023_v8 = vmul.f32 %v2092_v25, %v2477_v9 }
 0x135   :  { %2966 = vst [vmem:[#allocation9_spill] sm:$0xff] %v2685_v53  ;;  %v2096_v41 = vpop.eup %2095  ;;  %1813 = vst [vmem:[%s2957_s3 + $0x90] sm:$0xff] %v1729_v56   ;;  %2115 = vpow2.f32 %v1457_v31  ;;  %v1463_v26 = vmul.f32 -1.442695, %v2653_v51  ;;  %v1495_v59 = vmul.f32 -1.442695, %v2669_v10  ;;  %v1057_v53 = vmul.f32 %v2090_v24, %v2474_v6 }
 0x136   :  { %v2098_v52 = vpop.eup %2097  ;;  %v1026_v18 = vmul.f32 %v2096_v41, %v2487_v16  ;;  %2117 = vpow2.f32 %v1489_v43  ;;  %v1461_v31 = vmul.f32 -1.442695, %v2681_v38  ;;  %v1055_v16 = vmul.f32 %v2094_v0, %v2484_v15 }
 0x137   :  { %v2100_v14 = vpop.eup %2099  ;;  %v1058_v56 = vmul.f32 %v2098_v52, %v2494_v21  ;;  %2119 = vpow2.f32 %v1462_v32 }
 0x138   :  { %v2102_v2 = vpop.eup %2101  ;;  %v1664_v57 = vpack.c.bf16 %v1026_v18, %v1025_v20  ;;  %v1024_v39 = vmul.f32 %v2100_v14, %v2497_v22  ;;  %2121 = vpow2.f32 %v1494_v47  ;;  %v2729_v20 = vadd.f32 %v2563_v28, %v2403_v40 }
 0x139   :  { %v2705_v63 = vpop.eup %2103  ;;  %v1744_v37 = vpack.c.bf16 %v1058_v56, %v1057_v53  ;;  %v1056_v43 = vmul.f32 %v2102_v2, %v2510_v36  ;;  %2123 = vpow2.f32 %v1460_v12  ;;  %v2733_v18 = vadd.f32 %v2565_v29, %v2403_v40 }
 0x13a   :  { %v2709_v6 = vpop.eup %2105  ;;  %1800 = vst [vmem:[%s2957_s3 + $0x28] sm:$0xff] %v1664_v57   ;;  %v1659_v21 = vpack.c.bf16 %v1024_v39, %v1023_v8  ;;  %2125 = vpow2.f32 %v1492_v5  ;;  %v2725_v5 = vadd.f32 %v2403_v40, %v2538_v44  ;;  %v2737_v56 = vadd.f32 %v2403_v40, %v2569_v33 }
 0x13b   :  { %v2108_v9 = vpop.eup %2107  ;;  %1816 = vst [vmem:[%s2957_s3 + $0xa8] sm:$0xff] %v1744_v37   ;;  %v1739_v22 = vpack.c.bf16 %v1056_v43, %v1055_v16  ;;  %2127 = vpow2.f32 %v1463_v26  ;;  %v2741_v44 = vadd.f32 %v2403_v40, %v2571_v34  ;;  %v2745_v28 = vadd.f32 %v2573_v49, %v2403_v40 }
 0x13c   :  { %v2110_v15 = vpop.eup %2109  ;;  %1799 = vst [vmem:[%s2957_s3 + $0x20] sm:$0xff] %v1659_v21   ;;  %v835_v36 = vadd.f32 1.0, %v2108_v9  ;;  %2129 = vpow2.f32 %v1495_v59  ;;  %v2749_v29 = vadd.f32 %v2575_v35, %v2403_v40  ;;  %v2753_v33 = vadd.f32 %v2403_v40, %v2577_v62 }
 0x13d   :  { %v2112_v24 = vpop.eup %2111  ;;  %1815 = vst [vmem:[%s2957_s3 + $0xa0] sm:$0xff] %v1739_v22   ;;  %v867_v39 = vadd.f32 1.0, %v2110_v15  ;;  %2131 = vpow2.f32 %v1461_v31  ;;  %v1493_v9 = vmul.f32 -1.442695, %v2725_v5  ;;  %v1466_v22 = vmul.f32 -1.442695, %v2729_v20 }
 0x13e   :  { %v2114_v57 = vpop.eup %2113  ;;  %2133 = vrcp.f32 %v835_v36  ;;  %v838_v8 = vadd.f32 1.0, %v2112_v24  ;;  %v1498_v35 = vmul.f32 -1.442695, %v2733_v18  ;;  %v1464_v36 = vmul.f32 -1.442695, %v2737_v56 }
 0x13f   :  { %v2116_v25 = vpop.eup %2115  ;;  %2135 = vrcp.f32 %v867_v39  ;;  %v870_v32 = vadd.f32 1.0, %v2114_v57  ;;  %v1496_v39 = vmul.f32 -1.442695, %v2741_v44  ;;  %v1467_v62 = vmul.f32 -1.442695, %v2745_v28 }
 0x140   :  { %v2118_v2 = vpop.eup %2117  ;;  %2137 = vrcp.f32 %v838_v8  ;;  %v836_v53 = vadd.f32 1.0, %v2116_v25  ;;  %v1499_v57 = vmul.f32 -1.442695, %v2749_v29  ;;  %v1465_v25 = vmul.f32 -1.442695, %v2753_v33 }
 0x141   :  { %v2120_v0 = vpop.eup %2119  ;;  %2139 = vrcp.f32 %v870_v32  ;;  %v868_v47 = vadd.f32 1.0, %v2118_v2  ;;  %v2765_v32 = vadd.f32 %v2403_v40, %v2579_v3  ;;  %v2769_v2 = vadd.f32 %v2600_v27, %v2403_v40 }
 0x142   :  { %v2122_v41 = vpop.eup %2121  ;;  %2141 = vrcp.f32 %v836_v53  ;;  %v841_v12 = vadd.f32 1.0, %v2120_v0  ;;  %v1029_v0 = vmul.f32 %v2705_v63, %v2519_v50  ;;  %v1061_v3 = vmul.f32 %v2709_v6, %v2528_v61 }
 0x143   :  { %v2124_v26 = vpop.eup %2123  ;;  %2143 = vrcp.f32 %v868_v47  ;;  %v873_v52 = vadd.f32 1.0, %v2122_v41  ;;  %v2776_v41 = vadd.f32 %v2602_v30, %v2403_v40  ;;  %v2783_v27 = vadd.f32 %v2403_v40, %v2609_v45 }
 0x144   :  { %v2126_v59 = vpop.eup %2125  ;;  %2145 = vrcp.f32 %v841_v12  ;;  %v839_v14 = vadd.f32 1.0, %v2124_v26 }
 0x145   :  { %v2128_v31 = vpop.eup %2127  ;;  %2147 = vrcp.f32 %v873_v52  ;;  %v871_v16 = vadd.f32 1.0, %v2126_v59 }
 0x146   :  { %v2130_v37 = vpop.eup %2129  ;;  %2149 = vrcp.f32 %v839_v14  ;;  %v842_v43 = vadd.f32 1.0, %v2128_v31 }
 0x147   :  { %v2132_v34 = vpop.eup %2131  ;;  %2151 = vrcp.f32 %v871_v16  ;;  %v874_v21 = vadd.f32 1.0, %v2130_v37  ;;  %v1502_v16 = vmul.f32 -1.442695, %v2776_v41  ;;  %v1468_v37 = vmul.f32 -1.442695, %v2783_v27 }
 0x148   :  { %v2134_v49 = vpop.eup %2133  ;;  %2153 = vrcp.f32 %v842_v43  ;;  %v840_v15 = vadd.f32 1.0, %v2132_v34 }
 0x149   :  { %v2136_v24 = vpop.eup %2135  ;;  %2155 = vrcp.f32 %v874_v21  ;;  %v1027_v50 = vmul.f32 %v2134_v49, %v2586_v54  ;;  %v1497_v54 = vmul.f32 -1.442695, %v2765_v32 }
 0x14a   :  { %v2138_v8 = vpop.eup %2137  ;;  %2157 = vrcp.f32 %v840_v15  ;;  %v1059_v59 = vmul.f32 %v2136_v24, %v2590_v19 }
 0x14b   :  { %v2140_v53 = vpop.eup %2139  ;;  %v1030_v47 = vmul.f32 %v2138_v8, %v2594_v48  ;;  %2159 = vpow2.f32 %v1493_v9 }
 0x14c   :  { %v2142_v12 = vpop.eup %2141  ;;  %v1062_v26 = vmul.f32 %v2140_v53, %v2598_v1  ;;  %2161 = vpow2.f32 %v1466_v22 }
 0x14d   :  { %v2144_v52 = vpop.eup %2143  ;;  %v1674_v48 = vpack.c.bf16 %v1030_v47, %v1029_v0  ;;  %v1028_v63 = vmul.f32 %v2142_v12, %v2607_v11  ;;  %2163 = vpow2.f32 %v1498_v35  ;;  %v2795_v11 = vadd.f32 %v2403_v40, %v2611_v46 }
 0x14e   :  { %v2146_v30 = vpop.eup %2145  ;;  %v1754_v14 = vpack.c.bf16 %v1062_v26, %v1061_v3  ;;  %v1060_v61 = vmul.f32 %v2144_v52, %v2626_v60  ;;  %2165 = vpow2.f32 %v1464_v36  ;;  %v1470_v60 = vmul.f32 -1.442695, %v2769_v2 }
 0x14f   :  { %v2148_v1 = vpop.eup %2147  ;;  %1802 = vst [vmem:[%s2957_s3 + $0x38] sm:$0xff] %v1674_v48   ;;  %v1669_v45 = vpack.c.bf16 %v1028_v63, %v1027_v50  ;;  %2167 = vpow2.f32 %v1496_v39  ;;  %v1033_v34 = vmul.f32 %v2146_v30, %v2631_v55  ;;  %v1500_v9 = vmul.f32 -1.442695, %v2795_v11  ;;  %v2967_v63 = vld [vmem:[#allocation2_spill] sm:$0xff] }
 0x150   :  { %v2150_v6 = vpop.eup %2149  ;;  %1818 = vst [vmem:[%s2957_s3 + $0xb8] sm:$0xff] %v1754_v14   ;;  %v1749_v19 = vpack.c.bf16 %v1060_v61, %v1059_v59  ;;  %2169 = vpow2.f32 %v1467_v62  ;;  %v1065_v49 = vmul.f32 %v2148_v1, %v2635_v17  ;;  %v2829_v52 = vadd.f32 %v2614_v58, %v2403_v40  ;;  %v2968_v59 = vld [vmem:[#allocation3_spill] sm:$0xff] }
 0x151   :  { %v2801_v31 = vpop.eup %2151  ;;  %1801 = vst [vmem:[%s2957_s3 + $0x30] sm:$0xff] %v1669_v45   ;;  %2171 = vpow2.f32 %v1499_v57  ;;  %v1031_v36 = vmul.f32 %v2150_v6, %v2639_v23  ;;  %v2833_v30 = vadd.f32 %v2967_v63, %v2403_v40  ;;  %v2837_v14 = vadd.f32 %v2403_v40, %v2968_v59 }
 0x152   :  { %v2154_v46 = vpop.eup %2153  ;;  %1817 = vst [vmem:[%s2957_s3 + $0xb0] sm:$0xff] %v1749_v19   ;;  %2173 = vpow2.f32 %v1465_v25  ;;  %v1471_v19 = vmul.f32 -1.442695, %v2829_v52 }
 0x153   :  { %v2156_v43 = vpop.eup %2155  ;;  %v1034_v21 = vmul.f32 %v2154_v46, %v2653_v51  ;;  %2175 = vpow2.f32 %v1497_v54 }
 0x154   :  { %v2158_v22 = vpop.eup %2157  ;;  %v1066_v15 = vmul.f32 %v2156_v43, %v2669_v10  ;;  %2177 = vpow2.f32 %v1470_v60  ;;  %v2969_v60 = vld [vmem:[#allocation4_spill] sm:$0xff]  ;;  %v1503_v43 = vmul.f32 -1.442695, %v2833_v30 }
 0x155   :  { %v2160_v35 = vpop.eup %2159  ;;  %v1684_v24 = vpack.c.bf16 %v1034_v21, %v1033_v34  ;;  %v1032_v39 = vmul.f32 %v2158_v22, %v2681_v38  ;;  %2179 = vpow2.f32 %v1502_v16  ;;  %v2842_v16 = vadd.f32 %v2403_v40, %v2969_v60 }
 0x156   :  { %v2162_v62 = vpop.eup %2161  ;;  %v1764_v55 = vpack.c.bf16 %v1066_v15, %v1065_v49  ;;  %v872_v57 = vadd.f32 1.0, %v2160_v35  ;;  %2181 = vpow2.f32 %v1468_v37  ;;  %v1469_v34 = vmul.f32 -1.442695, %v2837_v14 }
 0x157   :  { %v2164_v51 = vpop.eup %2163  ;;  %1804 = vst [vmem:[%s2957_s3 + $0x48] sm:$0xff] %v1684_v24   ;;  %v1679_v17 = vpack.c.bf16 %v1032_v39, %v1031_v36  ;;  %v845_v8 = vadd.f32 1.0, %v2162_v62  ;;  %2183 = vpow2.f32 %v1500_v9  ;;  %v2848_v21 = vadd.f32 %v2655_v13, %v2403_v40  ;;  %v2970_v36 = vld [vmem:[#allocation5_spill] sm:$0xff]  ;;  %v2971_v39 = vld [vmem:[#allocation6_spill] sm:$0xff] }
 0x158   :  { %v2166_v10 = vpop.eup %2165  ;;  %1820 = vst [vmem:[%s2957_s3 + $0xc8] sm:$0xff] %v1764_v55   ;;  %2185 = vrcp.f32 %v872_v57  ;;  %v877_v23 = vadd.f32 1.0, %v2164_v51  ;;  %v2852_v22 = vadd.f32 %v2657_v4, %v2403_v40  ;;  %v2856_v49 = vadd.f32 %v2403_v40, %v2662_v7  ;;  %v2972_v55 = vld [vmem:[#allocation7_spill] sm:$0xff] }
 0x159   :  { %v2168_v38 = vpop.eup %2167  ;;  %1803 = vst [vmem:[%s2957_s3 + $0x40] sm:$0xff] %v1679_v17   ;;  %2187 = vrcp.f32 %v845_v8  ;;  %v843_v25 = vadd.f32 1.0, %v2166_v10  ;;  %v2860_v15 = vadd.f32 %v2403_v40, %v2664_v42  ;;  %v1063_v24 = vmul.f32 %v2801_v31, %v2970_v36  ;;  %v2973_v17 = vld [vmem:[#allocation8_spill] sm:$0xff] }
 0x15a   :  { %v2170_v53 = vpop.eup %2169  ;;  %2189 = vrcp.f32 %v877_v23  ;;  %v875_v0 = vadd.f32 1.0, %v2168_v38  ;;  %v2867_v62 = vadd.f32 %v2971_v39, %v2403_v40  ;;  %v1501_v7 = vmul.f32 -1.442695, %v2842_v16 }
 0x15b   :  { %v2172_v47 = vpop.eup %2171  ;;  %2191 = vrcp.f32 %v843_v25  ;;  %v846_v12 = vadd.f32 1.0, %v2170_v53  ;;  %v2872_v57 = vadd.f32 %v2972_v55, %v2403_v40  ;;  %v1474_v31 = vmul.f32 -1.442695, %v2848_v21 }
 0x15c   :  { %v2174_v3 = vpop.eup %2173  ;;  %2193 = vrcp.f32 %v875_v0  ;;  %v878_v26 = vadd.f32 1.0, %v2172_v47  ;;  %v1506_v23 = vmul.f32 -1.442695, %v2852_v22  ;;  %v1472_v38 = vmul.f32 -1.442695, %v2856_v49  ;;  %v2974_v0 = vld [vmem:[#allocation9_spill] sm:$0xff] }
 0x15d   :  { %v2176_v50 = vpop.eup %2175  ;;  %2195 = vrcp.f32 %v846_v12  ;;  %v844_v48 = vadd.f32 1.0, %v2174_v3  ;;  %v1504_v25 = vmul.f32 -1.442695, %v2860_v15  ;;  %v1475_v53 = vmul.f32 -1.442695, %v2867_v62 }
 0x15e   :  { %v2178_v61 = vpop.eup %2177  ;;  %2197 = vrcp.f32 %v878_v26  ;;  %v876_v1 = vadd.f32 1.0, %v2176_v50  ;;  %v1507_v50 = vmul.f32 -1.442695, %v2872_v57 }
 0x15f   :  { %v2180_v45 = vpop.eup %2179  ;;  %2199 = vrcp.f32 %v844_v48  ;;  %v849_v54 = vadd.f32 1.0, %v2178_v61 }
 0x160   :  { %v2182_v6 = vpop.eup %2181  ;;  %2201 = vrcp.f32 %v876_v1  ;;  %v881_v58 = vadd.f32 1.0, %v2180_v45 }
 0x161   :  { %v2184_v46 = vpop.eup %2183  ;;  %v847_v37 = vadd.f32 1.0, %v2182_v6  ;;  %2203 = vrcp.f32 %v849_v54 }
 0x162   :  { %v2186_v9 = vpop.eup %2185  ;;  %2205 = vrcp.f32 %v881_v58 }
 0x163   :  { %v2188_v35 = vpop.eup %2187  ;;  %v1064_v13 = vmul.f32 %v2186_v9, %v2725_v5  ;;  %2207 = vrcp.f32 %v847_v37  ;;  %v2259_v5 = vld [vmem:[%s2956_s2] ss:$0 sm:$0xff] }
 0x164   :  { %v2190_v4 = vpop.eup %2189  ;;  %2209 = vpow2.f32 %v1471_v19  ;;  %v2879_v8 = vadd.f32 %v2259_v5, %v2973_v17  ;;  %v2889_v47 = vadd.f32 %v2259_v5, %v2974_v0  ;;  %v1037_v3 = vmul.f32 %v2188_v35, %v2729_v20 }
 0x165   :  { %v2192_v42 = vpop.eup %2191  ;;  %v1759_v51 = vpack.c.bf16 %v1064_v13, %v1063_v24  ;;  %2211 = vpow2.f32 %v1503_v43  ;;  %v1069_v63 = vmul.f32 %v2190_v4, %v2733_v18 }
 0x166   :  { %v2194_v10 = vpop.eup %2193  ;;  %2213 = vpow2.f32 %v1469_v34  ;;  %v1473_v61 = vmul.f32 -1.442695, %v2879_v8  ;;  %v1035_v45 = vmul.f32 %v2192_v42, %v2737_v56 }
 0x167   :  { %v2196_v40 = vpop.eup %2195  ;;  %1819 = vst [vmem:[%s2957_s3 + $0xc0] sm:$0xff] %v1759_v51   ;;  %2215 = vpow2.f32 %v1501_v7  ;;  %v1067_v20 = vmul.f32 %v2194_v10, %v2741_v44  ;;  %v879_v44 = vadd.f32 1.0, %v2184_v46 }
 0x168   :  { %v2198_v12 = vpop.eup %2197  ;;  %v1038_v26 = vmul.f32 %v2196_v40, %v2745_v28  ;;  %2217 = vpow2.f32 %v1474_v31 }
 0x169   :  { %v2200_v48 = vpop.eup %2199  ;;  %v1070_v59 = vmul.f32 %v2198_v12, %v2749_v29  ;;  %2219 = vpow2.f32 %v1506_v23  ;;  %v1505_v29 = vmul.f32 -1.442695, %v2889_v47 }
 0x16a   :  { %v2202_v1 = vpop.eup %2201  ;;  %v1694_v54 = vpack.c.bf16 %v1038_v26, %v1037_v3  ;;  %v1036_v6 = vmul.f32 %v2200_v48, %v2753_v33  ;;  %2221 = vpow2.f32 %v1472_v38 }
 0x16b   :  { %v1774_v28 = vpack.c.bf16 %v1070_v59, %v1069_v63  ;;  %v1068_v58 = vmul.f32 %v2202_v1, %v2765_v32  ;;  %v2204_v19 = vpop.eup %2203  ;;  %2223 = vpow2.f32 %v1504_v25 }
 0x16c   :  { %1806 = vst [vmem:[%s2957_s3 + $0x58] sm:$0xff] %v1694_v54   ;;  %v1689_v18 = vpack.c.bf16 %v1036_v6, %v1035_v45  ;;  %v2206_v56 = vpop.eup %2205  ;;  %2225 = vpow2.f32 %v1475_v53  ;;  %v1041_v3 = vmul.f32 %v2204_v19, %v2769_v2 }
 0x16d   :  { %1822 = vst [vmem:[%s2957_s3 + $0xd8] sm:$0xff] %v1774_v28   ;;  %v1769_v33 = vpack.c.bf16 %v1068_v58, %v1067_v20  ;;  %v2208_v60 = vpop.eup %2207  ;;  %2227 = vpow2.f32 %v1507_v50  ;;  %v1073_v48 = vmul.f32 %v2206_v56, %v2776_v41 }
 0x16e   :  { %1805 = vst [vmem:[%s2957_s3 + $0x50] sm:$0xff] %v1689_v18   ;;  %v2210_v32 = vpop.eup %2209  ;;  %2229 = vpow2.f32 %v1473_v61  ;;  %v1039_v61 = vmul.f32 %v2208_v60, %v2783_v27 }
 0x16f   :  { %1821 = vst [vmem:[%s2957_s3 + $0xd0] sm:$0xff] %v1769_v33   ;;  %v2212_v37 = vpop.eup %2211  ;;  %v850_v43 = vadd.f32 1.0, %v2210_v32  ;;  %2231 = vpow2.f32 %v1505_v29 }
 0x170   :  { %v2214_v34 = vpop.eup %2213  ;;  %2233 = vrcp.f32 %v879_v44  ;;  %v882_v9 = vadd.f32 1.0, %v2212_v37 }
 0x171   :  { %v2216_v46 = vpop.eup %2215  ;;  %2235 = vrcp.f32 %v850_v43  ;;  %v848_v35 = vadd.f32 1.0, %v2214_v34 }
 0x172   :  { %v2218_v36 = vpop.eup %2217  ;;  %2237 = vrcp.f32 %v882_v9  ;;  %v880_v24 = vadd.f32 1.0, %v2216_v46 }
 0x173   :  { %v2220_v13 = vpop.eup %2219  ;;  %2239 = vrcp.f32 %v848_v35  ;;  %v853_v39 = vadd.f32 1.0, %v2218_v36 }
 0x174   :  { %v2222_v4 = vpop.eup %2221  ;;  %2241 = vrcp.f32 %v880_v24  ;;  %v885_v7 = vadd.f32 1.0, %v2220_v13 }
 0x175   :  { %v2224_v55 = vpop.eup %2223  ;;  %2243 = vrcp.f32 %v853_v39  ;;  %v851_v42 = vadd.f32 1.0, %v2222_v4 }
 0x176   :  { %v2226_v51 = vpop.eup %2225  ;;  %2245 = vrcp.f32 %v885_v7  ;;  %v883_v31 = vadd.f32 1.0, %v2224_v55 }
 0x177   :  { %v2228_v5 = vpop.eup %2227  ;;  %2247 = vrcp.f32 %v851_v42  ;;  %v854_v17 = vadd.f32 1.0, %v2226_v51 }
 0x178   :  { %v2230_v10 = vpop.eup %2229  ;;  %2249 = vrcp.f32 %v883_v31  ;;  %v886_v23 = vadd.f32 1.0, %v2228_v5 }
 0x179   :  { %v2232_v38 = vpop.eup %2231  ;;  %2251 = vrcp.f32 %v854_v17  ;;  %v852_v40 = vadd.f32 1.0, %v2230_v10 }
 0x17a   :  { %v2234_v25 = vpop.eup %2233  ;;  %2253 = vrcp.f32 %v886_v23  ;;  %v884_v53 = vadd.f32 1.0, %v2232_v38 }
 0x17b   :  { %v2236_v0 = vpop.eup %2235  ;;  %2255 = vrcp.f32 %v852_v40  ;;  %v1071_v6 = vmul.f32 %v2234_v25, %v2795_v11 }
 0x17c   :  { %v2238_v12 = vpop.eup %2237  ;;  %v1042_v26 = vmul.f32 %v2236_v0, %v2829_v52  ;;  %2257 = vrcp.f32 %v884_v53 }
 0x17d   :  { %v2240_v50 = vpop.eup %2239  ;;  %v1074_v63 = vmul.f32 %v2238_v12, %v2833_v30 }
 0x17e   :  { %v2242_v59 = vpop.eup %2241  ;;  %v1704_v1 = vpack.c.bf16 %v1042_v26, %v1041_v3  ;;  %v1040_v45 = vmul.f32 %v2240_v50, %v2837_v14 }
 0x17f   :  { %v2244_v54 = vpop.eup %2243  ;;  %v1784_v20 = vpack.c.bf16 %v1074_v63, %v1073_v48  ;;  %v1072_v2 = vmul.f32 %v2242_v59, %v2842_v16 }
 0x180   :  { %v2246_v28 = vpop.eup %2245  ;;  %1808 = vst [vmem:[%s2957_s3 + $0x68] sm:$0xff] %v1704_v1   ;;  %v1699_v41 = vpack.c.bf16 %v1040_v45, %v1039_v61  ;;  %v1045_v16 = vmul.f32 %v2244_v54, %v2848_v21 }
 0x181   :  { %v2248_v52 = vpop.eup %2247  ;;  %1824 = vst [vmem:[%s2957_s3 + $0xe8] sm:$0xff] %v1784_v20   ;;  %v1779_v27 = vpack.c.bf16 %v1072_v2, %v1071_v6  ;;  %v1077_v18 = vmul.f32 %v2246_v28, %v2852_v22 }
 0x182   :  { %v2250_v30 = vpop.eup %2249  ;;  %1807 = vst [vmem:[%s2957_s3 + $0x60] sm:$0xff] %v1699_v41   ;;  %v1043_v33 = vmul.f32 %v2248_v52, %v2856_v49 }
 0x183   :  { %v2252_v11 = vpop.eup %2251  ;;  %1823 = vst [vmem:[%s2957_s3 + $0xe0] sm:$0xff] %v1779_v27   ;;  %v1075_v32 = vmul.f32 %v2250_v30, %v2860_v15 }
 0x184   :  { %v2254_v14 = vpop.eup %2253  ;;  %v1046_v58 = vmul.f32 %v2252_v11, %v2867_v62 }
 0x185   :  { %v2256_v19 = vpop.eup %2255  ;;  %v1078_v29 = vmul.f32 %v2254_v14, %v2872_v57 }
 0x186   :  { %v2258_v56 = vpop.eup %2257  ;;  %v1714_v44 = vpack.c.bf16 %v1046_v58, %v1045_v16  ;;  %v1044_v60 = vmul.f32 %v2256_v19, %v2879_v8 }
 0x187   :  { %v1794_v37 = vpack.c.bf16 %v1078_v29, %v1077_v18  ;;  %v1076_v43 = vmul.f32 %v2258_v56, %v2889_v47 }
 0x188   :  { %1810 = vst [vmem:[%s2957_s3 + $0x78] sm:$0xff] %v1714_v44   ;;  %v1709_v21 = vpack.c.bf16 %v1044_v60, %v1043_v33 }
 0x189   :  { %1826 = vst [vmem:[%s2957_s3 + $0xf8] sm:$0xff] %v1794_v37   ;;  %v1789_v22 = vpack.c.bf16 %v1076_v43, %v1075_v32 }
 0x18a   :  { %1809 = vst [vmem:[%s2957_s3 + $0x70] sm:$0xff] %v1709_v21  }
 0x18b   :  { %1825 = vst [vmem:[%s2957_s3 + $0xf0] sm:$0xff] %v1789_v22  }

// kernel: csp_block_forward.6
= control target key start
LH: loop header
LB: loop body
LE: loop exit
PB: predicated region body
PF: predicated region fallthrough
CT: control target
= control target key end

     0   :  { %v3677_v1 = vmov 0   ;;  %v99_v49 = vlaneseq  ;;  %s5072_s1 = inlined_call_operand.vmem [shape: bf16[128,256], index: 1, kind: input, shape index: {}]   ;;  %s5073_s0 = inlined_call_operand.vmem [shape: bf16[512,128], index: 0, kind: input, shape index: {}]   ;;  %s5074_s2 = inlined_call_operand.vmem [shape: f32[1,256], index: 2, kind: input, shape index: {}]   ;;  %s5075_s3 = inlined_call_operand.vmem [shape: bf16[512,128], index: 3, kind: output, shape index: {0}]   ;;  %s5076_s4 = inlined_call_operand.vmem [shape: bf16[512,128], index: 4, kind: output, shape index: {1}]  }
   0x1   :  { %v3109_v0 = vld [vmem:[%s5072_s1 + $0x4] ss:$8 sps:$4 sm:$0xff]   ;;  %413 = vmatprep.mubr.bf16.mxu0 %v3677_v1  ;;  %573 = vmatprep.mubr.bf16.mxu1 %v3677_v1  ;;  %v3111_v2 = vld [vmem:[%s5072_s1] ss:$8 sps:$4 sm:$0xff]   ;;  %v3112_v3 = vld [vmem:[%s5072_s1 + $0x14] ss:$8 sps:$4 sm:$0xff]  }
   0x2   :  { %381 = vmatprep.subr.bf16.mxu0 %v3109_v0  ;;  %3092 = vmatprep.subr.bf16.mxu1 %v3109_v0  ;;  %v3114_v4 = vld [vmem:[%s5072_s1 + $0x10] ss:$8 sps:$4 sm:$0xff]   ;;  %v3115_v5 = vld [vmem:[%s5072_s1 + $0x24] ss:$8 sps:$4 sm:$0xff]   ;;  %v3117_v6 = vld [vmem:[%s5072_s1 + $0x20] ss:$8 sps:$4 sm:$0xff]  }
   0x3   :  { %382 = vmatpush1.bf16.msra.mxu0 %v3111_v2  ;;  %3100 = vmatpush1.bf16.msra.mxu1 %v3111_v2  ;;  %v3118_v7 = vld [vmem:[%s5072_s1 + $0x34] ss:$8 sps:$4 sm:$0xff]   ;;  %v3120_v8 = vld [vmem:[%s5072_s1 + $0x30] ss:$8 sps:$4 sm:$0xff]   ;;  %v3121_v9 = vld [vmem:[%s5072_s1 + $0x44] ss:$8 sps:$4 sm:$0xff]  }
   0x4   :  { %383 = vmatprep.subr.bf16.mxu0 %v3112_v3  ;;  %3093 = vmatprep.subr.bf16.mxu1 %v3112_v3  ;;  %v3123_v10 = vld [vmem:[%s5072_s1 + $0x40] ss:$8 sps:$4 sm:$0xff]   ;;  %v3124_v11 = vld [vmem:[%s5072_s1 + $0x54] ss:$8 sps:$4 sm:$0xff]   ;;  %v3126_v12 = vld [vmem:[%s5072_s1 + $0x50] ss:$8 sps:$4 sm:$0xff]  }
   0x5   :  { %v3127_v13 = vld [vmem:[%s5072_s1 + $0x64] ss:$8 sps:$4 sm:$0xff]   ;;  %v3129_v14 = vld [vmem:[%s5072_s1 + $0x60] ss:$8 sps:$4 sm:$0xff]   ;;  %v3130_v15 = vld [vmem:[%s5072_s1 + $0x74] ss:$8 sps:$4 sm:$0xff]  }
   0x6   :  { %v3132_v16 = vld [vmem:[%s5072_s1 + $0x70] ss:$8 sps:$4 sm:$0xff]   ;;  %v3133_v17 = vld [vmem:[%s5073_s0] sm:$0xff]   ;;  %v3135_v19 = vld [vmem:[%s5073_s0 + $0x8] sm:$0xff]   ;;  %v100_v50 = vshrl.u32 %v99_v49, 7 }
   0x7   :  { %384 = vmatpush1.bf16.msra.mxu0 %v3114_v4  ;;  %3101 = vmatpush1.bf16.msra.mxu1 %v3114_v4  ;;  %v3134_v18 = vld [vmem:[%s5073_s0 + $0x80] sm:$0xff]   ;;  %v3136_v20 = vld [vmem:[%s5073_s0 + $0x88] sm:$0xff]   ;;  %v3137_v21 = vld [vmem:[%s5073_s0 + $0x10] sm:$0xff]  }
   0x8   :  { %385 = vmatprep.subr.bf16.mxu0 %v3115_v5  ;;  %3094 = vmatprep.subr.bf16.mxu1 %v3115_v5  ;;  %v3138_v22 = vld [vmem:[%s5073_s0 + $0x90] sm:$0xff]   ;;  %v3139_v23 = vld [vmem:[%s5073_s0 + $0x18] sm:$0xff]   ;;  %v3141_v25 = vld [vmem:[%s5073_s0 + $0x20] sm:$0xff]   ;;  %v101_v51 = vsub.s32 0, %v100_v50  ;;  %v105_v53 = vsub.s32 1, %v100_v50 }
   0x9   :  { %v3140_v24 = vld [vmem:[%s5073_s0 + $0x98] sm:$0xff]   ;;  %v3142_v26 = vld [vmem:[%s5073_s0 + $0xa0] sm:$0xff]   ;;  %v3143_v27 = vld [vmem:[%s5073_s0 + $0x28] sm:$0xff]  }
   0xa   :  { %v3144_v28 = vld [vmem:[%s5073_s0 + $0xa8] sm:$0xff]   ;;  %v3145_v29 = vld [vmem:[%s5073_s0 + $0x30] sm:$0xff]   ;;  %v3147_v31 = vld [vmem:[%s5073_s0 + $0x38] sm:$0xff]  }
   0xb   :  { %386 = vmatpush1.bf16.msra.mxu0 %v3117_v6  ;;  %3102 = vmatpush1.bf16.msra.mxu1 %v3117_v6  ;;  %v3146_v30 = vld [vmem:[%s5073_s0 + $0xb0] sm:$0xff]   ;;  %v3148_v32 = vld [vmem:[%s5073_s0 + $0xb8] sm:$0xff]   ;;  %v3149_v33 = vld [vmem:[%s5073_s0 + $0x40] sm:$0xff]  }
   0xc   :  { %387 = vmatprep.subr.bf16.mxu0 %v3118_v7  ;;  %3095 = vmatprep.subr.bf16.mxu1 %v3118_v7  ;;  %v3150_v34 = vld [vmem:[%s5073_s0 + $0xc0] sm:$0xff]   ;;  %v3151_v35 = vld [vmem:[%s5073_s0 + $0x48] sm:$0xff]   ;;  %v3153_v37 = vld [vmem:[%s5073_s0 + $0x50] sm:$0xff]  }
   0xd   :  { %v3152_v36 = vld [vmem:[%s5073_s0 + $0xc8] sm:$0xff]   ;;  %v3154_v38 = vld [vmem:[%s5073_s0 + $0xd0] sm:$0xff]   ;;  %v3155_v39 = vld [vmem:[%s5073_s0 + $0x58] sm:$0xff]  }
   0xe   :  { %v3156_v40 = vld [vmem:[%s5073_s0 + $0xd8] sm:$0xff]   ;;  %v3157_v41 = vld [vmem:[%s5073_s0 + $0x60] sm:$0xff]   ;;  %v3159_v43 = vld [vmem:[%s5073_s0 + $0x68] sm:$0xff]  }
   0xf   :  { %388 = vmatpush1.bf16.msra.mxu0 %v3120_v8  ;;  %3103 = vmatpush1.bf16.msra.mxu1 %v3120_v8  ;;  %v3158_v42 = vld [vmem:[%s5073_s0 + $0xe0] sm:$0xff]   ;;  %v3160_v44 = vld [vmem:[%s5073_s0 + $0xe8] sm:$0xff]   ;;  %v3161_v45 = vld [vmem:[%s5073_s0 + $0x70] sm:$0xff]  }
  0x10   :  { %389 = vmatprep.subr.bf16.mxu0 %v3121_v9  ;;  %3096 = vmatprep.subr.bf16.mxu1 %v3121_v9  ;;  %v3162_v46 = vld [vmem:[%s5073_s0 + $0xf0] sm:$0xff]   ;;  %v3163_v47 = vld [vmem:[%s5073_s0 + $0x78] sm:$0xff]   ;;  %v97_v52 = vld [vmem:[%s5074_s2] sm:$0x3] }
  0x11   :  { %v3164_v48 = vld [vmem:[%s5073_s0 + $0xf8] sm:$0xff]   ;;  %v3882_v54 = vrot.slane %v97_v52, %v101_v51  ;;  %v3884_v55 = vrot.slane %v97_v52, %v105_v53 }
  0x13   :  { %390 = vmatpush1.bf16.msra.mxu0 %v3123_v10  ;;  %3104 = vmatpush1.bf16.msra.mxu1 %v3123_v10 }
  0x14   :  { %391 = vmatprep.subr.bf16.mxu0 %v3124_v11  ;;  %3097 = vmatprep.subr.bf16.mxu1 %v3124_v11 }
  0x17   :  { %392 = vmatpush1.bf16.msra.mxu0 %v3126_v12  ;;  %3105 = vmatpush1.bf16.msra.mxu1 %v3126_v12 }
  0x18   :  { %393 = vmatprep.subr.bf16.mxu0 %v3127_v13  ;;  %3098 = vmatprep.subr.bf16.mxu1 %v3127_v13 }
  0x1b   :  { %394 = vmatpush1.bf16.msra.mxu0 %v3129_v14  ;;  %3106 = vmatpush1.bf16.msra.mxu1 %v3129_v14 }
  0x1c   :  { %395 = vmatprep.subr.bf16.mxu0 %v3130_v15  ;;  %3099 = vmatprep.subr.bf16.mxu1 %v3130_v15 }
  0x1f   :  { %396 = vmatpush1.bf16.msra.mxu0 %v3132_v16  ;;  %3107 = vmatpush1.bf16.msra.mxu1 %v3132_v16 }
  0x22   :  { %414 = vmatmul.mubr.bf16.vlgmr.msra.gmra.mrb[0].mxu0 %v3133_v17  ;;  %574 = vmatmul.mubr.bf16.vlgmr.msra.gmra.mrb[0].mxu1 %v3134_v18 }
  0x23   :  { %423 = vmatprep.mubr.bf16.mxu0 %v3677_v1  ;;  %583 = vmatprep.mubr.bf16.mxu1 %v3677_v1 }
  0x2a   :  { %424 = vmatmul.mubr.bf16.gmra.mrb[4].mxu0 %v3135_v19  ;;  %584 = vmatmul.mubr.bf16.gmra.mrb[4].mxu1 %v3136_v20 }
  0x2b   :  { %433 = vmatprep.mubr.bf16.mxu0 %v3677_v1  ;;  %593 = vmatprep.mubr.bf16.mxu1 %v3677_v1 }
  0x32   :  { %434 = vmatmul.mubr.bf16.gmra.mrb[8].mxu0 %v3137_v21  ;;  %594 = vmatmul.mubr.bf16.gmra.mrb[8].mxu1 %v3138_v22 }
  0x33   :  { %443 = vmatprep.mubr.bf16.mxu0 %v3677_v1  ;;  %603 = vmatprep.mubr.bf16.mxu1 %v3677_v1 }
  0x3a   :  { %444 = vmatmul.mubr.bf16.gmra.mrb[12].mxu0 %v3139_v23  ;;  %604 = vmatmul.mubr.bf16.gmra.mrb[12].mxu1 %v3140_v24 }
  0x3b   :  { %453 = vmatprep.mubr.bf16.mxu0 %v3677_v1  ;;  %613 = vmatprep.mubr.bf16.mxu1 %v3677_v1 }
  0x42   :  { %454 = vmatmul.mubr.bf16.gmra.mrb[16].mxu0 %v3141_v25  ;;  %614 = vmatmul.mubr.bf16.gmra.mrb[16].mxu1 %v3142_v26 }
  0x43   :  { %463 = vmatprep.mubr.bf16.mxu0 %v3677_v1  ;;  %623 = vmatprep.mubr.bf16.mxu1 %v3677_v1 }
  0x4a   :  { %464 = vmatmul.mubr.bf16.gmra.mrb[20].mxu0 %v3143_v27  ;;  %624 = vmatmul.mubr.bf16.gmra.mrb[20].mxu1 %v3144_v28 }
  0x4b   :  { %473 = vmatprep.mubr.bf16.mxu0 %v3677_v1  ;;  %633 = vmatprep.mubr.bf16.mxu1 %v3677_v1 }
  0x52   :  { %474 = vmatmul.mubr.bf16.gmra.mrb[24].mxu0 %v3145_v29  ;;  %634 = vmatmul.mubr.bf16.gmra.mrb[24].mxu1 %v3146_v30 }
  0x53   :  { %483 = vmatprep.mubr.bf16.mxu0 %v3677_v1  ;;  %643 = vmatprep.mubr.bf16.mxu1 %v3677_v1 }
  0x5a   :  { %484 = vmatmul.mubr.bf16.gmra.mrb[28].mxu0 %v3147_v31  ;;  %644 = vmatmul.mubr.bf16.gmra.mrb[28].mxu1 %v3148_v32 }
  0x5b   :  { %493 = vmatprep.mubr.bf16.mxu0 %v3677_v1  ;;  %653 = vmatprep.mubr.bf16.mxu1 %v3677_v1 }
  0x62   :  { %494 = vmatmul.mubr.bf16.gmra.mrb[32].mxu0 %v3149_v33  ;;  %654 = vmatmul.mubr.bf16.gmra.mrb[32].mxu1 %v3150_v34 }
  0x63   :  { %503 = vmatprep.mubr.bf16.mxu0 %v3677_v1  ;;  %663 = vmatprep.mubr.bf16.mxu1 %v3677_v1 }
  0x6a   :  { %504 = vmatmul.mubr.bf16.gmra.mrb[36].mxu0 %v3151_v35  ;;  %664 = vmatmul.mubr.bf16.gmra.mrb[36].mxu1 %v3152_v36 }
  0x6b   :  { %513 = vmatprep.mubr.bf16.mxu0 %v3677_v1  ;;  %673 = vmatprep.mubr.bf16.mxu1 %v3677_v1 }
  0x72   :  { %514 = vmatmul.mubr.bf16.gmra.mrb[40].mxu0 %v3153_v37  ;;  %674 = vmatmul.mubr.bf16.gmra.mrb[40].mxu1 %v3154_v38 }
  0x73   :  { %523 = vmatprep.mubr.bf16.mxu0 %v3677_v1  ;;  %683 = vmatprep.mubr.bf16.mxu1 %v3677_v1 }
  0x7a   :  { %524 = vmatmul.mubr.bf16.gmra.mrb[44].mxu0 %v3155_v39  ;;  %684 = vmatmul.mubr.bf16.gmra.mrb[44].mxu1 %v3156_v40 }
  0x7b   :  { %533 = vmatprep.mubr.bf16.mxu0 %v3677_v1  ;;  %693 = vmatprep.mubr.bf16.mxu1 %v3677_v1 }
  0x82   :  { %534 = vmatmul.mubr.bf16.gmra.mrb[48].mxu0 %v3157_v41  ;;  %694 = vmatmul.mubr.bf16.gmra.mrb[48].mxu1 %v3158_v42 }
  0x83   :  { %543 = vmatprep.mubr.bf16.mxu0 %v3677_v1  ;;  %703 = vmatprep.mubr.bf16.mxu1 %v3677_v1 }
  0x8a   :  { %544 = vmatmul.mubr.bf16.gmra.mrb[52].mxu0 %v3159_v43  ;;  %704 = vmatmul.mubr.bf16.gmra.mrb[52].mxu1 %v3160_v44 }
  0x8b   :  { %553 = vmatprep.mubr.bf16.mxu0 %v3677_v1  ;;  %713 = vmatprep.mubr.bf16.mxu1 %v3677_v1 }
  0x92   :  { %554 = vmatmul.mubr.bf16.gmra.mrb[56].mxu0 %v3161_v45  ;;  %714 = vmatmul.mubr.bf16.gmra.mrb[56].mxu1 %v3162_v46 }
  0x93   :  { %563 = vmatprep.mubr.bf16.mxu0 %v3677_v1  ;;  %723 = vmatprep.mubr.bf16.mxu1 %v3677_v1 }
  0x9a   :  { %564 = vmatmul.mubr.bf16.gmra.mrb[60].mxu0 %v3163_v47  ;;  %724 = vmatmul.mubr.bf16.gmra.mrb[60].mxu1 %v3164_v48 }
  0xf5   :  { %v415_v56 = vpop.f32.mrb[0].mxu0  ;;  %v575_v57 = vpop.f32.mrb[0].mxu1 }
  0xf6   :  { %v3887_v58 = vadd.f32 %v415_v56, %v3882_v54  ;;  %v3890_v59 = vadd.f32 %v575_v57, %v3882_v54  ;;  %v417_v60 = vpop.f32.mrb[1].mxu0  ;;  %v577_v61 = vpop.f32.mrb[1].mxu1 }
  0xf7   :  { %v3893_v62 = vadd.f32 %v417_v60, %v3884_v55  ;;  %v3896_v63 = vadd.f32 %v577_v61, %v3884_v55  ;;  %v419_v0 = vpop.f32.mrb[2].mxu0  ;;  %v579_v1 = vpop.f32.mrb[2].mxu1 }
  0xf8   :  { %v2326_v2 = vmul.f32 -1.442695, %v3887_v58  ;;  %v2390_v3 = vmul.f32 -1.442695, %v3890_v59  ;;  %v3901_v4 = vadd.f32 %v419_v0, %v3882_v54  ;;  %v3904_v5 = vadd.f32 %v579_v1, %v3882_v54  ;;  %v421_v6 = vpop.f32.mrb[3].mxu0  ;;  %v581_v7 = vpop.f32.mrb[3].mxu1 }
  0xf9   :  { %v2327_v8 = vmul.f32 -1.442695, %v3893_v62  ;;  %v2391_v9 = vmul.f32 -1.442695, %v3896_v63  ;;  %v3909_v10 = vadd.f32 %v421_v6, %v3884_v55  ;;  %v3912_v11 = vadd.f32 %v581_v7, %v3884_v55 }
  0xfa   :  { %3165 = vpow2.f32 %v2326_v2  ;;  %v2328_v12 = vmul.f32 -1.442695, %v3901_v4  ;;  %v2392_v13 = vmul.f32 -1.442695, %v3904_v5 }
  0xfb   :  { %3167 = vpow2.f32 %v2390_v3  ;;  %v2329_v14 = vmul.f32 -1.442695, %v3909_v10  ;;  %v2393_v15 = vmul.f32 -1.442695, %v3912_v11 }
  0xfc   :  { %3169 = vpow2.f32 %v2327_v8 }
  0xfd   :  { %3171 = vpow2.f32 %v2391_v9  ;;  %v425_v16 = vpop.f32.mrb[4].mxu0  ;;  %v585_v17 = vpop.f32.mrb[4].mxu1 }
  0xfe   :  { %3173 = vpow2.f32 %v2328_v12  ;;  %v3919_v18 = vadd.f32 %v425_v16, %v3882_v54  ;;  %v3922_v19 = vadd.f32 %v585_v17, %v3882_v54  ;;  %v427_v20 = vpop.f32.mrb[5].mxu0  ;;  %v587_v21 = vpop.f32.mrb[5].mxu1 }
  0xff   :  { %3175 = vpow2.f32 %v2392_v13  ;;  %v3925_v22 = vadd.f32 %v427_v20, %v3884_v55  ;;  %v3928_v23 = vadd.f32 %v587_v21, %v3884_v55  ;;  %v429_v24 = vpop.f32.mrb[6].mxu0  ;;  %v589_v25 = vpop.f32.mrb[6].mxu1 }
 0x100   :  { %3177 = vpow2.f32 %v2329_v14  ;;  %v2330_v26 = vmul.f32 -1.442695, %v3919_v18  ;;  %v2394_v27 = vmul.f32 -1.442695, %v3922_v19  ;;  %v3933_v28 = vadd.f32 %v429_v24, %v3882_v54  ;;  %v431_v29 = vpop.f32.mrb[7].mxu0  ;;  %v591_v30 = vpop.f32.mrb[7].mxu1 }
 0x101   :  { %3179 = vpow2.f32 %v2393_v15  ;;  %v2331_v31 = vmul.f32 -1.442695, %v3925_v22  ;;  %v2395_v32 = vmul.f32 -1.442695, %v3928_v23  ;;  %v3939_v52 = vadd.f32 %v589_v25, %v3882_v54 }
 0x102   :  { %3181 = vpow2.f32 %v2330_v26  ;;  %v2332_v33 = vmul.f32 -1.442695, %v3933_v28  ;;  %v3942_v60 = vadd.f32 %v431_v29, %v3884_v55  ;;  %v3946_v8 = vadd.f32 %v591_v30, %v3884_v55 }
 0x103   :  { %3183 = vpow2.f32 %v2394_v27  ;;  %v2396_v7 = vmul.f32 -1.442695, %v3939_v52 }
 0x104   :  { %v3166_v34 = vpop.eup %3165  ;;  %3185 = vpow2.f32 %v2331_v31  ;;  %v2333_v14 = vmul.f32 -1.442695, %v3942_v60 }
 0x105   :  { %v3168_v35 = vpop.eup %3167  ;;  %v1118_v36 = vadd.f32 1.0, %v3166_v34  ;;  %3187 = vpow2.f32 %v2395_v32  ;;  %v435_v37 = vpop.f32.mrb[8].mxu0 }
 0x106   :  { %v595_v38 = vpop.f32.mrb[8].mxu1  ;;  %v3170_v39 = vpop.eup %3169  ;;  %v1182_v40 = vadd.f32 1.0, %v3168_v35  ;;  %3189 = vpow2.f32 %v2332_v33  ;;  %v3950_v15 = vadd.f32 %v435_v37, %v3882_v54 }
 0x107   :  { %v437_v41 = vpop.f32.mrb[9].mxu0  ;;  %v597_v42 = vpop.f32.mrb[9].mxu1  ;;  %3191 = vrcp.f32 %v1118_v36  ;;  %v1119_v44 = vadd.f32 1.0, %v3170_v39  ;;  %v3955_v24 = vadd.f32 %v595_v38, %v3882_v54 }
 0x108   :  { %v3172_v43 = vpop.eup %3171  ;;  %v439_v45 = vpop.f32.mrb[10].mxu0  ;;  %3193 = vrcp.f32 %v1182_v40  ;;  %v3958_v25 = vadd.f32 %v437_v41, %v3884_v55  ;;  %v3965_v31 = vadd.f32 %v597_v42, %v3884_v55  ;;  %v2397_v41 = vmul.f32 -1.442695, %v3946_v8 }
 0x109   :  { %v599_v46 = vpop.f32.mrb[10].mxu1  ;;  %v3174_v47 = vpop.eup %3173  ;;  %v1183_v48 = vadd.f32 1.0, %v3172_v43  ;;  %3195 = vrcp.f32 %v1119_v44  ;;  %v3968_v32 = vadd.f32 %v439_v45, %v3882_v54  ;;  %v2334_v43 = vmul.f32 -1.442695, %v3950_v15 }
 0x10a   :  { %v441_v49 = vpop.f32.mrb[11].mxu0  ;;  %v3176_v50 = vpop.eup %3175  ;;  %v1120_v51 = vadd.f32 1.0, %v3174_v47  ;;  %v3975_v37 = vadd.f32 %v599_v46, %v3882_v54  ;;  %v2398_v44 = vmul.f32 -1.442695, %v3955_v24  ;;  %v2335_v46 = vmul.f32 -1.442695, %v3958_v25 }
 0x10b   :  { %v601_v53 = vpop.f32.mrb[11].mxu1  ;;  %v3178_v56 = vpop.eup %3177  ;;  %3197 = vrcp.f32 %v1183_v48  ;;  %v1184_v57 = vadd.f32 1.0, %v3176_v50  ;;  %v3978_v38 = vadd.f32 %v441_v49, %v3884_v55  ;;  %v2399_v47 = vmul.f32 -1.442695, %v3965_v31 }
 0x10c   :  { %v3180_v61 = vpop.eup %3179  ;;  %3199 = vrcp.f32 %v1120_v51  ;;  %v1121_v0 = vadd.f32 1.0, %v3178_v56  ;;  %v2336_v48 = vmul.f32 -1.442695, %v3968_v32  ;;  %v2400_v50 = vmul.f32 -1.442695, %v3975_v37 }
 0x10d   :  { %v3182_v1 = vpop.eup %3181  ;;  %3201 = vrcp.f32 %v1184_v57  ;;  %v1185_v2 = vadd.f32 1.0, %v3180_v61  ;;  %v445_v9 = vpop.f32.mrb[12].mxu0  ;;  %v2337_v51 = vmul.f32 -1.442695, %v3978_v38  ;;  %v3991_v56 = vadd.f32 %v601_v53, %v3884_v55 }
 0x10e   :  { %v3184_v3 = vpop.eup %3183  ;;  %3203 = vrcp.f32 %v1121_v0  ;;  %v1122_v6 = vadd.f32 1.0, %v3182_v1  ;;  %v605_v16 = vpop.f32.mrb[12].mxu1 }
 0x10f   :  { %v3186_v12 = vpop.eup %3185  ;;  %3205 = vrcp.f32 %v1185_v2  ;;  %v1186_v13 = vadd.f32 1.0, %v3184_v3  ;;  %v3952_v17 = vpop.f32.mrb[13].mxu0  ;;  %v4000_v3 = vadd.f32 %v445_v9, %v3882_v54 }
 0x110   :  { %v3188_v20 = vpop.eup %3187  ;;  %3207 = vrcp.f32 %v1122_v6  ;;  %v1123_v21 = vadd.f32 1.0, %v3186_v12  ;;  %v3960_v26 = vpop.f32.mrb[13].mxu1 }
 0x111   :  { %v3962_v27 = vpop.f32.mrb[14].mxu0  ;;  %v3190_v29 = vpop.eup %3189  ;;  %3209 = vrcp.f32 %v1186_v13  ;;  %v1187_v30 = vadd.f32 1.0, %v3188_v20 }
 0x112   :  { %v3970_v33 = vpop.f32.mrb[14].mxu1  ;;  %v3972_v34 = vpop.f32.mrb[15].mxu0  ;;  %3211 = vrcp.f32 %v1123_v21  ;;  %v1124_v36 = vadd.f32 1.0, %v3190_v29 }
 0x113   :  { %v3192_v35 = vpop.eup %3191  ;;  %v3980_v39 = vpop.f32.mrb[15].mxu1  ;;  %3213 = vrcp.f32 %v1187_v30 }
 0x114   :  { %v3194_v40 = vpop.eup %3193  ;;  %3215 = vrcp.f32 %v1124_v36  ;;  %v1502_v1 = vmul.f32 %v3192_v35, %v3887_v58 }
 0x115   :  { %v3196_v42 = vpop.eup %3195  ;;  %3217 = vpow2.f32 %v2396_v7  ;;  %v3993_v57 = vpop.f32.mrb[16].mxu0  ;;  %v1566_v53 = vmul.f32 %v3194_v40, %v3890_v59 }
 0x116   :  { %v3198_v45 = vpop.eup %3197  ;;  %3219 = vpow2.f32 %v2333_v14  ;;  %v3995_v61 = vpop.f32.mrb[16].mxu1  ;;  %v4009_v14 = vadd.f32 %v605_v16, %v3882_v54  ;;  %v1503_v9 = vmul.f32 %v3196_v42, %v3893_v62 }
 0x117   :  { %v3200_v49 = vpop.eup %3199  ;;  %3221 = vpow2.f32 %v2397_v41  ;;  %v4002_v6 = vpop.f32.mrb[17].mxu0  ;;  %v1567_v35 = vmul.f32 %v3198_v45, %v3896_v63 }
 0x118   :  { %v3202_v0 = vpop.eup %3201  ;;  %v1504_v2 = vmul.f32 %v3200_v49, %v3901_v4  ;;  %v4004_v7 = vpop.f32.mrb[17].mxu1  ;;  %3223 = vpow2.f32 %v2334_v43  ;;  %v2402_v43 = vmul.f32 -1.442695, %v4009_v14 }
 0x119   :  { %v3204_v12 = vpop.eup %3203  ;;  %v1568_v13 = vmul.f32 %v3202_v0, %v3904_v5  ;;  %v4011_v58 = vpop.f32.mrb[18].mxu0  ;;  %3225 = vpow2.f32 %v2398_v44 }
 0x11a   :  { %v4013_v4 = vpop.f32.mrb[18].mxu1  ;;  %v3206_v20 = vpop.eup %3205  ;;  %v2713_v21 = vpack.c.bf16 %v1504_v2, %v1502_v1  ;;  %v1505_v29 = vmul.f32 %v3204_v12, %v3909_v10  ;;  %3227 = vpow2.f32 %v2335_v46  ;;  %v2401_v10 = vmul.f32 -1.442695, %v3991_v56 }
 0x11b   :  { %v4017_v30 = vpop.f32.mrb[19].mxu0  ;;  %v4019_v59 = vpop.f32.mrb[19].mxu1  ;;  %v2793_v16 = vpack.c.bf16 %v1568_v13, %v1566_v53  ;;  %v1569_v36 = vmul.f32 %v3206_v20, %v3912_v11  ;;  %3229 = vpow2.f32 %v2399_v47  ;;  %v2338_v11 = vmul.f32 -1.442695, %v4000_v3 }
 0x11c   :  { %v3208_v5 = vpop.eup %3207  ;;  %2714 = vst [vmem:[%s5075_s3] sm:$0xff] %v2713_v21   ;;  %v2873_v62 = vpack.c.bf16 %v1505_v29, %v1503_v9  ;;  %3231 = vpow2.f32 %v2336_v48 }
 0x11d   :  { %v4023_v40 = vpop.eup %3209  ;;  %3045 = vst [vmem:[%s5075_s3 + $0x80] sm:$0xff] %v2793_v16   ;;  %v2953_v63 = vpack.c.bf16 %v1569_v36, %v1567_v35  ;;  %3233 = vpow2.f32 %v2400_v50  ;;  %v4044_v45 = vpop.f32.mrb[20].mxu0  ;;  %v1506_v48 = vmul.f32 %v3208_v5, %v3919_v18  ;;  %v4067_v35 = vadd.f32 %v3952_v17, %v3884_v55 }
 0x11e   :  { %v4029_v41 = vpop.eup %3211  ;;  %2874 = vst [vmem:[%s5076_s4] sm:$0xff] %v2873_v62   ;;  %3235 = vpow2.f32 %v2337_v51  ;;  %v4046_v46 = vpop.f32.mrb[20].mxu1  ;;  %v4071_v62 = vadd.f32 %v3960_v26, %v3884_v55  ;;  %v4079_v17 = vadd.f32 %v3970_v33, %v3882_v54 }
 0x11f   :  { %v4035_v42 = vpop.eup %3213  ;;  %3076 = vst [vmem:[%s5076_s4 + $0x80] sm:$0xff] %v2953_v63   ;;  %3237 = vpow2.f32 %v2401_v10  ;;  %v4050_v0 = vpop.f32.mrb[21].mxu0 }
 0x120   :  { %v3216_v44 = vpop.eup %3215  ;;  %v4052_v50 = vpop.f32.mrb[21].mxu1  ;;  %3239 = vpow2.f32 %v2338_v11  ;;  %v4075_v11 = vadd.f32 %v3962_v27, %v3882_v54  ;;  %v4088_v27 = vadd.f32 %v3972_v34, %v3884_v55 }
 0x121   :  { %v3218_v47 = vpop.eup %3217  ;;  %v1508_v49 = vmul.f32 %v3216_v44, %v3933_v28  ;;  %v4054_v12 = vpop.f32.mrb[22].mxu0  ;;  %3241 = vpow2.f32 %v2402_v43 }
 0x122   :  { %v3220_v1 = vpop.eup %3219  ;;  %v1188_v2 = vadd.f32 1.0, %v3218_v47  ;;  %v4056_v51 = vpop.f32.mrb[22].mxu1 }
 0x123   :  { %v3222_v53 = vpop.eup %3221  ;;  %v2718_v13 = vpack.c.bf16 %v1508_v49, %v1506_v48  ;;  %v1125_v20 = vadd.f32 1.0, %v3220_v1  ;;  %v4058_v9 = vpop.f32.mrb[23].mxu0  ;;  %v2339_v1 = vmul.f32 -1.442695, %v4067_v35 }
 0x124   :  { %v4060_v18 = vpop.f32.mrb[23].mxu1  ;;  %v3224_v28 = vpop.eup %3223  ;;  %3243 = vrcp.f32 %v1188_v2  ;;  %v1189_v21 = vadd.f32 1.0, %v3222_v53 }
 0x125   :  { %v3226_v29 = vpop.eup %3225  ;;  %3030 = vst [vmem:[%s5075_s3 + $0x8] sm:$0xff] %v2718_v13   ;;  %3245 = vrcp.f32 %v1125_v20  ;;  %v1126_v5 = vadd.f32 1.0, %v3224_v28  ;;  %v4081_v47 = vpop.f32.mrb[24].mxu0  ;;  %v2403_v20 = vmul.f32 -1.442695, %v4071_v62 }
 0x126   :  { %v3228_v16 = vpop.eup %3227  ;;  %3247 = vrcp.f32 %v1189_v21  ;;  %v1190_v36 = vadd.f32 1.0, %v3226_v29  ;;  %v4083_v48 = vpop.f32.mrb[24].mxu1 }
 0x127   :  { %v3230_v10 = vpop.eup %3229  ;;  %3249 = vrcp.f32 %v1126_v5  ;;  %v1127_v63 = vadd.f32 1.0, %v3228_v16  ;;  %v4090_v2 = vpop.f32.mrb[25].mxu0  ;;  %v2340_v16 = vmul.f32 -1.442695, %v4075_v11 }
 0x128   :  { %v3232_v43 = vpop.eup %3231  ;;  %3251 = vrcp.f32 %v1190_v36  ;;  %v1191_v44 = vadd.f32 1.0, %v3230_v10  ;;  %v4092_v53 = vpop.f32.mrb[25].mxu1 }
 0x129   :  { %v3234_v26 = vpop.eup %3233  ;;  %3253 = vrcp.f32 %v1127_v63  ;;  %v1128_v49 = vadd.f32 1.0, %v3232_v43  ;;  %v4095_v28 = vpop.f32.mrb[26].mxu0  ;;  %v2404_v43 = vmul.f32 -1.442695, %v4079_v17 }
 0x12a   :  { %v3236_v13 = vpop.eup %3235  ;;  %3255 = vrcp.f32 %v1191_v44  ;;  %v1192_v33 = vadd.f32 1.0, %v3234_v26  ;;  %5078 = vst [vmem:[#allocation2_spill] sm:$0xff] %v4095_v28  ;;  %v4097_v21 = vpop.f32.mrb[26].mxu1  ;;  %v4107_v44 = vadd.f32 %v3980_v39, %v3884_v55  ;;  %v4120_v39 = vadd.f32 %v4002_v6, %v3884_v55 }
 0x12b   :  { %5079 = vst [vmem:[#allocation3_spill] sm:$0xff] %v4097_v21  ;;  %v3238_v29 = vpop.eup %3237  ;;  %3257 = vrcp.f32 %v1128_v49  ;;  %v1129_v5 = vadd.f32 1.0, %v3236_v13  ;;  %v4100_v34 = vpop.f32.mrb[27].mxu0  ;;  %v2341_v49 = vmul.f32 -1.442695, %v4088_v27  ;;  %v4112_v13 = vadd.f32 %v3993_v57, %v3882_v54 }
 0x12c   :  { %5080 = vst [vmem:[#allocation4_spill] sm:$0xff] %v4100_v34  ;;  %v4102_v36 = vpop.f32.mrb[27].mxu1  ;;  %v3240_v10 = vpop.eup %3239  ;;  %3259 = vrcp.f32 %v1192_v33  ;;  %v1193_v63 = vadd.f32 1.0, %v3238_v29  ;;  %v4116_v33 = vadd.f32 %v3995_v61, %v3882_v54  ;;  %v4127_v57 = vadd.f32 %v4004_v7, %v3884_v55 }
 0x12d   :  { %5081 = vst [vmem:[#allocation5_spill] sm:$0xff] %v4102_v36  ;;  %v3242_v26 = vpop.eup %3241  ;;  %3261 = vrcp.f32 %v1129_v5  ;;  %v1130_v21 = vadd.f32 1.0, %v3240_v10  ;;  %v1570_v5 = vmul.f32 %v4023_v40, %v3922_v19  ;;  %v1507_v61 = vmul.f32 %v4029_v41, %v3925_v22  ;;  %v4136_v28 = vpop.f32.mrb[28].mxu0 }
 0x12e   :  { %v3244_v34 = vpop.eup %3243  ;;  %3263 = vrcp.f32 %v1193_v63  ;;  %v1194_v36 = vadd.f32 1.0, %v3242_v26  ;;  %5082 = vst [vmem:[#allocation6_spill] sm:$0xff] %v4127_v57  ;;  %v4134_v6 = vadd.f32 %v4011_v58, %v3882_v54  ;;  %v4138_v19 = vpop.f32.mrb[28].mxu1  ;;  %v1571_v7 = vmul.f32 %v4035_v42, %v3928_v23 }
 0x12f   :  { %v3246_v29 = vpop.eup %3245  ;;  %v1572_v10 = vmul.f32 %v3244_v34, %v3939_v52  ;;  %3265 = vrcp.f32 %v1130_v21  ;;  %v4143_v22 = vpop.f32.mrb[29].mxu0  ;;  %v2405_v58 = vmul.f32 -1.442695, %v4107_v44 }
 0x130   :  { %v3248_v63 = vpop.eup %3247  ;;  %v1509_v26 = vmul.f32 %v3246_v29, %v3942_v60  ;;  %3267 = vrcp.f32 %v1194_v36  ;;  %v4145_v60 = vpop.f32.mrb[29].mxu1  ;;  %v4150_v36 = vadd.f32 %v4013_v4, %v3882_v54 }
 0x131   :  { %v3250_v52 = vpop.eup %3249  ;;  %v2798_v40 = vpack.c.bf16 %v1572_v10, %v1570_v5  ;;  %v1573_v21 = vmul.f32 %v3248_v63, %v3946_v8  ;;  %3269 = vpow2.f32 %v2339_v1  ;;  %v4152_v29 = vpop.f32.mrb[30].mxu0  ;;  %v2342_v1 = vmul.f32 -1.442695, %v4112_v13 }
 0x132   :  { %v3252_v41 = vpop.eup %3251  ;;  %v2878_v34 = vpack.c.bf16 %v1509_v26, %v1507_v61  ;;  %3271 = vpow2.f32 %v2403_v20  ;;  %5083 = vst [vmem:[#allocation7_spill] sm:$0xff] %v4152_v29  ;;  %v4154_v23 = vpop.f32.mrb[30].mxu1  ;;  %v4162_v20 = vadd.f32 %v4017_v30, %v3884_v55  ;;  %v2406_v63 = vmul.f32 -1.442695, %v4116_v33 }
 0x133   :  { %5084 = vst [vmem:[#allocation8_spill] sm:$0xff] %v4154_v23  ;;  %v3254_v42 = vpop.eup %3253  ;;  %3046 = vst [vmem:[%s5075_s3 + $0x88] sm:$0xff] %v2798_v40   ;;  %v2958_v8 = vpack.c.bf16 %v1573_v21, %v1571_v7  ;;  %3273 = vpow2.f32 %v2340_v16  ;;  %v4164_v5 = vpop.f32.mrb[31].mxu0  ;;  %v2343_v30 = vmul.f32 -1.442695, %v4120_v39  ;;  %v1510_v40 = vmul.f32 %v3250_v52, %v3950_v15 }
 0x134   :  { %5085 = vst [vmem:[#allocation9_spill] sm:$0xff] %v4164_v5  ;;  %v4166_v4 = vpop.f32.mrb[31].mxu1  ;;  %v3256_v10 = vpop.eup %3255  ;;  %3061 = vst [vmem:[%s5076_s4 + $0x8] sm:$0xff] %v2878_v34   ;;  %3275 = vpow2.f32 %v2404_v43  ;;  %v2407_v16 = vmul.f32 -1.442695, %v4127_v57  ;;  %v1511_v23 = vmul.f32 %v3254_v42, %v3958_v25 }
 0x135   :  { %5086 = vst [vmem:[#allocation10_spill] sm:$0xff] %v4166_v4  ;;  %v3258_v61 = vpop.eup %3257  ;;  %3077 = vst [vmem:[%s5076_s4 + $0x88] sm:$0xff] %v2958_v8   ;;  %3277 = vpow2.f32 %v2341_v49  ;;  %v2344_v26 = vmul.f32 -1.442695, %v4134_v6  ;;  %v2408_v43 = vmul.f32 -1.442695, %v4150_v36  ;;  %v1574_v4 = vmul.f32 %v3252_v41, %v3955_v24 }
 0x136   :  { %v3260_v7 = vpop.eup %3259  ;;  %v1512_v21 = vmul.f32 %v3258_v61, %v3968_v32  ;;  %3279 = vpow2.f32 %v2405_v58  ;;  %v2345_v49 = vmul.f32 -1.442695, %v4162_v20  ;;  %v4186_v15 = vpop.f32.mrb[32].mxu0  ;;  %v1575_v24 = vmul.f32 %v3256_v10, %v3965_v31 }
 0x137   :  { %v3262_v34 = vpop.eup %3261  ;;  %v1576_v8 = vmul.f32 %v3260_v7, %v3975_v37  ;;  %3281 = vpow2.f32 %v2342_v1  ;;  %v4188_v32 = vpop.f32.mrb[32].mxu1 }
 0x138   :  { %v3264_v5 = vpop.eup %3263  ;;  %v2723_v57 = vpack.c.bf16 %v1512_v21, %v1510_v40  ;;  %v1513_v29 = vmul.f32 %v3262_v34, %v3978_v38  ;;  %3283 = vpow2.f32 %v2406_v63  ;;  %v4194_v58 = vpop.f32.mrb[33].mxu0  ;;  %v4222_v21 = vadd.f32 %v4019_v59, %v3884_v55 }
 0x139   :  { %v4190_v52 = vpop.eup %3265  ;;  %v2803_v41 = vpack.c.bf16 %v1576_v8, %v1574_v4  ;;  %v1577_v37 = vmul.f32 %v3264_v5, %v3991_v56  ;;  %3285 = vpow2.f32 %v2343_v30  ;;  %v4196_v1 = vpop.f32.mrb[33].mxu1 }
 0x13a   :  { %v4198_v25 = vpop.eup %3267  ;;  %3031 = vst [vmem:[%s5075_s3 + $0x10] sm:$0xff] %v2723_v57   ;;  %v2883_v38 = vpack.c.bf16 %v1513_v29, %v1511_v23  ;;  %3287 = vpow2.f32 %v2407_v16  ;;  %v4203_v42 = vpop.f32.mrb[34].mxu0 }
 0x13b   :  { %v4205_v63 = vpop.f32.mrb[34].mxu1  ;;  %v3270_v31 = vpop.eup %3269  ;;  %3047 = vst [vmem:[%s5075_s3 + $0x90] sm:$0xff] %v2803_v41   ;;  %v2963_v56 = vpack.c.bf16 %v1577_v37, %v1575_v24  ;;  %3289 = vpow2.f32 %v2344_v26 }
 0x13c   :  { %v4210_v5 = vpop.f32.mrb[35].mxu0  ;;  %v4212_v4 = vpop.f32.mrb[35].mxu1  ;;  %3062 = vst [vmem:[%s5076_s4 + $0x10] sm:$0xff] %v2883_v38   ;;  %v1131_v57 = vadd.f32 1.0, %v3270_v31  ;;  %3291 = vpow2.f32 %v2408_v43  ;;  %v4234_v31 = vadd.f32 %v4044_v45, %v3882_v54 }
 0x13d   :  { %v3272_v10 = vpop.eup %3271  ;;  %3078 = vst [vmem:[%s5076_s4 + $0x90] sm:$0xff] %v2963_v56   ;;  %3293 = vpow2.f32 %v2345_v49  ;;  %v4224_v43 = vpop.f32.mrb[36].mxu0 }
 0x13e   :  { %v3274_v29 = vpop.eup %3273  ;;  %v1195_v23 = vadd.f32 1.0, %v3272_v10  ;;  %3295 = vrcp.f32 %v1131_v57  ;;  %v4226_v34 = vpop.f32.mrb[36].mxu1  ;;  %v4240_v57 = vadd.f32 %v4046_v46, %v3882_v54 }
 0x13f   :  { %v3276_v61 = vpop.eup %3275  ;;  %v1132_v30 = vadd.f32 1.0, %v3274_v29  ;;  %5087 = vst [vmem:[#allocation11_spill] sm:$0xff] %v4226_v34  ;;  %v4228_v24 = vpop.f32.mrb[37].mxu0  ;;  %v4244_v29 = vadd.f32 %v4050_v0, %v3884_v55  ;;  %v4259_v0 = vadd.f32 %v4054_v12, %v3882_v54 }
 0x140   :  { %v3278_v16 = vpop.eup %3277  ;;  %3297 = vrcp.f32 %v1195_v23  ;;  %v1196_v26 = vadd.f32 1.0, %v3276_v61  ;;  %5088 = vst [vmem:[#allocation12_spill] sm:$0xff] %v4228_v24  ;;  %v4230_v41 = vpop.f32.mrb[37].mxu1 }
 0x141   :  { %v3280_v7 = vpop.eup %3279  ;;  %3299 = vrcp.f32 %v1132_v30  ;;  %v1133_v40 = vadd.f32 1.0, %v3278_v16  ;;  %5089 = vst [vmem:[#allocation13_spill] sm:$0xff] %v4230_v41  ;;  %v4236_v59 = vpop.f32.mrb[38].mxu0  ;;  %v2409_v16 = vmul.f32 -1.442695, %v4222_v21 }
 0x142   :  { %v3282_v8 = vpop.eup %3281  ;;  %3301 = vrcp.f32 %v1196_v26  ;;  %v1197_v49 = vadd.f32 1.0, %v3280_v7  ;;  %5090 = vst [vmem:[#allocation14_spill] sm:$0xff] %v4236_v59  ;;  %v4246_v23 = vpop.f32.mrb[38].mxu1  ;;  %v4253_v26 = vadd.f32 %v4052_v50, %v3884_v55  ;;  %v4268_v50 = vadd.f32 %v4058_v9, %v3884_v55 }
 0x143   :  { %v3284_v37 = vpop.eup %3283  ;;  %3303 = vrcp.f32 %v1133_v40  ;;  %v1134_v38 = vadd.f32 1.0, %v3282_v8  ;;  %5091 = vst [vmem:[#allocation15_spill] sm:$0xff] %v4246_v23  ;;  %v4248_v61 = vpop.f32.mrb[39].mxu0  ;;  %v4263_v8 = vadd.f32 %v4056_v51, %v3882_v54  ;;  %v2347_v12 = vmul.f32 -1.442695, %v4244_v29 }
 0x144   :  { %v3286_v56 = vpop.eup %3285  ;;  %3305 = vrcp.f32 %v1197_v49  ;;  %v1198_v10 = vadd.f32 1.0, %v3284_v37  ;;  %5092 = vst [vmem:[#allocation16_spill] sm:$0xff] %v4248_v61  ;;  %v4255_v7 = vpop.f32.mrb[39].mxu1  ;;  %v2411_v61 = vmul.f32 -1.442695, %v4253_v26 }
 0x145   :  { %v3288_v30 = vpop.eup %3287  ;;  %3307 = vrcp.f32 %v1134_v38  ;;  %v1135_v45 = vadd.f32 1.0, %v3286_v56  ;;  %5093 = vst [vmem:[#allocation17_spill] sm:$0xff] %v4255_v7  ;;  %v2346_v38 = vmul.f32 -1.442695, %v4234_v31  ;;  %v2348_v9 = vmul.f32 -1.442695, %v4259_v0 }
 0x146   :  { %v3290_v46 = vpop.eup %3289  ;;  %3309 = vrcp.f32 %v1198_v10  ;;  %v1199_v40 = vadd.f32 1.0, %v3288_v30  ;;  %v2410_v30 = vmul.f32 -1.442695, %v4240_v57 }
 0x147   :  { %v3292_v49 = vpop.eup %3291  ;;  %3311 = vrcp.f32 %v1135_v45  ;;  %v1136_v37 = vadd.f32 1.0, %v3290_v46  ;;  %v4273_v45 = vpop.f32.mrb[40].mxu0 }
 0x148   :  { %v3294_v56 = vpop.eup %3293  ;;  %3313 = vrcp.f32 %v1199_v40  ;;  %v1200_v10 = vadd.f32 1.0, %v3292_v49  ;;  %5094 = vst [vmem:[#allocation18_spill] sm:$0xff] %v4273_v45  ;;  %v4275_v46 = vpop.f32.mrb[40].mxu1  ;;  %v2412_v40 = vmul.f32 -1.442695, %v4263_v8 }
 0x149   :  { %v3296_v7 = vpop.eup %3295  ;;  %3315 = vrcp.f32 %v1136_v37  ;;  %v1137_v51 = vadd.f32 1.0, %v3294_v56  ;;  %5095 = vst [vmem:[#allocation19_spill] sm:$0xff] %v4275_v46  ;;  %v4279_v49 = vpop.f32.mrb[41].mxu0  ;;  %v2349_v37 = vmul.f32 -1.442695, %v4268_v50  ;;  %v4286_v56 = vadd.f32 %v4060_v18, %v3884_v55 }
 0x14a   :  { %v3298_v23 = vpop.eup %3297  ;;  %3317 = vrcp.f32 %v1200_v10  ;;  %5096 = vst [vmem:[#allocation20_spill] sm:$0xff] %v4279_v49  ;;  %v4281_v59 = vpop.f32.mrb[41].mxu1  ;;  %v4290_v46 = vadd.f32 %v4081_v47, %v3882_v54  ;;  %v4301_v49 = vadd.f32 %v4083_v48, %v3882_v54 }
 0x14b   :  { %5097 = vst [vmem:[#allocation21_spill] sm:$0xff] %v4281_v59  ;;  %v3300_v41 = vpop.eup %3299  ;;  %3319 = vrcp.f32 %v1137_v51  ;;  %v4292_v10 = vpop.f32.mrb[42].mxu0  ;;  %v1514_v59 = vmul.f32 %v4190_v52, %v4000_v3  ;;  %v4312_v3 = vadd.f32 %v4090_v2, %v3884_v55  ;;  %v1515_v52 = vmul.f32 %v3296_v7, %v4067_v35 }
 0x14c   :  { %5098 = vst [vmem:[#allocation22_spill] sm:$0xff] %v4292_v10  ;;  %v4294_v45 = vpop.f32.mrb[42].mxu1  ;;  %v3302_v24 = vpop.eup %3301  ;;  %v1516_v51 = vmul.f32 %v3300_v41, %v4075_v11  ;;  %3321 = vpow2.f32 %v2409_v16  ;;  %v1578_v10 = vmul.f32 %v4198_v25, %v4009_v14  ;;  %v2413_v35 = vmul.f32 -1.442695, %v4286_v56 }
 0x14d   :  { %5099 = vst [vmem:[#allocation23_spill] sm:$0xff] %v4294_v45  ;;  %v4303_v18 = vpop.f32.mrb[43].mxu0  ;;  %v4305_v34 = vpop.f32.mrb[43].mxu1  ;;  %v1580_v45 = vmul.f32 %v3302_v24, %v4079_v17  ;;  %3323 = vpow2.f32 %v2346_v38  ;;  %v2351_v38 = vmul.f32 -1.442695, %v4312_v3 }
 0x14e   :  { %5100 = vst [vmem:[#allocation24_spill] sm:$0xff] %v4303_v18  ;;  %5101 = vst [vmem:[#allocation25_spill] sm:$0xff] %v4305_v34  ;;  %v3304_v47 = vpop.eup %3303  ;;  %v2728_v48 = vpack.c.bf16 %v1516_v51, %v1514_v59  ;;  %3325 = vpow2.f32 %v2410_v30  ;;  %v1579_v34 = vmul.f32 %v3298_v23, %v4071_v62  ;;  %v4330_v24 = vpop.f32.mrb[44].mxu0 }
 0x14f   :  { %v3306_v11 = vpop.eup %3305  ;;  %v1517_v41 = vmul.f32 %v3304_v47, %v4088_v27  ;;  %v2808_v18 = vpack.c.bf16 %v1580_v45, %v1578_v10  ;;  %3327 = vpow2.f32 %v2347_v12  ;;  %v4324_v27 = vadd.f32 %v4092_v53, %v3884_v55  ;;  %v4332_v59 = vpop.f32.mrb[44].mxu1 }
 0x150   :  { %v3308_v16 = vpop.eup %3307  ;;  %v1581_v14 = vmul.f32 %v3306_v11, %v4107_v44  ;;  %3032 = vst [vmem:[%s5075_s3 + $0x18] sm:$0xff] %v2728_v48   ;;  %3329 = vpow2.f32 %v2411_v61  ;;  %v2350_v44 = vmul.f32 -1.442695, %v4290_v46  ;;  %v2414_v53 = vmul.f32 -1.442695, %v4301_v49  ;;  %v4340_v61 = vpop.f32.mrb[45].mxu0 }
 0x151   :  { %v3310_v17 = vpop.eup %3309  ;;  %v2888_v2 = vpack.c.bf16 %v1517_v41, %v1515_v52  ;;  %3048 = vst [vmem:[%s5075_s3 + $0x98] sm:$0xff] %v2808_v18   ;;  %3331 = vpow2.f32 %v2348_v9  ;;  %v4342_v7 = vpop.f32.mrb[45].mxu1  ;;  %v1518_v9 = vmul.f32 %v3308_v16, %v4112_v13  ;;  %v2415_v10 = vmul.f32 -1.442695, %v4324_v27 }
 0x152   :  { %v3312_v25 = vpop.eup %3311  ;;  %v2968_v62 = vpack.c.bf16 %v1581_v14, %v1579_v34  ;;  %3333 = vpow2.f32 %v2412_v40  ;;  %v4348_v30 = vpop.f32.mrb[46].mxu0 }
 0x153   :  { %v4334_v23 = vpop.eup %3313  ;;  %3063 = vst [vmem:[%s5076_s4 + $0x18] sm:$0xff] %v2888_v2   ;;  %3335 = vpow2.f32 %v2349_v37  ;;  %v4350_v12 = vpop.f32.mrb[46].mxu1  ;;  %v1582_v37 = vmul.f32 %v3310_v17, %v4116_v33  ;;  %v1519_v48 = vmul.f32 %v3312_v25, %v4120_v39 }
 0x154   :  { %v3316_v34 = vpop.eup %3315  ;;  %3079 = vst [vmem:[%s5076_s4 + $0x98] sm:$0xff] %v2968_v62   ;;  %3337 = vpow2.f32 %v2413_v35  ;;  %v4355_v51 = vpop.f32.mrb[47].mxu0 }
 0x155   :  { %v3318_v45 = vpop.eup %3317  ;;  %v1520_v40 = vmul.f32 %v3316_v34, %v4134_v6  ;;  %v4357_v18 = vpop.f32.mrb[47].mxu1  ;;  %3339 = vpow2.f32 %v2350_v44 }
 0x156   :  { %5102 = vst [vmem:[#allocation26_spill] sm:$0xff] %v4357_v18  ;;  %v3320_v47 = vpop.eup %3319  ;;  %v1584_v11 = vmul.f32 %v3318_v45, %v4150_v36  ;;  %3341 = vpow2.f32 %v2414_v53  ;;  %v4371_v35 = vpop.f32.mrb[48].mxu1  ;;  %v5107_v45 = vld [vmem:[#allocation2_spill] sm:$0xff] }
 0x157   :  { %v3322_v52 = vpop.eup %3321  ;;  %v2733_v41 = vpack.c.bf16 %v1520_v40, %v1518_v9  ;;  %v1521_v13 = vmul.f32 %v3320_v47, %v4162_v20  ;;  %3343 = vpow2.f32 %v2351_v38  ;;  %v4369_v20 = vpop.f32.mrb[48].mxu0  ;;  %5104 = vst [vmem:[#allocation28_spill] sm:$0xff] %v4371_v35  ;;  %v4382_v9 = vadd.f32 %v5107_v45, %v3882_v54 }
 0x158   :  { %v3324_v6 = vpop.eup %3323  ;;  %v2813_v16 = vpack.c.bf16 %v1584_v11, %v1582_v37  ;;  %v1201_v14 = vadd.f32 1.0, %v3322_v52  ;;  %3345 = vpow2.f32 %v2415_v10  ;;  %5103 = vst [vmem:[#allocation27_spill] sm:$0xff] %v4369_v20  ;;  %v4376_v44 = vpop.f32.mrb[49].mxu0  ;;  %v5109_v37 = vld [vmem:[#allocation3_spill] sm:$0xff] }
 0x159   :  { %v3326_v2 = vpop.eup %3325  ;;  %3033 = vst [vmem:[%s5075_s3 + $0x20] sm:$0xff] %v2733_v41   ;;  %v2893_v33 = vpack.c.bf16 %v1521_v13, %v1519_v48  ;;  %v1138_v17 = vadd.f32 1.0, %v3324_v6  ;;  %5105 = vst [vmem:[#allocation29_spill] sm:$0xff] %v4376_v44  ;;  %v4378_v53 = vpop.f32.mrb[49].mxu1  ;;  %v4388_v11 = vadd.f32 %v5109_v37, %v3882_v54  ;;  %v5111_v13 = vld [vmem:[#allocation4_spill] sm:$0xff] }
 0x15a   :  { %v3328_v36 = vpop.eup %3327  ;;  %3049 = vst [vmem:[%s5075_s3 + $0xa0] sm:$0xff] %v2813_v16   ;;  %3347 = vrcp.f32 %v1201_v14  ;;  %v1202_v39 = vadd.f32 1.0, %v3326_v2  ;;  %5106 = vst [vmem:[#allocation30_spill] sm:$0xff] %v4378_v53  ;;  %v4384_v40 = vpop.f32.mrb[50].mxu0  ;;  %v4394_v6 = vadd.f32 %v5111_v13, %v3884_v55 }
 0x15b   :  { %v3330_v25 = vpop.eup %3329  ;;  %3064 = vst [vmem:[%s5076_s4 + $0x20] sm:$0xff] %v2893_v33   ;;  %3349 = vrcp.f32 %v1138_v17  ;;  %v1139_v62 = vadd.f32 1.0, %v3328_v36  ;;  %5108 = vst [vmem:[#allocation2_spill] sm:$0xff] %v4384_v40  ;;  %v4390_v52 = vpop.f32.mrb[50].mxu1 }
 0x15c   :  { %v3332_v34 = vpop.eup %3331  ;;  %3351 = vrcp.f32 %v1202_v39  ;;  %v1203_v38 = vadd.f32 1.0, %v3330_v25  ;;  %5110 = vst [vmem:[#allocation3_spill] sm:$0xff] %v4390_v52  ;;  %v4396_v16 = vpop.f32.mrb[51].mxu0  ;;  %v2352_v39 = vmul.f32 -1.442695, %v4382_v9 }
 0x15d   :  { %v3334_v10 = vpop.eup %3333  ;;  %3353 = vrcp.f32 %v1139_v62  ;;  %v1140_v47 = vadd.f32 1.0, %v3332_v34  ;;  %5112 = vst [vmem:[#allocation4_spill] sm:$0xff] %v4396_v16  ;;  %v4398_v14 = vpop.f32.mrb[51].mxu1  ;;  %v2416_v34 = vmul.f32 -1.442695, %v4388_v11 }
 0x15e   :  { %v3336_v48 = vpop.eup %3335  ;;  %3355 = vrcp.f32 %v1203_v38  ;;  %v1204_v41 = vadd.f32 1.0, %v3334_v10  ;;  %5113 = vst [vmem:[#allocation31_spill] sm:$0xff] %v4398_v14  ;;  %v5114_v38 = vld [vmem:[#allocation5_spill] sm:$0xff]  ;;  %v4413_v13 = vpop.f32.mrb[52].mxu1 }
 0x15f   :  { %v3338_v2 = vpop.eup %3337  ;;  %3357 = vrcp.f32 %v1140_v47  ;;  %v1141_v33 = vadd.f32 1.0, %v3336_v48  ;;  %v4404_v45 = vadd.f32 %v5114_v38, %v3884_v55  ;;  %v2353_v47 = vmul.f32 -1.442695, %v4394_v6  ;;  %5116 = vst [vmem:[#allocation32_spill] sm:$0xff] %v4413_v13  ;;  %v4425_v38 = vpop.f32.mrb[53].mxu1 }
 0x160   :  { %v3340_v17 = vpop.eup %3339  ;;  %3359 = vrcp.f32 %v1204_v41  ;;  %v1205_v36 = vadd.f32 1.0, %v3338_v2  ;;  %v4409_v48 = vadd.f32 %v4136_v28, %v3882_v54  ;;  %v4411_v41 = vpop.f32.mrb[52].mxu0  ;;  %5118 = vst [vmem:[#allocation34_spill] sm:$0xff] %v4425_v38  ;;  %v4429_v13 = vadd.f32 %v4145_v60, %v3884_v55 }
 0x161   :  { %v3342_v25 = vpop.eup %3341  ;;  %3361 = vrcp.f32 %v1141_v33  ;;  %v1142_v62 = vadd.f32 1.0, %v3340_v17  ;;  %5115 = vst [vmem:[#allocation5_spill] sm:$0xff] %v4411_v41  ;;  %v4417_v17 = vadd.f32 %v4138_v19, %v3882_v54  ;;  %v4444_v38 = vpop.f32.mrb[54].mxu1 }
 0x162   :  { %v3344_v10 = vpop.eup %3343  ;;  %3363 = vrcp.f32 %v1205_v36  ;;  %v1206_v37 = vadd.f32 1.0, %v3342_v25  ;;  %v4421_v36 = vadd.f32 %v4143_v22, %v3884_v55  ;;  %v4423_v25 = vpop.f32.mrb[53].mxu0  ;;  %v5121_v22 = vld [vmem:[#allocation6_spill] sm:$0xff] }
 0x163   :  { %v3346_v2 = vpop.eup %3345  ;;  %3365 = vrcp.f32 %v1142_v62  ;;  %v1143_v33 = vadd.f32 1.0, %v3344_v10  ;;  %5117 = vst [vmem:[#allocation33_spill] sm:$0xff] %v4423_v25  ;;  %v5119_v62 = vld [vmem:[#allocation7_spill] sm:$0xff]  ;;  %v4435_v19 = vpop.f32.mrb[54].mxu0  ;;  %v1583_v16 = vmul.f32 %v4334_v23, %v5121_v22  ;;  %5123 = vst [vmem:[#allocation6_spill] sm:$0xff] %v4444_v38 }
 0x164   :  { %v3348_v28 = vpop.eup %3347  ;;  %3367 = vrcp.f32 %v1206_v37  ;;  %v1207_v41 = vadd.f32 1.0, %v3346_v2  ;;  %v4433_v10 = vadd.f32 %v5119_v62, %v3882_v54  ;;  %5120 = vst [vmem:[#allocation7_spill] sm:$0xff] %v4435_v19  ;;  %v5122_v37 = vld [vmem:[#allocation8_spill] sm:$0xff]  ;;  %v4446_v60 = vpop.f32.mrb[55].mxu0  ;;  %v2417_v62 = vmul.f32 -1.442695, %v4404_v45 }
 0x165   :  { %v3350_v14 = vpop.eup %3349  ;;  %v1585_v25 = vmul.f32 %v3348_v28, %v4222_v21  ;;  %3369 = vrcp.f32 %v1143_v33  ;;  %v4442_v2 = vadd.f32 %v5122_v37, %v3882_v54  ;;  %5124 = vst [vmem:[#allocation8_spill] sm:$0xff] %v4446_v60  ;;  %v5125_v19 = vld [vmem:[#allocation9_spill] sm:$0xff]  ;;  %v4453_v23 = vpop.f32.mrb[55].mxu1  ;;  %v2354_v28 = vmul.f32 -1.442695, %v4409_v48 }
 0x166   :  { %v3352_v52 = vpop.eup %3351  ;;  %3371 = vrcp.f32 %v1207_v41  ;;  %v4451_v40 = vadd.f32 %v5125_v19, %v3884_v55  ;;  %5126 = vst [vmem:[#allocation9_spill] sm:$0xff] %v4453_v23  ;;  %v2418_v37 = vmul.f32 -1.442695, %v4417_v17  ;;  %v2355_v60 = vmul.f32 -1.442695, %v4421_v36  ;;  %v4471_v35 = vpop.f32.mrb[56].mxu0 }
 0x167   :  { %v3354_v21 = vpop.eup %3353  ;;  %v2973_v33 = vpack.c.bf16 %v1585_v25, %v1583_v16  ;;  %3373 = vpow2.f32 %v2352_v39  ;;  %v2419_v41 = vmul.f32 -1.442695, %v4429_v13  ;;  %v2356_v19 = vmul.f32 -1.442695, %v4433_v10  ;;  %v5127_v39 = vld [vmem:[#allocation10_spill] sm:$0xff] }
 0x168   :  { %v3356_v22 = vpop.eup %3355  ;;  %3375 = vpow2.f32 %v2416_v34  ;;  %v2420_v16 = vmul.f32 -1.442695, %v4442_v2  ;;  %v4466_v25 = vadd.f32 %v5127_v39, %v3884_v55  ;;  %v1522_v23 = vmul.f32 %v3350_v14, %v4234_v31  ;;  %5128 = vst [vmem:[#allocation10_spill] sm:$0xff] %v4471_v35  ;;  %v4481_v31 = vpop.f32.mrb[57].mxu0 }
 0x169   :  { %v3358_v38 = vpop.eup %3357  ;;  %3080 = vst [vmem:[%s5076_s4 + $0xa0] sm:$0xff] %v2973_v33   ;;  %3377 = vpow2.f32 %v2353_v47  ;;  %v2357_v44 = vmul.f32 -1.442695, %v4451_v40  ;;  %v4473_v33 = vpop.f32.mrb[56].mxu1  ;;  %v1586_v20 = vmul.f32 %v3352_v52, %v4240_v57  ;;  %v4479_v39 = vadd.f32 %v4186_v15, %v3882_v54 }
 0x16a   :  { %v3360_v34 = vpop.eup %3359  ;;  %v1524_v53 = vmul.f32 %v3358_v38, %v4259_v0  ;;  %3379 = vpow2.f32 %v2417_v62  ;;  %5129 = vst [vmem:[#allocation35_spill] sm:$0xff] %v4473_v33  ;;  %v4483_v0 = vpop.f32.mrb[57].mxu1  ;;  %v1523_v38 = vmul.f32 %v3354_v21, %v4244_v29  ;;  %v1587_v15 = vmul.f32 %v3356_v22, %v4253_v26 }
 0x16b   :  { %v3362_v47 = vpop.eup %3361  ;;  %v1588_v18 = vmul.f32 %v3360_v34, %v4263_v8  ;;  %3381 = vpow2.f32 %v2354_v28  ;;  %5130 = vst [vmem:[#allocation36_spill] sm:$0xff] %v4483_v0  ;;  %v4487_v35 = vpop.f32.mrb[58].mxu0 }
 0x16c   :  { %v3364_v14 = vpop.eup %3363  ;;  %v2738_v62 = vpack.c.bf16 %v1524_v53, %v1522_v23  ;;  %v1525_v33 = vmul.f32 %v3362_v47, %v4268_v50  ;;  %3383 = vpow2.f32 %v2418_v37  ;;  %v4489_v57 = vpop.f32.mrb[58].mxu1  ;;  %v2421_v53 = vmul.f32 -1.442695, %v4466_v25 }
 0x16d   :  { %v4491_v8 = vpop.eup %3365  ;;  %v2818_v52 = vpack.c.bf16 %v1588_v18, %v1586_v20  ;;  %v1589_v28 = vmul.f32 %v3364_v14, %v4286_v56  ;;  %3385 = vpow2.f32 %v2355_v60  ;;  %v4495_v34 = vpop.f32.mrb[59].mxu0  ;;  %v2358_v56 = vmul.f32 -1.442695, %v4479_v39 }
 0x16e   :  { %v4497_v0 = vpop.f32.mrb[59].mxu1  ;;  %v4499_v29 = vpop.eup %3367  ;;  %3034 = vst [vmem:[%s5075_s3 + $0x28] sm:$0xff] %v2738_v62   ;;  %v2898_v50 = vpack.c.bf16 %v1525_v33, %v1523_v38  ;;  %3387 = vpow2.f32 %v2419_v41 }
 0x16f   :  { %v4505_v23 = vpop.eup %3369  ;;  %3050 = vst [vmem:[%s5075_s3 + $0xa8] sm:$0xff] %v2818_v52   ;;  %v2978_v26 = vpack.c.bf16 %v1589_v28, %v1587_v15  ;;  %3389 = vpow2.f32 %v2356_v19  ;;  %v4519_v22 = vpop.f32.mrb[60].mxu0 }
 0x170   :  { %v4511_v18 = vpop.eup %3371  ;;  %3065 = vst [vmem:[%s5076_s4 + $0x28] sm:$0xff] %v2898_v50   ;;  %3391 = vpow2.f32 %v2420_v16  ;;  %5131 = vst [vmem:[#allocation37_spill] sm:$0xff] %v4519_v22  ;;  %v4521_v19 = vpop.f32.mrb[60].mxu1 }
 0x171   :  { %v3374_v20 = vpop.eup %3373  ;;  %3081 = vst [vmem:[%s5076_s4 + $0xa8] sm:$0xff] %v2978_v26   ;;  %3393 = vpow2.f32 %v2357_v44  ;;  %5132 = vst [vmem:[#allocation38_spill] sm:$0xff] %v4521_v19  ;;  %v4523_v33 = vpop.f32.mrb[61].mxu0 }
 0x172   :  { %v3376_v60 = vpop.eup %3375  ;;  %v1144_v21 = vadd.f32 1.0, %v3374_v20  ;;  %3395 = vpow2.f32 %v2421_v53  ;;  %5133 = vst [vmem:[#allocation39_spill] sm:$0xff] %v4523_v33  ;;  %v4525_v14 = vpop.f32.mrb[61].mxu1  ;;  %v4535_v53 = vadd.f32 %v4188_v32, %v3882_v54  ;;  %v4549_v32 = vadd.f32 %v4203_v42, %v3882_v54 }
 0x173   :  { %v3378_v37 = vpop.eup %3377  ;;  %v1208_v41 = vadd.f32 1.0, %v3376_v60  ;;  %3397 = vpow2.f32 %v2358_v56  ;;  %5134 = vst [vmem:[#allocation40_spill] sm:$0xff] %v4525_v14  ;;  %v4527_v38 = vpop.f32.mrb[62].mxu0  ;;  %v4541_v60 = vadd.f32 %v4194_v58, %v3884_v55  ;;  %v4557_v58 = vadd.f32 %v4210_v5, %v3884_v55  ;;  %v5140_v14 = vld [vmem:[#allocation12_spill] sm:$0xff] }
 0x174   :  { %v3380_v47 = vpop.eup %3379  ;;  %3399 = vrcp.f32 %v1144_v21  ;;  %v1145_v16 = vadd.f32 1.0, %v3378_v37  ;;  %5135 = vst [vmem:[#allocation41_spill] sm:$0xff] %v4527_v38  ;;  %v4529_v15 = vpop.f32.mrb[62].mxu1  ;;  %v4545_v21 = vadd.f32 %v4196_v1, %v3884_v55  ;;  %v4565_v5 = vadd.f32 %v4212_v4, %v3884_v55 }
 0x175   :  { %v3382_v44 = vpop.eup %3381  ;;  %3401 = vrcp.f32 %v1208_v41  ;;  %v1209_v62 = vadd.f32 1.0, %v3380_v47  ;;  %5136 = vst [vmem:[#allocation42_spill] sm:$0xff] %v4529_v15  ;;  %v4531_v52 = vpop.f32.mrb[63].mxu0  ;;  %v4582_v33 = vadd.f32 %v5140_v14, %v3884_v55 }
 0x176   :  { %5137 = vst [vmem:[#allocation43_spill] sm:$0xff] %v4531_v52  ;;  %v3384_v28 = vpop.eup %3383  ;;  %3403 = vrcp.f32 %v1145_v16  ;;  %v1146_v50 = vadd.f32 1.0, %v3382_v44  ;;  %v4537_v26 = vpop.f32.mrb[63].mxu1  ;;  %v4553_v44 = vadd.f32 %v4205_v63, %v3882_v54 }
 0x177   :  { %5138 = vst [vmem:[#allocation44_spill] sm:$0xff] %v4537_v26  ;;  %v3386_v56 = vpop.eup %3385  ;;  %3405 = vrcp.f32 %v1209_v62  ;;  %v1210_v20 = vadd.f32 1.0, %v3384_v28  ;;  %v2422_v28 = vmul.f32 -1.442695, %v4535_v53  ;;  %v2360_v26 = vmul.f32 -1.442695, %v4549_v32 }
 0x178   :  { %v3388_v37 = vpop.eup %3387  ;;  %3407 = vrcp.f32 %v1146_v50  ;;  %v1147_v41 = vadd.f32 1.0, %v3386_v56  ;;  %v2359_v56 = vmul.f32 -1.442695, %v4541_v60  ;;  %v2424_v52 = vmul.f32 -1.442695, %v4553_v44 }
 0x179   :  { %v3390_v47 = vpop.eup %3389  ;;  %3409 = vrcp.f32 %v1210_v20  ;;  %v1211_v16 = vadd.f32 1.0, %v3388_v37  ;;  %v2423_v20 = vmul.f32 -1.442695, %v4545_v21 }
 0x17a   :  { %v3392_v1 = vpop.eup %3391  ;;  %3411 = vrcp.f32 %v1147_v41  ;;  %v1148_v62 = vadd.f32 1.0, %v3390_v47 }
 0x17b   :  { %v3394_v50 = vpop.eup %3393  ;;  %3413 = vrcp.f32 %v1211_v16  ;;  %v1212_v42 = vadd.f32 1.0, %v3392_v1  ;;  %v2361_v16 = vmul.f32 -1.442695, %v4557_v58 }
 0x17c   :  { %v3396_v37 = vpop.eup %3395  ;;  %3415 = vrcp.f32 %v1148_v62  ;;  %v1149_v63 = vadd.f32 1.0, %v3394_v50  ;;  %v4571_v62 = vadd.f32 %v4224_v43, %v3882_v54  ;;  %v5139_v50 = vld [vmem:[#allocation11_spill] sm:$0xff]  ;;  %v1590_v43 = vmul.f32 %v4499_v29, %v4301_v49 }
 0x17d   :  { %v3398_v41 = vpop.eup %3397  ;;  %3417 = vrcp.f32 %v1212_v42  ;;  %v1213_v47 = vadd.f32 1.0, %v3396_v37  ;;  %v4575_v38 = vadd.f32 %v5139_v50, %v3882_v54  ;;  %v1526_v42 = vmul.f32 %v4491_v8, %v4290_v46  ;;  %v5141_v50 = vld [vmem:[#allocation13_spill] sm:$0xff] }
 0x17e   :  { %v3400_v1 = vpop.eup %3399  ;;  %3419 = vrcp.f32 %v1149_v63  ;;  %v1150_v15 = vadd.f32 1.0, %v3398_v41  ;;  %v4589_v19 = vadd.f32 %v5141_v50, %v3884_v55  ;;  %v1527_v46 = vmul.f32 %v4505_v23, %v4312_v3 }
 0x17f   :  { %v3402_v4 = vpop.eup %3401  ;;  %v1528_v37 = vmul.f32 %v3400_v1, %v4382_v9  ;;  %3421 = vrcp.f32 %v1213_v47  ;;  %v1591_v47 = vmul.f32 %v4511_v18, %v4324_v27  ;;  %v2425_v3 = vmul.f32 -1.442695, %v4565_v5  ;;  %v5143_v18 = vld [vmem:[#allocation15_spill] sm:$0xff] }
 0x180   :  { %v3404_v63 = vpop.eup %3403  ;;  %v1592_v41 = vmul.f32 %v3402_v4, %v4388_v11  ;;  %3423 = vrcp.f32 %v1150_v15  ;;  %v2427_v4 = vmul.f32 -1.442695, %v4589_v19 }
 0x181   :  { %v3406_v22 = vpop.eup %3405  ;;  %v2743_v9 = vpack.c.bf16 %v1528_v37, %v1526_v42  ;;  %v1529_v8 = vmul.f32 %v3404_v63, %v4394_v6  ;;  %3425 = vpow2.f32 %v2422_v28  ;;  %v5142_v6 = vld [vmem:[#allocation14_spill] sm:$0xff] }
 0x182   :  { %v3408_v14 = vpop.eup %3407  ;;  %v2823_v49 = vpack.c.bf16 %v1592_v41, %v1590_v43  ;;  %v1593_v11 = vmul.f32 %v3406_v22, %v4404_v45  ;;  %3427 = vpow2.f32 %v2359_v56  ;;  %v4603_v23 = vadd.f32 %v5142_v6, %v3882_v54 }
 0x183   :  { %v3410_v29 = vpop.eup %3409  ;;  %3035 = vst [vmem:[%s5075_s3 + $0x30] sm:$0xff] %v2743_v9   ;;  %v2903_v15 = vpack.c.bf16 %v1529_v8, %v1527_v46  ;;  %3429 = vpow2.f32 %v2423_v20  ;;  %v2362_v45 = vmul.f32 -1.442695, %v4571_v62  ;;  %v4611_v22 = vadd.f32 %v5143_v18, %v3882_v54 }
 0x184   :  { %v3412_v28 = vpop.eup %3411  ;;  %3051 = vst [vmem:[%s5075_s3 + $0xb0] sm:$0xff] %v2823_v49   ;;  %v2983_v27 = vpack.c.bf16 %v1593_v11, %v1591_v47  ;;  %3431 = vpow2.f32 %v2360_v26  ;;  %v2426_v20 = vmul.f32 -1.442695, %v4575_v38  ;;  %v2363_v26 = vmul.f32 -1.442695, %v4582_v33 }
 0x185   :  { %v3414_v56 = vpop.eup %3413  ;;  %3066 = vst [vmem:[%s5076_s4 + $0x30] sm:$0xff] %v2903_v15   ;;  %3433 = vpow2.f32 %v2424_v52  ;;  %v1530_v37 = vmul.f32 %v3408_v14, %v4409_v48  ;;  %v2364_v52 = vmul.f32 -1.442695, %v4603_v23  ;;  %v1594_v41 = vmul.f32 %v3410_v29, %v4417_v17 }
 0x186   :  { %v3416_v1 = vpop.eup %3415  ;;  %3082 = vst [vmem:[%s5076_s4 + $0xb0] sm:$0xff] %v2983_v27   ;;  %3435 = vpow2.f32 %v2361_v16  ;;  %v2428_v16 = vmul.f32 -1.442695, %v4611_v22  ;;  %v1531_v9 = vmul.f32 %v3412_v28, %v4421_v36  ;;  %v5144_v28 = vld [vmem:[#allocation16_spill] sm:$0xff] }
 0x187   :  { %v3418_v42 = vpop.eup %3417  ;;  %v1532_v63 = vmul.f32 %v3416_v1, %v4433_v10  ;;  %3437 = vpow2.f32 %v2425_v3  ;;  %v1595_v10 = vmul.f32 %v3414_v56, %v4429_v13  ;;  %v4648_v27 = vadd.f32 %v5144_v28, %v3884_v55 }
 0x188   :  { %v3420_v43 = vpop.eup %3419  ;;  %v1596_v50 = vmul.f32 %v3418_v42, %v4442_v2  ;;  %3439 = vpow2.f32 %v2362_v45 }
 0x189   :  { %v3422_v46 = vpop.eup %3421  ;;  %v2748_v8 = vpack.c.bf16 %v1532_v63, %v1530_v37  ;;  %v1533_v47 = vmul.f32 %v3420_v43, %v4451_v40  ;;  %3441 = vpow2.f32 %v2426_v20  ;;  %v2365_v37 = vmul.f32 -1.442695, %v4648_v27  ;;  %v5145_v43 = vld [vmem:[#allocation17_spill] sm:$0xff] }
 0x18a   :  { %v4630_v48 = vpop.eup %3423  ;;  %v2828_v14 = vpack.c.bf16 %v1596_v50, %v1594_v41  ;;  %v1597_v49 = vmul.f32 %v3422_v46, %v4466_v25  ;;  %3443 = vpow2.f32 %v2363_v26  ;;  %v4653_v41 = vadd.f32 %v5145_v43, %v3884_v55  ;;  %v5146_v50 = vld [vmem:[#allocation18_spill] sm:$0xff] }
 0x18b   :  { %v3426_v17 = vpop.eup %3425  ;;  %3036 = vst [vmem:[%s5075_s3 + $0x38] sm:$0xff] %v2748_v8   ;;  %v2908_v2 = vpack.c.bf16 %v1533_v47, %v1531_v9  ;;  %3445 = vpow2.f32 %v2427_v4  ;;  %v5147_v8 = vld [vmem:[#allocation19_spill] sm:$0xff] }
 0x18c   :  { %v3428_v36 = vpop.eup %3427  ;;  %3052 = vst [vmem:[%s5075_s3 + $0xb8] sm:$0xff] %v2828_v14   ;;  %v2988_v40 = vpack.c.bf16 %v1597_v49, %v1595_v10  ;;  %v1214_v11 = vadd.f32 1.0, %v3426_v17  ;;  %3447 = vpow2.f32 %v2364_v52  ;;  %v4661_v47 = vadd.f32 %v5147_v8, %v3882_v54  ;;  %v5148_v10 = vld [vmem:[#allocation20_spill] sm:$0xff] }
 0x18d   :  { %v3430_v13 = vpop.eup %3429  ;;  %3067 = vst [vmem:[%s5076_s4 + $0x38] sm:$0xff] %v2908_v2   ;;  %v1151_v25 = vadd.f32 1.0, %v3428_v36  ;;  %3449 = vpow2.f32 %v2428_v16  ;;  %v4657_v16 = vadd.f32 %v5146_v50, %v3882_v54  ;;  %v4665_v14 = vadd.f32 %v5148_v10, %v3884_v55  ;;  %v5149_v2 = vld [vmem:[#allocation21_spill] sm:$0xff] }
 0x18e   :  { %v3432_v29 = vpop.eup %3431  ;;  %3083 = vst [vmem:[%s5076_s4 + $0xb8] sm:$0xff] %v2988_v40   ;;  %3451 = vrcp.f32 %v1214_v11  ;;  %v1215_v15 = vadd.f32 1.0, %v3430_v13  ;;  %v4669_v36 = vadd.f32 %v5149_v2, %v3884_v55  ;;  %v5150_v40 = vld [vmem:[#allocation22_spill] sm:$0xff]  ;;  %v4697_v8 = vadd.f32 %v4330_v24, %v3882_v54 }
 0x18f   :  { %v3434_v3 = vpop.eup %3433  ;;  %3453 = vrcp.f32 %v1151_v25  ;;  %v1152_v6 = vadd.f32 1.0, %v3432_v29  ;;  %v4673_v11 = vadd.f32 %v5150_v40, %v3882_v54  ;;  %v5151_v29 = vld [vmem:[#allocation23_spill] sm:$0xff]  ;;  %v4704_v2 = vadd.f32 %v4332_v59, %v3882_v54 }
 0x190   :  { %v3436_v45 = vpop.eup %3435  ;;  %3455 = vrcp.f32 %v1215_v15  ;;  %v1216_v18 = vadd.f32 1.0, %v3434_v3  ;;  %v4677_v15 = vadd.f32 %v5151_v29, %v3882_v54  ;;  %v5152_v3 = vld [vmem:[#allocation24_spill] sm:$0xff]  ;;  %v4710_v24 = vadd.f32 %v4340_v61, %v3884_v55 }
 0x191   :  { %v3438_v56 = vpop.eup %3437  ;;  %3457 = vrcp.f32 %v1152_v6  ;;  %v1153_v20 = vadd.f32 1.0, %v3436_v45  ;;  %v4681_v6 = vadd.f32 %v5152_v3, %v3884_v55 }
 0x192   :  { %v3440_v1 = vpop.eup %3439  ;;  %3459 = vrcp.f32 %v1216_v18  ;;  %v1217_v26 = vadd.f32 1.0, %v3438_v56  ;;  %v2429_v18 = vmul.f32 -1.442695, %v4653_v41 }
 0x193   :  { %v3442_v4 = vpop.eup %3441  ;;  %3461 = vrcp.f32 %v1153_v20  ;;  %v1154_v42 = vadd.f32 1.0, %v3440_v1  ;;  %v2366_v20 = vmul.f32 -1.442695, %v4657_v16  ;;  %v2430_v1 = vmul.f32 -1.442695, %v4661_v47 }
 0x194   :  { %v3444_v63 = vpop.eup %3443  ;;  %3463 = vrcp.f32 %v1217_v26  ;;  %v1218_v52 = vadd.f32 1.0, %v3442_v4  ;;  %v2367_v26 = vmul.f32 -1.442695, %v4665_v14 }
 0x195   :  { %v3446_v46 = vpop.eup %3445  ;;  %3465 = vrcp.f32 %v1154_v42  ;;  %v1155_v9 = vadd.f32 1.0, %v3444_v63  ;;  %v2431_v42 = vmul.f32 -1.442695, %v4669_v36  ;;  %v2368_v63 = vmul.f32 -1.442695, %v4673_v11 }
 0x196   :  { %v3448_v49 = vpop.eup %3447  ;;  %3467 = vrcp.f32 %v1218_v52  ;;  %v1219_v17 = vadd.f32 1.0, %v3446_v46  ;;  %v5153_v52 = vld [vmem:[#allocation25_spill] sm:$0xff]  ;;  %v2432_v46 = vmul.f32 -1.442695, %v4677_v15 }
 0x197   :  { %v3450_v13 = vpop.eup %3449  ;;  %3469 = vrcp.f32 %v1155_v9  ;;  %v1156_v25 = vadd.f32 1.0, %v3448_v49  ;;  %v4691_v43 = vadd.f32 %v5153_v52, %v3884_v55  ;;  %v2369_v9 = vmul.f32 -1.442695, %v4681_v6 }
 0x198   :  { %v3452_v28 = vpop.eup %3451  ;;  %3471 = vrcp.f32 %v1219_v17  ;;  %v1220_v45 = vadd.f32 1.0, %v3450_v13  ;;  %v1534_v49 = vmul.f32 %v4630_v48, %v4479_v39 }
 0x199   :  { %v3454_v56 = vpop.eup %3453  ;;  %3473 = vrcp.f32 %v1156_v25  ;;  %v1598_v40 = vmul.f32 %v3452_v28, %v4535_v53 }
 0x19a   :  { %v3456_v4 = vpop.eup %3455  ;;  %3475 = vrcp.f32 %v1220_v45  ;;  %v1535_v39 = vmul.f32 %v3454_v56, %v4541_v60  ;;  %v2433_v60 = vmul.f32 -1.442695, %v4691_v43  ;;  %v2434_v45 = vmul.f32 -1.442695, %v4704_v2 }
 0x19b   :  { %v3458_v50 = vpop.eup %3457  ;;  %3477 = vpow2.f32 %v2365_v37  ;;  %v1599_v59 = vmul.f32 %v3456_v4, %v4545_v21  ;;  %v2371_v56 = vmul.f32 -1.442695, %v4710_v24 }
 0x19c   :  { %v3460_v10 = vpop.eup %3459  ;;  %v1536_v17 = vmul.f32 %v3458_v50, %v4549_v32  ;;  %3479 = vpow2.f32 %v2429_v18 }
 0x19d   :  { %v3462_v37 = vpop.eup %3461  ;;  %v1600_v13 = vmul.f32 %v3460_v10, %v4553_v44  ;;  %3481 = vpow2.f32 %v2366_v20 }
 0x19e   :  { %v3464_v25 = vpop.eup %3463  ;;  %v2753_v48 = vpack.c.bf16 %v1536_v17, %v1534_v49  ;;  %v1537_v32 = vmul.f32 %v3462_v37, %v4557_v58  ;;  %3483 = vpow2.f32 %v2430_v1  ;;  %v2370_v58 = vmul.f32 -1.442695, %v4697_v8 }
 0x19f   :  { %v3466_v29 = vpop.eup %3465  ;;  %v2833_v3 = vpack.c.bf16 %v1600_v13, %v1598_v40  ;;  %v1601_v53 = vmul.f32 %v3464_v25, %v4565_v5  ;;  %3485 = vpow2.f32 %v2367_v26  ;;  %v4748_v25 = vadd.f32 %v4342_v7, %v3884_v55 }
 0x1a0   :  { %v3468_v44 = vpop.eup %3467  ;;  %3037 = vst [vmem:[%s5075_s3 + $0x40] sm:$0xff] %v2753_v48   ;;  %v2913_v61 = vpack.c.bf16 %v1537_v32, %v1535_v39  ;;  %3487 = vpow2.f32 %v2431_v42  ;;  %v1538_v1 = vmul.f32 %v3466_v29, %v4571_v62  ;;  %v4752_v39 = vadd.f32 %v4348_v30, %v3882_v54 }
 0x1a1   :  { %v4720_v28 = vpop.eup %3469  ;;  %3053 = vst [vmem:[%s5075_s3 + $0xc0] sm:$0xff] %v2833_v3   ;;  %v2993_v21 = vpack.c.bf16 %v1601_v53, %v1599_v59  ;;  %3489 = vpow2.f32 %v2368_v63  ;;  %v1602_v42 = vmul.f32 %v3468_v44, %v4575_v38  ;;  %v4756_v3 = vadd.f32 %v4350_v12, %v3882_v54  ;;  %v5154_v12 = vld [vmem:[#allocation26_spill] sm:$0xff] }
 0x1a2   :  { %v4726_v5 = vpop.eup %3471  ;;  %3068 = vst [vmem:[%s5076_s4 + $0x40] sm:$0xff] %v2913_v61   ;;  %3491 = vpow2.f32 %v2432_v46  ;;  %v4760_v53 = vadd.f32 %v4355_v51, %v3884_v55  ;;  %v5155_v51 = vld [vmem:[#allocation27_spill] sm:$0xff] }
 0x1a3   :  { %v3474_v18 = vpop.eup %3473  ;;  %3084 = vst [vmem:[%s5076_s4 + $0xc0] sm:$0xff] %v2993_v21   ;;  %3493 = vpow2.f32 %v2369_v9  ;;  %v2372_v21 = vmul.f32 -1.442695, %v4752_v39 }
 0x1a4   :  { %v3476_v20 = vpop.eup %3475  ;;  %v1540_v26 = vmul.f32 %v3474_v18, %v4603_v23  ;;  %3495 = vpow2.f32 %v2433_v60  ;;  %v2435_v60 = vmul.f32 -1.442695, %v4748_v25  ;;  %v4766_v18 = vadd.f32 %v5154_v12, %v3884_v55 }
 0x1a5   :  { %v3478_v4 = vpop.eup %3477  ;;  %v1604_v63 = vmul.f32 %v3476_v20, %v4611_v22  ;;  %3497 = vpow2.f32 %v2370_v58 }
 0x1a6   :  { %v3480_v52 = vpop.eup %3479  ;;  %v2758_v50 = vpack.c.bf16 %v1540_v26, %v1538_v1  ;;  %v1157_v46 = vadd.f32 1.0, %v3478_v4  ;;  %3499 = vpow2.f32 %v2434_v45  ;;  %v2436_v26 = vmul.f32 -1.442695, %v4756_v3 }
 0x1a7   :  { %v3482_v10 = vpop.eup %3481  ;;  %v2838_v9 = vpack.c.bf16 %v1604_v63, %v1602_v42  ;;  %v1221_v49 = vadd.f32 1.0, %v3480_v52  ;;  %3501 = vpow2.f32 %v2371_v56  ;;  %v4770_v56 = vadd.f32 %v5155_v51, %v3882_v54  ;;  %v5156_v52 = vld [vmem:[#allocation28_spill] sm:$0xff] }
 0x1a8   :  { %v3484_v17 = vpop.eup %3483  ;;  %3038 = vst [vmem:[%s5075_s3 + $0x48] sm:$0xff] %v2758_v50   ;;  %3503 = vrcp.f32 %v1157_v46  ;;  %v1158_v62 = vadd.f32 1.0, %v3482_v10  ;;  %v2373_v4 = vmul.f32 -1.442695, %v4760_v53  ;;  %v4776_v50 = vadd.f32 %v5156_v52, %v3882_v54  ;;  %v5157_v46 = vld [vmem:[#allocation29_spill] sm:$0xff] }
 0x1a9   :  { %v3486_v23 = vpop.eup %3485  ;;  %3054 = vst [vmem:[%s5075_s3 + $0xc8] sm:$0xff] %v2838_v9   ;;  %3505 = vrcp.f32 %v1221_v49  ;;  %v1222_v38 = vadd.f32 1.0, %v3484_v17  ;;  %v4780_v10 = vadd.f32 %v5157_v46, %v3884_v55  ;;  %v1539_v49 = vmul.f32 %v4720_v28, %v4582_v33  ;;  %v5160_v28 = vld [vmem:[#allocation3_spill] sm:$0xff] }
 0x1aa   :  { %v3488_v22 = vpop.eup %3487  ;;  %3507 = vrcp.f32 %v1158_v62  ;;  %v1159_v37 = vadd.f32 1.0, %v3486_v23  ;;  %v5158_v62 = vld [vmem:[#allocation30_spill] sm:$0xff] }
 0x1ab   :  { %v3490_v40 = vpop.eup %3489  ;;  %3509 = vrcp.f32 %v1222_v38  ;;  %v1223_v13 = vadd.f32 1.0, %v3488_v22  ;;  %v4787_v23 = vadd.f32 %v5158_v62, %v3884_v55  ;;  %v1603_v22 = vmul.f32 %v4726_v5, %v4589_v19 }
 0x1ac   :  { %v3492_v48 = vpop.eup %3491  ;;  %3511 = vrcp.f32 %v1159_v37  ;;  %v1160_v32 = vadd.f32 1.0, %v3490_v40  ;;  %v5159_v40 = vld [vmem:[#allocation2_spill] sm:$0xff]  ;;  %v2374_v19 = vmul.f32 -1.442695, %v4770_v56 }
 0x1ad   :  { %v3494_v29 = vpop.eup %3493  ;;  %3513 = vrcp.f32 %v1223_v13  ;;  %v1224_v59 = vadd.f32 1.0, %v3492_v48  ;;  %v4794_v13 = vadd.f32 %v5159_v40, %v3882_v54 }
 0x1ae   :  { %v3496_v7 = vpop.eup %3495  ;;  %3515 = vrcp.f32 %v1160_v32  ;;  %v1161_v44 = vadd.f32 1.0, %v3494_v29  ;;  %v4799_v32 = vadd.f32 %v5160_v28, %v3882_v54 }
 0x1af   :  { %v3498_v61 = vpop.eup %3497  ;;  %3517 = vrcp.f32 %v1224_v59  ;;  %v1225_v30 = vadd.f32 1.0, %v3496_v7 }
 0x1b0   :  { %v3500_v58 = vpop.eup %3499  ;;  %3519 = vrcp.f32 %v1161_v44  ;;  %v1162_v45 = vadd.f32 1.0, %v3498_v61  ;;  %v2438_v44 = vmul.f32 -1.442695, %v4776_v50  ;;  %v2375_v61 = vmul.f32 -1.442695, %v4780_v10 }
 0x1b1   :  { %v3502_v20 = vpop.eup %3501  ;;  %3521 = vrcp.f32 %v1225_v30  ;;  %v1226_v1 = vadd.f32 1.0, %v3500_v58  ;;  %v5162_v58 = vld [vmem:[#allocation31_spill] sm:$0xff] }
 0x1b2   :  { %v3504_v42 = vpop.eup %3503  ;;  %3523 = vrcp.f32 %v1162_v45  ;;  %v1163_v63 = vadd.f32 1.0, %v3502_v20  ;;  %v4818_v45 = vadd.f32 %v5162_v58, %v3884_v55  ;;  %v5164_v58 = vld [vmem:[#allocation32_spill] sm:$0xff] }
 0x1b3   :  { %v3506_v9 = vpop.eup %3505  ;;  %v1541_v17 = vmul.f32 %v3504_v42, %v4648_v27  ;;  %3525 = vrcp.f32 %v1226_v1  ;;  %v2437_v27 = vmul.f32 -1.442695, %v4766_v18  ;;  %v2440_v1 = vmul.f32 -1.442695, %v4799_v32 }
 0x1b4   :  { %v3508_v38 = vpop.eup %3507  ;;  %v1605_v37 = vmul.f32 %v3506_v9, %v4653_v41  ;;  %3527 = vrcp.f32 %v1163_v63  ;;  %v5161_v41 = vld [vmem:[#allocation4_spill] sm:$0xff] }
 0x1b5   :  { %v3510_v48 = vpop.eup %3509  ;;  %v2918_v33 = vpack.c.bf16 %v1541_v17, %v1539_v49  ;;  %3529 = vpow2.f32 %v2435_v60  ;;  %v4804_v5 = vadd.f32 %v5161_v41, %v3884_v55  ;;  %v2439_v60 = vmul.f32 -1.442695, %v4787_v23 }
 0x1b6   :  { %v3512_v29 = vpop.eup %3511  ;;  %v2998_v59 = vpack.c.bf16 %v1605_v37, %v1603_v22  ;;  %3531 = vpow2.f32 %v2372_v21  ;;  %v2376_v21 = vmul.f32 -1.442695, %v4794_v13  ;;  %v1542_v51 = vmul.f32 %v3508_v38, %v4657_v16 }
 0x1b7   :  { %v3514_v7 = vpop.eup %3513  ;;  %3069 = vst [vmem:[%s5076_s4 + $0x48] sm:$0xff] %v2918_v33   ;;  %3533 = vpow2.f32 %v2436_v26  ;;  %v1606_v42 = vmul.f32 %v3510_v48, %v4661_v47  ;;  %v2377_v63 = vmul.f32 -1.442695, %v4804_v5  ;;  %v1543_v46 = vmul.f32 %v3512_v29, %v4665_v14 }
 0x1b8   :  { %v3516_v30 = vpop.eup %3515  ;;  %3085 = vst [vmem:[%s5076_s4 + $0xc8] sm:$0xff] %v2998_v59   ;;  %3535 = vpow2.f32 %v2373_v4  ;;  %v2441_v14 = vmul.f32 -1.442695, %v4818_v45 }
 0x1b9   :  { %v3518_v12 = vpop.eup %3517  ;;  %v1544_v20 = vmul.f32 %v3516_v30, %v4673_v11  ;;  %3537 = vpow2.f32 %v2437_v27  ;;  %v1607_v11 = vmul.f32 %v3514_v7, %v4669_v36 }
 0x1ba   :  { %v3520_v26 = vpop.eup %3519  ;;  %v1608_v4 = vmul.f32 %v3518_v12, %v4677_v15  ;;  %3539 = vpow2.f32 %v2374_v19  ;;  %v4855_v12 = vadd.f32 %v5164_v58, %v3882_v54 }
 0x1bb   :  { %v3522_v52 = vpop.eup %3521  ;;  %v2763_v9 = vpack.c.bf16 %v1544_v20, %v1542_v51  ;;  %v1545_v49 = vmul.f32 %v3520_v26, %v4681_v6  ;;  %3541 = vpow2.f32 %v2438_v44  ;;  %v5165_v51 = vld [vmem:[#allocation33_spill] sm:$0xff] }
 0x1bc   :  { %v4828_v16 = vpop.eup %3523  ;;  %v2843_v17 = vpack.c.bf16 %v1608_v4, %v1606_v42  ;;  %v1609_v62 = vmul.f32 %v3522_v52, %v4691_v43  ;;  %3543 = vpow2.f32 %v2375_v61  ;;  %v5163_v61 = vld [vmem:[#allocation5_spill] sm:$0xff]  ;;  %v4859_v20 = vadd.f32 %v5165_v51, %v3884_v55  ;;  %v5166_v42 = vld [vmem:[#allocation34_spill] sm:$0xff] }
 0x1bd   :  { %v4832_v47 = vpop.eup %3525  ;;  %3039 = vst [vmem:[%s5075_s3 + $0x50] sm:$0xff] %v2763_v9   ;;  %v2923_v15 = vpack.c.bf16 %v1545_v49, %v1543_v46  ;;  %3545 = vpow2.f32 %v2439_v60  ;;  %v4851_v30 = vadd.f32 %v5163_v61, %v3882_v54  ;;  %v4863_v4 = vadd.f32 %v5166_v42, %v3884_v55  ;;  %v5168_v49 = vld [vmem:[#allocation6_spill] sm:$0xff] }
 0x1be   :  { %v4838_v6 = vpop.eup %3527  ;;  %3055 = vst [vmem:[%s5075_s3 + $0xd0] sm:$0xff] %v2843_v17   ;;  %v3003_v36 = vpack.c.bf16 %v1609_v62, %v1607_v11  ;;  %3547 = vpow2.f32 %v2376_v21  ;;  %v4871_v11 = vadd.f32 %v5168_v49, %v3882_v54  ;;  %v5169_v17 = vld [vmem:[#allocation8_spill] sm:$0xff]  ;;  %v1610_v51 = vmul.f32 %v4832_v47, %v4704_v2 }
 0x1bf   :  { %v3530_v43 = vpop.eup %3529  ;;  %3070 = vst [vmem:[%s5076_s4 + $0x50] sm:$0xff] %v2923_v15   ;;  %3549 = vpow2.f32 %v2440_v1  ;;  %v4875_v62 = vadd.f32 %v5169_v17, %v3884_v55  ;;  %v4921_v17 = vadd.f32 %v4487_v35, %v3882_v54 }
 0x1c0   :  { %v3532_v38 = vpop.eup %3531  ;;  %3086 = vst [vmem:[%s5076_s4 + $0xd0] sm:$0xff] %v3003_v36   ;;  %v1227_v22 = vadd.f32 1.0, %v3530_v43  ;;  %3551 = vpow2.f32 %v2377_v63  ;;  %v5167_v63 = vld [vmem:[#allocation7_spill] sm:$0xff]  ;;  %v2378_v36 = vmul.f32 -1.442695, %v4851_v30 }
 0x1c1   :  { %v3534_v37 = vpop.eup %3533  ;;  %v1164_v40 = vadd.f32 1.0, %v3532_v38  ;;  %3553 = vpow2.f32 %v2441_v14  ;;  %v4867_v52 = vadd.f32 %v5167_v63, %v3882_v54 }
 0x1c2   :  { %v3536_v48 = vpop.eup %3535  ;;  %3555 = vrcp.f32 %v1227_v22  ;;  %v1228_v33 = vadd.f32 1.0, %v3534_v37  ;;  %v2442_v22 = vmul.f32 -1.442695, %v4855_v12  ;;  %v2379_v37 = vmul.f32 -1.442695, %v4859_v20 }
 0x1c3   :  { %v3538_v27 = vpop.eup %3537  ;;  %3557 = vrcp.f32 %v1164_v40  ;;  %v1165_v28 = vadd.f32 1.0, %v3536_v48 }
 0x1c4   :  { %v3540_v29 = vpop.eup %3539  ;;  %3559 = vrcp.f32 %v1228_v33  ;;  %v1229_v59 = vadd.f32 1.0, %v3538_v27  ;;  %v2443_v33 = vmul.f32 -1.442695, %v4863_v4  ;;  %v2380_v27 = vmul.f32 -1.442695, %v4867_v52 }
 0x1c5   :  { %v3542_v19 = vpop.eup %3541  ;;  %3561 = vrcp.f32 %v1165_v28  ;;  %v1166_v41 = vadd.f32 1.0, %v3540_v29  ;;  %v2444_v29 = vmul.f32 -1.442695, %v4871_v11 }
 0x1c6   :  { %v3544_v7 = vpop.eup %3543  ;;  %3563 = vrcp.f32 %v1229_v59  ;;  %v1230_v44 = vadd.f32 1.0, %v3542_v19  ;;  %v2381_v59 = vmul.f32 -1.442695, %v4875_v62  ;;  %v5170_v19 = vld [vmem:[#allocation9_spill] sm:$0xff] }
 0x1c7   :  { %v3546_v60 = vpop.eup %3545  ;;  %3565 = vrcp.f32 %v1166_v41  ;;  %v1167_v21 = vadd.f32 1.0, %v3544_v7  ;;  %v4886_v41 = vadd.f32 %v5170_v19, %v3884_v55 }
 0x1c8   :  { %v3548_v1 = vpop.eup %3547  ;;  %3567 = vrcp.f32 %v1230_v44  ;;  %v1231_v26 = vadd.f32 1.0, %v3546_v60  ;;  %v1546_v44 = vmul.f32 %v4828_v16, %v4697_v8  ;;  %v5171_v60 = vld [vmem:[#allocation10_spill] sm:$0xff]  ;;  %v1547_v8 = vmul.f32 %v4838_v6, %v4710_v24 }
 0x1c9   :  { %v3550_v46 = vpop.eup %3549  ;;  %3569 = vrcp.f32 %v1167_v21  ;;  %v1168_v9 = vadd.f32 1.0, %v3548_v1  ;;  %v4893_v21 = vadd.f32 %v5171_v60, %v3882_v54  ;;  %v2445_v24 = vmul.f32 -1.442695, %v4886_v41 }
 0x1ca   :  { %v3552_v15 = vpop.eup %3551  ;;  %3571 = vrcp.f32 %v1231_v26  ;;  %v1232_v14 = vadd.f32 1.0, %v3550_v46  ;;  %v5172_v26 = vld [vmem:[#allocation35_spill] sm:$0xff] }
 0x1cb   :  { %v3554_v43 = vpop.eup %3553  ;;  %3573 = vrcp.f32 %v1168_v9  ;;  %v1169_v38 = vadd.f32 1.0, %v3552_v15  ;;  %v4900_v42 = vadd.f32 %v5172_v26, %v3882_v54 }
 0x1cc   :  { %v3556_v40 = vpop.eup %3555  ;;  %3575 = vrcp.f32 %v1232_v14  ;;  %v1233_v48 = vadd.f32 1.0, %v3554_v43 }
 0x1cd   :  { %v3558_v28 = vpop.eup %3557  ;;  %3577 = vrcp.f32 %v1169_v38  ;;  %v1611_v9 = vmul.f32 %v3556_v40, %v4748_v25 }
 0x1ce   :  { %v3560_v7 = vpop.eup %3559  ;;  %v1548_v61 = vmul.f32 %v3558_v28, %v4752_v39  ;;  %3579 = vrcp.f32 %v1233_v48  ;;  %v2384_v48 = vmul.f32 -1.442695, %v4921_v17 }
 0x1cf   :  { %v3562_v58 = vpop.eup %3561  ;;  %v1612_v1 = vmul.f32 %v3560_v7, %v4756_v3  ;;  %3581 = vpow2.f32 %v2378_v36 }
 0x1d0   :  { %v3564_v63 = vpop.eup %3563  ;;  %v2768_v39 = vpack.c.bf16 %v1548_v61, %v1546_v44  ;;  %v1549_v16 = vmul.f32 %v3562_v58, %v4760_v53  ;;  %3583 = vpow2.f32 %v2442_v22  ;;  %v4913_v53 = vadd.f32 %v4481_v31, %v3884_v55  ;;  %v5173_v61 = vld [vmem:[#allocation36_spill] sm:$0xff] }
 0x1d1   :  { %v3566_v46 = vpop.eup %3565  ;;  %v2848_v49 = vpack.c.bf16 %v1612_v1, %v1610_v51  ;;  %v1613_v2 = vmul.f32 %v3564_v63, %v4766_v18  ;;  %3585 = vpow2.f32 %v2379_v37  ;;  %v2382_v18 = vmul.f32 -1.442695, %v4893_v21 }
 0x1d2   :  { %v3568_v3 = vpop.eup %3567  ;;  %3040 = vst [vmem:[%s5075_s3 + $0x58] sm:$0xff] %v2768_v39   ;;  %v2928_v47 = vpack.c.bf16 %v1549_v16, %v1547_v8  ;;  %3587 = vpow2.f32 %v2443_v33  ;;  %v2446_v31 = vmul.f32 -1.442695, %v4900_v42  ;;  %v1550_v43 = vmul.f32 %v3566_v46, %v4770_v56 }
 0x1d3   :  { %v3570_v6 = vpop.eup %3569  ;;  %3056 = vst [vmem:[%s5075_s3 + $0xd8] sm:$0xff] %v2848_v49   ;;  %v3008_v25 = vpack.c.bf16 %v1613_v2, %v1611_v9  ;;  %3589 = vpow2.f32 %v2380_v27  ;;  %v2383_v38 = vmul.f32 -1.442695, %v4913_v53  ;;  %v1614_v37 = vmul.f32 %v3568_v3, %v4776_v50 }
 0x1d4   :  { %v3572_v15 = vpop.eup %3571  ;;  %3071 = vst [vmem:[%s5076_s4 + $0x58] sm:$0xff] %v2928_v47   ;;  %3591 = vpow2.f32 %v2444_v29  ;;  %v1551_v27 = vmul.f32 %v3570_v6, %v4780_v10  ;;  %v4951_v60 = vadd.f32 %v5173_v61, %v3884_v55  ;;  %v4959_v9 = vadd.f32 %v4489_v57, %v3882_v54 }
 0x1d5   :  { %v3574_v14 = vpop.eup %3573  ;;  %3087 = vst [vmem:[%s5076_s4 + $0xd8] sm:$0xff] %v3008_v25   ;;  %3593 = vpow2.f32 %v2381_v59  ;;  %v4963_v3 = vadd.f32 %v4495_v34, %v3884_v55  ;;  %v4967_v25 = vadd.f32 %v4497_v0, %v3884_v55  ;;  %v5177_v0 = vld [vmem:[#allocation40_spill] sm:$0xff] }
 0x1d6   :  { %v3576_v36 = vpop.eup %3575  ;;  %v1552_v35 = vmul.f32 %v3574_v14, %v4794_v13  ;;  %3595 = vpow2.f32 %v2445_v24  ;;  %v1615_v13 = vmul.f32 %v3572_v15, %v4787_v23  ;;  %v2447_v46 = vmul.f32 -1.442695, %v4951_v60  ;;  %v5174_v15 = vld [vmem:[#allocation37_spill] sm:$0xff] }
 0x1d7   :  { %v3578_v22 = vpop.eup %3577  ;;  %v1616_v40 = vmul.f32 %v3576_v36, %v4799_v32  ;;  %3597 = vpow2.f32 %v2382_v18  ;;  %v2448_v57 = vmul.f32 -1.442695, %v4959_v9  ;;  %v2385_v34 = vmul.f32 -1.442695, %v4963_v3  ;;  %v5175_v36 = vld [vmem:[#allocation38_spill] sm:$0xff] }
 0x1d8   :  { %v3580_v33 = vpop.eup %3579  ;;  %v2773_v28 = vpack.c.bf16 %v1552_v35, %v1550_v43  ;;  %v1553_v29 = vmul.f32 %v3578_v22, %v4804_v5  ;;  %3599 = vpow2.f32 %v2446_v31  ;;  %v4972_v31 = vadd.f32 %v5174_v15, %v3882_v54  ;;  %v5176_v35 = vld [vmem:[#allocation39_spill] sm:$0xff] }
 0x1d9   :  { %v3582_v56 = vpop.eup %3581  ;;  %v2853_v59 = vpack.c.bf16 %v1616_v40, %v1614_v37  ;;  %v1617_v19 = vmul.f32 %v3580_v33, %v4818_v45  ;;  %3601 = vpow2.f32 %v2383_v38  ;;  %v4977_v43 = vadd.f32 %v5175_v36, %v3882_v54 }
 0x1da   :  { %v3584_v7 = vpop.eup %3583  ;;  %3041 = vst [vmem:[%s5075_s3 + $0x60] sm:$0xff] %v2773_v28   ;;  %v2933_v50 = vpack.c.bf16 %v1553_v29, %v1551_v27  ;;  %v1170_v32 = vadd.f32 1.0, %v3582_v56  ;;  %3603 = vpow2.f32 %v2384_v48  ;;  %v4981_v38 = vadd.f32 %v5176_v35, %v3884_v55  ;;  %v5178_v48 = vld [vmem:[#allocation41_spill] sm:$0xff]  ;;  %v5179_v27 = vld [vmem:[#allocation42_spill] sm:$0xff] }
 0x1db   :  { %v3586_v44 = vpop.eup %3585  ;;  %3057 = vst [vmem:[%s5075_s3 + $0xe0] sm:$0xff] %v2853_v59   ;;  %v3013_v10 = vpack.c.bf16 %v1617_v19, %v1615_v13  ;;  %v1234_v5 = vadd.f32 1.0, %v3584_v7  ;;  %v4985_v22 = vadd.f32 %v5177_v0, %v3884_v55  ;;  %v4989_v33 = vadd.f32 %v5178_v48, %v3882_v54  ;;  %v5180_v19 = vld [vmem:[#allocation43_spill] sm:$0xff] }
 0x1dc   :  { %v3588_v23 = vpop.eup %3587  ;;  %3072 = vst [vmem:[%s5076_s4 + $0x60] sm:$0xff] %v2933_v50   ;;  %3605 = vrcp.f32 %v1170_v32  ;;  %v1171_v45 = vadd.f32 1.0, %v3586_v44  ;;  %v4993_v28 = vadd.f32 %v5179_v27, %v3882_v54  ;;  %v2449_v56 = vmul.f32 -1.442695, %v4967_v25 }
 0x1dd   :  { %v3590_v58 = vpop.eup %3589  ;;  %3088 = vst [vmem:[%s5076_s4 + $0xe0] sm:$0xff] %v3013_v10   ;;  %3607 = vrcp.f32 %v1234_v5  ;;  %v1235_v51 = vadd.f32 1.0, %v3588_v23  ;;  %v2386_v59 = vmul.f32 -1.442695, %v4972_v31  ;;  %v4999_v7 = vadd.f32 %v5180_v19, %v3884_v55 }
 0x1de   :  { %v3592_v1 = vpop.eup %3591  ;;  %3609 = vrcp.f32 %v1171_v45  ;;  %v1172_v26 = vadd.f32 1.0, %v3590_v58  ;;  %v2450_v32 = vmul.f32 -1.442695, %v4977_v43  ;;  %v2387_v44 = vmul.f32 -1.442695, %v4981_v38 }
 0x1df   :  { %v3594_v63 = vpop.eup %3593  ;;  %3611 = vrcp.f32 %v1235_v51  ;;  %v1236_v8 = vadd.f32 1.0, %v3592_v1  ;;  %v2451_v10 = vmul.f32 -1.442695, %v4985_v22  ;;  %v2388_v5 = vmul.f32 -1.442695, %v4989_v33  ;;  %v5181_v51 = vld [vmem:[#allocation44_spill] sm:$0xff] }
 0x1e0   :  { %v3596_v39 = vpop.eup %3595  ;;  %3613 = vrcp.f32 %v1172_v26  ;;  %v1173_v16 = vadd.f32 1.0, %v3594_v63  ;;  %v2452_v23 = vmul.f32 -1.442695, %v4993_v28  ;;  %v5010_v1 = vadd.f32 %v5181_v51, %v3884_v55 }
 0x1e1   :  { %v3598_v49 = vpop.eup %3597  ;;  %3615 = vrcp.f32 %v1236_v8  ;;  %v1237_v2 = vadd.f32 1.0, %v3596_v39  ;;  %v2389_v39 = vmul.f32 -1.442695, %v4999_v7 }
 0x1e2   :  { %v3600_v47 = vpop.eup %3599  ;;  %3617 = vrcp.f32 %v1173_v16  ;;  %v1174_v24 = vadd.f32 1.0, %v3598_v49 }
 0x1e3   :  { %3619 = vrcp.f32 %v1237_v2  ;;  %v1238_v6 = vadd.f32 1.0, %v3600_v47  ;;  %v3602_v18 = vpop.eup %3601 }
 0x1e4   :  { %3621 = vpow2.f32 %v2447_v46  ;;  %v3604_v14 = vpop.eup %3603 }
 0x1e5   :  { %3623 = vrcp.f32 %v1174_v24  ;;  %v1176_v40 = vadd.f32 1.0, %v3604_v14  ;;  %v1175_v24 = vadd.f32 1.0, %v3602_v18 }
 0x1e6   :  { %v3606_v37 = vpop.eup %3605  ;;  %3625 = vrcp.f32 %v1238_v6 }
 0x1e7   :  { %v3608_v29 = vpop.eup %3607  ;;  %3627 = vrcp.f32 %v1176_v40  ;;  %v1554_v61 = vmul.f32 %v3606_v37, %v4851_v30 }
 0x1e8   :  { %v3610_v13 = vpop.eup %3609  ;;  %3629 = vpow2.f32 %v2448_v57  ;;  %v1618_v63 = vmul.f32 %v3608_v29, %v4855_v12 }
 0x1e9   :  { %v3612_v50 = vpop.eup %3611  ;;  %3631 = vpow2.f32 %v2385_v34  ;;  %v1555_v46 = vmul.f32 %v3610_v13, %v4859_v20 }
 0x1ea   :  { %v3614_v54 = vpop.eup %3613  ;;  %3633 = vpow2.f32 %v2449_v56  ;;  %v1619_v2 = vmul.f32 %v3612_v50, %v4863_v4 }
 0x1eb   :  { %v3616_v45 = vpop.eup %3615  ;;  %v1556_v58 = vmul.f32 %v3614_v54, %v4867_v52  ;;  %3635 = vpow2.f32 %v2386_v59 }
 0x1ec   :  { %v3618_v26 = vpop.eup %3617  ;;  %v1620_v8 = vmul.f32 %v3616_v45, %v4871_v11  ;;  %3637 = vpow2.f32 %v2450_v32  ;;  %v2453_v11 = vmul.f32 -1.442695, %v5010_v1 }
 0x1ed   :  { %v3620_v16 = vpop.eup %3619  ;;  %v2778_v49 = vpack.c.bf16 %v1556_v58, %v1554_v61  ;;  %v1557_v30 = vmul.f32 %v3618_v26, %v4875_v62  ;;  %3639 = vpow2.f32 %v2387_v44 }
 0x1ee   :  { %v3622_v52 = vpop.eup %3621  ;;  %v2858_v55 = vpack.c.bf16 %v1620_v8, %v1618_v63  ;;  %v1621_v47 = vmul.f32 %v3620_v16, %v4886_v41  ;;  %3641 = vpow2.f32 %v2451_v10 }
 0x1ef   :  { %3042 = vst [vmem:[%s5075_s3 + $0x68] sm:$0xff] %v2778_v49   ;;  %v2938_v12 = vpack.c.bf16 %v1557_v30, %v1555_v46  ;;  %v3624_v20 = vpop.eup %3623  ;;  %3643 = vpow2.f32 %v2388_v5  ;;  %v1239_v41 = vadd.f32 1.0, %v3622_v52 }
 0x1f0   :  { %3058 = vst [vmem:[%s5075_s3 + $0xe8] sm:$0xff] %v2858_v55   ;;  %v3018_v62 = vpack.c.bf16 %v1621_v47, %v1619_v2  ;;  %v3626_v4 = vpop.eup %3625  ;;  %3645 = vpow2.f32 %v2452_v23  ;;  %v1558_v15 = vmul.f32 %v3624_v20, %v4893_v21 }
 0x1f1   :  { %3073 = vst [vmem:[%s5076_s4 + $0x68] sm:$0xff] %v2938_v12   ;;  %v3628_v6 = vpop.eup %3627  ;;  %3647 = vpow2.f32 %v2389_v39  ;;  %v1622_v51 = vmul.f32 %v3626_v4, %v4900_v42 }
 0x1f2   :  { %3089 = vst [vmem:[%s5076_s4 + $0xe8] sm:$0xff] %v3018_v62   ;;  %v3630_v57 = vpop.eup %3629  ;;  %v1560_v14 = vmul.f32 %v3628_v6, %v4921_v17  ;;  %3649 = vpow2.f32 %v2453_v11 }
 0x1f3   :  { %v3632_v18 = vpop.eup %3631  ;;  %3651 = vrcp.f32 %v1175_v24  ;;  %v1240_v34 = vadd.f32 1.0, %v3630_v57 }
 0x1f4   :  { %v3634_v36 = vpop.eup %3633  ;;  %3653 = vrcp.f32 %v1239_v41  ;;  %v2783_v35 = vpack.c.bf16 %v1560_v14, %v1558_v15  ;;  %v1177_v0 = vadd.f32 1.0, %v3632_v18 }
 0x1f5   :  { %v3636_v37 = vpop.eup %3635  ;;  %3655 = vrcp.f32 %v1240_v34  ;;  %v1241_v40 = vadd.f32 1.0, %v3634_v36 }
 0x1f6   :  { %v3638_v48 = vpop.eup %3637  ;;  %3043 = vst [vmem:[%s5075_s3 + $0x70] sm:$0xff] %v2783_v35   ;;  %3657 = vrcp.f32 %v1177_v0  ;;  %v1178_v21 = vadd.f32 1.0, %v3636_v37 }
 0x1f7   :  { %v3640_v27 = vpop.eup %3639  ;;  %3659 = vrcp.f32 %v1241_v40  ;;  %v1242_v17 = vadd.f32 1.0, %v3638_v48 }
 0x1f8   :  { %v3642_v29 = vpop.eup %3641  ;;  %3661 = vrcp.f32 %v1178_v21  ;;  %v1179_v56 = vadd.f32 1.0, %v3640_v27 }
 0x1f9   :  { %v3644_v13 = vpop.eup %3643  ;;  %3663 = vrcp.f32 %v1242_v17  ;;  %v1243_v59 = vadd.f32 1.0, %v3642_v29 }
 0x1fa   :  { %v3646_v19 = vpop.eup %3645  ;;  %3665 = vrcp.f32 %v1179_v56  ;;  %v1180_v50 = vadd.f32 1.0, %v3644_v13 }
 0x1fb   :  { %v3648_v32 = vpop.eup %3647  ;;  %3667 = vrcp.f32 %v1243_v59  ;;  %v1244_v44 = vadd.f32 1.0, %v3646_v19 }
 0x1fc   :  { %v3650_v54 = vpop.eup %3649  ;;  %3669 = vrcp.f32 %v1180_v50  ;;  %v1181_v10 = vadd.f32 1.0, %v3648_v32 }
 0x1fd   :  { %v3652_v5 = vpop.eup %3651  ;;  %3671 = vrcp.f32 %v1244_v44  ;;  %v1245_v23 = vadd.f32 1.0, %v3650_v54 }
 0x1fe   :  { %v3654_v45 = vpop.eup %3653  ;;  %3673 = vrcp.f32 %v1181_v10  ;;  %v1559_v8 = vmul.f32 %v3652_v5, %v4913_v53 }
 0x1ff   :  { %v3656_v61 = vpop.eup %3655  ;;  %3675 = vrcp.f32 %v1245_v23  ;;  %v1623_v46 = vmul.f32 %v3654_v45, %v4951_v60 }
 0x200   :  { %v3658_v58 = vpop.eup %3657  ;;  %v1624_v26 = vmul.f32 %v3656_v61, %v4959_v9 }
 0x201   :  { %v3660_v63 = vpop.eup %3659  ;;  %v1561_v39 = vmul.f32 %v3658_v58, %v4963_v3 }
 0x202   :  { %v3662_v16 = vpop.eup %3661  ;;  %v2863_v49 = vpack.c.bf16 %v1624_v26, %v1622_v51  ;;  %v1625_v30 = vmul.f32 %v3660_v63, %v4967_v25 }
 0x203   :  { %v3664_v52 = vpop.eup %3663  ;;  %v2943_v2 = vpack.c.bf16 %v1561_v39, %v1559_v8  ;;  %v1562_v3 = vmul.f32 %v3662_v16, %v4972_v31 }
 0x204   :  { %v3666_v55 = vpop.eup %3665  ;;  %3059 = vst [vmem:[%s5075_s3 + $0xf0] sm:$0xff] %v2863_v49   ;;  %v3023_v42 = vpack.c.bf16 %v1625_v30, %v1623_v46  ;;  %v1626_v12 = vmul.f32 %v3664_v52, %v4977_v43 }
 0x205   :  { %v3668_v9 = vpop.eup %3667  ;;  %3074 = vst [vmem:[%s5076_s4 + $0x70] sm:$0xff] %v2943_v2   ;;  %v1563_v62 = vmul.f32 %v3666_v55, %v4981_v38 }
 0x206   :  { %v3670_v53 = vpop.eup %3669  ;;  %3090 = vst [vmem:[%s5076_s4 + $0xf0] sm:$0xff] %v3023_v42   ;;  %v1627_v41 = vmul.f32 %v3668_v9, %v4985_v22 }
 0x207   :  { %v3672_v60 = vpop.eup %3671  ;;  %v1564_v25 = vmul.f32 %v3670_v53, %v4989_v33 }
 0x208   :  { %v3674_v47 = vpop.eup %3673  ;;  %v1628_v11 = vmul.f32 %v3672_v60, %v4993_v28 }
 0x209   :  { %v3676_v20 = vpop.eup %3675  ;;  %v2788_v24 = vpack.c.bf16 %v1564_v25, %v1562_v3  ;;  %v1565_v4 = vmul.f32 %v3674_v47, %v4999_v7 }
 0x20a   :  { %v2868_v6 = vpack.c.bf16 %v1628_v11, %v1626_v12  ;;  %v1629_v57 = vmul.f32 %v3676_v20, %v5010_v1 }
 0x20b   :  { %3044 = vst [vmem:[%s5075_s3 + $0x78] sm:$0xff] %v2788_v24   ;;  %v2948_v31 = vpack.c.bf16 %v1565_v4, %v1563_v62 }
 0x20c   :  { %3060 = vst [vmem:[%s5075_s3 + $0xf8] sm:$0xff] %v2868_v6   ;;  %v3028_v43 = vpack.c.bf16 %v1629_v57, %v1627_v41 }
 0x20d   :  { %3075 = vst [vmem:[%s5076_s4 + $0x78] sm:$0xff] %v2948_v31  }
 0x20e   :  { %3091 = vst [vmem:[%s5076_s4 + $0xf8] sm:$0xff] %v3028_v43  }

// kernel: csp_block_forward.11
= control target key start
LH: loop header
LB: loop body
LE: loop exit
PB: predicated region body
PF: predicated region fallthrough
CT: control target
= control target key end

     0   :  { %s3883_s3 = inlined_call_operand.vmem [shape: bf16[128,128], index: 3, kind: input, shape index: {}]   ;;  %s3884_s2 = inlined_call_operand.vmem [shape: bf16[128,128], index: 2, kind: input, shape index: {}]   ;;  %s3885_s1 = inlined_call_operand.vmem [shape: bf16[512,128], index: 1, kind: input, shape index: {}]   ;;  %s3886_s0 = inlined_call_operand.vmem [shape: bf16[512,128], index: 0, kind: input, shape index: {}]   ;;  %s3887_s4 = inlined_call_operand.vmem [shape: f32[1,128], index: 4, kind: input, shape index: {}]   ;;  %s3888_s5 = inlined_call_operand.vmem [shape: bf16[512,128], index: 5, kind: output, shape index: {}]  }
   0x1   :  { %v2850_v0 = vld [vmem:[%s3883_s3] sm:$0xff]   ;;  %v2852_v2 = vld [vmem:[%s3883_s3 + $0x8] sm:$0xff]   ;;  %v2854_v4 = vld [vmem:[%s3883_s3 + $0x10] sm:$0xff]  }
   0x2   :  { %v2851_v1 = vld [vmem:[%s3884_s2] sm:$0xff]   ;;  %2626 = vmatprep.subr.bf16.mxu1 %v2850_v0  ;;  %v2853_v3 = vld [vmem:[%s3884_s2 + $0x8] sm:$0xff]   ;;  %v2855_v5 = vld [vmem:[%s3884_s2 + $0x10] sm:$0xff]  }
   0x3   :  { %2706 = vmatprep.subr.bf16.mxu0 %v2851_v1  ;;  %2627 = vmatpush3.bf16.msra.mxu1 %v2850_v0  ;;  %v2856_v6 = vld [vmem:[%s3883_s3 + $0x18] sm:$0xff]   ;;  %v2858_v8 = vld [vmem:[%s3883_s3 + $0x20] sm:$0xff]   ;;  %v2860_v10 = vld [vmem:[%s3883_s3 + $0x28] sm:$0xff]  }
   0x4   :  { %2707 = vmatpush3.bf16.msra.mxu0 %v2851_v1  ;;  %2628 = vmatprep.subr.bf16.mxu1 %v2852_v2  ;;  %v2857_v7 = vld [vmem:[%s3884_s2 + $0x18] sm:$0xff]   ;;  %v2859_v9 = vld [vmem:[%s3884_s2 + $0x20] sm:$0xff]   ;;  %v2861_v11 = vld [vmem:[%s3884_s2 + $0x28] sm:$0xff]  }
   0x5   :  { %2708 = vmatprep.subr.bf16.mxu0 %v2853_v3  ;;  %v2866_v12 = vld [vmem:[%s3885_s1] sm:$0xff]   ;;  %v2862_v14 = vld [vmem:[%s3883_s3 + $0x30] sm:$0xff]   ;;  %v2864_v16 = vld [vmem:[%s3883_s3 + $0x38] sm:$0xff]  }
   0x6   :  { %v2867_v13 = vld [vmem:[%s3886_s0] sm:$0xff]   ;;  %2642 = vmatprep.mubr.bf16.mxu1 %v2866_v12  ;;  %v2863_v15 = vld [vmem:[%s3884_s2 + $0x30] sm:$0xff]   ;;  %v2865_v17 = vld [vmem:[%s3884_s2 + $0x38] sm:$0xff]  }
   0x7   :  { %2629 = vmatpush3.bf16.msra.mxu1 %v2852_v2  ;;  %2722 = vmatprep.mubr.bf16.mxu0 %v2867_v13  ;;  %v2868_v18 = vld [vmem:[%s3885_s1 + $0x8] sm:$0xff]   ;;  %v2870_v20 = vld [vmem:[%s3885_s1 + $0x10] sm:$0xff]   ;;  %v2872_v22 = vld [vmem:[%s3885_s1 + $0x18] sm:$0xff]  }
   0x8   :  { %2709 = vmatpush3.bf16.msra.mxu0 %v2853_v3  ;;  %2630 = vmatprep.subr.bf16.mxu1 %v2854_v4  ;;  %v2869_v19 = vld [vmem:[%s3886_s0 + $0x8] sm:$0xff]   ;;  %v2871_v21 = vld [vmem:[%s3886_s0 + $0x10] sm:$0xff]   ;;  %v2873_v23 = vld [vmem:[%s3886_s0 + $0x18] sm:$0xff]  }
   0x9   :  { %2710 = vmatprep.subr.bf16.mxu0 %v2855_v5  ;;  %v2874_v24 = vld [vmem:[%s3885_s1 + $0x20] sm:$0xff]   ;;  %v2876_v26 = vld [vmem:[%s3885_s1 + $0x28] sm:$0xff]   ;;  %v2878_v28 = vld [vmem:[%s3885_s1 + $0x30] sm:$0xff]  }
   0xa   :  { %v2875_v25 = vld [vmem:[%s3886_s0 + $0x20] sm:$0xff]   ;;  %v2877_v27 = vld [vmem:[%s3886_s0 + $0x28] sm:$0xff]   ;;  %v2879_v29 = vld [vmem:[%s3886_s0 + $0x30] sm:$0xff]  }
   0xb   :  { %2631 = vmatpush3.bf16.msra.mxu1 %v2854_v4  ;;  %v2880_v30 = vld [vmem:[%s3885_s1 + $0x38] sm:$0xff]   ;;  %v2882_v32 = vld [vmem:[%s3885_s1 + $0x40] sm:$0xff]   ;;  %v2884_v34 = vld [vmem:[%s3885_s1 + $0x48] sm:$0xff]  }
   0xc   :  { %2711 = vmatpush3.bf16.msra.mxu0 %v2855_v5  ;;  %2632 = vmatprep.subr.bf16.mxu1 %v2856_v6  ;;  %v2881_v31 = vld [vmem:[%s3886_s0 + $0x38] sm:$0xff]   ;;  %v2883_v33 = vld [vmem:[%s3886_s0 + $0x40] sm:$0xff]   ;;  %v2885_v35 = vld [vmem:[%s3886_s0 + $0x48] sm:$0xff]  }
   0xd   :  { %2712 = vmatprep.subr.bf16.mxu0 %v2857_v7  ;;  %v2886_v36 = vld [vmem:[%s3885_s1 + $0x50] sm:$0xff]   ;;  %v2888_v38 = vld [vmem:[%s3885_s1 + $0x58] sm:$0xff]   ;;  %v2890_v40 = vld [vmem:[%s3885_s1 + $0x60] sm:$0xff]  }
   0xe   :  { %v2887_v37 = vld [vmem:[%s3886_s0 + $0x50] sm:$0xff]   ;;  %v2889_v39 = vld [vmem:[%s3886_s0 + $0x58] sm:$0xff]   ;;  %v2891_v41 = vld [vmem:[%s3886_s0 + $0x60] sm:$0xff]  }
   0xf   :  { %2633 = vmatpush3.bf16.msra.mxu1 %v2856_v6  ;;  %v2892_v42 = vld [vmem:[%s3885_s1 + $0x68] sm:$0xff]   ;;  %v2894_v44 = vld [vmem:[%s3885_s1 + $0x70] sm:$0xff]   ;;  %v2896_v46 = vld [vmem:[%s3885_s1 + $0x78] sm:$0xff]  }
  0x10   :  { %2713 = vmatpush3.bf16.msra.mxu0 %v2857_v7  ;;  %2634 = vmatprep.subr.bf16.mxu1 %v2858_v8  ;;  %v2893_v43 = vld [vmem:[%s3886_s0 + $0x68] sm:$0xff]   ;;  %v2895_v45 = vld [vmem:[%s3886_s0 + $0x70] sm:$0xff]   ;;  %v2897_v47 = vld [vmem:[%s3886_s0 + $0x78] sm:$0xff]  }
  0x11   :  { %2714 = vmatprep.subr.bf16.mxu0 %v2859_v9  ;;  %v2898_v48 = vld [vmem:[%s3885_s1 + $0x80] sm:$0xff]   ;;  %v2900_v50 = vld [vmem:[%s3885_s1 + $0x88] sm:$0xff]   ;;  %v2902_v52 = vld [vmem:[%s3885_s1 + $0x90] sm:$0xff]  }
  0x12   :  { %v2899_v49 = vld [vmem:[%s3886_s0 + $0x80] sm:$0xff]   ;;  %v2901_v51 = vld [vmem:[%s3886_s0 + $0x88] sm:$0xff]   ;;  %v2903_v53 = vld [vmem:[%s3886_s0 + $0x90] sm:$0xff]  }
  0x13   :  { %2635 = vmatpush3.bf16.msra.mxu1 %v2858_v8  ;;  %v2904_v54 = vld [vmem:[%s3885_s1 + $0x98] sm:$0xff]   ;;  %v2906_v56 = vld [vmem:[%s3885_s1 + $0xa0] sm:$0xff]   ;;  %v2908_v58 = vld [vmem:[%s3885_s1 + $0xa8] sm:$0xff]  }
  0x14   :  { %2715 = vmatpush3.bf16.msra.mxu0 %v2859_v9  ;;  %2636 = vmatprep.subr.bf16.mxu1 %v2860_v10  ;;  %v2905_v55 = vld [vmem:[%s3886_s0 + $0x98] sm:$0xff]   ;;  %v2907_v57 = vld [vmem:[%s3886_s0 + $0xa0] sm:$0xff]   ;;  %v2909_v59 = vld [vmem:[%s3886_s0 + $0xa8] sm:$0xff]  }
  0x15   :  { %2716 = vmatprep.subr.bf16.mxu0 %v2861_v11  ;;  %v2910_v60 = vld [vmem:[%s3885_s1 + $0xb0] sm:$0xff]   ;;  %v2912_v62 = vld [vmem:[%s3885_s1 + $0xb8] sm:$0xff]   ;;  %v2914_v0 = vld [vmem:[%s3885_s1 + $0xc0] sm:$0xff]  }
  0x16   :  { %v2911_v61 = vld [vmem:[%s3886_s0 + $0xb0] sm:$0xff]   ;;  %v2913_v63 = vld [vmem:[%s3886_s0 + $0xb8] sm:$0xff]   ;;  %v2915_v1 = vld [vmem:[%s3886_s0 + $0xc0] sm:$0xff]  }
  0x17   :  { %2637 = vmatpush3.bf16.msra.mxu1 %v2860_v10  ;;  %v2916_v2 = vld [vmem:[%s3885_s1 + $0xc8] sm:$0xff]   ;;  %v2918_v4 = vld [vmem:[%s3885_s1 + $0xd0] sm:$0xff]   ;;  %v2920_v6 = vld [vmem:[%s3885_s1 + $0xd8] sm:$0xff]  }
  0x18   :  { %2717 = vmatpush3.bf16.msra.mxu0 %v2861_v11  ;;  %2638 = vmatprep.subr.bf16.mxu1 %v2862_v14  ;;  %v2917_v3 = vld [vmem:[%s3886_s0 + $0xc8] sm:$0xff]   ;;  %v2919_v5 = vld [vmem:[%s3886_s0 + $0xd0] sm:$0xff]   ;;  %v2921_v7 = vld [vmem:[%s3886_s0 + $0xd8] sm:$0xff]  }
  0x19   :  { %2718 = vmatprep.subr.bf16.mxu0 %v2863_v15  ;;  %v2922_v8 = vld [vmem:[%s3885_s1 + $0xe0] sm:$0xff]   ;;  %v2924_v10 = vld [vmem:[%s3885_s1 + $0xe8] sm:$0xff]   ;;  %v2926_v12 = vld [vmem:[%s3885_s1 + $0xf0] sm:$0xff]  }
  0x1a   :  { %v2923_v9 = vld [vmem:[%s3886_s0 + $0xe0] sm:$0xff]   ;;  %v2925_v11 = vld [vmem:[%s3886_s0 + $0xe8] sm:$0xff]   ;;  %v2927_v13 = vld [vmem:[%s3886_s0 + $0xf0] sm:$0xff]  }
  0x1b   :  { %2639 = vmatpush3.bf16.msra.mxu1 %v2862_v14  ;;  %v2928_v14 = vld [vmem:[%s3885_s1 + $0xf8] sm:$0xff]  }
  0x1c   :  { %2719 = vmatpush3.bf16.msra.mxu0 %v2863_v15  ;;  %2640 = vmatprep.subr.bf16.mxu1 %v2864_v16  ;;  %v2929_v15 = vld [vmem:[%s3886_s0 + $0xf8] sm:$0xff]  }
  0x1d   :  { %2720 = vmatprep.subr.bf16.mxu0 %v2865_v17 }
  0x1f   :  { %2641 = vmatpush3.bf16.msra.mxu1 %v2864_v16 }
  0x20   :  { %2721 = vmatpush3.bf16.msra.mxu0 %v2865_v17 }
  0x22   :  { %2643 = vmatmul.mubr.bf16.vlgmr.msra.gmra.mrb[0].mxu1 %v2868_v18  ;;  %v3460_v18 = vld [vmem:[%s3887_s4] ss:$0 sm:$0xff] }
  0x23   :  { %2723 = vmatmul.mubr.bf16.vlgmr.msra.gmra.mrb[0].mxu0 %v2869_v19  ;;  %2646 = vmatprep.mubr.bf16.mxu1 %v2870_v20 }
  0x24   :  { %2726 = vmatprep.mubr.bf16.mxu0 %v2871_v21 }
  0x2a   :  { %2647 = vmatmul.mubr.bf16.gmra.mrb[4].mxu1 %v2872_v22 }
  0x2b   :  { %2727 = vmatmul.mubr.bf16.gmra.mrb[4].mxu0 %v2873_v23  ;;  %2650 = vmatprep.mubr.bf16.mxu1 %v2874_v24 }
  0x2c   :  { %2730 = vmatprep.mubr.bf16.mxu0 %v2875_v25 }
  0x32   :  { %2651 = vmatmul.mubr.bf16.gmra.mrb[8].mxu1 %v2876_v26 }
  0x33   :  { %2731 = vmatmul.mubr.bf16.gmra.mrb[8].mxu0 %v2877_v27  ;;  %2654 = vmatprep.mubr.bf16.mxu1 %v2878_v28 }
  0x34   :  { %2734 = vmatprep.mubr.bf16.mxu0 %v2879_v29 }
  0x3a   :  { %2655 = vmatmul.mubr.bf16.gmra.mrb[12].mxu1 %v2880_v30 }
  0x3b   :  { %2735 = vmatmul.mubr.bf16.gmra.mrb[12].mxu0 %v2881_v31  ;;  %2658 = vmatprep.mubr.bf16.mxu1 %v2882_v32 }
  0x3c   :  { %2738 = vmatprep.mubr.bf16.mxu0 %v2883_v33 }
  0x42   :  { %2659 = vmatmul.mubr.bf16.gmra.mrb[16].mxu1 %v2884_v34 }
  0x43   :  { %2739 = vmatmul.mubr.bf16.gmra.mrb[16].mxu0 %v2885_v35  ;;  %2662 = vmatprep.mubr.bf16.mxu1 %v2886_v36 }
  0x44   :  { %2742 = vmatprep.mubr.bf16.mxu0 %v2887_v37 }
  0x4a   :  { %2663 = vmatmul.mubr.bf16.gmra.mrb[20].mxu1 %v2888_v38 }
  0x4b   :  { %2743 = vmatmul.mubr.bf16.gmra.mrb[20].mxu0 %v2889_v39  ;;  %2666 = vmatprep.mubr.bf16.mxu1 %v2890_v40 }
  0x4c   :  { %2746 = vmatprep.mubr.bf16.mxu0 %v2891_v41 }
  0x52   :  { %2667 = vmatmul.mubr.bf16.gmra.mrb[24].mxu1 %v2892_v42 }
  0x53   :  { %2747 = vmatmul.mubr.bf16.gmra.mrb[24].mxu0 %v2893_v43  ;;  %2670 = vmatprep.mubr.bf16.mxu1 %v2894_v44 }
  0x54   :  { %2750 = vmatprep.mubr.bf16.mxu0 %v2895_v45 }
  0x5a   :  { %2671 = vmatmul.mubr.bf16.gmra.mrb[28].mxu1 %v2896_v46 }
  0x5b   :  { %2751 = vmatmul.mubr.bf16.gmra.mrb[28].mxu0 %v2897_v47  ;;  %2674 = vmatprep.mubr.bf16.mxu1 %v2898_v48 }
  0x5c   :  { %2754 = vmatprep.mubr.bf16.mxu0 %v2899_v49 }
  0x62   :  { %2675 = vmatmul.mubr.bf16.gmra.mrb[32].mxu1 %v2900_v50 }
  0x63   :  { %2755 = vmatmul.mubr.bf16.gmra.mrb[32].mxu0 %v2901_v51  ;;  %2678 = vmatprep.mubr.bf16.mxu1 %v2902_v52 }
  0x64   :  { %2758 = vmatprep.mubr.bf16.mxu0 %v2903_v53 }
  0x6a   :  { %2679 = vmatmul.mubr.bf16.gmra.mrb[36].mxu1 %v2904_v54 }
  0x6b   :  { %2759 = vmatmul.mubr.bf16.gmra.mrb[36].mxu0 %v2905_v55  ;;  %2682 = vmatprep.mubr.bf16.mxu1 %v2906_v56 }
  0x6c   :  { %2762 = vmatprep.mubr.bf16.mxu0 %v2907_v57 }
  0x72   :  { %2683 = vmatmul.mubr.bf16.gmra.mrb[40].mxu1 %v2908_v58 }
  0x73   :  { %2763 = vmatmul.mubr.bf16.gmra.mrb[40].mxu0 %v2909_v59  ;;  %2686 = vmatprep.mubr.bf16.mxu1 %v2910_v60 }
  0x74   :  { %2766 = vmatprep.mubr.bf16.mxu0 %v2911_v61 }
  0x7a   :  { %2687 = vmatmul.mubr.bf16.gmra.mrb[44].mxu1 %v2912_v62 }
  0x7b   :  { %2767 = vmatmul.mubr.bf16.gmra.mrb[44].mxu0 %v2913_v63  ;;  %2690 = vmatprep.mubr.bf16.mxu1 %v2914_v0 }
  0x7c   :  { %2770 = vmatprep.mubr.bf16.mxu0 %v2915_v1 }
  0x82   :  { %2691 = vmatmul.mubr.bf16.gmra.mrb[48].mxu1 %v2916_v2 }
  0x83   :  { %2771 = vmatmul.mubr.bf16.gmra.mrb[48].mxu0 %v2917_v3  ;;  %2694 = vmatprep.mubr.bf16.mxu1 %v2918_v4 }
  0x84   :  { %2774 = vmatprep.mubr.bf16.mxu0 %v2919_v5 }
  0x8a   :  { %2695 = vmatmul.mubr.bf16.gmra.mrb[52].mxu1 %v2920_v6 }
  0x8b   :  { %2775 = vmatmul.mubr.bf16.gmra.mrb[52].mxu0 %v2921_v7  ;;  %2698 = vmatprep.mubr.bf16.mxu1 %v2922_v8 }
  0x8c   :  { %2778 = vmatprep.mubr.bf16.mxu0 %v2923_v9 }
  0x92   :  { %2699 = vmatmul.mubr.bf16.gmra.mrb[56].mxu1 %v2924_v10 }
  0x93   :  { %2779 = vmatmul.mubr.bf16.gmra.mrb[56].mxu0 %v2925_v11  ;;  %2702 = vmatprep.mubr.bf16.mxu1 %v2926_v12 }
  0x94   :  { %2782 = vmatprep.mubr.bf16.mxu0 %v2927_v13 }
  0x9a   :  { %2703 = vmatmul.mubr.bf16.gmra.mrb[60].mxu1 %v2928_v14 }
  0x9b   :  { %2783 = vmatmul.mubr.bf16.gmra.mrb[60].mxu0 %v2929_v15 }
  0xf5   :  { %v2644_v16 = vpop.f32.mrb[0].mxu1 }
  0xf6   :  { %v2724_v17 = vpop.f32.mrb[0].mxu0  ;;  %v455_v19 = vpop.f32.mrb[1].mxu1 }
  0xf7   :  { %v993_v20 = vadd.f32 %v2724_v17, %v2644_v16  ;;  %v984_v21 = vpop.f32.mrb[1].mxu0  ;;  %v2645_v22 = vpop.f32.mrb[2].mxu1 }
  0xf8   :  { %v985_v23 = vadd.f32 %v984_v21, %v455_v19  ;;  %v2725_v24 = vpop.f32.mrb[2].mxu0  ;;  %v458_v25 = vpop.f32.mrb[3].mxu1 }
  0xf9   :  { %v3463_v26 = vadd.f32 %v3460_v18, %v993_v20  ;;  %v996_v27 = vadd.f32 %v2725_v24, %v2645_v22  ;;  %v987_v28 = vpop.f32.mrb[3].mxu0 }
  0xfa   :  { %v3466_v29 = vadd.f32 %v3460_v18, %v985_v23  ;;  %v988_v30 = vadd.f32 %v987_v28, %v458_v25 }
  0xfb   :  { %v2165_v31 = vmul.f32 -1.442695, %v3463_v26  ;;  %v3470_v32 = vadd.f32 %v3460_v18, %v996_v27 }
  0xfc   :  { %v2163_v33 = vmul.f32 -1.442695, %v3466_v29  ;;  %v3474_v34 = vadd.f32 %v3460_v18, %v988_v30 }
  0xfd   :  { %2930 = vpow2.f32 %v2165_v31  ;;  %v2166_v35 = vmul.f32 -1.442695, %v3470_v32  ;;  %v2648_v36 = vpop.f32.mrb[4].mxu1 }
  0xfe   :  { %2932 = vpow2.f32 %v2163_v33  ;;  %v2164_v37 = vmul.f32 -1.442695, %v3474_v34  ;;  %v2728_v38 = vpop.f32.mrb[4].mxu0  ;;  %v471_v39 = vpop.f32.mrb[5].mxu1 }
  0xff   :  { %2934 = vpow2.f32 %v2166_v35  ;;  %v1009_v40 = vadd.f32 %v2728_v38, %v2648_v36  ;;  %v1000_v41 = vpop.f32.mrb[5].mxu0  ;;  %v2649_v42 = vpop.f32.mrb[6].mxu1 }
 0x100   :  { %2936 = vpow2.f32 %v2164_v37  ;;  %v1001_v43 = vadd.f32 %v1000_v41, %v471_v39  ;;  %v2729_v44 = vpop.f32.mrb[6].mxu0  ;;  %v474_v45 = vpop.f32.mrb[7].mxu1 }
 0x101   :  { %v3479_v46 = vadd.f32 %v3460_v18, %v1009_v40  ;;  %v1012_v47 = vadd.f32 %v2729_v44, %v2649_v42  ;;  %v1003_v48 = vpop.f32.mrb[7].mxu0 }
 0x102   :  { %v3482_v49 = vadd.f32 %v3460_v18, %v1001_v43  ;;  %v1004_v50 = vadd.f32 %v1003_v48, %v474_v45 }
 0x103   :  { %v2169_v51 = vmul.f32 -1.442695, %v3479_v46  ;;  %v3486_v52 = vadd.f32 %v3460_v18, %v1012_v47 }
 0x104   :  { %v2167_v53 = vmul.f32 -1.442695, %v3482_v49  ;;  %v3490_v54 = vadd.f32 %v3460_v18, %v1004_v50 }
 0x105   :  { %2938 = vpow2.f32 %v2169_v51  ;;  %v2170_v55 = vmul.f32 -1.442695, %v3486_v52  ;;  %v2652_v56 = vpop.f32.mrb[8].mxu1 }
 0x106   :  { %2940 = vpow2.f32 %v2167_v53  ;;  %v2168_v57 = vmul.f32 -1.442695, %v3490_v54  ;;  %v2732_v58 = vpop.f32.mrb[8].mxu0  ;;  %v487_v59 = vpop.f32.mrb[9].mxu1 }
 0x107   :  { %v2931_v60 = vpop.eup %2930  ;;  %2942 = vpow2.f32 %v2170_v55  ;;  %v1025_v61 = vadd.f32 %v2732_v58, %v2652_v56  ;;  %v1016_v62 = vpop.f32.mrb[9].mxu0 }
 0x108   :  { %v2653_v63 = vpop.f32.mrb[10].mxu1  ;;  %v2933_v0 = vpop.eup %2932  ;;  %v1504_v1 = vadd.f32 1.0, %v2931_v60  ;;  %2944 = vpow2.f32 %v2168_v57  ;;  %v1017_v2 = vadd.f32 %v1016_v62, %v487_v59 }
 0x109   :  { %v2733_v3 = vpop.f32.mrb[10].mxu0  ;;  %v490_v4 = vpop.f32.mrb[11].mxu1  ;;  %v1502_v6 = vadd.f32 1.0, %v2933_v0  ;;  %v3495_v7 = vadd.f32 %v3460_v18, %v1025_v61 }
 0x10a   :  { %v2935_v5 = vpop.eup %2934  ;;  %v1028_v8 = vadd.f32 %v2733_v3, %v2653_v63  ;;  %v1019_v9 = vpop.f32.mrb[11].mxu0  ;;  %2946 = vrcp.f32 %v1504_v1  ;;  %v3498_v12 = vadd.f32 %v3460_v18, %v1017_v2 }
 0x10b   :  { %v2937_v10 = vpop.eup %2936  ;;  %v1505_v11 = vadd.f32 1.0, %v2935_v5  ;;  %v1020_v13 = vadd.f32 %v1019_v9, %v490_v4  ;;  %2948 = vrcp.f32 %v1502_v6  ;;  %v2173_v15 = vmul.f32 -1.442695, %v3495_v7 }
 0x10c   :  { %v1503_v14 = vadd.f32 1.0, %v2937_v10  ;;  %v3502_v16 = vadd.f32 %v3460_v18, %v1028_v8  ;;  %v2171_v17 = vmul.f32 -1.442695, %v3498_v12 }
 0x10d   :  { %2950 = vrcp.f32 %v1505_v11  ;;  %v3506_v19 = vadd.f32 %v3460_v18, %v1020_v13  ;;  %v2656_v21 = vpop.f32.mrb[12].mxu1 }
 0x10e   :  { %2952 = vrcp.f32 %v1503_v14  ;;  %v2174_v20 = vmul.f32 -1.442695, %v3502_v16  ;;  %v2736_v23 = vpop.f32.mrb[12].mxu0  ;;  %v503_v24 = vpop.f32.mrb[13].mxu1 }
 0x10f   :  { %2954 = vpow2.f32 %v2173_v15  ;;  %v2172_v22 = vmul.f32 -1.442695, %v3506_v19  ;;  %v2939_v25 = vpop.eup %2938  ;;  %v1041_v27 = vadd.f32 %v2736_v23, %v2656_v21  ;;  %v1032_v28 = vpop.f32.mrb[13].mxu0 }
 0x110   :  { %2956 = vpow2.f32 %v2171_v17  ;;  %v2657_v30 = vpop.f32.mrb[14].mxu1  ;;  %v2941_v31 = vpop.eup %2940  ;;  %v1508_v33 = vadd.f32 1.0, %v2939_v25  ;;  %v1033_v35 = vadd.f32 %v1032_v28, %v503_v24 }
 0x111   :  { %2958 = vpow2.f32 %v2174_v20  ;;  %v2737_v36 = vpop.f32.mrb[14].mxu0  ;;  %v506_v37 = vpop.f32.mrb[15].mxu1  ;;  %v1506_v39 = vadd.f32 1.0, %v2941_v31  ;;  %v3511_v40 = vadd.f32 %v3460_v18, %v1041_v27 }
 0x112   :  { %v2943_v38 = vpop.eup %2942  ;;  %2960 = vpow2.f32 %v2172_v22  ;;  %v1044_v41 = vadd.f32 %v2737_v36, %v2657_v30  ;;  %v1035_v42 = vpop.f32.mrb[15].mxu0  ;;  %v3514_v45 = vadd.f32 %v3460_v18, %v1033_v35 }
 0x113   :  { %v2945_v43 = vpop.eup %2944  ;;  %2962 = vrcp.f32 %v1508_v33  ;;  %v1509_v44 = vadd.f32 1.0, %v2943_v38  ;;  %v1036_v47 = vadd.f32 %v1035_v42, %v506_v37  ;;  %v2177_v50 = vmul.f32 -1.442695, %v3511_v40 }
 0x114   :  { %2964 = vrcp.f32 %v1506_v39  ;;  %v1507_v48 = vadd.f32 1.0, %v2945_v43  ;;  %v3518_v51 = vadd.f32 %v3460_v18, %v1044_v41  ;;  %v2947_v53 = vpop.eup %2946  ;;  %v2175_v55 = vmul.f32 -1.442695, %v3514_v45 }
 0x115   :  { %2966 = vrcp.f32 %v1509_v44  ;;  %v3522_v56 = vadd.f32 %v3460_v18, %v1036_v47  ;;  %v2949_v57 = vpop.eup %2948  ;;  %v2660_v59 = vpop.f32.mrb[16].mxu1  ;;  %v1696_v1 = vmul.f32 %v2947_v53, %v3463_v26 }
 0x116   :  { %2968 = vrcp.f32 %v1507_v48  ;;  %v2178_v58 = vmul.f32 -1.442695, %v3518_v51  ;;  %v2740_v62 = vpop.f32.mrb[16].mxu0  ;;  %v519_v63 = vpop.f32.mrb[17].mxu1  ;;  %v1694_v8 = vmul.f32 %v2949_v57, %v3466_v29 }
 0x117   :  { %v2951_v60 = vpop.eup %2950  ;;  %2970 = vpow2.f32 %v2177_v50  ;;  %v2176_v61 = vmul.f32 -1.442695, %v3522_v56  ;;  %v1057_v3 = vadd.f32 %v2740_v62, %v2660_v59  ;;  %v1048_v4 = vpop.f32.mrb[17].mxu0 }
 0x118   :  { %v2953_v0 = vpop.eup %2952  ;;  %v1697_v2 = vmul.f32 %v2951_v60, %v3470_v32  ;;  %2972 = vpow2.f32 %v2175_v55  ;;  %v2661_v5 = vpop.f32.mrb[18].mxu1  ;;  %v1049_v10 = vadd.f32 %v1048_v4, %v519_v63 }
 0x119   :  { %v2955_v6 = vpop.eup %2954  ;;  %v1695_v9 = vmul.f32 %v2953_v0, %v3474_v34  ;;  %2974 = vpow2.f32 %v2178_v58  ;;  %v2741_v11 = vpop.f32.mrb[18].mxu0  ;;  %v3531_v26 = vadd.f32 %v3460_v18, %v1057_v3 }
 0x11a   :  { %v522_v13 = vpop.f32.mrb[19].mxu1  ;;  %v2957_v14 = vpop.eup %2956  ;;  %v2363_v15 = vpack.c.bf16 %v1697_v2, %v1696_v1  ;;  %v1512_v17 = vadd.f32 1.0, %v2955_v6  ;;  %2976 = vpow2.f32 %v2176_v61  ;;  %v3534_v23 = vadd.f32 %v3460_v18, %v1049_v10 }
 0x11b   :  { %v1051_v32 = vpop.f32.mrb[19].mxu0  ;;  %v2959_v20 = vpop.eup %2958  ;;  %v2358_v21 = vpack.c.bf16 %v1695_v9, %v1694_v8  ;;  %v1510_v22 = vadd.f32 1.0, %v2957_v14  ;;  %v1060_v29 = vadd.f32 %v2741_v11, %v2661_v5  ;;  %v2181_v25 = vmul.f32 -1.442695, %v3531_v26 }
 0x11c   :  { %v2961_v34 = vpop.eup %2960  ;;  %2515 = vst [vmem:[%s3888_s5 + $0x8] sm:$0xff] %v2363_v15   ;;  %2978 = vrcp.f32 %v1512_v17  ;;  %v1513_v24 = vadd.f32 1.0, %v2959_v20  ;;  %v1052_v27 = vadd.f32 %v1051_v32, %v522_v13  ;;  %v2179_v31 = vmul.f32 -1.442695, %v3534_v23 }
 0x11d   :  { %v2963_v28 = vpop.eup %2962  ;;  %2359 = vst [vmem:[%s3888_s5] sm:$0xff] %v2358_v21   ;;  %2980 = vrcp.f32 %v1510_v22  ;;  %v1511_v30 = vadd.f32 1.0, %v2961_v34  ;;  %v3545_v33 = vadd.f32 %v3460_v18, %v1060_v29  ;;  %v2664_v37 = vpop.f32.mrb[20].mxu1 }
 0x11e   :  { %v2965_v35 = vpop.eup %2964  ;;  %2982 = vrcp.f32 %v1513_v24  ;;  %v3548_v36 = vadd.f32 %v3460_v18, %v1052_v27  ;;  %v1700_v39 = vmul.f32 %v2963_v28, %v3479_v46  ;;  %v2744_v42 = vpop.f32.mrb[20].mxu0 }
 0x11f   :  { %v2967_v38 = vpop.eup %2966  ;;  %2984 = vrcp.f32 %v1511_v30  ;;  %v2182_v41 = vmul.f32 -1.442695, %v3545_v33  ;;  %v535_v43 = vpop.f32.mrb[21].mxu1  ;;  %v1073_v50 = vadd.f32 %v2744_v42, %v2664_v37  ;;  %v1698_v58 = vmul.f32 %v2965_v35, %v3482_v49 }
 0x120   :  { %v2969_v44 = vpop.eup %2968  ;;  %v1701_v47 = vmul.f32 %v2967_v38, %v3486_v52  ;;  %2986 = vpow2.f32 %v2181_v25  ;;  %v2180_v48 = vmul.f32 -1.442695, %v3548_v36  ;;  %v1064_v53 = vpop.f32.mrb[21].mxu0 }
 0x121   :  { %v2665_v55 = vpop.f32.mrb[22].mxu1  ;;  %v2971_v57 = vpop.eup %2970  ;;  %v1699_v59 = vmul.f32 %v2969_v44, %v3490_v54  ;;  %2988 = vpow2.f32 %v2179_v31  ;;  %v1065_v46 = vadd.f32 %v1064_v53, %v535_v43  ;;  %v3557_v52 = vadd.f32 %v3460_v18, %v1073_v50 }
 0x122   :  { %v2745_v60 = vpop.f32.mrb[22].mxu0  ;;  %v538_v61 = vpop.f32.mrb[23].mxu1  ;;  %v2373_v63 = vpack.c.bf16 %v1701_v47, %v1700_v39  ;;  %v1516_v0 = vadd.f32 1.0, %v2971_v57  ;;  %2990 = vpow2.f32 %v2182_v41 }
 0x123   :  { %v2973_v62 = vpop.eup %2972  ;;  %v1067_v1 = vpop.f32.mrb[23].mxu0  ;;  %v2368_v3 = vpack.c.bf16 %v1699_v59, %v1698_v58  ;;  %2992 = vpow2.f32 %v2180_v48  ;;  %v3560_v49 = vadd.f32 %v3460_v18, %v1065_v46  ;;  %v2185_v6 = vmul.f32 -1.442695, %v3557_v52 }
 0x124   :  { %v2975_v2 = vpop.eup %2974  ;;  %v1514_v4 = vadd.f32 1.0, %v2973_v62  ;;  %2517 = vst [vmem:[%s3888_s5 + $0x18] sm:$0xff] %v2373_v63   ;;  %2994 = vrcp.f32 %v1516_v0  ;;  %v1076_v8 = vadd.f32 %v2745_v60, %v2665_v55  ;;  %v1068_v11 = vadd.f32 %v1067_v1, %v538_v61 }
 0x125   :  { %v2977_v54 = vpop.eup %2976  ;;  %v1517_v5 = vadd.f32 1.0, %v2975_v2  ;;  %2516 = vst [vmem:[%s3888_s5 + $0x10] sm:$0xff] %v2368_v3   ;;  %v2183_v10 = vmul.f32 -1.442695, %v3560_v49  ;;  %v2668_v15 = vpop.f32.mrb[24].mxu1 }
 0x126   :  { %2996 = vrcp.f32 %v1514_v4  ;;  %v1515_v9 = vadd.f32 1.0, %v2977_v54  ;;  %v2979_v13 = vpop.eup %2978  ;;  %v3571_v14 = vadd.f32 %v3460_v18, %v1076_v8  ;;  %v3575_v20 = vadd.f32 %v3460_v18, %v1068_v11  ;;  %v2748_v21 = vpop.f32.mrb[24].mxu0 }
 0x127   :  { %2998 = vrcp.f32 %v1517_v5  ;;  %v2981_v17 = vpop.eup %2980  ;;  %v1704_v32 = vmul.f32 %v2979_v13, %v3495_v7  ;;  %v551_v22 = vpop.f32.mrb[25].mxu1  ;;  %v1089_v25 = vadd.f32 %v2748_v21, %v2668_v15 }
 0x128   :  { %3000 = vrcp.f32 %v1515_v9  ;;  %v2983_v29 = vpop.eup %2982  ;;  %v1702_v34 = vmul.f32 %v2981_v17, %v3498_v12  ;;  %v2186_v24 = vmul.f32 -1.442695, %v3571_v14  ;;  %v1080_v27 = vpop.f32.mrb[25].mxu0  ;;  %v2184_v7 = vmul.f32 -1.442695, %v3575_v20 }
 0x129   :  { %3002 = vpow2.f32 %v2185_v6  ;;  %v2669_v28 = vpop.f32.mrb[26].mxu1  ;;  %v2985_v30 = vpop.eup %2984  ;;  %v1705_v31 = vmul.f32 %v2983_v29, %v3502_v16  ;;  %v1081_v35 = vadd.f32 %v1080_v27, %v551_v22  ;;  %v3583_v12 = vadd.f32 %v3460_v18, %v1089_v25 }
 0x12a   :  { %3004 = vpow2.f32 %v2183_v10  ;;  %v2749_v37 = vpop.f32.mrb[26].mxu0  ;;  %v554_v38 = vpop.f32.mrb[27].mxu1  ;;  %v1703_v41 = vmul.f32 %v2985_v30, %v3506_v19 }
 0x12b   :  { %v2987_v39 = vpop.eup %2986  ;;  %3006 = vpow2.f32 %v2186_v24  ;;  %v1092_v42 = vadd.f32 %v2749_v37, %v2669_v28  ;;  %v1083_v43 = vpop.f32.mrb[27].mxu0  ;;  %v2383_v47 = vpack.c.bf16 %v1705_v31, %v1704_v32  ;;  %v3586_v16 = vadd.f32 %v3460_v18, %v1081_v35 }
 0x12c   :  { %v2989_v44 = vpop.eup %2988  ;;  %v1520_v48 = vadd.f32 1.0, %v2987_v39  ;;  %3008 = vpow2.f32 %v2184_v7  ;;  %v2378_v53 = vpack.c.bf16 %v1703_v41, %v1702_v34  ;;  %v2189_v59 = vmul.f32 -1.442695, %v3583_v12 }
 0x12d   :  { %v2991_v50 = vpop.eup %2990  ;;  %v1518_v55 = vadd.f32 1.0, %v2989_v44  ;;  %v3589_v57 = vadd.f32 %v3460_v18, %v1092_v42  ;;  %2519 = vst [vmem:[%s3888_s5 + $0x28] sm:$0xff] %v2383_v47   ;;  %v1084_v46 = vadd.f32 %v1083_v43, %v554_v38  ;;  %v2187_v62 = vmul.f32 -1.442695, %v3586_v16  ;;  %v2672_v63 = vpop.f32.mrb[28].mxu1 }
 0x12e   :  { %v2993_v19 = vpop.eup %2992  ;;  %3010 = vrcp.f32 %v1520_v48  ;;  %v1521_v58 = vadd.f32 1.0, %v2991_v50  ;;  %2518 = vst [vmem:[%s3888_s5 + $0x20] sm:$0xff] %v2378_v53   ;;  %v2752_v3 = vpop.f32.mrb[28].mxu0 }
 0x12f   :  { %v2995_v60 = vpop.eup %2994  ;;  %3012 = vrcp.f32 %v1518_v55  ;;  %v1519_v61 = vadd.f32 1.0, %v2993_v19  ;;  %v2190_v1 = vmul.f32 -1.442695, %v3589_v57  ;;  %v3601_v2 = vadd.f32 %v3460_v18, %v1084_v46  ;;  %v567_v4 = vpop.f32.mrb[29].mxu1 }
 0x130   :  { %v2997_v0 = vpop.eup %2996  ;;  %3014 = vrcp.f32 %v1521_v58  ;;  %v1708_v5 = vmul.f32 %v2995_v60, %v3511_v40  ;;  %v1105_v8 = vadd.f32 %v2752_v3, %v2672_v63  ;;  %v1096_v9 = vpop.f32.mrb[29].mxu0 }
 0x131   :  { %v2999_v54 = vpop.eup %2998  ;;  %v1706_v6 = vmul.f32 %v2997_v0, %v3514_v45  ;;  %3016 = vrcp.f32 %v1519_v61  ;;  %v2673_v10 = vpop.f32.mrb[30].mxu1  ;;  %v2188_v15 = vmul.f32 -1.442695, %v3601_v2  ;;  %v1097_v17 = vadd.f32 %v1096_v9, %v567_v4 }
 0x132   :  { %v3001_v11 = vpop.eup %3000  ;;  %v1709_v13 = vmul.f32 %v2999_v54, %v3518_v51  ;;  %3018 = vpow2.f32 %v2189_v59  ;;  %v2753_v32 = vpop.f32.mrb[30].mxu0  ;;  %v3609_v40 = vadd.f32 %v3460_v18, %v1105_v8 }
 0x133   :  { %v570_v21 = vpop.f32.mrb[31].mxu1  ;;  %v3003_v22 = vpop.eup %3002  ;;  %v1707_v29 = vmul.f32 %v3001_v11, %v3522_v56  ;;  %3020 = vpow2.f32 %v2187_v62  ;;  %v1108_v45 = vadd.f32 %v2753_v32, %v2673_v10  ;;  %v3612_v51 = vadd.f32 %v3460_v18, %v1097_v17 }
 0x134   :  { %v1099_v34 = vpop.f32.mrb[31].mxu0  ;;  %v3005_v24 = vpop.eup %3004  ;;  %v2393_v25 = vpack.c.bf16 %v1709_v13, %v1708_v5  ;;  %v1524_v27 = vadd.f32 1.0, %v3003_v22  ;;  %3022 = vpow2.f32 %v2190_v1  ;;  %v2193_v35 = vmul.f32 -1.442695, %v3609_v40 }
 0x135   :  { %v3007_v28 = vpop.eup %3006  ;;  %v2388_v30 = vpack.c.bf16 %v1707_v29, %v1706_v6  ;;  %v1522_v31 = vadd.f32 1.0, %v3005_v24  ;;  %3024 = vpow2.f32 %v2188_v15  ;;  %v3619_v37 = vadd.f32 %v3460_v18, %v1108_v45  ;;  %v2676_v42 = vpop.f32.mrb[32].mxu1 }
 0x136   :  { %v3009_v7 = vpop.eup %3008  ;;  %2521 = vst [vmem:[%s3888_s5 + $0x38] sm:$0xff] %v2393_v25   ;;  %3026 = vrcp.f32 %v1524_v27  ;;  %v1525_v56 = vadd.f32 1.0, %v3007_v28  ;;  %v2191_v39 = vmul.f32 -1.442695, %v3612_v51  ;;  %v1100_v41 = vadd.f32 %v1099_v34, %v570_v21  ;;  %v2756_v47 = vpop.f32.mrb[32].mxu0 }
 0x137   :  { %2520 = vst [vmem:[%s3888_s5 + $0x30] sm:$0xff] %v2388_v30   ;;  %3028 = vrcp.f32 %v1522_v31  ;;  %v1523_v38 = vadd.f32 1.0, %v3009_v7  ;;  %v2194_v44 = vmul.f32 -1.442695, %v3619_v37  ;;  %v583_v48 = vpop.f32.mrb[33].mxu1  ;;  %v1121_v55 = vadd.f32 %v2756_v47, %v2676_v42  ;;  %v1112_v19 = vpop.f32.mrb[33].mxu0 }
 0x138   :  { %v3011_v43 = vpop.eup %3010  ;;  %3030 = vrcp.f32 %v1525_v56  ;;  %v3627_v53 = vadd.f32 %v3460_v18, %v1100_v41  ;;  %v2677_v58 = vpop.f32.mrb[34].mxu1  ;;  %v1113_v61 = vadd.f32 %v1112_v19, %v583_v48 }
 0x139   :  { %v3013_v50 = vpop.eup %3012  ;;  %3032 = vrcp.f32 %v1523_v38  ;;  %v1712_v46 = vmul.f32 %v3011_v43, %v3531_v26  ;;  %v2757_v62 = vpop.f32.mrb[34].mxu0  ;;  %v3634_v4 = vadd.f32 %v3460_v18, %v1121_v55 }
 0x13a   :  { %v3015_v59 = vpop.eup %3014  ;;  %v1710_v60 = vmul.f32 %v3013_v50, %v3534_v23  ;;  %3034 = vpow2.f32 %v2193_v35  ;;  %v586_v63 = vpop.f32.mrb[35].mxu1  ;;  %v2192_v3 = vmul.f32 -1.442695, %v3627_v53  ;;  %v3638_v26 = vadd.f32 %v3460_v18, %v1113_v61 }
 0x13b   :  { %v3017_v0 = vpop.eup %3016  ;;  %v1713_v1 = vmul.f32 %v3015_v59, %v3545_v33  ;;  %3036 = vpow2.f32 %v2191_v39  ;;  %v1115_v54 = vpop.f32.mrb[35].mxu0  ;;  %v1124_v23 = vadd.f32 %v2757_v62, %v2677_v58  ;;  %v2197_v32 = vmul.f32 -1.442695, %v3634_v4 }
 0x13c   :  { %v3019_v5 = vpop.eup %3018  ;;  %v1711_v6 = vmul.f32 %v3017_v0, %v3548_v36  ;;  %3038 = vpow2.f32 %v2194_v44  ;;  %v1116_v21 = vadd.f32 %v1115_v54, %v586_v63  ;;  %v2195_v34 = vmul.f32 -1.442695, %v3638_v26 }
 0x13d   :  { %v3021_v8 = vpop.eup %3020  ;;  %v2403_v9 = vpack.c.bf16 %v1713_v1, %v1712_v46  ;;  %v1528_v10 = vadd.f32 1.0, %v3019_v5  ;;  %3040 = vpow2.f32 %v2192_v3  ;;  %v3641_v15 = vadd.f32 %v3460_v18, %v1124_v23  ;;  %v2680_v22 = vpop.f32.mrb[36].mxu1 }
 0x13e   :  { %v3023_v33 = vpop.eup %3022  ;;  %v2398_v11 = vpack.c.bf16 %v1711_v6, %v1710_v60  ;;  %v1526_v13 = vadd.f32 1.0, %v3021_v8  ;;  %v2760_v24 = vpop.f32.mrb[36].mxu0  ;;  %v3653_v30 = vadd.f32 %v3460_v18, %v1116_v21 }
 0x13f   :  { %v3025_v17 = vpop.eup %3024  ;;  %2523 = vst [vmem:[%s3888_s5 + $0x48] sm:$0xff] %v2403_v9   ;;  %3042 = vrcp.f32 %v1528_v10  ;;  %v1529_v36 = vadd.f32 1.0, %v3023_v33  ;;  %v599_v25 = vpop.f32.mrb[37].mxu1  ;;  %v2198_v28 = vmul.f32 -1.442695, %v3641_v15  ;;  %v1137_v31 = vadd.f32 %v2760_v24, %v2680_v22 }
 0x140   :  { %v3027_v29 = vpop.eup %3026  ;;  %2522 = vst [vmem:[%s3888_s5 + $0x40] sm:$0xff] %v2398_v11   ;;  %3044 = vrcp.f32 %v1526_v13  ;;  %v1527_v45 = vadd.f32 1.0, %v3025_v17  ;;  %v1128_v7 = vpop.f32.mrb[37].mxu0  ;;  %v2196_v48 = vmul.f32 -1.442695, %v3653_v30 }
 0x141   :  { %v3029_v27 = vpop.eup %3028  ;;  %3046 = vrcp.f32 %v1529_v36  ;;  %v2681_v56 = vpop.f32.mrb[38].mxu1  ;;  %v1716_v38 = vmul.f32 %v3027_v29, %v3557_v52  ;;  %v1129_v41 = vadd.f32 %v1128_v7, %v599_v25  ;;  %v3660_v50 = vadd.f32 %v3460_v18, %v1137_v31 }
 0x142   :  { %v3031_v35 = vpop.eup %3030  ;;  %v1714_v39 = vmul.f32 %v3029_v27, %v3560_v49  ;;  %3048 = vrcp.f32 %v1527_v45  ;;  %v2761_v42 = vpop.f32.mrb[38].mxu0 }
 0x143   :  { %v602_v43 = vpop.f32.mrb[39].mxu1  ;;  %v3033_v44 = vpop.eup %3032  ;;  %v1717_v47 = vmul.f32 %v3031_v35, %v3571_v14  ;;  %3050 = vpow2.f32 %v2197_v32  ;;  %v3664_v52 = vadd.f32 %v3460_v18, %v1129_v41  ;;  %v1140_v49 = vadd.f32 %v2761_v42, %v2681_v56 }
 0x144   :  { %v1131_v55 = vpop.f32.mrb[39].mxu0  ;;  %v3035_v19 = vpop.eup %3034  ;;  %v1715_v58 = vmul.f32 %v3033_v44, %v3575_v20  ;;  %3052 = vpow2.f32 %v2195_v34  ;;  %v2201_v63 = vmul.f32 -1.442695, %v3660_v50 }
 0x145   :  { %v3037_v59 = vpop.eup %3036  ;;  %v2413_v46 = vpack.c.bf16 %v1717_v47, %v1716_v38  ;;  %v1532_v60 = vadd.f32 1.0, %v3035_v19  ;;  %3054 = vpow2.f32 %v2198_v28  ;;  %v3671_v1 = vadd.f32 %v3460_v18, %v1140_v49  ;;  %v2684_v54 = vpop.f32.mrb[40].mxu1 }
 0x146   :  { %v3039_v14 = vpop.eup %3038  ;;  %v2408_v61 = vpack.c.bf16 %v1715_v58, %v1714_v39  ;;  %v1530_v62 = vadd.f32 1.0, %v3037_v59  ;;  %3056 = vpow2.f32 %v2196_v48  ;;  %v1132_v3 = vadd.f32 %v1131_v55, %v602_v43  ;;  %v2764_v23 = vpop.f32.mrb[40].mxu0 }
 0x147   :  { %v3041_v0 = vpop.eup %3040  ;;  %2525 = vst [vmem:[%s3888_s5 + $0x58] sm:$0xff] %v2413_v46   ;;  %3058 = vrcp.f32 %v1532_v60  ;;  %v1533_v20 = vadd.f32 1.0, %v3039_v14  ;;  %v2199_v6 = vmul.f32 -1.442695, %v3664_v52  ;;  %v615_v8 = vpop.f32.mrb[41].mxu1  ;;  %v1153_v11 = vadd.f32 %v2764_v23, %v2684_v54 }
 0x148   :  { %2524 = vst [vmem:[%s3888_s5 + $0x50] sm:$0xff] %v2408_v61   ;;  %3060 = vrcp.f32 %v1530_v62  ;;  %v1531_v5 = vadd.f32 1.0, %v3041_v0  ;;  %v2202_v10 = vmul.f32 -1.442695, %v3671_v1  ;;  %v3679_v33 = vadd.f32 %v3460_v18, %v1132_v3  ;;  %v1144_v13 = vpop.f32.mrb[41].mxu0  ;;  %v2685_v17 = vpop.f32.mrb[42].mxu1 }
 0x149   :  { %v3043_v9 = vpop.eup %3042  ;;  %3062 = vrcp.f32 %v1533_v20  ;;  %v1145_v21 = vadd.f32 %v1144_v13, %v615_v8  ;;  %v2765_v22 = vpop.f32.mrb[42].mxu0  ;;  %v3685_v25 = vadd.f32 %v3460_v18, %v1153_v11 }
 0x14a   :  { %v3045_v36 = vpop.eup %3044  ;;  %v1720_v32 = vmul.f32 %v3043_v9, %v3583_v12  ;;  %3064 = vrcp.f32 %v1531_v5  ;;  %v618_v29 = vpop.f32.mrb[43].mxu1  ;;  %v2200_v24 = vmul.f32 -1.442695, %v3679_v33  ;;  %v1156_v7 = vadd.f32 %v2765_v22, %v2685_v17 }
 0x14b   :  { %v3047_v45 = vpop.eup %3046  ;;  %v1718_v34 = vmul.f32 %v3045_v36, %v3586_v16  ;;  %3066 = vpow2.f32 %v2201_v63  ;;  %v1147_v27 = vpop.f32.mrb[43].mxu0  ;;  %v3689_v12 = vadd.f32 %v3460_v18, %v1145_v21  ;;  %v2205_v16 = vmul.f32 -1.442695, %v3685_v25 }
 0x14c   :  { %v3049_v28 = vpop.eup %3048  ;;  %v1721_v31 = vmul.f32 %v3047_v45, %v3589_v57  ;;  %3068 = vpow2.f32 %v2199_v6  ;;  %v1148_v38 = vadd.f32 %v1147_v27, %v618_v29  ;;  %v3694_v57 = vadd.f32 %v3460_v18, %v1156_v7 }
 0x14d   :  { %v3051_v56 = vpop.eup %3050  ;;  %v1719_v35 = vmul.f32 %v3049_v28, %v3601_v2  ;;  %3070 = vpow2.f32 %v2202_v10  ;;  %v2688_v48 = vpop.f32.mrb[44].mxu1  ;;  %v2203_v19 = vmul.f32 -1.442695, %v3689_v12 }
 0x14e   :  { %v3053_v39 = vpop.eup %3052  ;;  %v2423_v41 = vpack.c.bf16 %v1721_v31, %v1720_v32  ;;  %v1536_v42 = vadd.f32 1.0, %v3051_v56  ;;  %3072 = vpow2.f32 %v2200_v24  ;;  %v3701_v58 = vadd.f32 %v3460_v18, %v1148_v38  ;;  %v2768_v49 = vpop.f32.mrb[44].mxu0 }
 0x14f   :  { %v3055_v43 = vpop.eup %3054  ;;  %v2418_v44 = vpack.c.bf16 %v1719_v35, %v1718_v34  ;;  %v1534_v47 = vadd.f32 1.0, %v3053_v39  ;;  %3074 = vpow2.f32 %v2205_v16  ;;  %v631_v59 = vpop.f32.mrb[45].mxu1  ;;  %v2206_v14 = vmul.f32 -1.442695, %v3694_v57 }
 0x150   :  { %v3057_v55 = vpop.eup %3056  ;;  %2527 = vst [vmem:[%s3888_s5 + $0x68] sm:$0xff] %v2423_v41   ;;  %3076 = vrcp.f32 %v1536_v42  ;;  %v1537_v2 = vadd.f32 1.0, %v3055_v43  ;;  %v1169_v61 = vadd.f32 %v2768_v49, %v2688_v48  ;;  %v1160_v62 = vpop.f32.mrb[45].mxu0  ;;  %v2204_v20 = vmul.f32 -1.442695, %v3701_v58 }
 0x151   :  { %v3059_v46 = vpop.eup %3058  ;;  %2526 = vst [vmem:[%s3888_s5 + $0x60] sm:$0xff] %v2418_v44   ;;  %3078 = vrcp.f32 %v1534_v47  ;;  %v1535_v60 = vadd.f32 1.0, %v3057_v55  ;;  %v2689_v63 = vpop.f32.mrb[46].mxu1  ;;  %v1161_v3 = vadd.f32 %v1160_v62, %v631_v59  ;;  %v3737_v59 = vld [vmem:[%s3887_s4] ss:$0 sm:$0xff] }
 0x152   :  { %v3061_v0 = vpop.eup %3060  ;;  %3080 = vrcp.f32 %v1537_v2  ;;  %v2769_v54 = vpop.f32.mrb[46].mxu0  ;;  %v1724_v23 = vmul.f32 %v3059_v46, %v3609_v40  ;;  %v3710_v8 = vadd.f32 %v3460_v18, %v1169_v61 }
 0x153   :  { %v634_v5 = vpop.f32.mrb[47].mxu1  ;;  %v3063_v6 = vpop.eup %3062  ;;  %3082 = vrcp.f32 %v1535_v60  ;;  %v1172_v9 = vadd.f32 %v2769_v54, %v2689_v63  ;;  %v1722_v13 = vmul.f32 %v3061_v0, %v3612_v51  ;;  %v3717_v40 = vadd.f32 %v3460_v18, %v1161_v3 }
 0x154   :  { %v1163_v10 = vpop.f32.mrb[47].mxu0  ;;  %v3065_v11 = vpop.eup %3064  ;;  %v1725_v17 = vmul.f32 %v3063_v6, %v3619_v37  ;;  %3084 = vpow2.f32 %v2203_v19  ;;  %v2209_v22 = vmul.f32 -1.442695, %v3710_v8 }
 0x155   :  { %v1164_v36 = vadd.f32 %v1163_v10, %v634_v5  ;;  %v3067_v32 = vpop.eup %3066  ;;  %v1723_v21 = vmul.f32 %v3065_v11, %v3627_v53  ;;  %3086 = vpow2.f32 %v2206_v14  ;;  %v3720_v24 = vadd.f32 %v3460_v18, %v1172_v9  ;;  %v2692_v28 = vpop.f32.mrb[48].mxu1 }
 0x156   :  { %v3069_v29 = vpop.eup %3068  ;;  %v2433_v45 = vpack.c.bf16 %v1725_v17, %v1724_v23  ;;  %v1540_v34 = vadd.f32 1.0, %v3067_v32  ;;  %3088 = vpow2.f32 %v2204_v20  ;;  %v2772_v56 = vpop.f32.mrb[48].mxu0  ;;  %v2207_v39 = vmul.f32 -1.442695, %v3717_v40 }
 0x157   :  { %v3071_v51 = vpop.eup %3070  ;;  %v2428_v37 = vpack.c.bf16 %v1723_v21, %v1722_v13  ;;  %v1538_v27 = vadd.f32 1.0, %v3069_v29  ;;  %3090 = vpow2.f32 %v2209_v22  ;;  %v3726_v7 = vadd.f32 %v3460_v18, %v1164_v36  ;;  %v647_v35 = vpop.f32.mrb[49].mxu1 }
 0x158   :  { %v3073_v31 = vpop.eup %3072  ;;  %2529 = vst [vmem:[%s3888_s5 + $0x78] sm:$0xff] %v2433_v45   ;;  %3092 = vrcp.f32 %v1540_v34  ;;  %v1541_v53 = vadd.f32 1.0, %v3071_v51  ;;  %v1185_v41 = vadd.f32 %v2772_v56, %v2692_v28  ;;  %v1176_v42 = vpop.f32.mrb[49].mxu0  ;;  %v2210_v18 = vmul.f32 -1.442695, %v3720_v24 }
 0x159   :  { %v3075_v16 = vpop.eup %3074  ;;  %2528 = vst [vmem:[%s3888_s5 + $0x70] sm:$0xff] %v2428_v37   ;;  %3094 = vrcp.f32 %v1538_v27  ;;  %v1539_v38 = vadd.f32 1.0, %v3073_v31  ;;  %v2693_v43 = vpop.f32.mrb[50].mxu1  ;;  %v1177_v48 = vadd.f32 %v1176_v42, %v647_v35  ;;  %v2208_v49 = vmul.f32 -1.442695, %v3726_v7 }
 0x15a   :  { %v3077_v44 = vpop.eup %3076  ;;  %3096 = vrcp.f32 %v1541_v53  ;;  %v1544_v47 = vadd.f32 1.0, %v3075_v16  ;;  %v2773_v55 = vpop.f32.mrb[50].mxu0  ;;  %v3740_v46 = vadd.f32 %v3737_v59, %v1185_v41 }
 0x15b   :  { %v650_v2 = vpop.f32.mrb[51].mxu1  ;;  %v3079_v19 = vpop.eup %3078  ;;  %3098 = vrcp.f32 %v1539_v38  ;;  %v1188_v60 = vadd.f32 %v2773_v55, %v2693_v43  ;;  %v1728_v62 = vmul.f32 %v3077_v44, %v3634_v4  ;;  %v3744_v63 = vadd.f32 %v3737_v59, %v1177_v48 }
 0x15c   :  { %v1179_v14 = vpop.f32.mrb[51].mxu0  ;;  %v3081_v61 = vpop.eup %3080  ;;  %3100 = vrcp.f32 %v1544_v47  ;;  %v2213_v54 = vmul.f32 -1.442695, %v3740_v46  ;;  %v1726_v23 = vmul.f32 %v3079_v19, %v3638_v26 }
 0x15d   :  { %v1180_v0 = vadd.f32 %v1179_v14, %v650_v2  ;;  %v3083_v20 = vpop.eup %3082  ;;  %v1729_v3 = vmul.f32 %v3081_v61, %v3641_v15  ;;  %3102 = vpow2.f32 %v2207_v39  ;;  %v3749_v5 = vadd.f32 %v3737_v59, %v1188_v60  ;;  %v2696_v15 = vpop.f32.mrb[52].mxu1 }
 0x15e   :  { %v3085_v6 = vpop.eup %3084  ;;  %v1727_v9 = vmul.f32 %v3083_v20, %v3653_v30  ;;  %3104 = vpow2.f32 %v2210_v18  ;;  %v2211_v21 = vmul.f32 -1.442695, %v3744_v63  ;;  %v2776_v22 = vpop.f32.mrb[52].mxu0 }
 0x15f   :  { %v3754_v4 = vadd.f32 %v3737_v59, %v1180_v0  ;;  %v3087_v10 = vpop.eup %3086  ;;  %v2443_v11 = vpack.c.bf16 %v1729_v3, %v1728_v62  ;;  %v1542_v13 = vadd.f32 1.0, %v3085_v6  ;;  %3106 = vpow2.f32 %v2208_v49  ;;  %v663_v29 = vpop.f32.mrb[53].mxu1 }
 0x160   :  { %v3089_v17 = vpop.eup %3088  ;;  %v2438_v36 = vpack.c.bf16 %v1727_v9, %v1726_v23  ;;  %v1545_v32 = vadd.f32 1.0, %v3087_v10  ;;  %3108 = vpow2.f32 %v2213_v54  ;;  %v2214_v45 = vmul.f32 -1.442695, %v3749_v5  ;;  %v1192_v51 = vpop.f32.mrb[53].mxu0 }
 0x161   :  { %v3091_v26 = vpop.eup %3090  ;;  %2531 = vst [vmem:[%s3888_s5 + $0x88] sm:$0xff] %v2443_v11   ;;  %3110 = vrcp.f32 %v1542_v13  ;;  %v1543_v30 = vadd.f32 1.0, %v3089_v17  ;;  %v1201_v34 = vadd.f32 %v2776_v22, %v2696_v15  ;;  %v2697_v37 = vpop.f32.mrb[54].mxu1  ;;  %v2212_v31 = vmul.f32 -1.442695, %v3754_v4 }
 0x162   :  { %v3093_v27 = vpop.eup %3092  ;;  %2530 = vst [vmem:[%s3888_s5 + $0x80] sm:$0xff] %v2438_v36   ;;  %3112 = vrcp.f32 %v1545_v32  ;;  %v1548_v28 = vadd.f32 1.0, %v3091_v26  ;;  %v1193_v53 = vadd.f32 %v1192_v51, %v663_v29  ;;  %v2777_v56 = vpop.f32.mrb[54].mxu0 }
 0x163   :  { %v666_v35 = vpop.f32.mrb[55].mxu1  ;;  %v3095_v16 = vpop.eup %3094  ;;  %v1732_v38 = vmul.f32 %v3093_v27, %v3660_v50  ;;  %3114 = vrcp.f32 %v1543_v30  ;;  %v3767_v39 = vadd.f32 %v3737_v59, %v1201_v34  ;;  %v1204_v41 = vadd.f32 %v2777_v56, %v2697_v37 }
 0x164   :  { %v1195_v42 = vpop.f32.mrb[55].mxu0  ;;  %v3097_v43 = vpop.eup %3096  ;;  %v1730_v44 = vmul.f32 %v3095_v16, %v3664_v52  ;;  %3116 = vrcp.f32 %v1548_v28  ;;  %v3771_v47 = vadd.f32 %v3737_v59, %v1193_v53 }
 0x165   :  { %v1196_v18 = vadd.f32 %v1195_v42, %v666_v35  ;;  %v3099_v48 = vpop.eup %3098  ;;  %v1733_v55 = vmul.f32 %v3097_v43, %v3671_v1  ;;  %3118 = vpow2.f32 %v2211_v21  ;;  %v2217_v50 = vmul.f32 -1.442695, %v3767_v39  ;;  %v2700_v62 = vpop.f32.mrb[56].mxu1 }
 0x166   :  { %v3776_v2 = vadd.f32 %v3737_v59, %v1204_v41  ;;  %v3101_v19 = vpop.eup %3100  ;;  %v1731_v49 = vmul.f32 %v3099_v48, %v3679_v33  ;;  %3120 = vpow2.f32 %v2214_v45  ;;  %v2215_v52 = vmul.f32 -1.442695, %v3771_v47  ;;  %v2780_v54 = vpop.f32.mrb[56].mxu0 }
 0x167   :  { %v3781_v60 = vadd.f32 %v3737_v59, %v1196_v18  ;;  %v3103_v14 = vpop.eup %3102  ;;  %v2453_v61 = vpack.c.bf16 %v1733_v55, %v1732_v38  ;;  %3122 = vpow2.f32 %v2212_v31  ;;  %v1736_v20 = vmul.f32 %v3101_v19, %v3685_v25  ;;  %v679_v6 = vpop.f32.mrb[57].mxu1 }
 0x168   :  { %v3105_v1 = vpop.eup %3104  ;;  %v2448_v0 = vpack.c.bf16 %v1731_v49, %v1730_v44  ;;  %v1546_v3 = vadd.f32 1.0, %v3103_v14  ;;  %3124 = vpow2.f32 %v2217_v50  ;;  %v2218_v9 = vmul.f32 -1.442695, %v3776_v2  ;;  %v1208_v11 = vpop.f32.mrb[57].mxu0 }
 0x169   :  { %v3107_v23 = vpop.eup %3106  ;;  %2533 = vst [vmem:[%s3888_s5 + $0x98] sm:$0xff] %v2453_v61   ;;  %v1549_v33 = vadd.f32 1.0, %v3105_v1  ;;  %3126 = vpow2.f32 %v2215_v52  ;;  %v1217_v10 = vadd.f32 %v2780_v54, %v2700_v62  ;;  %v2701_v13 = vpop.f32.mrb[58].mxu1  ;;  %v2216_v17 = vmul.f32 -1.442695, %v3781_v60 }
 0x16a   :  { %v3109_v15 = vpop.eup %3108  ;;  %2532 = vst [vmem:[%s3888_s5 + $0x90] sm:$0xff] %v2448_v0   ;;  %3128 = vrcp.f32 %v1546_v3  ;;  %v1547_v25 = vadd.f32 1.0, %v3107_v23  ;;  %v1209_v36 = vadd.f32 %v1208_v11, %v679_v6  ;;  %v2781_v32 = vpop.f32.mrb[58].mxu0 }
 0x16b   :  { %v682_v21 = vpop.f32.mrb[59].mxu1  ;;  %v3111_v22 = vpop.eup %3110  ;;  %3130 = vrcp.f32 %v1549_v33  ;;  %v1552_v29 = vadd.f32 1.0, %v3109_v15  ;;  %v3793_v26 = vadd.f32 %v3737_v59, %v1217_v10  ;;  %v1220_v30 = vadd.f32 %v2781_v32, %v2701_v13 }
 0x16c   :  { %v1211_v45 = vpop.f32.mrb[59].mxu0  ;;  %v3113_v34 = vpop.eup %3112  ;;  %v1734_v51 = vmul.f32 %v3111_v22, %v3689_v12  ;;  %3132 = vrcp.f32 %v1547_v25  ;;  %v3797_v37 = vadd.f32 %v3737_v59, %v1209_v36 }
 0x16d   :  { %v1212_v27 = vadd.f32 %v1211_v45, %v682_v21  ;;  %v3115_v28 = vpop.eup %3114  ;;  %v1737_v31 = vmul.f32 %v3113_v34, %v3694_v57  ;;  %3134 = vrcp.f32 %v1552_v29  ;;  %v2221_v53 = vmul.f32 -1.442695, %v3793_v26  ;;  %v2704_v43 = vpop.f32.mrb[60].mxu1 }
 0x16e   :  { %v3802_v56 = vadd.f32 %v3737_v59, %v1220_v30  ;;  %v3117_v35 = vpop.eup %3116  ;;  %v1735_v16 = vmul.f32 %v3115_v28, %v3701_v58  ;;  %3136 = vpow2.f32 %v2218_v9  ;;  %v2219_v12 = vmul.f32 -1.442695, %v3797_v37  ;;  %v2784_v48 = vpop.f32.mrb[60].mxu0 }
 0x16f   :  { %v3807_v38 = vadd.f32 %v3737_v59, %v1212_v27  ;;  %v3119_v41 = vpop.eup %3118  ;;  %v2463_v42 = vpack.c.bf16 %v1737_v31, %v1736_v20  ;;  %3138 = vpow2.f32 %v2216_v17  ;;  %v695_v55 = vpop.f32.mrb[61].mxu1  ;;  %v1233_v49 = vadd.f32 %v2784_v48, %v2704_v43 }
 0x170   :  { %v3121_v57 = vpop.eup %3120  ;;  %v2458_v44 = vpack.c.bf16 %v1735_v16, %v1734_v51  ;;  %v1550_v18 = vadd.f32 1.0, %v3119_v41  ;;  %3140 = vpow2.f32 %v2221_v53  ;;  %v2222_v19 = vmul.f32 -1.442695, %v3802_v56  ;;  %v1224_v52 = vpop.f32.mrb[61].mxu0 }
 0x171   :  { %v3123_v50 = vpop.eup %3122  ;;  %2535 = vst [vmem:[%s3888_s5 + $0xa8] sm:$0xff] %v2463_v42   ;;  %v1553_v58 = vadd.f32 1.0, %v3121_v57  ;;  %3142 = vpow2.f32 %v2219_v12  ;;  %v2705_v14 = vpop.f32.mrb[62].mxu1  ;;  %v2220_v1 = vmul.f32 -1.442695, %v3807_v38  ;;  %v1225_v0 = vadd.f32 %v1224_v52, %v695_v55 }
 0x172   :  { %v3125_v61 = vpop.eup %3124  ;;  %2534 = vst [vmem:[%s3888_s5 + $0xa0] sm:$0xff] %v2458_v44   ;;  %3144 = vrcp.f32 %v1550_v18  ;;  %v1551_v62 = vadd.f32 1.0, %v3123_v50  ;;  %v2785_v20 = vpop.f32.mrb[62].mxu0  ;;  %v3818_v23 = vadd.f32 %v3737_v59, %v1233_v49  ;;  %v1740_v32 = vmul.f32 %v3117_v35, %v3710_v8 }
 0x173   :  { %v698_v3 = vpop.f32.mrb[63].mxu1  ;;  %v3127_v54 = vpop.eup %3126  ;;  %3146 = vrcp.f32 %v1553_v58  ;;  %v1556_v6 = vadd.f32 1.0, %v3125_v61  ;;  %v1236_v33 = vadd.f32 %v2785_v20, %v2705_v14  ;;  %v3821_v13 = vadd.f32 %v3737_v59, %v1225_v0 }
 0x174   :  { %v1227_v9 = vpop.f32.mrb[63].mxu0  ;;  %v3129_v10 = vpop.eup %3128  ;;  %3148 = vrcp.f32 %v1551_v62  ;;  %v1554_v11 = vadd.f32 1.0, %v3127_v54  ;;  %v2225_v17 = vmul.f32 -1.442695, %v3818_v23 }
 0x175   :  { %v1228_v15 = vadd.f32 %v1227_v9, %v698_v3  ;;  %v3131_v25 = vpop.eup %3130  ;;  %3150 = vrcp.f32 %v1556_v6  ;;  %v2223_v22 = vmul.f32 -1.442695, %v3821_v13  ;;  %v1738_v30 = vmul.f32 %v3129_v10, %v3717_v40 }
 0x176   :  { %v3133_v36 = vpop.eup %3132  ;;  %v1741_v21 = vmul.f32 %v3131_v25, %v3720_v24  ;;  %3152 = vrcp.f32 %v1554_v11  ;;  %v3830_v34 = vadd.f32 %v3737_v59, %v1236_v33 }
 0x177   :  { %v3135_v29 = vpop.eup %3134  ;;  %v1739_v45 = vmul.f32 %v3133_v36, %v3726_v7  ;;  %3154 = vpow2.f32 %v2222_v19  ;;  %v3833_v28 = vadd.f32 %v3737_v59, %v1228_v15 }
 0x178   :  { %v3137_v51 = vpop.eup %3136  ;;  %v2473_v27 = vpack.c.bf16 %v1741_v21, %v1740_v32  ;;  %3156 = vpow2.f32 %v2220_v1  ;;  %v2226_v59 = vmul.f32 -1.442695, %v3830_v34  ;;  %v1744_v42 = vmul.f32 %v3135_v29, %v3740_v46 }
 0x179   :  { %v3139_v8 = vpop.eup %3138  ;;  %v2468_v24 = vpack.c.bf16 %v1739_v45, %v1738_v30  ;;  %v1557_v31 = vadd.f32 1.0, %v3137_v51  ;;  %3158 = vpow2.f32 %v2225_v17  ;;  %v2224_v16 = vmul.f32 -1.442695, %v3833_v28 }
 0x17a   :  { %v3141_v53 = vpop.eup %3140  ;;  %2537 = vst [vmem:[%s3888_s5 + $0xb8] sm:$0xff] %v2473_v27   ;;  %v1555_v40 = vadd.f32 1.0, %v3139_v8  ;;  %3160 = vpow2.f32 %v2223_v22 }
 0x17b   :  { %v3143_v7 = vpop.eup %3142  ;;  %2536 = vst [vmem:[%s3888_s5 + $0xb0] sm:$0xff] %v2468_v24   ;;  %3162 = vrcp.f32 %v1557_v31  ;;  %v1560_v57 = vadd.f32 1.0, %v3141_v53 }
 0x17c   :  { %v3145_v35 = vpop.eup %3144  ;;  %3164 = vrcp.f32 %v1555_v40  ;;  %v1558_v55 = vadd.f32 1.0, %v3143_v7 }
 0x17d   :  { %v3147_v12 = vpop.eup %3146  ;;  %v1742_v18 = vmul.f32 %v3145_v35, %v3744_v63  ;;  %3166 = vpow2.f32 %v2226_v59 }
 0x17e   :  { %v3149_v41 = vpop.eup %3148  ;;  %v1745_v43 = vmul.f32 %v3147_v12, %v3749_v5  ;;  %3168 = vpow2.f32 %v2224_v16 }
 0x17f   :  { %v3151_v44 = vpop.eup %3150  ;;  %v1743_v48 = vmul.f32 %v3149_v41, %v3754_v4  ;;  %3170 = vrcp.f32 %v1560_v57 }
 0x180   :  { %v3153_v50 = vpop.eup %3152  ;;  %v2483_v58 = vpack.c.bf16 %v1745_v43, %v1744_v42  ;;  %3172 = vrcp.f32 %v1558_v55  ;;  %v1748_v62 = vmul.f32 %v3151_v44, %v3767_v39 }
 0x181   :  { %v3155_v19 = vpop.eup %3154  ;;  %v2478_v49 = vpack.c.bf16 %v1743_v48, %v1742_v18  ;;  %v1746_v20 = vmul.f32 %v3153_v50, %v3771_v47 }
 0x182   :  { %v3157_v52 = vpop.eup %3156  ;;  %2539 = vst [vmem:[%s3888_s5 + $0xc8] sm:$0xff] %v2483_v58   ;;  %v1561_v46 = vadd.f32 1.0, %v3155_v19 }
 0x183   :  { %v3159_v5 = vpop.eup %3158  ;;  %2538 = vst [vmem:[%s3888_s5 + $0xc0] sm:$0xff] %v2478_v49   ;;  %v1559_v63 = vadd.f32 1.0, %v3157_v52 }
 0x184   :  { %v3161_v4 = vpop.eup %3160  ;;  %3174 = vrcp.f32 %v1561_v46  ;;  %v1564_v0 = vadd.f32 1.0, %v3159_v5 }
 0x185   :  { %v3163_v14 = vpop.eup %3162  ;;  %3176 = vrcp.f32 %v1559_v63  ;;  %v1562_v54 = vadd.f32 1.0, %v3161_v4 }
 0x186   :  { %v3165_v61 = vpop.eup %3164  ;;  %v1749_v1 = vmul.f32 %v3163_v14, %v3776_v2  ;;  %3178 = vrcp.f32 %v1564_v0 }
 0x187   :  { %v1747_v3 = vmul.f32 %v3165_v61, %v3781_v60  ;;  %v3167_v33 = vpop.eup %3166  ;;  %3180 = vrcp.f32 %v1562_v54 }
 0x188   :  { %v2493_v6 = vpack.c.bf16 %v1749_v1, %v1748_v62  ;;  %v3169_v10 = vpop.eup %3168  ;;  %v1565_v11 = vadd.f32 1.0, %v3167_v33 }
 0x189   :  { %v2488_v9 = vpack.c.bf16 %v1747_v3, %v1746_v20  ;;  %v1563_v39 = vadd.f32 1.0, %v3169_v10  ;;  %v3171_v47 = vpop.eup %3170 }
 0x18a   :  { %2541 = vst [vmem:[%s3888_s5 + $0xd8] sm:$0xff] %v2493_v6   ;;  %3182 = vrcp.f32 %v1565_v11  ;;  %v3173_v2 = vpop.eup %3172  ;;  %v1752_v25 = vmul.f32 %v3171_v47, %v3793_v26 }
 0x18b   :  { %2540 = vst [vmem:[%s3888_s5 + $0xd0] sm:$0xff] %v2488_v9   ;;  %3184 = vrcp.f32 %v1563_v39  ;;  %v1750_v36 = vmul.f32 %v3173_v2, %v3797_v37 }
 0x18e   :  { %v3175_v60 = vpop.eup %3174 }
 0x18f   :  { %v3177_v15 = vpop.eup %3176  ;;  %v1753_v17 = vmul.f32 %v3175_v60, %v3802_v56 }
 0x190   :  { %v1751_v32 = vmul.f32 %v3177_v15, %v3807_v38  ;;  %v3179_v29 = vpop.eup %3178 }
 0x191   :  { %v2503_v21 = vpack.c.bf16 %v1753_v17, %v1752_v25  ;;  %v3181_v30 = vpop.eup %3180  ;;  %v1756_v56 = vmul.f32 %v3179_v29, %v3818_v23 }
 0x192   :  { %v2498_v22 = vpack.c.bf16 %v1751_v32, %v1750_v36  ;;  %v1754_v38 = vmul.f32 %v3181_v30, %v3821_v13 }
 0x193   :  { %2543 = vst [vmem:[%s3888_s5 + $0xe8] sm:$0xff] %v2503_v21  }
 0x194   :  { %2542 = vst [vmem:[%s3888_s5 + $0xe0] sm:$0xff] %v2498_v22   ;;  %v3183_v45 = vpop.eup %3182 }
 0x195   :  { %v3185_v26 = vpop.eup %3184  ;;  %v1757_v37 = vmul.f32 %v3183_v45, %v3830_v34 }
 0x196   :  { %v1755_v51 = vmul.f32 %v3185_v26, %v3833_v28 }
 0x197   :  { %v2513_v27 = vpack.c.bf16 %v1757_v37, %v1756_v56 }
 0x198   :  { %v2508_v8 = vpack.c.bf16 %v1755_v51, %v1754_v38 }
 0x199   :  { %2545 = vst [vmem:[%s3888_s5 + $0xf8] sm:$0xff] %v2513_v27  }
 0x19a   :  { %2544 = vst [vmem:[%s3888_s5 + $0xf0] sm:$0xff] %v2508_v8  }

// kernel: csp_block_forward.8
= control target key start
LH: loop header
LB: loop body
LE: loop exit
PB: predicated region body
PF: predicated region fallthrough
CT: control target
= control target key end

     0   :  { %s3537_s18 = smov 0   ;;  %s3539_s19 = smov 0   ;;  %s4482_s0 = inlined_call_operand.vmem [shape: bf16[2,576,128], index: 0, kind: input, shape index: {}, may-alias: {0,1}]   ;;  %s4483_s1 = inlined_call_operand.vmem [shape: bf16[2,576,128], index: 1, kind: input, shape index: {}, may-alias: {0,1}]   ;;  %s4484_s2 = inlined_call_operand.vmem [shape: bf16[3,384,128], index: 2, kind: input, shape index: {}]   ;;  %s4485_s3 = inlined_call_operand.vmem [shape: f32[1,128], index: 3, kind: input, shape index: {}]   ;;  %s4486_s4 = inlined_call_operand.vmem [shape: bf16[2,16,16,128], index: 4, kind: input, shape index: {}]   ;;  %s4487_s5 = inlined_call_operand.vmem [shape: bf16[2,16,16,128], index: 5, kind: output, shape index: {}]  }
   0x1   :  { %s3541_s20 = smov 0   ;;  %s3543_s21 = smov 0  }
   0x2   :  { %s3545_s22 = smov 0  }
   0x3 LB: > { %s24_s23 = sadd.s32 1, %s3497_s20  ;;  %s27_s24 = sadd.s32 1, %s3501_s21  ;;  %s3505_s22 = sphi %s3545_s22, %s15_s22   ;;  %s3501_s21 = sphi %s3543_s21, %s4492_s21   ;;  %s3497_s20 = sphi %s3541_s20, %s4491_s20   ;;  %s3493_s19 = sphi %s3539_s19, %s4490_s19   ;;  %s3489_s18 = sphi %s3537_s18, %s4489_s18  }
   0x4   : > { %p25_p0 = scmp.ge.s32.totalorder %s24_s23, 2  ;;  %p2490_p1 = scmp.ge.s32.totalorder %s3505_s22, 1 }
   0x5   : > { %p251_p2 = scmp.lt.s32.totalorder %s3505_s22, 5 }
   0x6   : > { %s4494_s23 = smov (%p25_p0, %s24_s23), 0  ;;  %s4496_s24 = smov (!%p25_p0, %s27_s24), %s3501_s21 }
   0x7   : > { %p252_p3 = pnand %p2490_p1, %p251_p2  ;;  %p29_p4 = scmp.ge.s32.totalorder %s4496_s24, 2 }
   0x8   : > { %v3315_v0 = vld [vmem:[%s4484_s2 + $0x100] sm:$0xff] (!%p252_p3)   ;;  %v3318_v3 = vld [vmem:[%s4484_s2 + $0x108] sm:$0xff] (!%p252_p3)   ;;  %s309_s8 = smul.u32 (!%p252_p3), 24, %s3489_s18  ;;  %p310_p5 = scmp.lt.s32.totalorder (!%p252_p3), %s3493_s19, 1  ;;  %v3321_v6 = vld [vmem:[%s4484_s2 + $0x110] sm:$0xff] (!%p252_p3)   ;;  %vm744_vm0 = vcmask (!%p252_p3), 1043456  }
   0x9   : > { %s4498_s24 = smov (%p29_p4, %s4496_s24), 0  ;;  %255 = sbr.rel (%p252_p3) target bundleno = 517 (0x205), region = 40 }
   0xa   : > { %v3316_v1 = vld [vmem:[%s4484_s2 + $0x140] sm:$0xff] (!%p252_p3)   ;;  %2814 = vmatprep.subr.bf16.mxu0 (!%p252_p3), %v3315_v0  ;;  %v3319_v4 = vld [vmem:[%s4484_s2 + $0x148] sm:$0xff] (!%p252_p3)   ;;  %v3322_v7 = vld [vmem:[%s4484_s2 + $0x150] sm:$0xff] (!%p252_p3)   ;;  %p312_p6 = scmp.lt.s32.totalorder (!%p252_p3), %s309_s8, 71  ;;  %s319_s7 = sadd.s32 (!%p252_p3), 1, %s3489_s18  ;;  %vm596_vm2 = vcmask (!%p252_p3), 1046528  }
   0xb   : > { %v3317_v2 = vld [vmem:[%s4484_s2 + $0xc0] sm:$0xff] (!%p252_p3)   ;;  %3138 = vmatprep.subr.bf16.mxu1 (!%p252_p3), %v3316_v1  ;;  %v3320_v5 = vld [vmem:[%s4484_s2 + $0xc8] sm:$0xff] (!%p252_p3)   ;;  %v3323_v8 = vld [vmem:[%s4484_s2 + $0xd0] sm:$0xff] (!%p252_p3)   ;;  %s3654_s27 = smul.u32 (!%p252_p3), 24, %s319_s7  ;;  %vm483_vm1 = vsmask.f32 (!%p252_p3), 7424 }
   0xc   : > { %2815 = vmatpush3.bf16.msra.mxu0 (!%p252_p3), %v3317_v2  ;;  %3139 = vmatpush3.bf16.msra.mxu1 (!%p252_p3), %v3316_v1  ;;  %v3324_v9 = vld [vmem:[%s4484_s2 + $0x118] sm:$0xff] (!%p252_p3)   ;;  %v3327_v12 = vld [vmem:[%s4484_s2 + $0x120] sm:$0xff] (!%p252_p3)   ;;  %v3330_v15 = vld [vmem:[%s4484_s2 + $0x128] sm:$0xff] (!%p252_p3)  }
   0xd   : > { %2816 = vmatprep.subr.bf16.mxu0 (!%p252_p3), %v3318_v3  ;;  %3140 = vmatprep.subr.bf16.mxu1 (!%p252_p3), %v3319_v4  ;;  %v3325_v10 = vld [vmem:[%s4484_s2 + $0x158] sm:$0xff] (!%p252_p3)   ;;  %v3328_v13 = vld [vmem:[%s4484_s2 + $0x160] sm:$0xff] (!%p252_p3)   ;;  %v3331_v16 = vld [vmem:[%s4484_s2 + $0x168] sm:$0xff] (!%p252_p3)   ;;  %p324_p7 = scmp.lt.s32.totalorder (!%p252_p3), %s3654_s27, 71 }
   0xe   : > { %v3326_v11 = vld [vmem:[%s4484_s2 + $0xd8] sm:$0xff] (!%p252_p3)   ;;  %v3329_v14 = vld [vmem:[%s4484_s2 + $0xe0] sm:$0xff] (!%p252_p3)   ;;  %v3332_v17 = vld [vmem:[%s4484_s2 + $0xe8] sm:$0xff] (!%p252_p3)  }
   0xf   : > { %v3333_v18 = vld [vmem:[%s4484_s2 + $0x130] sm:$0xff] (!%p252_p3)   ;;  %v3336_v21 = vld [vmem:[%s4484_s2 + $0x138] sm:$0xff] (!%p252_p3)   ;;  %v3687_v40 = vld [vmem:[%s4484_s2 + $0x80] sm:$0xff] (!%p252_p3)  }
  0x10   : > { %2817 = vmatpush3.bf16.msra.mxu0 %v3320_v5  ;;  %3141 = vmatpush3.bf16.msra.mxu1 %v3319_v4  ;;  %s4500_s19 = smov (!%p310_p5, %s3493_s19), 1  ;;  %s4502_s8 = smov (!%p312_p6, %s309_s8), 71  ;;  %v3334_v19 = vld [vmem:[%s4484_s2 + $0x170] sm:$0xff]   ;;  %v3337_v22 = vld [vmem:[%s4484_s2 + $0x178] sm:$0xff]   ;;  %v3344_v41 = vld [vmem:[%s4484_s2 + $0x40] sm:$0xff]  }
  0x11   : > { %2818 = vmatprep.subr.bf16.mxu0 %v3321_v6  ;;  %3142 = vmatprep.subr.bf16.mxu1 %v3322_v7  ;;  %s3274_s10 = smul.u32 72, %s4500_s19  ;;  %v3335_v20 = vld [vmem:[%s4484_s2 + $0xf0] sm:$0xff]   ;;  %v3338_v23 = vld [vmem:[%s4484_s2 + $0xf8] sm:$0xff]   ;;  %s4504_s27 = smov (!%p324_p7, %s3654_s27), 71  ;;  %v3345_v50 = vld [vmem:[%s4484_s2] sm:$0xff]  }
  0x12   : > { %v3347_v55 = vld [vmem:[%s4484_s2 + $0x48] sm:$0xff]   ;;  %s2497_s7 = sshll.u32 %s4500_s19, 5 }
  0x13   : > { %s315_s17 = sadd.s32 %s3274_s10, %s4502_s8  ;;  %s3770_s30 = sadd.s32 %s3274_s10, %s4504_s27 }
  0x14   : > { %2819 = vmatpush3.bf16.msra.mxu0 %v3323_v8  ;;  %3143 = vmatpush3.bf16.msra.mxu1 %v3322_v7  ;;  %s2491_s29 = sshll.u32 %s315_s17, 2  ;;  %v3349_v8 = vld [vmem:[%s4484_s2 + $0x8] sm:$0xff]   ;;  %s2494_s10 = sshll.u32 %s3770_s30, 2 }
  0x15   : > { %2820 = vmatprep.subr.bf16.mxu0 %v3324_v9  ;;  %3144 = vmatprep.subr.bf16.mxu1 %v3325_v10  ;;  %s3652_s26 = scalar_lea.vmem %s4482_s0, %s2491_s29  ;;  %s3850_s17 = scalar_lea.vmem %s4483_s1, %s2494_s10 }
  0x16   : > { %v3660_v24 = vld [vmem:[%s3652_s26 + $0x8] sm:$0xff]   ;;  %v3663_v25 = vld [vmem:[%s3652_s26 + $0x10] sm:$0xff]   ;;  %v3666_v26 = vld [vmem:[%s3652_s26 + $0x18] sm:$0xff]   ;;  %s2495_s10 = sshll.u32 %s3489_s18, 3 }
  0x17   : > { %v3669_v27 = vld [vmem:[%s3652_s26 + $0x20] sm:$0xff]   ;;  %v492_v28 = vshll.u32 %v3660_v24, 16  ;;  %v496_v29 = vshrl.u32 %v3660_v24, 16  ;;  %v500_v30 = vshll.u32 %v3663_v25, 16  ;;  %v504_v31 = vshrl.u32 %v3663_v25, 16  ;;  %v3713_v51 = vld [vmem:[%s3652_s26 + $0x28] sm:$0xff]  }
  0x18   : > { %2821 = vmatpush3.bf16.msra.mxu0 %v3326_v11  ;;  %3145 = vmatpush3.bf16.msra.mxu1 %v3325_v10  ;;  %v508_v32 = vshll.u32 %v3666_v26, 16  ;;  %v512_v33 = vshrl.u32 %v3666_v26, 16  ;;  %v598_v34 = vrot.slane %v3660_v24, 1  ;;  %v600_v35 = vrot.slane %v3663_v25, 1  ;;  %v3736_v0 = vld [vmem:[%s3652_s26 + $0x30] sm:$0xff]   ;;  %v3758_v11 = vld [vmem:[%s4484_s2 + $0x88] sm:$0xff]  }
  0x19   : > { %2822 = vmatprep.subr.bf16.mxu0 %v3327_v12  ;;  %3146 = vmatprep.subr.bf16.mxu1 %v3328_v13  ;;  %v3680_v36 = vrot.slane %v492_v28, 1  ;;  %v502_v37 = vrot.slane %v500_v30, 1  ;;  %v602_v38 = vrot.slane %v3666_v26, 1  ;;  %v745_v39 = vrot.slane %v3660_v24, 4  ;;  %p4336_p8 = scmp.lt.s32.totalorder %s2495_s10, 15 }
  0x1a   : > { %v510_v42 = vrot.slane %v508_v32, 1  ;;  %v3695_v43 = vsel %vm596_vm2, %v598_v34, %v600_v35  ;;  %v746_v44 = vrot.slane %v3663_v25, 4  ;;  %v604_v45 = vrot.slane %v3669_v27, 1  ;;  %v3355_v32 = vld [vmem:[%s4484_s2 + $0x58] sm:$0xff]  }
  0x1b   : > { %v498_v46 = vor.u32 %v496_v29, %v3680_v36  ;;  %v506_v47 = vor.u32 %v504_v31, %v502_v37  ;;  %v3706_v48 = vsel %vm596_vm2, %v600_v35, %v602_v38  ;;  %v751_v49 = vrot.slane %v3695_v43, 4  ;;  %v3788_v29 = vld [vmem:[%s3652_s26 + $0x40] sm:$0xff]   ;;  %s4506_s10 = smov (!%p4336_p8, %s2495_s10), 15 }
  0x1c   : > { %2823 = vmatpush3.bf16.msra.mxu0 %v3329_v14  ;;  %3147 = vmatpush3.bf16.msra.mxu1 %v3328_v13  ;;  %v514_v52 = vor.u32 %v512_v33, %v510_v42  ;;  %v752_v53 = vrot.slane %v3706_v48, 4  ;;  %v3717_v54 = vsel %vm596_vm2, %v602_v38, %v604_v45  ;;  %v516_v59 = vshll.u32 %v3669_v27, 16  ;;  %v3351_v14 = vld [vmem:[%s4484_s2 + $0x50] sm:$0xff]   ;;  %s2496_s18 = sshll.u32 %s4506_s10, 1 }
  0x1d   : > { %2824 = vmatprep.subr.bf16.mxu0 %v3330_v15  ;;  %3148 = vmatprep.subr.bf16.mxu1 %v3331_v16  ;;  %v3724_v56 = vsel %vm483_vm1, %v498_v46, %v502_v37  ;;  %v3727_v57 = vsel %vm483_vm1, %v506_v47, %v510_v42  ;;  %v758_v58 = vrot.slane %v3717_v54, 4  ;;  %v606_v63 = vrot.slane %v3713_v51, 1  ;;  %v3356_v37 = vld [vmem:[%s4484_s2 + $0x18] sm:$0xff]   ;;  %v3818_v46 = vld [vmem:[%s3652_s26 + $0x50] sm:$0xff]   ;;  %s4365_s8 = sadd.s32 %s2497_s7, %s2496_s18 }
  0x1e   : > { %v748_v60 = vrot.slane %v3724_v56, 4  ;;  %v749_v61 = vrot.slane %v3727_v57, 4  ;;  %v753_v62 = vsel %vm744_vm0, %v751_v49, %v752_v53  ;;  %v747_v1 = vsel %vm744_vm0, %v745_v39, %v746_v44  ;;  %s2498_s19 = sshll.u32 %s4365_s8, 2 }
  0x1f   : > { %3154 = vmatprep.mubr.bf16.mxu1 %v753_v62  ;;  %v759_v2 = vsel %vm744_vm0, %v752_v53, %v758_v58  ;;  %v518_v3 = vrot.slane %v516_v59, 1  ;;  %v754_v4 = vrot.slane %v3666_v26, 4  ;;  %v3745_v6 = vsel %vm596_vm2, %v604_v45, %v606_v63  ;;  %v3815_v45 = vld [vmem:[%s3652_s26 + $0x48] sm:$0xff]   ;;  %v3835_v62 = vld [vmem:[%s4484_s2 + $0x90] sm:$0xff]   ;;  %s4380_s12 = scalar_lea.vmem %s4486_s4, %s2498_s19  ;;  %s4426_s15 = scalar_lea.vmem %s4487_s5, %s2498_s19 }
  0x20   : > { %2825 = vmatpush3.bf16.msra.mxu0 %v3332_v17  ;;  %3149 = vmatpush3.bf16.msra.mxu1 %v3331_v16  ;;  %v750_v5 = vsel %vm744_vm0, %v748_v60, %v749_v61  ;;  %v608_v7 = vrot.slane %v3736_v0, 1  ;;  %v764_v10 = vrot.slane %v3745_v6, 4  ;;  %v3352_v17 = vld [vmem:[%s4484_s2 + $0x10] sm:$0xff]   ;;  %v612_v35 = vrot.slane %v3788_v29, 1 }
  0x21   : > { %2826 = vmatprep.subr.bf16.mxu0 %v3333_v18  ;;  %3150 = vmatprep.subr.bf16.mxu1 %v3334_v19  ;;  %v3752_v9 = vsel %vm483_vm1, %v514_v52, %v518_v3  ;;  %v755_v30 = vsel %vm744_vm0, %v746_v44, %v754_v4  ;;  %v528_v38 = vshrl.u32 %v3713_v51, 16  ;;  %v532_v39 = vshll.u32 %v3736_v0, 16 }
  0x22   : > { %1032 = vmatprep.mubr.bf16.mxu0 %v750_v5  ;;  %v756_v12 = vrot.slane %v3752_v9, 4  ;;  %v3762_v13 = vsel %vm596_vm2, %v606_v63, %v608_v7  ;;  %v765_v15 = vsel %vm744_vm0, %v758_v58, %v764_v10  ;;  %v760_v44 = vrot.slane %v3669_v27, 4 }
  0x23   : > { %v770_v16 = vrot.slane %v3762_v13, 4  ;;  %v534_v52 = vrot.slane %v532_v39, 1  ;;  %v614_v58 = vrot.slane %v3815_v45, 1 }
  0x24   : > { %2827 = vmatpush3.bf16.msra.mxu0 %v3335_v20  ;;  %3151 = vmatpush3.bf16.msra.mxu1 %v3334_v19  ;;  %v757_v18 = vsel %vm744_vm0, %v749_v61, %v756_v12  ;;  %v520_v19 = vshrl.u32 %v3669_v27, 16  ;;  %v524_v20 = vshll.u32 %v3713_v51, 16  ;;  %v616_v61 = vrot.slane %v3818_v46, 1 }
  0x25   : > { %2828 = vmatprep.subr.bf16.mxu0 %v3336_v21  ;;  %3152 = vmatprep.subr.bf16.mxu1 %v3337_v22  ;;  %v771_v21 = vsel %vm744_vm0, %v764_v10, %v770_v16  ;;  %v536_v10 = vshrl.u32 %v3736_v0, 16 }
  0x26   : > { %v526_v28 = vrot.slane %v524_v20, 1 }
  0x28   : > { %2829 = vmatpush3.bf16.msra.mxu0 %v3338_v23  ;;  %3153 = vmatpush3.bf16.msra.mxu1 %v3337_v22  ;;  %v3784_v22 = vld [vmem:[%s3652_s26 + $0x38] sm:$0xff]   ;;  %v522_v23 = vor.u32 %v520_v19, %v518_v3  ;;  %v3360_v3 = vld [vmem:[%s4484_s2 + $0x60] sm:$0xff]   ;;  %v538_v19 = vor.u32 %v536_v10, %v534_v52 }
  0x29   : > { %3178 = vmatprep.subr.bf16.mxu0 %v3687_v40  ;;  %2922 = vmatprep.subr.bf16.mxu1 %v3344_v41  ;;  %v610_v31 = vrot.slane %v3784_v22, 1 }
  0x2a   : > { %v3801_v33 = vsel %vm483_vm1, %v522_v23, %v526_v28  ;;  %v3878_v23 = vld [vmem:[%s3850_s17] sm:$0xff]  }
  0x2b   : > { %3155 = vmatmul.mubr.bf16.vlgmr.msra.gmra.mrb[0].mxu1 %v759_v2  ;;  %1033 = vmatmul.mubr.bf16.vlgmr.msra.gmra.mrb[0].mxu0 %v747_v1  ;;  %v762_v41 = vrot.slane %v3801_v33, 4  ;;  %v3811_v42 = vsel %vm596_vm2, %v608_v7, %v610_v31  ;;  %v3822_v49 = vsel %vm596_vm2, %v610_v31, %v612_v35  ;;  %v3840_v2 = vsel %vm596_vm2, %v612_v35, %v614_v58 }
  0x2c   : > { %2923 = vmatpush3.bf16.msra.mxu1 %v3345_v50  ;;  %3179 = vmatpush3.bf16.msra.mxu0 %v3687_v40  ;;  %v776_v47 = vrot.slane %v3811_v42, 4  ;;  %v530_v50 = vor.u32 %v528_v38, %v526_v28  ;;  %v788_v5 = vrot.slane %v3840_v2, 4  ;;  %v3854_v7 = vsel %vm596_vm2, %v614_v58, %v616_v61  ;;  %v3365_v28 = vld [vmem:[%s4484_s2 + $0x28] sm:$0xff]   ;;  %v3367_v38 = vld [vmem:[%s4484_s2 + $0x70] sm:$0xff]  }
  0x2d   : > { %2924 = vmatprep.subr.bf16.mxu1 %v3347_v55  ;;  %3158 = vmatprep.mubr.bf16.mxu1 %v765_v15  ;;  %v763_v53 = vsel %vm744_vm0, %v756_v12, %v762_v41  ;;  %v782_v55 = vrot.slane %v3822_v49, 4  ;;  %v540_v12 = vshll.u32 %v3784_v22, 16  ;;  %v620_v31 = vrot.slane %v3878_v23, 1 }
  0x2e   : > { %3180 = vmatprep.subr.bf16.mxu0 %v3758_v11  ;;  %1040 = vmatprep.mubr.bf16.mxu0 %v757_v18  ;;  %v777_v59 = vsel %vm744_vm0, %v770_v16, %v776_v47  ;;  %v3829_v60 = vsel %vm483_vm1, %v530_v50, %v534_v52  ;;  %v3870_v16 = vld [vmem:[%s3652_s26 + $0x58] sm:$0xff]   ;;  %v794_v18 = vrot.slane %v3854_v7, 4  ;;  %v766_v35 = vrot.slane %v3713_v51, 4  ;;  %v3368_v52 = vld [vmem:[%s4484_s2 + $0x30] sm:$0xff]  }
  0x2f   : > { %v783_v63 = vsel %vm744_vm0, %v776_v47, %v782_v55  ;;  %v768_v1 = vrot.slane %v3829_v60, 4  ;;  %v542_v20 = vrot.slane %v540_v12, 1  ;;  %v548_v58 = vshll.u32 %v3788_v29, 16 }
  0x30   : > { %2925 = vmatpush3.bf16.msra.mxu1 %v3349_v8  ;;  %3181 = vmatpush3.bf16.msra.mxu0 %v3758_v11  ;;  %v3361_v8 = vld [vmem:[%s4484_s2 + $0x20] sm:$0xff]   ;;  %v795_v50 = vsel %vm744_vm0, %v788_v5, %v794_v18 }
  0x31   : > { %2926 = vmatprep.subr.bf16.mxu1 %v3351_v14  ;;  %3182 = vmatprep.subr.bf16.mxu0 %v3835_v62  ;;  %v761_v14 = vsel %vm744_vm0, %v754_v4, %v760_v44  ;;  %v769_v15 = vsel %vm744_vm0, %v762_v41, %v768_v1  ;;  %v618_v4 = vrot.slane %v3870_v16, 1  ;;  %v550_v10 = vrot.slane %v548_v58, 1 }
  0x33   : > { %3159 = vmatmul.mubr.bf16.gmra.mrb[4].mxu1 %v771_v21  ;;  %1041 = vmatmul.mubr.bf16.gmra.mrb[4].mxu0 %v755_v30  ;;  %v3363_v21 = vld [vmem:[%s4484_s2 + $0x68] sm:$0xff]   ;;  %v3885_v30 = vsel %vm483_vm1, %v538_v19, %v542_v20  ;;  %v3903_v47 = vsel %vm596_vm2, %v618_v4, %v620_v31  ;;  %v772_v19 = vrot.slane %v3736_v0, 4 }
  0x34   : > { %2927 = vmatpush3.bf16.msra.mxu1 %v3352_v17  ;;  %1047 = vmatprep.mubr.bf16.mxu0 %v763_v53  ;;  %v789_v17 = vsel %vm744_vm0, %v782_v55, %v788_v5  ;;  %v774_v39 = vrot.slane %v3885_v30, 4  ;;  %v544_v53 = vshrl.u32 %v3784_v22, 16  ;;  %v3370_v5 = vld [vmem:[%s4484_s2 + $0x78] sm:$0xff]  }
  0x35   : > { %2928 = vmatprep.subr.bf16.mxu1 %v3355_v32  ;;  %3162 = vmatprep.mubr.bf16.mxu1 %v777_v59  ;;  %v3891_v32 = vld [vmem:[%s4484_s2 + $0x98] sm:$0xff]   ;;  %v3915_v59 = vld [vmem:[%s3850_s17 + $0x8] sm:$0xff]  }
  0x36   : > { %3183 = vmatpush3.bf16.msra.mxu0 %v3835_v62  ;;  %v3926_v12 = vrot.slane %v3915_v59, 1 }
  0x37   : > { %3184 = vmatprep.subr.bf16.mxu0 %v3891_v32 }
  0x38   : > { %2929 = vmatpush3.bf16.msra.mxu1 %v3356_v37  ;;  %v3895_v37 = vsel %vm596_vm2, %v616_v61, %v618_v4  ;;  %v767_v61 = vsel %vm744_vm0, %v760_v44, %v766_v35  ;;  %v3371_v44 = vld [vmem:[%s4484_s2 + $0x38] sm:$0xff]  }
  0x39   : > { %2930 = vmatprep.subr.bf16.mxu1 %v3360_v3  ;;  %v800_v41 = vrot.slane %v3895_v37, 4  ;;  %v546_v3 = vor.u32 %v544_v53, %v542_v20 }
  0x3a   : > { %3185 = vmatpush3.bf16.msra.mxu0 %v3891_v32 }
  0x3b   : > { %3163 = vmatmul.mubr.bf16.gmra.mrb[8].mxu1 %v783_v63  ;;  %1048 = vmatmul.mubr.bf16.gmra.mrb[8].mxu0 %v761_v14  ;;  %v801_v55 = vsel %vm744_vm0, %v794_v18, %v800_v41  ;;  %v806_v63 = vrot.slane %v3903_v47, 4  ;;  %v552_v14 = vshrl.u32 %v3788_v29, 16  ;;  %v3937_v18 = vsel %vm483_vm1, %v546_v3, %v550_v10 }
  0x3c   : > { %3166 = vmatprep.mubr.bf16.mxu1 %v789_v17  ;;  %2931 = vmatpush3.bf16.msra.mxu1 %v3361_v8  ;;  %v775_v8 = vsel %vm744_vm0, %v768_v1, %v774_v39  ;;  %v3934_v17 = vld [vmem:[%s3652_s26] sm:$0xff]   ;;  %v3941_v1 = vsel %vm596_vm2, %v620_v31, %v3926_v12  ;;  %v780_v4 = vrot.slane %v3937_v18, 4  ;;  %v3955_v31 = vld [vmem:[%s4484_s2 + $0xa8] sm:$0xff]  }
  0x3d   : > { %2932 = vmatprep.subr.bf16.mxu1 %v3363_v21  ;;  %1054 = vmatprep.mubr.bf16.mxu0 %v769_v15  ;;  %v556_v15 = vshll.u32 %v3815_v45, 16  ;;  %v812_v20 = vrot.slane %v3941_v1, 4  ;;  %v3948_v21 = vld [vmem:[%s4484_s2 + $0xa0] sm:$0xff]  }
  0x3e   : > { %3186 = vmatprep.subr.bf16.mxu0 %v3948_v21  ;;  %v781_v3 = vsel %vm744_vm0, %v774_v39, %v780_v4  ;;  %v778_v39 = vrot.slane %v3784_v22, 4 }
  0x3f   : > { %v813_v53 = vsel %vm744_vm0, %v806_v63, %v812_v20  ;;  %3187 = vmatpush3.bf16.msra.mxu0 %v3948_v21 }
  0x40   : > { %2933 = vmatpush3.bf16.msra.mxu1 %v3365_v28  ;;  %v558_v28 = vrot.slane %v556_v15, 1  ;;  %3188 = vmatprep.subr.bf16.mxu0 %v3955_v31 }
  0x41   : > { %2934 = vmatprep.subr.bf16.mxu1 %v3367_v38  ;;  %v487_v38 = vshll.u32 %v3934_v17, 16 }
  0x43   : > { %3167 = vmatmul.mubr.bf16.gmra.mrb[12].mxu1 %v795_v50  ;;  %1055 = vmatmul.mubr.bf16.gmra.mrb[12].mxu0 %v767_v61  ;;  %v807_v50 = vsel %vm744_vm0, %v800_v41, %v806_v63  ;;  %v489_v58 = vrot.slane %v487_v38, 1  ;;  %v773_v61 = vsel %vm744_vm0, %v766_v35, %v772_v19  ;;  %v818_v41 = vrot.slane %v3926_v12, 4  ;;  %v3970_v63 = vld [vmem:[%s4484_s2 + $0xb0] sm:$0xff]  }
  0x44   : > { %3170 = vmatprep.mubr.bf16.mxu1 %v801_v55  ;;  %2935 = vmatpush3.bf16.msra.mxu1 %v3368_v52  ;;  %v554_v52 = vor.u32 %v552_v14, %v550_v10  ;;  %v485_v55 = vshrl.u32 %v3934_v17, 16  ;;  %v560_v35 = vshrl.u32 %v3815_v45, 16  ;;  %v3984_v14 = vld [vmem:[%s4484_s2 + $0xb8] sm:$0xff]  }
  0x45   : > { %2936 = vmatprep.subr.bf16.mxu1 %v3370_v5  ;;  %1062 = vmatprep.mubr.bf16.mxu0 %v775_v8  ;;  %v564_v8 = vshll.u32 %v3818_v46, 16  ;;  %v819_v15 = vsel %vm744_vm0, %v812_v20, %v818_v41 }
  0x46   : > { %v3973_v5 = vsel %vm483_vm1, %v554_v52, %v558_v28  ;;  %v490_v10 = vor.u32 %v489_v58, %v485_v55  ;;  %3189 = vmatpush3.bf16.msra.mxu0 %v3955_v31  ;;  %v562_v38 = vor.u32 %v560_v35, %v558_v28  ;;  %v3377_v55 = vld [vmem:[%s4484_s2 + $0x1c0] sm:$0xff]   ;;  %v568_v28 = vshrl.u32 %v3818_v46, 16 }
  0x47   : > { %3190 = vmatprep.subr.bf16.mxu0 %v3970_v63 }
  0x48   : > { %2937 = vmatpush3.bf16.msra.mxu1 %v3371_v44  ;;  %v786_v44 = vrot.slane %v3973_v5, 4  ;;  %v495_v52 = vsel %vm483_vm1, %v490_v10, %v3680_v36  ;;  %v572_v36 = vshll.u32 %v3870_v16, 16  ;;  %v576_v10 = vshrl.u32 %v3870_v16, 16 }
  0x49   : > { %3258 = vmatprep.subr.bf16.mxu1 %v3687_v40 }
  0x4a   : > { %3191 = vmatpush3.bf16.msra.mxu0 %v3970_v63  ;;  %v787_v58 = vsel %vm744_vm0, %v780_v4, %v786_v44 }
  0x4b   : > { %3171 = vmatmul.mubr.bf16.gmra.mrb[16].mxu1 %v807_v50  ;;  %1063 = vmatmul.mubr.bf16.gmra.mrb[16].mxu0 %v773_v61  ;;  %v566_v50 = vrot.slane %v564_v8, 1 }
  0x4c   : > { %3174 = vmatprep.mubr.bf16.mxu1 %v813_v53  ;;  %1069 = vmatprep.mubr.bf16.mxu0 %v781_v3  ;;  %v779_v53 = vsel %vm744_vm0, %v772_v19, %v778_v39  ;;  %v784_v19 = vrot.slane %v3788_v29, 4  ;;  %v574_v3 = vrot.slane %v572_v36, 1 }
  0x4d   : > { %3192 = vmatprep.subr.bf16.mxu0 %v3984_v14  ;;  %v3997_v20 = vsel %vm483_vm1, %v562_v38, %v566_v50  ;;  %v570_v4 = vor.u32 %v568_v28, %v566_v50 }
  0x4e   : > { %3193 = vmatpush3.bf16.msra.mxu0 %v3984_v14  ;;  %v792_v61 = vrot.slane %v3997_v20, 4  ;;  %v785_v41 = vsel %vm744_vm0, %v778_v39, %v784_v19  ;;  %v790_v39 = vrot.slane %v3815_v45, 4 }
  0x4f   : > { %3030 = vmatprep.subr.bf16.mxu0 %v3377_v55  ;;  %v4010_v8 = vsel %vm483_vm1, %v570_v4, %v574_v3  ;;  %v796_v55 = vrot.slane %v3818_v46, 4  ;;  %v690_v4 = vshrl.u32 %v3915_v59, 16 }
  0x50   : > { %v793_v35 = vsel %vm744_vm0, %v786_v44, %v792_v61  ;;  %v798_v38 = vrot.slane %v4010_v8, 4 }
  0x52   : > { %v799_v50 = vsel %vm744_vm0, %v792_v61, %v798_v38 }
  0x53   : > { %3175 = vmatmul.mubr.bf16.gmra.mrb[20].mxu1 %v819_v15  ;;  %1070 = vmatmul.mubr.bf16.gmra.mrb[20].mxu0 %v779_v53  ;;  %v580_v15 = vshll.u32 %v3878_v23, 16  ;;  %v682_v53 = vshrl.u32 %v3878_v23, 16 }
  0x54   : > { %1418 = vmatprep.mubr.bf16.mxu1 %v495_v52  ;;  %1076 = vmatprep.mubr.bf16.mxu0 %v787_v58 }
  0x55   : > { %v582_v44 = vrot.slane %v580_v15, 1  ;;  %v814_v15 = vrot.slane %v3915_v59, 4 }
  0x57   : > { %v684_v28 = vor.u32 %v682_v53, %v582_v44  ;;  %v3387_v53 = vld [vmem:[%s4484_s2 + $0x1e8] sm:$0xff]  }
  0x5b   : > { %1419 = vmatmul.mubr.bf16.vlgmr.msra.gmra.mrb[24].mxu1 %v3934_v17  ;;  %1077 = vmatmul.mubr.bf16.gmra.mrb[24].mxu0 %v785_v41  ;;  %v808_v41 = vrot.slane %v3878_v23, 4 }
  0x5c   : > { %3266 = vmatpush3.bf16.msra.mxu1 %v3687_v40  ;;  %1426 = vmatprep.mubr.bf16.mxu1 %v3724_v56  ;;  %v578_v40 = vor.u32 %v576_v10, %v574_v3  ;;  %v791_v56 = vsel %vm744_vm0, %v784_v19, %v790_v39 }
  0x5d   : > { %3259 = vmatprep.subr.bf16.mxu1 %v3758_v11  ;;  %1084 = vmatprep.mubr.bf16.mxu0 %v793_v35 }
  0x5e   : > { %v4024_v52 = vsel %vm483_vm1, %v578_v40, %v582_v44  ;;  %v3378_v40 = vld [vmem:[%s4484_s2 + $0x180] sm:$0xff]   ;;  %v3382_v44 = vld [vmem:[%s4484_s2 + $0x190] sm:$0xff]  }
  0x5f   : > { %v804_v58 = vrot.slane %v4024_v52, 4 }
  0x60   : > { %3267 = vmatpush3.bf16.msra.mxu1 %v3758_v11  ;;  %v686_v11 = vshll.u32 %v3915_v59, 16 }
  0x61   : > { %3260 = vmatprep.subr.bf16.mxu1 %v3835_v62 }
  0x62   : > { %v688_v36 = vrot.slane %v686_v11, 1  ;;  %v3388_v11 = vld [vmem:[%s4484_s2 + $0x1a8] sm:$0xff]  }
  0x63   : > { %1427 = vmatmul.mubr.bf16.gmra.mrb[28].mxu1 %v3660_v24  ;;  %1085 = vmatmul.mubr.bf16.gmra.mrb[28].mxu0 %v791_v56  ;;  %v3380_v24 = vld [vmem:[%s4484_s2 + $0x188] sm:$0xff]   ;;  %v3385_v56 = vld [vmem:[%s4484_s2 + $0x1e0] sm:$0xff]  }
  0x64   : > { %1433 = vmatprep.mubr.bf16.mxu1 %v3727_v57  ;;  %3268 = vmatpush3.bf16.msra.mxu1 %v3835_v62  ;;  %v797_v57 = vsel %vm744_vm0, %v790_v39, %v796_v55  ;;  %v805_v62 = vsel %vm744_vm0, %v798_v38, %v804_v58  ;;  %v4039_v19 = vsel %vm483_vm1, %v684_v28, %v688_v36  ;;  %v597_v39 = vrot.slane %v3934_v17, 1  ;;  %v3379_v17 = vld [vmem:[%s4484_s2 + $0x1c8] sm:$0xff]   ;;  %v3391_v28 = vld [vmem:[%s4484_s2 + $0x1f8] sm:$0xff]  }
  0x65   : > { %3261 = vmatprep.subr.bf16.mxu1 %v3891_v32  ;;  %1091 = vmatprep.mubr.bf16.mxu0 %v799_v50  ;;  %v810_v61 = vrot.slane %v4039_v19, 4  ;;  %v4051_v3 = vor.u32 %v690_v4, %v688_v36  ;;  %v815_v38 = vsel %vm744_vm0, %v808_v41, %v814_v15  ;;  %v3386_v50 = vld [vmem:[%s4484_s2 + $0x1a0] sm:$0xff]   ;;  %v3392_v36 = vld [vmem:[%s4484_s2 + $0x1b8] sm:$0xff]  }
  0x67   : > { %v816_v35 = vrot.slane %v4051_v3, 4 }
  0x68   : > { %3269 = vmatpush3.bf16.msra.mxu1 %v3891_v32  ;;  %v802_v32 = vrot.slane %v3870_v16, 4 }
  0x69   : > { %3262 = vmatprep.subr.bf16.mxu1 %v3948_v21 }
  0x6a   : > { %v809_v10 = vsel %vm744_vm0, %v802_v32, %v808_v41 }
  0x6b   : > { %1434 = vmatmul.mubr.bf16.gmra.mrb[32].mxu1 %v3663_v25  ;;  %1092 = vmatmul.mubr.bf16.gmra.mrb[32].mxu0 %v797_v57  ;;  %v803_v25 = vsel %vm744_vm0, %v796_v55, %v802_v32  ;;  %v3389_v55 = vld [vmem:[%s4484_s2 + $0x1f0] sm:$0xff]  }
  0x6c   : > { %1440 = vmatprep.mubr.bf16.mxu1 %v3752_v9  ;;  %3270 = vmatpush3.bf16.msra.mxu1 %v3948_v21  ;;  %v811_v21 = vsel %vm744_vm0, %v804_v58, %v810_v61  ;;  %v3390_v58 = vld [vmem:[%s4484_s2 + $0x1b0] sm:$0xff]  }
  0x6d   : > { %3263 = vmatprep.subr.bf16.mxu1 %v3955_v31  ;;  %1098 = vmatprep.mubr.bf16.mxu0 %v805_v62 }
  0x70   : > { %3271 = vmatpush3.bf16.msra.mxu1 %v3955_v31  ;;  %v4059_v31 = vld [vmem:[%s4484_s2 + $0x200] sm:$0xff]  }
  0x71   : > { %3264 = vmatprep.subr.bf16.mxu1 %v3970_v63 }
  0x73   : > { %1441 = vmatmul.mubr.bf16.gmra.mrb[36].mxu1 %v3666_v26  ;;  %1099 = vmatmul.mubr.bf16.gmra.mrb[36].mxu0 %v803_v25 }
  0x74   : > { %1448 = vmatprep.mubr.bf16.mxu1 %v3801_v33  ;;  %3272 = vmatpush3.bf16.msra.mxu1 %v3970_v63  ;;  %v817_v63 = vsel %vm744_vm0, %v810_v61, %v816_v35 }
  0x75   : > { %3265 = vmatprep.subr.bf16.mxu1 %v3984_v14  ;;  %1106 = vmatprep.mubr.bf16.mxu0 %v811_v21 }
  0x78   : > { %3273 = vmatpush3.bf16.msra.mxu1 %v3984_v14  ;;  %v599_v14 = vsel %vm596_vm2, %v597_v39, %v598_v34  ;;  %v3381_v34 = vld [vmem:[%s4484_s2 + $0x1d0] sm:$0xff]  }
  0x79   : > { %3218 = vmatprep.subr.bf16.mxu1 %v4059_v31 }
  0x7b   : > { %1449 = vmatmul.mubr.bf16.gmra.mrb[40].mxu1 %v3669_v27  ;;  %1107 = vmatmul.mubr.bf16.gmra.mrb[40].mxu0 %v809_v10 }
  0x7c   : > { %1455 = vmatprep.mubr.bf16.mxu1 %v3829_v60  ;;  %1113 = vmatprep.mubr.bf16.mxu0 %v817_v63 }
  0x83   : > { %1456 = vmatmul.mubr.bf16.gmra.mrb[44].mxu1 %v3713_v51  ;;  %1114 = vmatmul.mubr.bf16.gmra.mrb[44].mxu0 %v815_v38 }
  0x84   : > { %1462 = vmatprep.mubr.bf16.mxu1 %v3885_v30  ;;  %3194 = vmatprep.mubr.bf16.mxu0 %v599_v14 }
  0x8b   : > { %1463 = vmatmul.mubr.bf16.gmra.mrb[48].mxu1 %v3736_v0  ;;  %3195 = vmatmul.mubr.bf16.vlgmr.msra.gmra.mrb[48].mxu0 %v3695_v43  ;;  %v3383_v43 = vld [vmem:[%s4484_s2 + $0x1d8] sm:$0xff]  }
  0x8c   : > { %1470 = vmatprep.mubr.bf16.mxu1 %v3937_v18  ;;  %3031 = vmatpush3.bf16.msra.mxu0 %v3378_v40 }
  0x8d   : > { %3198 = vmatprep.mubr.bf16.mxu0 %v3706_v48  ;;  %3032 = vmatprep.subr.bf16.mxu0 %v3379_v17  ;;  %v3384_v48 = vld [vmem:[%s4484_s2 + $0x198] sm:$0xff]  }
  0x90   : > { %3033 = vmatpush3.bf16.msra.mxu0 %v3380_v24 }
  0x91   : > { %3034 = vmatprep.subr.bf16.mxu0 %v3381_v34 }
  0x93   : > { %1471 = vmatmul.mubr.bf16.gmra.mrb[52].mxu1 %v3784_v22  ;;  %3199 = vmatmul.mubr.bf16.gmra.mrb[52].mxu0 %v3717_v54 }
  0x94   : > { %1477 = vmatprep.mubr.bf16.mxu1 %v3973_v5  ;;  %3035 = vmatpush3.bf16.msra.mxu0 %v3382_v44 }
  0x95   : > { %3202 = vmatprep.mubr.bf16.mxu0 %v3745_v6  ;;  %3036 = vmatprep.subr.bf16.mxu0 %v3383_v43 }
  0x98   : > { %3037 = vmatpush3.bf16.msra.mxu0 %v3384_v48 }
  0x99   : > { %3038 = vmatprep.subr.bf16.mxu0 %v3385_v56 }
  0x9b   : > { %1478 = vmatmul.mubr.bf16.gmra.mrb[56].mxu1 %v3788_v29  ;;  %3203 = vmatmul.mubr.bf16.gmra.mrb[56].mxu0 %v3762_v13 }
  0x9c   : > { %1484 = vmatprep.mubr.bf16.mxu1 %v3997_v20  ;;  %3039 = vmatpush3.bf16.msra.mxu0 %v3386_v50 }
  0x9d   : > { %3206 = vmatprep.mubr.bf16.mxu0 %v3811_v42  ;;  %3040 = vmatprep.subr.bf16.mxu0 %v3387_v53 }
  0xa0   : > { %3041 = vmatpush3.bf16.msra.mxu0 %v3388_v11 }
  0xa1   : > { %3042 = vmatprep.subr.bf16.mxu0 %v3389_v55 }
  0xa3   : > { %1485 = vmatmul.mubr.bf16.gmra.mrb[60].mxu1 %v3815_v45  ;;  %3207 = vmatmul.mubr.bf16.gmra.mrb[60].mxu0 %v3822_v49 }
  0xa4   : > { %1492 = vmatprep.mubr.bf16.mxu1 %v4010_v8  ;;  %3043 = vmatpush3.bf16.msra.mxu0 %v3390_v58 }
  0xa5   : > { %1876 = vmatprep.mubr.bf16.mxu0 %v3752_v9  ;;  %3044 = vmatprep.subr.bf16.mxu0 %v3391_v28  ;;  %v3394_v9 = vld [vmem:[%s4484_s2 + $0x208] sm:$0xff]  }
  0xa8   : > { %3045 = vmatpush3.bf16.msra.mxu0 %v3392_v36 }
  0xab   : > { %1493 = vmatmul.mubr.bf16.gmra.mrb[64].mxu1 %v3818_v46  ;;  %1877 = vmatmul.mubr.bf16.vlgmr.msra.gmra.mrb[64].mxu0 %v3666_v26  ;;  %v3395_v26 = vld [vmem:[%s4484_s2 + $0x210] sm:$0xff]  }
  0xac   : > { %1499 = vmatprep.mubr.bf16.mxu1 %v4024_v52  ;;  %1884 = vmatprep.mubr.bf16.mxu0 %v3801_v33  ;;  %v3398_v33 = vld [vmem:[%s4484_s2 + $0x228] sm:$0xff]  }
  0xb3   : > { %1500 = vmatmul.mubr.bf16.gmra.mrb[68].mxu1 %v3870_v16  ;;  %1885 = vmatmul.mubr.bf16.gmra.mrb[68].mxu0 %v3669_v27  ;;  %v3396_v27 = vld [vmem:[%s4484_s2 + $0x218] sm:$0xff]  }
  0xb4   : > { %3210 = vmatprep.mubr.bf16.mxu1 %v3840_v2  ;;  %1891 = vmatprep.mubr.bf16.mxu0 %v3829_v60 }
  0xbb   : > { %3211 = vmatmul.mubr.bf16.vlgmr.msra.gmra.mrb[72].mxu1 %v3854_v7  ;;  %1892 = vmatmul.mubr.bf16.gmra.mrb[72].mxu0 %v3713_v51  ;;  %v3397_v51 = vld [vmem:[%s4484_s2 + $0x220] sm:$0xff]  }
  0xbc   : > { %3219 = vmatpush3.bf16.msra.mxu1 %v4059_v31  ;;  %3214 = vmatprep.mubr.bf16.mxu1 %v3895_v37 }
  0xbd   : > { %3220 = vmatprep.subr.bf16.mxu1 %v3394_v9  ;;  %1898 = vmatprep.mubr.bf16.mxu0 %v3885_v30 }
  0xc0   : > { %3221 = vmatpush3.bf16.msra.mxu1 %v3394_v9 }
  0xc1   : > { %3222 = vmatprep.subr.bf16.mxu1 %v3395_v26 }
  0xc3   : > { %3215 = vmatmul.mubr.bf16.gmra.mrb[76].mxu1 %v3903_v47  ;;  %1899 = vmatmul.mubr.bf16.gmra.mrb[76].mxu0 %v3736_v0  ;;  %v3400_v0 = vld [vmem:[%s4484_s2 + $0x238] sm:$0xff]  }
  0xc4   : > { %3223 = vmatpush3.bf16.msra.mxu1 %v3395_v26  ;;  %3234 = vmatprep.mubr.bf16.mxu1 %v3717_v54  ;;  %v3399_v54 = vld [vmem:[%s4484_s2 + $0x230] sm:$0xff]  }
  0xc5   : > { %3224 = vmatprep.subr.bf16.mxu1 %v3396_v27  ;;  %1906 = vmatprep.mubr.bf16.mxu0 %v3937_v18 }
  0xc8   : > { %3225 = vmatpush3.bf16.msra.mxu1 %v3396_v27 }
  0xc9   : > { %3226 = vmatprep.subr.bf16.mxu1 %v3397_v51 }
  0xcb   : > { %1907 = vmatmul.mubr.bf16.gmra.mrb[80].mxu0 %v3784_v22  ;;  %v3401_v22 = vld [vmem:[%s3850_s17 + $0x10] sm:$0xff]  }
  0xcc   : > { %3227 = vmatpush3.bf16.msra.mxu1 %v3397_v51  ;;  %1913 = vmatprep.mubr.bf16.mxu0 %v3973_v5 }
  0xcd   : > { %3228 = vmatprep.subr.bf16.mxu1 %v3398_v33 }
  0xd0   : > { %3229 = vmatpush3.bf16.msra.mxu1 %v3398_v33 }
  0xd1   : > { %3230 = vmatprep.subr.bf16.mxu1 %v3399_v54 }
  0xd3   : > { %1914 = vmatmul.mubr.bf16.gmra.mrb[84].mxu0 %v3788_v29  ;;  %v1629_v29 = vshll.u32 %v3401_v22, 16 }
  0xd4   : > { %3231 = vmatpush3.bf16.msra.mxu1 %v3399_v54  ;;  %1920 = vmatprep.mubr.bf16.mxu0 %v3997_v20 }
  0xd5   : > { %3232 = vmatprep.subr.bf16.mxu1 %v3400_v0 }
  0xd8   : > { %3233 = vmatpush3.bf16.msra.mxu1 %v3400_v0 }
  0xdb   : > { %3235 = vmatmul.mubr.bf16.vlgmr.msra.gmra.mrb[80].mxu1 %v3745_v6  ;;  %1921 = vmatmul.mubr.bf16.gmra.mrb[88].mxu0 %v3815_v45  ;;  %v1631_v6 = vrot.slane %v1629_v29, 1  ;;  %v1633_v45 = vshrl.u32 %v3401_v22, 16 }
  0xdc   : > { %3238 = vmatprep.mubr.bf16.mxu1 %v3762_v13  ;;  %1928 = vmatprep.mubr.bf16.mxu0 %v4010_v8  ;;  %v3402_v13 = vld [vmem:[%s3850_s17 + $0x18] sm:$0xff]  }
  0xdd   : > { %v1635_v60 = vor.u32 %v1633_v45, %v1631_v6  ;;  %v1646_v30 = vrot.slane %v3402_v13, 1 }
  0xe3   : > { %3239 = vmatmul.mubr.bf16.gmra.mrb[84].mxu1 %v3811_v42  ;;  %1929 = vmatmul.mubr.bf16.gmra.mrb[92].mxu0 %v3818_v46  ;;  %v1632_v42 = vsel %vm483_vm1, %v4051_v3, %v1631_v6  ;;  %v1637_v46 = vshll.u32 %v3402_v13, 16 }
  0xe4   : > { %3242 = vmatprep.mubr.bf16.mxu1 %v3822_v49  ;;  %1935 = vmatprep.mubr.bf16.mxu0 %v4024_v52  ;;  %v1644_v49 = vrot.slane %v3401_v22, 1 }
  0xe6   : > { %v1647_v5 = vsel %vm596_vm2, %v1644_v49, %v1646_v30 }
  0xeb   : > { %3243 = vmatmul.mubr.bf16.gmra.mrb[88].mxu1 %v3840_v2  ;;  %1936 = vmatmul.mubr.bf16.gmra.mrb[96].mxu0 %v3870_v16  ;;  %v1639_v2 = vrot.slane %v1637_v46, 1 }
  0xec   : > { %3246 = vmatprep.mubr.bf16.mxu1 %v3854_v7  ;;  %1942 = vmatprep.mubr.bf16.mxu0 %v4039_v19  ;;  %v1645_v7 = vsel %vm596_vm2, %v3926_v12, %v1644_v49 }
  0xed   : > { %v1640_v16 = vsel %vm483_vm1, %v1635_v60, %v1639_v2 }
  0xf3   : > { %3247 = vmatmul.mubr.bf16.gmra.mrb[92].mxu1 %v3895_v37  ;;  %1943 = vmatmul.mubr.bf16.gmra.mrb[100].mxu0 %v3878_v23 }
  0xf4   : > { %3250 = vmatprep.mubr.bf16.mxu1 %v3903_v47  ;;  %1950 = vmatprep.mubr.bf16.mxu0 %v1632_v42 }
  0xfb   : > { %3251 = vmatmul.mubr.bf16.gmra.mrb[96].mxu1 %v3941_v1  ;;  %1951 = vmatmul.mubr.bf16.gmra.mrb[104].mxu0 %v3915_v59 }
  0xfc   : > { %3254 = vmatprep.mubr.bf16.mxu1 %v1645_v7  ;;  %1957 = vmatprep.mubr.bf16.mxu0 %v1640_v16 }
  0xfe   : > { %v3156_v37 = vpop.f32.mrb[0].mxu1  ;;  %v2830_v18 = vpop.f32.mrb[0].mxu0 }
  0xff   : > { %v1155_v47 = vpop.f32.mrb[1].mxu1  ;;  %v2831_v20 = vpop.f32.mrb[1].mxu0 }
 0x100   : > { %v3157_v23 = vpop.f32.mrb[2].mxu1  ;;  %v2832_v52 = vadd.f32 %v2831_v20, %v2830_v18  ;;  %v2833_v57 = vpop.f32.mrb[2].mxu0 }
 0x101   : > { %v1158_v8 = vpop.f32.mrb[3].mxu1  ;;  %v2834_v12 = vpop.f32.mrb[3].mxu0 }
 0x102   : > { %v4205_v1 = vadd.f32 %v2832_v52, %v1155_v47  ;;  %v2835_v62 = vadd.f32 %v2834_v12, %v2833_v57 }
 0x103   : > { %3255 = vmatmul.mubr.bf16.gmra.mrb[100].mxu1 %v1647_v5  ;;  %1958 = vmatmul.mubr.bf16.gmra.mrb[108].mxu0 %v3401_v22 }
 0x104   : > { %v4207_v19 = vadd.f32 %v2835_v62, %v1158_v8 }
 0x106   : > { %v3160_v59 = vpop.f32.mrb[4].mxu1  ;;  %v2836_v61 = vpop.f32.mrb[4].mxu0 }
 0x107   : > { %v1170_v32 = vpop.f32.mrb[5].mxu1  ;;  %v2837_v25 = vpop.f32.mrb[5].mxu0 }
 0x108   : > { %v3161_v4 = vpop.f32.mrb[6].mxu1  ;;  %v2839_v3 = vpop.f32.mrb[6].mxu0 }
 0x109   : > { %v1173_v21 = vpop.f32.mrb[7].mxu1  ;;  %v2840_v31 = vpop.f32.mrb[7].mxu0 }
 0x10a   : > { %v2841_v41 = vadd.f32 %v2840_v31, %v2839_v3 }
 0x10c   : > { %v4209_v35 = vadd.f32 %v3157_v23, %v2841_v41 }
 0x10e   : > { %v3164_v10 = vpop.f32.mrb[8].mxu1  ;;  %v2842_v15 = vpop.f32.mrb[8].mxu0 }
 0x10f   : > { %v1185_v63 = vpop.f32.mrb[9].mxu1  ;;  %v2843_v38 = vpop.f32.mrb[9].mxu0 }
 0x110   : > { %v3165_v39 = vpop.f32.mrb[10].mxu1  ;;  %v2844_v40 = vadd.f32 %v2843_v38, %v2842_v15  ;;  %v2845_v17 = vpop.f32.mrb[10].mxu0 }
 0x111   : > { %v1187_v14 = vpop.f32.mrb[11].mxu1  ;;  %v2846_v24 = vpop.f32.mrb[11].mxu0 }
 0x112   : > { %v4211_v34 = vadd.f32 %v2844_v40, %v1170_v32 }
 0x116   : > { %v3168_v44 = vpop.f32.mrb[12].mxu1  ;;  %v2848_v48 = vpop.f32.mrb[12].mxu0 }
 0x117   : > { %v1199_v43 = vpop.f32.mrb[13].mxu1  ;;  %v2849_v50 = vpop.f32.mrb[13].mxu0 }
 0x118   : > { %v3169_v56 = vpop.f32.mrb[14].mxu1  ;;  %v2850_v11 = vadd.f32 %v2849_v50, %v2848_v48  ;;  %v2851_v55 = vpop.f32.mrb[14].mxu0 }
 0x119   : > { %v1202_v53 = vpop.f32.mrb[15].mxu1  ;;  %v2852_v58 = vpop.f32.mrb[15].mxu0 }
 0x11a   : > { %v4213_v28 = vadd.f32 %v3160_v59, %v2850_v11  ;;  %v2853_v36 = vadd.f32 %v2852_v58, %v2851_v55 }
 0x11c   : > { %v4215_v9 = vadd.f32 %v3161_v4, %v2853_v36 }
 0x11e   : > { %v4217_v26 = vpop.f32.mrb[16].mxu1  ;;  %v2854_v51 = vpop.f32.mrb[16].mxu0 }
 0x11f   : > { %v1214_v27 = vpop.f32.mrb[17].mxu1  ;;  %v2855_v54 = vpop.f32.mrb[17].mxu0 }
 0x120   : > { %v4219_v33 = vpop.f32.mrb[18].mxu1  ;;  %v2857_v22 = vpop.f32.mrb[18].mxu0 }
 0x121   : > { %v1217_v0 = vpop.f32.mrb[19].mxu1  ;;  %v2858_v29 = vpop.f32.mrb[19].mxu0 }
 0x122   : > { %v2859_v6 = vadd.f32 %v2858_v29, %v2857_v22 }
 0x124   : > { %v4221_v13 = vadd.f32 %v2859_v6, %v1187_v14 }
 0x126   : > { %v4223_v42 = vpop.f32.mrb[20].mxu1  ;;  %v2860_v46 = vpop.f32.mrb[20].mxu0 }
 0x127   : > { %v1229_v45 = vpop.f32.mrb[21].mxu1  ;;  %v2861_v60 = vpop.f32.mrb[21].mxu0 }
 0x128   : > { %v3177_v49 = vpop.f32.mrb[22].mxu1  ;;  %v2862_v7 = vadd.f32 %v2861_v60, %v2860_v46  ;;  %v2863_v16 = vpop.f32.mrb[22].mxu0 }
 0x129   : > { %v4225_v2 = vpop.f32.mrb[23].mxu1  ;;  %v2864_v30 = vpop.f32.mrb[23].mxu0 }
 0x12a   : > { %v4227_v37 = vadd.f32 %v3164_v10, %v2862_v7 }
 0x12e   : > { %v2938_v47 = vpop.f32.mrb[24].mxu1  ;;  %v2866_v23 = vpop.f32.mrb[24].mxu0 }
 0x12f   : > { %v2939_v18 = vpop.f32.mrb[25].mxu1  ;;  %v2867_v8 = vpop.f32.mrb[25].mxu0 }
 0x130   : > { %v2940_v5 = vadd.f32 %v2939_v18, %v2938_v47  ;;  %v2941_v20 = vpop.f32.mrb[26].mxu1  ;;  %v2868_v57 = vadd.f32 %v2867_v8, %v2866_v23  ;;  %v2869_v12 = vpop.f32.mrb[26].mxu0 }
 0x131   : > { %v2942_v52 = vpop.f32.mrb[27].mxu1  ;;  %v2870_v32 = vpop.f32.mrb[27].mxu0 }
 0x132   : > { %v2943_v62 = vadd.f32 %v2942_v52, %v2941_v20  ;;  %v4230_v59 = vadd.f32 %v2940_v5, %v4205_v1  ;;  %v4232_v61 = vadd.f32 %v2868_v57, %v1199_v43  ;;  %v2871_v4 = vadd.f32 %v2870_v32, %v2869_v12 }
 0x134   : > { %v4235_v25 = vadd.f32 %v2943_v62, %v4207_v19  ;;  %v4237_v21 = vadd.f32 %v2871_v4, %v1202_v53 }
 0x136   : > { %v2944_v3 = vpop.f32.mrb[28].mxu1  ;;  %v2872_v41 = vpop.f32.mrb[28].mxu0 }
 0x137   : > { %v2945_v31 = vpop.f32.mrb[29].mxu1  ;;  %v2873_v63 = vpop.f32.mrb[29].mxu0 }
 0x138   : > { %v2947_v10 = vpop.f32.mrb[30].mxu1  ;;  %v2875_v39 = vpop.f32.mrb[30].mxu0 }
 0x139   : > { %v2948_v15 = vpop.f32.mrb[31].mxu1  ;;  %v2876_v14 = vpop.f32.mrb[31].mxu0 }
 0x13a   : > { %v2949_v38 = vadd.f32 %v2948_v15, %v2947_v10  ;;  %v2877_v1 = vadd.f32 %v2876_v14, %v2875_v39 }
 0x13c   : > { %v4240_v40 = vadd.f32 %v2949_v38, %v4209_v35  ;;  %v4242_v17 = vadd.f32 %v3169_v56, %v2877_v1 }
 0x13e   : > { %v2950_v24 = vpop.f32.mrb[32].mxu1  ;;  %v2878_v44 = vpop.f32.mrb[32].mxu0 }
 0x13f   : > { %v2951_v19 = vpop.f32.mrb[33].mxu1  ;;  %v2879_v50 = vpop.f32.mrb[33].mxu0 }
 0x140   : > { %v2952_v43 = vadd.f32 %v2951_v19, %v2950_v24  ;;  %v2953_v48 = vpop.f32.mrb[34].mxu1  ;;  %v2880_v11 = vadd.f32 %v2879_v50, %v2878_v44  ;;  %v2881_v55 = vpop.f32.mrb[34].mxu0 }
 0x141   : > { %v2954_v53 = vpop.f32.mrb[35].mxu1  ;;  %v2882_v36 = vpop.f32.mrb[35].mxu0 }
 0x142   : > { %v4245_v58 = vadd.f32 %v2952_v43, %v4211_v34  ;;  %v4247_v51 = vadd.f32 %v2880_v11, %v1214_v27 }
 0x146   : > { %v2956_v54 = vpop.f32.mrb[36].mxu1  ;;  %v2884_v0 = vpop.f32.mrb[36].mxu0 }
 0x147   : > { %v2957_v35 = vpop.f32.mrb[37].mxu1  ;;  %v2885_v29 = vpop.f32.mrb[37].mxu0 }
 0x148   : > { %v2958_v56 = vadd.f32 %v2957_v35, %v2956_v54  ;;  %v2959_v22 = vpop.f32.mrb[38].mxu1  ;;  %v2886_v45 = vadd.f32 %v2885_v29, %v2884_v0  ;;  %v2887_v46 = vpop.f32.mrb[38].mxu0 }
 0x149   : > { %v2960_v6 = vpop.f32.mrb[39].mxu1  ;;  %v2888_v7 = vpop.f32.mrb[39].mxu0 }
 0x14a   : > { %v2961_v49 = vadd.f32 %v2960_v6, %v2959_v22  ;;  %v1443_v60 = vadd.f32 %v2958_v56, %v4213_v28  ;;  %v4251_v16 = vadd.f32 %v4217_v26, %v2886_v45  ;;  %v2889_v34 = vadd.f32 %v2888_v7, %v2887_v46 }
 0x14c   : > { %v1446_v27 = vadd.f32 %v2961_v49, %v4215_v9  ;;  %v4255_v30 = vadd.f32 %v4219_v33, %v2889_v34 }
 0x14e   : > { %v2962_v47 = vpop.f32.mrb[40].mxu1  ;;  %v2890_v23 = vpop.f32.mrb[40].mxu0 }
 0x14f   : > { %v2963_v18 = vpop.f32.mrb[41].mxu1  ;;  %v2891_v20 = vpop.f32.mrb[41].mxu0 }
 0x150   : > { %v2965_v5 = vpop.f32.mrb[42].mxu1  ;;  %v2893_v52 = vpop.f32.mrb[42].mxu0 }
 0x151   : > { %v2966_v8 = vpop.f32.mrb[43].mxu1  ;;  %v2894_v12 = vpop.f32.mrb[43].mxu0 }
 0x152   : > { %v2967_v57 = vadd.f32 %v2966_v8, %v2965_v5  ;;  %v2895_v28 = vadd.f32 %v2894_v12, %v2893_v52 }
 0x154   : > { %v1453_v62 = vadd.f32 %v2967_v57, %v4221_v13  ;;  %v4259_v26 = vadd.f32 %v2895_v28, %v4225_v2 }
 0x156   : > { %v2968_v32 = vpop.f32.mrb[44].mxu1  ;;  %v2896_v4 = vpop.f32.mrb[44].mxu0 }
 0x157   : > { %v2969_v9 = vpop.f32.mrb[45].mxu1  ;;  %v2897_v31 = vpop.f32.mrb[45].mxu0 }
 0x158   : > { %v2970_v33 = vadd.f32 %v2969_v9, %v2968_v32  ;;  %v2971_v3 = vpop.f32.mrb[46].mxu1  ;;  %v2898_v10 = vadd.f32 %v2897_v31, %v2896_v4  ;;  %v2899_v63 = vpop.f32.mrb[46].mxu0 }
 0x159   : > { %v2972_v41 = vpop.f32.mrb[47].mxu1  ;;  %v2900_v39 = vpop.f32.mrb[47].mxu0 }
 0x15a   : > { %v1458_v15 = vadd.f32 %v2970_v33, %v4227_v37  ;;  %v4263_v38 = vadd.f32 %v4223_v42, %v2898_v10 }
 0x15e   : > { %v2974_v14 = vpop.f32.mrb[48].mxu1  ;;  %v3196_v1 = vpop.f32.mrb[48].mxu0 }
 0x15f   : > { %v2975_v13 = vpop.f32.mrb[49].mxu1  ;;  %v1541_v19 = vpop.f32.mrb[49].mxu0 }
 0x160   : > { %v2976_v2 = vadd.f32 %v2975_v13, %v2974_v14  ;;  %v2977_v24 = vpop.f32.mrb[50].mxu1  ;;  %v4266_v43 = vadd.f32 %v1541_v19, %v4230_v59  ;;  %v3197_v48 = vpop.f32.mrb[50].mxu0 }
 0x161   : > { %v2978_v44 = vpop.f32.mrb[51].mxu1  ;;  %v4270_v37 = vadd.f32 %v3197_v48, %v4240_v40  ;;  %v1544_v11 = vpop.f32.mrb[51].mxu0 }
 0x162   : > { %v2979_v50 = vadd.f32 %v2978_v44, %v2977_v24  ;;  %v1465_v53 = vadd.f32 %v2976_v2, %v4232_v61  ;;  %v4273_v42 = vadd.f32 %v1544_v11, %v4235_v25 }
 0x164   : > { %v1468_v55 = vadd.f32 %v2979_v50, %v4237_v21 }
 0x166   : > { %v2980_v36 = vpop.f32.mrb[52].mxu1  ;;  %v3200_v35 = vpop.f32.mrb[52].mxu0 }
 0x167   : > { %v2981_v54 = vpop.f32.mrb[53].mxu1  ;;  %v4276_v56 = vadd.f32 %v3200_v35, %v1443_v60  ;;  %v1556_v59 = vpop.f32.mrb[53].mxu0 }
 0x168   : > { %v2983_v0 = vpop.f32.mrb[54].mxu1  ;;  %v4279_v29 = vadd.f32 %v1556_v59, %v4245_v58  ;;  %v3201_v61 = vpop.f32.mrb[54].mxu0 }
 0x169   : > { %v2984_v22 = vpop.f32.mrb[55].mxu1  ;;  %v4281_v6 = vadd.f32 %v3201_v61, %v1446_v27  ;;  %v1559_v45 = vpop.f32.mrb[55].mxu0 }
 0x16a   : > { %v2985_v40 = vadd.f32 %v2984_v22, %v2983_v0 }
 0x16c   : > { %v1475_v25 = vadd.f32 %v2985_v40, %v4242_v17 }
 0x16e   : > { %v2986_v46 = vpop.f32.mrb[56].mxu1  ;;  %v3204_v49 = vpop.f32.mrb[56].mxu0 }
 0x16f   : > { %v2987_v21 = vpop.f32.mrb[57].mxu1  ;;  %v4284_v47 = vadd.f32 %v3204_v49, %v1458_v15  ;;  %v1571_v60 = vpop.f32.mrb[57].mxu0 }
 0x170   : > { %v2988_v7 = vadd.f32 %v2987_v21, %v2986_v46  ;;  %v2989_v34 = vpop.f32.mrb[58].mxu1  ;;  %v3205_v23 = vpop.f32.mrb[58].mxu0 }
 0x171   : > { %v2990_v18 = vpop.f32.mrb[59].mxu1  ;;  %v1573_v5 = vpop.f32.mrb[59].mxu0 }
 0x172   : > { %v1480_v58 = vadd.f32 %v2988_v7, %v4247_v51  ;;  %v4287_v20 = vadd.f32 %v1573_v5, %v1453_v62 }
 0x176   : > { %v2992_v27 = vpop.f32.mrb[60].mxu1  ;;  %v3208_v52 = vpop.f32.mrb[60].mxu0 }
 0x177   : > { %v2993_v8 = vpop.f32.mrb[61].mxu1  ;;  %v1585_v12 = vpop.f32.mrb[61].mxu0 }
 0x178   : > { %v2994_v57 = vadd.f32 %v2993_v8, %v2992_v27  ;;  %v2995_v17 = vpop.f32.mrb[62].mxu1  ;;  %v4289_v32 = vadd.f32 %v1585_v12, %v1465_v53  ;;  %v3209_v9 = vpop.f32.mrb[62].mxu0 }
 0x179   : > { %v2996_v28 = vpop.f32.mrb[63].mxu1  ;;  %v4292_v3 = vadd.f32 %v3209_v9, %v1475_v25  ;;  %v1588_v31 = vpop.f32.mrb[63].mxu0 }
 0x17a   : > { %v2997_v4 = vadd.f32 %v2996_v28, %v2995_v17  ;;  %v1487_v33 = vadd.f32 %v2994_v57, %v4251_v16  ;;  %v4294_v51 = vadd.f32 %v1588_v31, %v1468_v55 }
 0x17c   : > { %v1490_v62 = vadd.f32 %v2997_v4, %v4255_v30 }
 0x17e   : > { %v2998_v41 = vpop.f32.mrb[64].mxu1  ;;  %v3046_v63 = vpop.f32.mrb[64].mxu0 }
 0x17f   : > { %v2999_v10 = vpop.f32.mrb[65].mxu1  ;;  %v3047_v39 = vpop.f32.mrb[65].mxu0 }
 0x180   : > { %v3001_v15 = vpop.f32.mrb[66].mxu1  ;;  %v3048_v13 = vadd.f32 %v3047_v39, %v3046_v63  ;;  %v3049_v1 = vpop.f32.mrb[66].mxu0 }
 0x181   : > { %v3002_v14 = vpop.f32.mrb[67].mxu1  ;;  %v3050_v24 = vpop.f32.mrb[67].mxu0 }
 0x182   : > { %v3003_v2 = vadd.f32 %v3002_v14, %v3001_v15  ;;  %v3051_v19 = vadd.f32 %v3050_v24, %v3049_v1 }
 0x184   : > { %v1497_v16 = vadd.f32 %v3003_v2, %v4259_v26 }
 0x186   : > { %v3004_v44 = vpop.f32.mrb[68].mxu1  ;;  %v3052_v50 = vpop.f32.mrb[68].mxu0 }
 0x187   : > { %v3005_v48 = vpop.f32.mrb[69].mxu1  ;;  %v3053_v55 = vpop.f32.mrb[69].mxu0 }
 0x188   : > { %v3006_v53 = vadd.f32 %v3005_v48, %v3004_v44  ;;  %v3007_v11 = vpop.f32.mrb[70].mxu1  ;;  %v3055_v36 = vpop.f32.mrb[70].mxu0 }
 0x189   : > { %v3008_v30 = vpop.f32.mrb[71].mxu1  ;;  %v3056_v35 = vpop.f32.mrb[71].mxu0 }
 0x18a   : > { %v1502_v54 = vadd.f32 %v3006_v53, %v4263_v38  ;;  %v3057_v0 = vadd.f32 %v3056_v35, %v3055_v36 }
 0x18e   : > { %v3212_v59 = vpop.f32.mrb[72].mxu1  ;;  %v3058_v40 = vpop.f32.mrb[72].mxu0 }
 0x18f   : > { %v4299_v22 = vadd.f32 %v3212_v59, %v1487_v33  ;;  %v1600_v61 = vpop.f32.mrb[73].mxu1  ;;  %v3059_v25 = vpop.f32.mrb[73].mxu0 }
 0x190   : > { %v4301_v45 = vadd.f32 %v1600_v61, %v1480_v58  ;;  %v3213_v26 = vpop.f32.mrb[74].mxu1  ;;  %v3060_v49 = vadd.f32 %v3059_v25, %v3058_v40  ;;  %v3061_v7 = vpop.f32.mrb[74].mxu0 }
 0x191   : > { %v4303_v46 = vadd.f32 %v3213_v26, %v1490_v62  ;;  %v1603_v21 = vpop.f32.mrb[75].mxu1  ;;  %v3062_v34 = vpop.f32.mrb[75].mxu0 }
 0x196   : > { %v3216_v60 = vpop.f32.mrb[76].mxu1  ;;  %v3064_v23 = vpop.f32.mrb[76].mxu0 }
 0x197   : > { %v4305_v18 = vadd.f32 %v3216_v60, %v1502_v54  ;;  %v1615_v38 = vpop.f32.mrb[77].mxu1  ;;  %v3065_v27 = vpop.f32.mrb[77].mxu0 }
 0x198   : > { %v3217_v5 = vpop.f32.mrb[78].mxu1  ;;  %v3066_v52 = vadd.f32 %v3065_v27, %v3064_v23  ;;  %v3067_v57 = vpop.f32.mrb[78].mxu0 }
 0x199   : > { %v1617_v8 = vpop.f32.mrb[79].mxu1  ;;  %v3068_v17 = vpop.f32.mrb[79].mxu0 }
 0x19a   : > { %v4307_v58 = vadd.f32 %v1617_v8, %v1497_v16  ;;  %v3069_v12 = vadd.f32 %v3068_v17, %v3067_v57  ;;  %v4314_v16 = vld [vmem:[%s4485_s3] ss:$0 sm:$0xff] }
 0x19e   : > { %v3070_v28 = vpop.f32.mrb[80].mxu0 }
 0x19f   : > { %v3071_v9 = vpop.f32.mrb[81].mxu0 }
 0x1a0   : > { %v3073_v4 = vpop.f32.mrb[82].mxu0 }
 0x1a1   : > { %v3074_v33 = vpop.f32.mrb[83].mxu0 }
 0x1a2   : > { %v4309_v31 = vadd.f32 %v3074_v33, %v3073_v4 }
 0x1a6   : > { %v3076_v62 = vpop.f32.mrb[84].mxu0 }
 0x1a7   : > { %v3077_v41 = vpop.f32.mrb[85].mxu0 }
 0x1a8   : > { %v3078_v10 = vadd.f32 %v3077_v41, %v3076_v62  ;;  %v3079_v63 = vpop.f32.mrb[86].mxu0 }
 0x1a9   : > { %v3080_v15 = vpop.f32.mrb[87].mxu0 }
 0x1ae   : > { %v3236_v39 = vpop.f32.mrb[80].mxu1  ;;  %v3082_v1 = vpop.f32.mrb[88].mxu0 }
 0x1af   : > { %v1999_v14 = vpop.f32.mrb[81].mxu1  ;;  %v3083_v44 = vpop.f32.mrb[89].mxu0 }
 0x1b0   : > { %v2000_v2 = vadd.f32 %v3048_v13, %v1999_v14  ;;  %v3237_v24 = vpop.f32.mrb[82].mxu1  ;;  %v4317_v11 = vadd.f32 %v3083_v44, %v3082_v1  ;;  %v3085_v55 = vpop.f32.mrb[90].mxu0 }
 0x1b1   : > { %v2010_v48 = vadd.f32 %v3237_v24, %v3057_v0  ;;  %v2002_v50 = vpop.f32.mrb[83].mxu1  ;;  %v3086_v54 = vpop.f32.mrb[91].mxu0 }
 0x1b2   : > { %v2086_v53 = vadd.f32 %v2000_v2, %v4266_v43  ;;  %v2003_v30 = vadd.f32 %v3051_v19, %v2002_v50  ;;  %v4324_v59 = vadd.f32 %v3086_v54, %v3085_v55 }
 0x1b3   : > { %v2088_v36 = vadd.f32 %v2010_v48, %v4270_v37 }
 0x1b4   : > { %v4321_v13 = vadd.f32 %v4314_v16, %v2086_v53  ;;  %v2087_v35 = vadd.f32 %v2003_v30, %v4273_v42 }
 0x1b5   : > { %v4327_v61 = vadd.f32 %v4314_v16, %v2088_v36 }
 0x1b6   : > { %v2125_v43 = vsub.f32 0.0, %v4321_v13  ;;  %v4332_v0 = vadd.f32 %v4314_v16, %v2087_v35  ;;  %v3240_v19 = vpop.f32.mrb[84].mxu1  ;;  %v3088_v42 = vpop.f32.mrb[92].mxu0 }
 0x1b7   : > { %v2127_v37 = vsub.f32 0.0, %v4327_v61  ;;  %v2022_v40 = vadd.f32 %v3240_v19, %v3066_v52  ;;  %v2014_v26 = vpop.f32.mrb[85].mxu1  ;;  %v3089_v23 = vpop.f32.mrb[93].mxu0 }
 0x1b8   : > { %v2141_v25 = vmul.f32 1.442695, %v2125_v43  ;;  %v2126_v21 = vsub.f32 0.0, %v4332_v0  ;;  %v2015_v7 = vadd.f32 %v3060_v49, %v2014_v26  ;;  %v3241_v34 = vpop.f32.mrb[86].mxu1  ;;  %v3091_v57 = vpop.f32.mrb[94].mxu0 }
 0x1b9   : > { %v2145_v60 = vmul.f32 1.442695, %v2127_v37  ;;  %v2090_v38 = vadd.f32 %v2022_v40, %v4276_v56  ;;  %v2025_v5 = vadd.f32 %v3241_v34, %v3069_v12  ;;  %v2017_v27 = vpop.f32.mrb[87].mxu1  ;;  %v3092_v28 = vpop.f32.mrb[95].mxu0 }
 0x1ba   : > { %3403 = vpow2.f32 %v2141_v25  ;;  %v2143_v8 = vmul.f32 1.442695, %v2126_v21  ;;  %v2089_v52 = vadd.f32 %v2015_v7, %v4279_v29  ;;  %v3093_v56 = vadd.f32 %v3092_v28, %v3091_v57 }
 0x1bb   : > { %3405 = vpow2.f32 %v2145_v60  ;;  %v4343_v49 = vadd.f32 %v4314_v16, %v2090_v38  ;;  %v2091_v17 = vadd.f32 %v2025_v5, %v4281_v6 }
 0x1bc   : > { %3407 = vpow2.f32 %v2143_v8  ;;  %v4347_v9 = vadd.f32 %v4314_v16, %v2089_v52 }
 0x1bd   : > { %v2129_v12 = vsub.f32 0.0, %v4343_v49  ;;  %v4353_v29 = vadd.f32 %v4314_v16, %v2091_v17 }
 0x1be   : > { %v2128_v4 = vsub.f32 0.0, %v4347_v9  ;;  %v3244_v33 = vpop.f32.mrb[88].mxu1  ;;  %v3094_v39 = vpop.f32.mrb[96].mxu0 }
 0x1bf   : > { %v2149_v62 = vmul.f32 1.442695, %v2129_v12  ;;  %v2130_v6 = vsub.f32 0.0, %v4353_v29  ;;  %v2037_v41 = vadd.f32 %v3244_v33, %v3078_v10  ;;  %v2029_v63 = vpop.f32.mrb[89].mxu1  ;;  %v3095_v24 = vpop.f32.mrb[97].mxu0 }
 0x1c0   : > { %v2147_v15 = vmul.f32 1.442695, %v2128_v4  ;;  %v3245_v14 = vpop.f32.mrb[90].mxu1  ;;  %v4359_v48 = vadd.f32 %v3095_v24, %v3094_v39  ;;  %v3097_v50 = vpop.f32.mrb[98].mxu0 }
 0x1c1   : > { %3409 = vpow2.f32 %v2149_v62  ;;  %v2151_v1 = vmul.f32 1.442695, %v2130_v6  ;;  %v2093_v2 = vadd.f32 %v2037_v41, %v4284_v47  ;;  %v2031_v44 = vpop.f32.mrb[91].mxu1  ;;  %v3098_v55 = vpop.f32.mrb[99].mxu0  ;;  %v2729_v62 = vld [vmem:[%s4380_s12] sm:$0xff]  }
 0x1c2   : > { %3411 = vpow2.f32 %v2147_v15  ;;  %v2032_v53 = vadd.f32 %v4309_v31, %v2031_v44  ;;  %v4400_v55 = vld [vmem:[%s4380_s12 + $0x8] sm:$0xff]  }
 0x1c3   : > { %3413 = vpow2.f32 %v2151_v1  ;;  %v4363_v10 = vadd.f32 %v4314_v16, %v2093_v2  ;;  %v2730_v2 = vunpack.c.l.bf16 %v2729_v62 }
 0x1c4   : > { %v3404_v30 = vpop.eup %3403  ;;  %v2092_v36 = vadd.f32 %v2032_v53, %v4287_v20 }
 0x1c5   : > { %v3406_v47 = vpop.eup %3405  ;;  %v2173_v54 = vadd.f32 1.0, %v3404_v30  ;;  %v2132_v35 = vsub.f32 0.0, %v4363_v10 }
 0x1c6   : > { %v3408_v43 = vpop.eup %3407  ;;  %v4370_v19 = vadd.f32 %v4314_v16, %v2092_v36  ;;  %v3248_v31 = vpop.f32.mrb[92].mxu1  ;;  %v2175_v37 = vadd.f32 1.0, %v3406_v47 }
 0x1c7   : > { %3415 = vrcp.f32 %v2173_v54  ;;  %v2174_v40 = vadd.f32 1.0, %v3408_v43  ;;  %v2155_v26 = vmul.f32 1.442695, %v2132_v35  ;;  %v2043_v25 = vpop.f32.mrb[93].mxu1  ;;  %v3100_v42 = vpop.f32.mrb[100].mxu0 }
 0x1c8   : > { %v2131_v21 = vsub.f32 0.0, %v4370_v19  ;;  %v2044_v20 = vadd.f32 %v4317_v11, %v2043_v25  ;;  %v3249_v7 = vpop.f32.mrb[94].mxu1  ;;  %v3101_v34 = vpop.f32.mrb[101].mxu0 }
 0x1c9   : > { %3417 = vrcp.f32 %v2174_v40  ;;  %v2054_v60 = vadd.f32 %v3249_v7, %v3093_v56  ;;  %v2046_v38 = vpop.f32.mrb[95].mxu1  ;;  %v3102_v27 = vadd.f32 %v3101_v34, %v3100_v42  ;;  %v3103_v8 = vpop.f32.mrb[102].mxu0 }
 0x1ca   : > { %3419 = vpow2.f32 %v2155_v26  ;;  %v2153_v23 = vmul.f32 1.442695, %v2131_v21  ;;  %v2094_v5 = vadd.f32 %v2044_v20, %v4289_v32  ;;  %v2047_v57 = vadd.f32 %v4324_v59, %v2046_v38  ;;  %v3104_v17 = vpop.f32.mrb[103].mxu0 }
 0x1cb   : > { %v3410_v52 = vpop.eup %3409  ;;  %3421 = vrcp.f32 %v2175_v37  ;;  %v2096_v11 = vadd.f32 %v2054_v60, %v4292_v3  ;;  %v3105_v4 = vadd.f32 %v3104_v17, %v3103_v8  ;;  %v2731_v37 = vunpack.c.h.bf16 %v2729_v62  ;;  %v2801_v8 = vld [vmem:[%s4380_s12 + $0x10] sm:$0xff]  }
 0x1cc   : > { %v3412_v28 = vpop.eup %3411  ;;  %v2177_v56 = vadd.f32 1.0, %v3410_v52  ;;  %3423 = vpow2.f32 %v2153_v23  ;;  %v4386_v12 = vadd.f32 %v4314_v16, %v2094_v5  ;;  %v2095_v41 = vadd.f32 %v2047_v57, %v4294_v51 }
 0x1cd   : > { %v3414_v33 = vpop.eup %3413  ;;  %v2176_v6 = vadd.f32 1.0, %v3412_v28  ;;  %v4390_v32 = vadd.f32 %v4314_v16, %v2096_v11 }
 0x1ce   : > { %3425 = vrcp.f32 %v2177_v56  ;;  %v2178_v3 = vadd.f32 1.0, %v3414_v33  ;;  %v2133_v59 = vsub.f32 0.0, %v4386_v12  ;;  %v3252_v63 = vpop.f32.mrb[96].mxu1  ;;  %v4396_v39 = vadd.f32 %v4314_v16, %v2095_v41  ;;  %v3106_v44 = vpop.f32.mrb[104].mxu0 }
 0x1cf   : > { %3427 = vrcp.f32 %v2176_v6  ;;  %v2135_v15 = vsub.f32 0.0, %v4390_v32  ;;  %v2066_v14 = vadd.f32 %v3252_v63, %v3102_v27  ;;  %v2058_v1 = vpop.f32.mrb[97].mxu1  ;;  %v3107_v54 = vpop.f32.mrb[105].mxu0 }
 0x1d0   : > { %3429 = vrcp.f32 %v2178_v3  ;;  %v2157_v24 = vmul.f32 1.442695, %v2133_v59  ;;  %v2059_v51 = vadd.f32 %v4359_v48, %v2058_v1  ;;  %v3253_v50 = vpop.f32.mrb[98].mxu1  ;;  %v2134_v36 = vsub.f32 0.0, %v4396_v39  ;;  %v3109_v26 = vpop.f32.mrb[106].mxu0 }
 0x1d1   : > { %v3416_v53 = vpop.eup %3415  ;;  %v2161_v30 = vmul.f32 1.442695, %v2135_v15  ;;  %v2098_v47 = vadd.f32 %v2066_v14, %v4299_v22  ;;  %v2069_v35 = vadd.f32 %v3253_v50, %v3105_v4  ;;  %v2061_v43 = vpop.f32.mrb[99].mxu1  ;;  %v2734_v22 = vunpack.c.l.bf16 %v4400_v55 }
 0x1d2   : > { %v2205_v31 = vmul.f32 %v3416_v53, %v4321_v13  ;;  %3431 = vpow2.f32 %v2157_v24  ;;  %v2097_v40 = vadd.f32 %v2059_v51, %v4301_v45  ;;  %v2159_v25 = vmul.f32 1.442695, %v2134_v36  ;;  %v3110_v42 = vpop.f32.mrb[107].mxu0 }
 0x1d3   : > { %v3418_v48 = vpop.eup %3417  ;;  %3433 = vpow2.f32 %v2161_v30  ;;  %v4407_v21 = vadd.f32 %v4314_v16, %v2098_v47  ;;  %v2099_v45 = vadd.f32 %v2069_v35, %v4303_v46  ;;  %v2735_v46 = vunpack.c.h.bf16 %v4400_v55 }
 0x1d4   : > { %v3420_v20 = vpop.eup %3419  ;;  %v2206_v7 = vmul.f32 %v3418_v48, %v4332_v0  ;;  %v4412_v13 = vadd.f32 %v4314_v16, %v2097_v40  ;;  %v2253_v60 = vadd.f32 %v2730_v2, %v2205_v31  ;;  %3435 = vpow2.f32 %v2159_v25  ;;  %v2802_v48 = vld [vmem:[%s4380_s12 + $0x18] sm:$0xff]  }
 0x1d5   : > { %v3422_v34 = vpop.eup %3421  ;;  %v2180_v38 = vadd.f32 1.0, %v3420_v20  ;;  %v2137_v23 = vsub.f32 0.0, %v4407_v21  ;;  %v4419_v11 = vadd.f32 %v4314_v16, %v2099_v45  ;;  %v3111_v0 = vadd.f32 %v3110_v42, %v3109_v26 }
 0x1d6   : > { %v3424_v5 = vpop.eup %3423  ;;  %v2254_v27 = vadd.f32 %v2731_v37, %v2206_v7  ;;  %v2136_v52 = vsub.f32 0.0, %v4412_v13  ;;  %v3256_v57 = vpop.f32.mrb[100].mxu1  ;;  %v2207_v33 = vmul.f32 %v3422_v34, %v4327_v61  ;;  %v2738_v14 = vunpack.c.l.bf16 %v2801_v8 }
 0x1d7   : > { %3437 = vrcp.f32 %v2180_v38  ;;  %v2179_v17 = vadd.f32 1.0, %v3424_v5  ;;  %v2165_v28 = vmul.f32 1.442695, %v2137_v23  ;;  %v2073_v56 = vpop.f32.mrb[101].mxu1  ;;  %v2138_v41 = vsub.f32 0.0, %v4419_v11  ;;  %v3112_v3 = vpop.f32.mrb[108].mxu0 }
 0x1d8   : > { %v3426_v4 = vpop.eup %3425  ;;  %v2763_v62 = vpack.c.bf16 %v2254_v27, %v2253_v60  ;;  %v2163_v6 = vmul.f32 1.442695, %v2136_v52  ;;  %v3257_v59 = vpop.f32.mrb[102].mxu1  ;;  %v2739_v1 = vunpack.c.h.bf16 %v2801_v8  ;;  %v2255_v47 = vadd.f32 %v2734_v22, %v2207_v33  ;;  %v2803_v33 = vld [vmem:[%s4380_s12 + $0x20] sm:$0xff]  }
 0x1d9   : > { %v3428_v63 = vpop.eup %3427  ;;  %v2209_v15 = vmul.f32 %v3426_v4, %v4343_v49  ;;  %3439 = vrcp.f32 %v2179_v17  ;;  %v3113_v2 = vpop.f32.mrb[109].mxu0  ;;  %v2167_v61 = vmul.f32 1.442695, %v2138_v41  ;;  %v2743_v60 = vunpack.c.h.bf16 %v2802_v48  ;;  %v2804_v59 = vld [vmem:[%s4380_s12 + $0x28] sm:$0xff]  }
 0x1da   : > { %v2075_v24 = vpop.f32.mrb[103].mxu1  ;;  %v3430_v44 = vpop.eup %3429  ;;  %2764 = vst [vmem:[%s4426_s15] sm:$0xff] %v2763_v62   ;;  %v2208_v51 = vmul.f32 %v3428_v63, %v4347_v9  ;;  %3441 = vpow2.f32 %v2165_v28  ;;  %v3114_v50 = vadd.f32 %v3113_v2, %v3112_v3  ;;  %v2747_v41 = vunpack.c.h.bf16 %v2803_v33 }
 0x1db   : > { %v3115_v53 = vpop.f32.mrb[110].mxu0  ;;  %v2210_v55 = vmul.f32 %v3430_v44, %v4353_v29  ;;  %3443 = vpow2.f32 %v2163_v6  ;;  %v2076_v30 = vadd.f32 %v3111_v0, %v2075_v24  ;;  %v2257_v31 = vadd.f32 %v2738_v14, %v2209_v15  ;;  %v2805_v24 = vld [vmem:[%s4380_s12 + $0x30] sm:$0xff]  }
 0x1dc   : > { %v3116_v36 = vpop.f32.mrb[111].mxu0  ;;  %v3432_v49 = vpop.eup %3431  ;;  %v2256_v54 = vadd.f32 %v2735_v46, %v2208_v51  ;;  %3445 = vpow2.f32 %v2167_v61  ;;  %v2081_v35 = vadd.f32 %v3256_v57, %v3114_v50  ;;  %v2746_v6 = vunpack.c.l.bf16 %v2803_v33 }
 0x1dd   : > { %v3434_v43 = vpop.eup %3433  ;;  %v2258_v9 = vadd.f32 %v2739_v1, %v2210_v55  ;;  %v2181_v37 = vadd.f32 1.0, %v3432_v49  ;;  %v2100_v40 = vadd.f32 %v2076_v30, %v4307_v58  ;;  %v2750_v51 = vunpack.c.l.bf16 %v2804_v59 }
 0x1de   : > { %v2768_v26 = vpack.c.bf16 %v2256_v54, %v2255_v47  ;;  %v2101_v29 = vadd.f32 %v2081_v35, %v4305_v18  ;;  %v3436_v25 = vpop.eup %3435  ;;  %v2183_v22 = vadd.f32 1.0, %v3434_v43  ;;  %v2742_v18 = vunpack.c.l.bf16 %v2802_v48 }
 0x1df   : > { %v2773_v42 = vpack.c.bf16 %v2258_v9, %v2257_v31  ;;  %3447 = vrcp.f32 %v2181_v37  ;;  %v4439_v20 = vadd.f32 %v4314_v16, %v2100_v40  ;;  %v2182_v7 = vadd.f32 1.0, %v3436_v25 }
 0x1e0   : > { %2807 = vst [vmem:[%s4426_s15 + $0x8] sm:$0xff] %v2768_v26   ;;  %v4443_v45 = vadd.f32 %v4314_v16, %v2101_v29  ;;  %v2755_v47 = vunpack.c.h.bf16 %v2805_v24 }
 0x1e1   : > { %v3438_v34 = vpop.eup %3437  ;;  %2808 = vst [vmem:[%s4426_s15 + $0x10] sm:$0xff] %v2773_v42   ;;  %v2139_v58 = vsub.f32 0.0, %v4439_v20  ;;  %3449 = vrcp.f32 %v2182_v7 }
 0x1e2   : > { %v2212_v38 = vmul.f32 %v3438_v34, %v4363_v10  ;;  %v2140_v23 = vsub.f32 0.0, %v4443_v45  ;;  %3451 = vrcp.f32 %v2183_v22 }
 0x1e3   : > { %v3440_v5 = vpop.eup %3439  ;;  %v2169_v27 = vmul.f32 1.442695, %v2139_v58 }
 0x1e4   : > { %v3442_v8 = vpop.eup %3441  ;;  %v2211_v52 = vmul.f32 %v3440_v5, %v4370_v19  ;;  %v2171_v16 = vmul.f32 1.442695, %v2140_v23  ;;  %v2260_v17 = vadd.f32 %v2743_v60, %v2212_v38 }
 0x1e5   : > { %v3444_v0 = vpop.eup %3443  ;;  %v2185_v57 = vadd.f32 1.0, %v3442_v8  ;;  %3453 = vpow2.f32 %v2169_v27 }
 0x1e6   : > { %v3446_v46 = vpop.eup %3445  ;;  %v2259_v10 = vadd.f32 %v2742_v18, %v2211_v52  ;;  %v2184_v28 = vadd.f32 1.0, %v3444_v0  ;;  %3455 = vpow2.f32 %v2171_v16 }
 0x1e7   : > { %3457 = vrcp.f32 %v2185_v57  ;;  %v2186_v56 = vadd.f32 1.0, %v3446_v46 }
 0x1e8   : > { %v2778_v4 = vpack.c.bf16 %v2260_v17, %v2259_v10  ;;  %3459 = vrcp.f32 %v2184_v28 }
 0x1e9   : > { %v3448_v62 = vpop.eup %3447  ;;  %3461 = vrcp.f32 %v2186_v56 }
 0x1ea   : > { %2809 = vst [vmem:[%s4426_s15 + $0x18] sm:$0xff] %v2778_v4   ;;  %v2213_v19 = vmul.f32 %v3448_v62, %v4386_v12  ;;  %v2751_v12 = vunpack.c.h.bf16 %v2804_v59 }
 0x1eb   : > { %v3450_v3 = vpop.eup %3449 }
 0x1ec   : > { %v2214_v63 = vmul.f32 %v3450_v3, %v4396_v39  ;;  %v3452_v15 = vpop.eup %3451  ;;  %v2261_v1 = vadd.f32 %v2746_v6, %v2213_v19  ;;  %v2754_v39 = vunpack.c.l.bf16 %v2805_v24 }
 0x1ed   : > { %v2215_v53 = vmul.f32 %v3452_v15, %v4390_v32 }
 0x1ee   : > { %v2262_v2 = vadd.f32 %v2747_v41, %v2214_v63 }
 0x1ef   : > { %v3454_v14 = vpop.eup %3453  ;;  %v2263_v32 = vadd.f32 %v2750_v51, %v2215_v53 }
 0x1f0   : > { %v3456_v44 = vpop.eup %3455  ;;  %v2187_v61 = vadd.f32 1.0, %v3454_v14  ;;  %v2783_v55 = vpack.c.bf16 %v2262_v2, %v2261_v1 }
 0x1f1   : > { %v3458_v50 = vpop.eup %3457  ;;  %v2188_v30 = vadd.f32 1.0, %v3456_v44 }
 0x1f2   : > { %v3460_v36 = vpop.eup %3459  ;;  %v2217_v49 = vmul.f32 %v3458_v50, %v4407_v21  ;;  %3463 = vrcp.f32 %v2187_v61  ;;  %2810 = vst [vmem:[%s4426_s15 + $0x20] sm:$0xff] %v2783_v55   ;;  %v2806_v21 = vld [vmem:[%s4380_s12 + $0x38] sm:$0xff]  }
 0x1f3   : > { %v3462_v54 = vpop.eup %3461  ;;  %v2216_v35 = vmul.f32 %v3460_v36, %v4412_v13  ;;  %3465 = vrcp.f32 %v2188_v30  ;;  %v2758_v48 = vunpack.c.l.bf16 %v2806_v21  ;;  %v2759_v25 = vunpack.c.h.bf16 %v2806_v21 }
 0x1f4   : > { %v2218_v43 = vmul.f32 %v3462_v54, %v4419_v11  ;;  %v2265_v9 = vadd.f32 %v2754_v39, %v2217_v49 }
 0x1f5   : > { %v2264_v31 = vadd.f32 %v2751_v12, %v2216_v35 }
 0x1f6   : > { %v2266_v37 = vadd.f32 %v2755_v47, %v2218_v43 }
 0x1f7   : > { %v2788_v40 = vpack.c.bf16 %v2264_v31, %v2263_v32 }
 0x1f8   : > { %v2793_v26 = vpack.c.bf16 %v2266_v37, %v2265_v9 }
 0x1f9   : > { %2811 = vst [vmem:[%s4426_s15 + $0x28] sm:$0xff] %v2788_v40  }
 0x1fa   : > { %2812 = vst [vmem:[%s4426_s15 + $0x30] sm:$0xff] %v2793_v26  }
 0x1fc   : > { %v3464_v29 = vpop.eup %3463 }
 0x1fd   : > { %v3466_v42 = vpop.eup %3465  ;;  %v2219_v22 = vmul.f32 %v3464_v29, %v4439_v20 }
 0x1fe   : > { %v2220_v13 = vmul.f32 %v3466_v42, %v4443_v45 }
 0x1ff   : > { %v2267_v7 = vadd.f32 %v2758_v48, %v2219_v22 }
 0x200   : > { %v2268_v11 = vadd.f32 %v2759_v25, %v2220_v13 }
 0x202   : > { %v2798_v34 = vpack.c.bf16 %v2268_v11, %v2267_v7 }
 0x204   : > { %2813 = vst [vmem:[%s4426_s15 + $0x38] sm:$0xff] %v2798_v34  }
 0x205 PF: > { %s15_s22 = sadd.s32 1, %s3505_s22   ;;  %s4489_s18 = smov %s3497_s20 }
 0x206   : > { %p12_p9 = scmp.ge.s32.totalorder %s15_s22, 6   ;;  %s4490_s19 = smov %s3501_s21 }
 0x207   : > { %s4491_s20 = smov %s4494_s23  ;;  %s4492_s21 = smov %s4498_s24 }
 0x208   :  { %14 = sbr.rel (!%p12_p9) target bundleno = 3 (0x3), region = 78 }

</bundles_post_ra>
